<compile_context>
chip_gen: v7x
topology: tpu7x:2x2x1
jax: 0.10.0
libtpu: 0.0.40
codegen_flags: <defaults>
</compile_context>

<pallas_src>
import functools
import math

import jax
import jax.numpy as jnp
from jax import lax
from jax.experimental import pallas as pl
from jax.experimental.pallas import tpu as pltpu


def _resolve_pos(pos):
    if pos == "first":
        return False, 0.2
    if pos == "middle":
        return True, 0.2
    if pos == "last":
        return True, 1.0
    raise NotImplementedError("ReLU position error in make_dense")


def _make_dense_kernel(*refs, TH, W, Cin, Cout, neg_slope, apply_act, has_halo):
    """One (batch, row-block) grid step.

    refs (has_halo=True):  x, top, bot, w, out, xpad
    refs (has_halo=False): x,           w, out, xpad

    x_ref   : (Cin, TH, W)        f32 NCHW row block (pre-activation)
    top_ref : (Cin, 1, W)         f32 row just above the block (clamped fetch)
    bot_ref : (Cin, 1, W)         f32 row just below the block (clamped fetch)
    w_ref   : (Cout, 9*Cin)       f32 weight-normed conv weight (im2col order)
    out_ref : (Cin+Cout, TH*W)    fused dense output, channels-major flat
    xpad_ref: (Cin, TH+2, W+2)    f32 VMEM scratch: zero-padded activated window
    """
    if has_halo:
        x_ref, top_ref, bot_ref, w_ref, out_ref, xpad_ref = refs
    else:
        x_ref, w_ref, out_ref, xpad_ref = refs
        top_ref = bot_ref = None

    f32 = jnp.float32

    def act(v):
        if not apply_act:
            return v
        return jnp.where(v >= 0, v, neg_slope * v)

    x = x_ref[...].astype(f32)                                   # (Cin, TH, W)

    # ---- identity half of the dense concat (x is already in VMEM) ----------
    out_ref[0:Cin, :] = x.reshape(Cin, TH * W).astype(out_ref.dtype)

    # ---- zero-padded, activated conv input window (channels-major) ---------
    # Full zero-fill every step (cheap, and megacore-safe: no program_id==0
    # init that a second core would never execute).
    xpad_ref[...] = jnp.zeros_like(xpad_ref)
    xpad_ref[:, 1:TH + 1, 1:W + 1] = act(x)

    if has_halo:
        h = pl.program_id(1)
        n_h = pl.num_programs(1)

        @pl.when(h > 0)
        def _():
            xpad_ref[:, 0:1, 1:W + 1] = act(top_ref[...].astype(f32))

        @pl.when(h < n_h - 1)
        def _():
            xpad_ref[:, TH + 1:TH + 2, 1:W + 1] = act(bot_ref[...].astype(f32))

    # ---- channels-major im2col: one K = 9*Cin matmul ------------------------
    # patches[(kh*3+kw)*Cin + c, r*W + s] = xpad[c, kh+r, kw+s]
    slabs = [xpad_ref[:, kh:kh + TH, kw:kw + W]
             for kh in range(3) for kw in range(3)]           # 9 x (Cin, TH, W)
    patches = jnp.concatenate(slabs, axis=0).reshape(9 * Cin, TH * W)

    conv = jnp.dot(w_ref[...], patches,
                   preferred_element_type=jnp.float32)        # (Cout, TH*W)

    out_ref[Cin:Cin + Cout, :] = conv.astype(out_ref.dtype)


def _tpu_vmem_capacity_bytes():
    try:
        return int(pltpu.get_tpu_info().vmem_capacity_bytes)
    except Exception:
        return 64 << 20   # conservative default (v7x per-TensorCore VMEM)


def _pick_row_block(H, W, Cin, Cout, budget_bytes):
    """Largest row-block TH (TH | H) whose per-step VMEM footprint fits the
    budget.  TH < H must keep TH % 8 == 0 (sublane tiling of the input block)
    and (TH*W) % 128 == 0 (lane-dense output stores).  Falls back to the
    SMALLEST legal block (never silently to H) when nothing fits."""
    def step_bytes(th):
        xin = 2 * Cin * th * W * 4                    # double-buffered input
        outp = 2 * (Cin + Cout) * th * W * 4          # double-buffered output
        pad = Cin * (th + 2) * (W + 2) * 4            # padded scratch
        im2c = 2 * 9 * Cin * th * W * 4               # im2col intermediates
        return xin + outp + pad + im2c

    cands = [H] + [th for th in range(H - 1, 0, -1)
                   if H % th == 0 and th % 8 == 0 and (th * W) % 128 == 0]
    fitting = [th for th in cands if step_bytes(th) <= budget_bytes]
    if fitting:
        return max(fitting)
    return min(cands)


def make_dense_forward(x_nchw, v_oihw, g, *, pos="middle", row_block=None):
    """x_nchw: (N, Cin, H, W) f32; v_oihw: (Cout, Cin, 3, 3); g: (Cout,)
       returns (N, Cin+Cout, H, W) = concat([x, conv3x3_wn(act(x))], channel)."""
    apply_act, neg_slope = _resolve_pos(pos)
    N, Cin, H, W = x_nchw.shape
    Cout = v_oihw.shape[0]

    # weight norm in f32: w = g * v / ||v|| (norm over all dims except dim 0)
    v32 = v_oihw.astype(jnp.float32)
    v_norm = jnp.sqrt(jnp.sum(v32 * v32, axis=(1, 2, 3), keepdims=True))
    w_oihw = g.astype(jnp.float32).reshape(-1, 1, 1, 1) * v32 / v_norm
    # (Cout,Cin,3,3) -> (Cout,3,3,Cin) -> (Cout, 9*Cin): channels-major im2col.
    w_mat = jnp.transpose(w_oihw, (0, 2, 3, 1)).reshape(Cout, 9 * Cin)

    # Per-generation VMEM sizing (v7x: 64 MiB/TC, v5e/v6e: 128 MiB).
    vmem_cap = _tpu_vmem_capacity_bytes()
    vmem_limit = max(32 << 20, min(int(vmem_cap * 0.75), vmem_cap - (16 << 20)))
    budget = max(4 << 20, int(vmem_cap * 0.25))

    TH = row_block if row_block is not None else _pick_row_block(
        H, W, Cin, Cout, budget)
    assert H % TH == 0, (H, TH)
    n_h = H // TH
    has_halo = n_h > 1
    grid = (N, n_h)

    kernel = functools.partial(
        _make_dense_kernel, TH=TH, W=W, Cin=Cin, Cout=Cout,
        neg_slope=neg_slope, apply_act=apply_act, has_halo=has_halo)

    # Main NCHW row block: channels on sublanes, W on lanes.  No wrapper
    # transpose, no jnp.pad — padding is synthesized in VMEM scratch.
    in_specs = [pl.BlockSpec((None, Cin, TH, W), lambda n, h: (n, 0, h, 0))]
    inputs = [x_nchw]
    if has_halo:
        # One-row halos (block size 1 along H => block index == element row),
        # clamped at the image boundary and zero-masked in-kernel.
        in_specs += [
            pl.BlockSpec((None, Cin, 1, W),
                         lambda n, h: (n, 0, jnp.maximum(h * TH - 1, 0), 0)),
            pl.BlockSpec((None, Cin, 1, W),
                         lambda n, h: (n, 0, jnp.minimum(h * TH + TH, H - 1), 0)),
        ]
        inputs += [x_nchw, x_nchw]
    in_specs.append(pl.BlockSpec((Cout, 9 * Cin), lambda n, h: (0, 0)))
    inputs.append(w_mat)

    flops = 2 * N * H * W * 9 * Cin * Cout
    bytes_accessed = 4 * (x_nchw.size + N * (Cin + Cout) * H * W + w_mat.size)

    out_flat = pl.pallas_call(
        kernel,
        out_shape=jax.ShapeDtypeStruct((N, Cin + Cout, H * W), x_nchw.dtype),
        grid=grid,
        in_specs=in_specs,
        # Fused dense output: identity + conv halves, pixels on the lane axis.
        out_specs=pl.BlockSpec((None, Cin + Cout, TH * W),
                               lambda n, h: (n, 0, h)),
        scratch_shapes=[pltpu.VMEM((Cin, TH + 2, W + 2), jnp.float32)],
        compiler_params=pltpu.CompilerParams(
            dimension_semantics=("parallel", "parallel"),
            vmem_limit_bytes=vmem_limit),
        cost_estimate=pl.CostEstimate(
            flops=flops, transcendentals=0, bytes_accessed=bytes_accessed),
    )(*inputs)

    # Metadata-only reshape; the channel concat already happened in-kernel.
    return out_flat.reshape(N, Cin + Cout, H, W)


def _reference(x_nchw, v_oihw, g, *, pos="middle"):
    """Pure-JAX reference mirroring the PyTorch forward."""
    apply_act, neg_slope = _resolve_pos(pos)
    v_norm = jnp.sqrt(jnp.sum(v_oihw ** 2, axis=(1, 2, 3), keepdims=True))
    w = g.reshape(-1, 1, 1, 1) * v_oihw / v_norm
    xin = (jnp.where(x_nchw >= 0, x_nchw, neg_slope * x_nchw)
           if apply_act else x_nchw)
    conv = lax.conv_general_dilated(
        xin, w, window_strides=(1, 1), padding="SAME",
        dimension_numbers=("NCHW", "OIHW", "NCHW"))
    return jnp.concatenate([x_nchw, conv], axis=1)


if __name__ == "__main__":
    # Small shapes consistent with make_dense(nChannels, growthRate).
    N, Cin, H, W = 2, 16, 16, 16
    Cout = 8            # growthRate
    pos = "middle"

    key = jax.random.PRNGKey(0)
    kx, kv = jax.random.split(key)
    x = jax.random.normal(kx, (N, Cin, H, W), dtype=jnp.float32)

    # kaiming_normal_(a=0.2, mode='fan_in', nonlinearity='leaky_relu')
    fan_in = Cin * 3 * 3
    gain = math.sqrt(2.0 / (1.0 + 0.2 ** 2))
    std = gain / math.sqrt(fan_in)
    v = std * jax.random.normal(kv, (Cout, Cin, 3, 3), dtype=jnp.float32)
    # weight_norm init: g = ||v|| per output channel.
    g = jnp.sqrt(jnp.sum(v ** 2, axis=(1, 2, 3)))

    ref = _reference(x, v, g, pos=pos)

    # Single-block path (whole image per batch step, no halo inputs).
    out = jax.block_until_ready(make_dense_forward(x, v, g, pos=pos))
    assert out.shape == (N, Cin + Cout, H, W), out.shape
    assert jnp.allclose(out, ref, atol=1e-4, rtol=1e-4), \
        float(jnp.max(jnp.abs(out - ref)))

    # Row-blocked path (n_h > 1) exercising the clamped halo fetches.
    out_blk = jax.block_until_ready(
        make_dense_forward(x, v, g, pos=pos, row_block=8))
    assert out_blk.shape == (N, Cin + Cout, H, W), out_blk.shape
    assert jnp.allclose(out_blk, ref, atol=1e-4, rtol=1e-4), \
        float(jnp.max(jnp.abs(out_blk - ref)))

    print("KERNEL_OK")
</pallas_src>

<mosaic_0001>
module attributes {stable_mosaic.version = 11 : i64} {
  func.func @_make_dense_kernel(%arg0: i32, %arg1: i32, %arg2: memref<1x16x16x16xf32, #tpu.memory_space<vmem>>, %arg3: memref<8x144xf32, #tpu.memory_space<vmem>>, %arg4: memref<1x24x256xf32, #tpu.memory_space<vmem>>, %arg5: memref<16x18x18xf32, #tpu.memory_space<vmem>>) attributes {dimension_semantics = [#tpu.dimension_semantics<parallel>, #tpu.dimension_semantics<parallel>], iteration_bounds = array<i64: 2, 1>, scalar_prefetch = 0 : i64, scratch_operands = 1 : i64, tpu.core_type = #tpu.core_type<tc>, window_params = [{transform_indices = @transform_0, window_bounds = array<i64: 1, 16, 16, 16>}, {pipeline_mode = #tpu.pipeline_mode<synchronous>, transform_indices = @transform_1, window_bounds = array<i64: 8, 144>}, {transform_indices = @transform_2, window_bounds = array<i64: 1, 24, 256>}]} {
    %c0 = arith.constant 0 : index
    %c0_0 = arith.constant 0 : index
    %c0_1 = arith.constant 0 : index
    %c0_2 = arith.constant 0 : index
    %0 = vector.load %arg2[%c0, %c0_0, %c0_1, %c0_2] : memref<1x16x16x16xf32, #tpu.memory_space<vmem>>, vector<1x16x16x16xf32>
    %1 = vector.shape_cast %0 : vector<1x16x16x16xf32> to vector<16x16x16xf32>
    %2 = vector.shape_cast %1 : vector<16x16x16xf32> to vector<16x256xf32>
    %c0_3 = arith.constant 0 : index
    %c0_4 = arith.constant 0 : index
    %c0_5 = arith.constant 0 : index
    %3 = vector.load %arg4[%c0_3, %c0_4, %c0_5] : memref<1x24x256xf32, #tpu.memory_space<vmem>>, vector<1x16x256xf32>
    %4 = vector.shape_cast %3 : vector<1x16x256xf32> to vector<16x256xf32>
    %5 = vector.shape_cast %2 : vector<16x256xf32> to vector<1x16x256xf32>
    tpu.vector_store %arg4[%c0_3, %c0_4, %c0_5], %5 {strides = array<i32>} : memref<1x24x256xf32, #tpu.memory_space<vmem>>, vector<1x16x256xf32>,
    %cst = arith.constant 0.000000e+00 : f32
    %6 = vector.broadcast %cst : f32 to vector<16x18x18xf32>
    %c0_6 = arith.constant 0 : index
    %c0_7 = arith.constant 0 : index
    %c0_8 = arith.constant 0 : index
    %7 = vector.load %arg5[%c0_6, %c0_7, %c0_8] : memref<16x18x18xf32, #tpu.memory_space<vmem>>, vector<16x18x18xf32>
    tpu.vector_store %arg5[%c0_6, %c0_7, %c0_8], %6 {strides = array<i32>} : memref<16x18x18xf32, #tpu.memory_space<vmem>>, vector<16x18x18xf32>,
    %cst_9 = arith.constant 0.000000e+00 : f32
    %8 = vector.broadcast %cst_9 : f32 to vector<16x16x16xf32>
    %9 = arith.cmpf oge, %1, %8 : vector<16x16x16xf32>
    %cst_10 = arith.constant 2.000000e-01 : f32
    %10 = vector.broadcast %cst_10 : f32 to vector<16x16x16xf32>
    %11 = arith.mulf %10, %1 : vector<16x16x16xf32>
    %12 = arith.select %9, %1, %11 : vector<16x16x16xi1>, vector<16x16x16xf32>
    %c0_11 = arith.constant 0 : index
    %c1 = arith.constant 1 : index
    %c1_12 = arith.constant 1 : index
    %13 = vector.load %arg5[%c0_11, %c1, %c1_12] : memref<16x18x18xf32, #tpu.memory_space<vmem>>, vector<16x16x16xf32>
    tpu.vector_store %arg5[%c0_11, %c1, %c1_12], %12 {strides = array<i32>} : memref<16x18x18xf32, #tpu.memory_space<vmem>>, vector<16x16x16xf32>,
    %c0_13 = arith.constant 0 : index
    %c0_14 = arith.constant 0 : index
    %c0_15 = arith.constant 0 : index
    %14 = vector.load %arg5[%c0_13, %c0_14, %c0_15] : memref<16x18x18xf32, #tpu.memory_space<vmem>>, vector<16x16x16xf32>
    %c0_16 = arith.constant 0 : index
    %c0_17 = arith.constant 0 : index
    %c1_18 = arith.constant 1 : index
    %15 = vector.load %arg5[%c0_16, %c0_17, %c1_18] : memref<16x18x18xf32, #tpu.memory_space<vmem>>, vector<16x16x16xf32>
    %c0_19 = arith.constant 0 : index
    %c0_20 = arith.constant 0 : index
    %c2 = arith.constant 2 : index
    %16 = vector.load %arg5[%c0_19, %c0_20, %c2] : memref<16x18x18xf32, #tpu.memory_space<vmem>>, vector<16x16x16xf32>
    %c0_21 = arith.constant 0 : index
    %c1_22 = arith.constant 1 : index
    %c0_23 = arith.constant 0 : index
    %17 = vector.load %arg5[%c0_21, %c1_22, %c0_23] : memref<16x18x18xf32, #tpu.memory_space<vmem>>, vector<16x16x16xf32>
    %c0_24 = arith.constant 0 : index
    %c1_25 = arith.constant 1 : index
    %c1_26 = arith.constant 1 : index
    %18 = vector.load %arg5[%c0_24, %c1_25, %c1_26] : memref<16x18x18xf32, #tpu.memory_space<vmem>>, vector<16x16x16xf32>
    %c0_27 = arith.constant 0 : index
    %c1_28 = arith.constant 1 : index
    %c2_29 = arith.constant 2 : index
    %19 = vector.load %arg5[%c0_27, %c1_28, %c2_29] : memref<16x18x18xf32, #tpu.memory_space<vmem>>, vector<16x16x16xf32>
    %c0_30 = arith.constant 0 : index
    %c2_31 = arith.constant 2 : index
    %c0_32 = arith.constant 0 : index
    %20 = vector.load %arg5[%c0_30, %c2_31, %c0_32] : memref<16x18x18xf32, #tpu.memory_space<vmem>>, vector<16x16x16xf32>
    %c0_33 = arith.constant 0 : index
    %c2_34 = arith.constant 2 : index
    %c1_35 = arith.constant 1 : index
    %21 = vector.load %arg5[%c0_33, %c2_34, %c1_35] : memref<16x18x18xf32, #tpu.memory_space<vmem>>, vector<16x16x16xf32>
    %c0_36 = arith.constant 0 : index
    %c2_37 = arith.constant 2 : index
    %c2_38 = arith.constant 2 : index
    %22 = vector.load %arg5[%c0_36, %c2_37, %c2_38] : memref<16x18x18xf32, #tpu.memory_space<vmem>>, vector<16x16x16xf32>
    %23 = tpu.concatenate %14, %15, %16, %17, %18, %19, %20, %21, %22 in 0 : vector<16x16x16xf32>, vector<16x16x16xf32>, vector<16x16x16xf32>, vector<16x16x16xf32>, vector<16x16x16xf32>, vector<16x16x16xf32>, vector<16x16x16xf32>, vector<16x16x16xf32>, vector<16x16x16xf32> -> vector<144x16x16xf32>
    %24 = vector.shape_cast %23 : vector<144x16x16xf32> to vector<144x256xf32>
    %c0_39 = arith.constant 0 : index
    %c0_40 = arith.constant 0 : index
    %25 = vector.load %arg3[%c0_39, %c0_40] : memref<8x144xf32, #tpu.memory_space<vmem>>, vector<8x144xf32>
    %cst_41 = arith.constant dense<0.000000e+00> : vector<8x256xf32>
    %26 = tpu.matmul %25, %24, %cst_41 {dimension_numbers = #tpu.dot_dimension_numbers<[1], [0], [0], [1], [0, 0, 1, 1], [], []>} : vector<8x144xf32>, vector<144x256xf32>, vector<8x256xf32> -> vector<8x256xf32>
    %c0_42 = arith.constant 0 : index
    %c16 = arith.constant 16 : index
    %c0_43 = arith.constant 0 : index
    %27 = vector.load %arg4[%c0_42, %c16, %c0_43] : memref<1x24x256xf32, #tpu.memory_space<vmem>>, vector<1x8x256xf32>
    %28 = vector.shape_cast %27 : vector<1x8x256xf32> to vector<8x256xf32>
    %29 = vector.shape_cast %26 : vector<8x256xf32> to vector<1x8x256xf32>
    tpu.vector_store %arg4[%c0_42, %c16, %c0_43], %29 {strides = array<i32>} : memref<1x24x256xf32, #tpu.memory_space<vmem>>, vector<1x8x256xf32>,
    return
  }
  func.func @transform_0(%arg0: i32, %arg1: i32) -> (i32, i32, i32, i32) {
    %c0_i32 = arith.constant 0 : i32
    %c0_i32_0 = arith.constant 0 : i32
    %c0_i32_1 = arith.constant 0 : i32
    return %arg0, %c0_i32, %arg1, %c0_i32_0 : i32, i32, i32, i32
  }
  func.func @transform_1(%arg0: i32, %arg1: i32) -> (i32, i32) {
    %c0_i32 = arith.constant 0 : i32
    %c0_i32_0 = arith.constant 0 : i32
    %c0_i32_1 = arith.constant 0 : i32
    return %c0_i32, %c0_i32_0 : i32, i32
  }
  func.func @transform_2(%arg0: i32, %arg1: i32) -> (i32, i32, i32) {
    %c0_i32 = arith.constant 0 : i32
    %c0_i32_0 = arith.constant 0 : i32
    return %arg0, %c0_i32, %arg1 : i32, i32, i32
  }
}

</mosaic_0001>

<bundles_post_ra>
// kernel: tpu_custom_call.1
= control target key start
LH: loop header
LB: loop body
LE: loop exit
PB: predicated region body
PF: predicated region fallthrough
CT: control target
= control target key end

     0   :  { %7 = vsyncpa [#allocation4], 0  ;;  %s14907_s0 = inlined_call_operand.hbm [shape: f32[2,16,16,16], index: 0, kind: input, shape index: {}]   ;;  %s14908_s1 = inlined_call_operand.hbm [shape: f32[8,144], index: 1, kind: input, shape index: {}]   ;;  %s14909_s2 = inlined_call_operand.hbm [shape: f32[2,24,256], index: 2, kind: output, shape index: {}]  }
   0x1   :  { %9 = vsyncpa [#allocation4 + $0x1], 0 }
   0x2   :  { %10 = vsyncpa [#allocation7], 0 }
   0x3   :  { %11 = vsyncpa [#allocation5], 0 }
   0x4   :  { %13 = vsyncpa [#allocation5 + $0x1], 0  ;;  %s9429_s9 = smov 0   ;;  %s9431_s10 = smov 0  }
   0x5   :  { %s9433_s11 = smov 0   ;;  %s9435_s12 = smov 0  }
   0x6   :  { %s9437_s13 = smov 0   ;;  %s9439_s14 = smov 0  }
   0x7 LB: > { %s8344_s15 = sadd.s32 4294967295, %s9393_s14   ;;  %s8345_s16 = sadd.s32 4294967294, %s9393_s14   ;;  %s9393_s14 = sphi %s9439_s14, %s19_s14   ;;  %s9389_s13 = sphi %s9437_s13, %s16528_s13   ;;  %s9385_s12 = sphi %s9435_s12, %s16527_s12   ;;  %s9381_s11 = sphi %s9433_s11, %s16526_s11   ;;  %s9377_s10 = sphi %s9431_s10, %s16525_s10   ;;  %s9373_s9 = sphi %s9429_s9, %s16524_s9  }
   0x8   : > { %s40_s17 = sadd.s32 1, %s9381_s11  ;;  %p47_p0 = scmp.ne.s32.totalorder %s9381_s11, %s9377_s10 }
   0x9   : > { %p48_p1 = scmp.eq.s32.totalorder %s9393_s14, 0  ;;  %p53_p2 = scmp.ne.s32.totalorder %s9377_s10, %s9373_s9 }
   0xa   : > { %p9467_p3 = scmp.eq.s32.totalorder %s8344_s15, 0  ;;  %p100_p4 = scmp.eq.s32.totalorder %s8344_s15, 1 }
   0xb   : > { %p9471_p5 = por %p48_p1, %p47_p0  ;;  %p106_p6 = scmp.eq.s32.totalorder %s8345_s16, 1 }
   0xc   : > { %s15409_s18 = scalar_select %p9467_p3, 1, 0 }
   0xd   : > { %p9477_p7 = por %p9467_p3, %p53_p2  ;;  %p9481_p8 = por %p100_p4, %p47_p0 }
   0xe   : > { %p9485_p9 = por %p106_p6, %p53_p2  ;;  %p8346_p10 = scmp.ge.s32.totalorder %s9393_s14, 1 }
   0xf   : > { %s15411_s20 = scalar_select %p9477_p7, 1, 0 }
  0x10   : > { %s15412_s21 = scalar_select %p9481_p8, 1, 0 }
  0x11   : > { %s15413_s22 = scalar_select %p9485_p9, 1, 0 }
  0x12   : > { %p113_p11 = scmp.lt.s32.totalorder %s9393_s14, 3  ;;  %s9395_s24 = smov [#allocation6]  }
  0x13   : > { %s126_s25 = sshll.u32 %s9395_s24, 4  ;;  %p8419_p1 = scmp.lt.s32.totalorder %s9393_s14, 2  ;;  %s127_s25 = int_to_ptr.vmem [resolvable:$true] %s126_s25 }
  0x14   : > { %p9492_p13 = pnand %p8346_p10, %p113_p11  ;;  %s31_s28 = sadd.s32 1, %s9389_s13 }
  0x15   : > { %p9501_p4 = pnand %p8419_p1, %p9471_p5  ;;  %p9512_p6 = scmp.ge.s32.totalorder %s31_s28, 2 }
  0x16   : > { %s15414_s23 = scalar_select %p9492_p13, 1, 0 }
  0x17   : > { %p8406_p0 = pneg %p9492_p13  ;;  %s137_s30 = sand.u32 1, %s9381_s11  }
  0x18   : > { %s15415_s26 = scalar_select %p9501_p4, 1, 0 }
  0x19   : > { %p9507_p2 = pnand %p8406_p0, %p9467_p3  ;;  %s9249_s5 = scalar_lea.hbm %s14908_s1, 256 }
  0x1a   : > { %s15417_s29 = scalar_select %p9512_p6, 1, 0 }
  0x1b   : > { %p9250_p5 = scmp.ne.s32.totalorder %s14908_s1, %s9249_s5  ;;  %p9251_p10 = pneg %p9507_p2 }
  0x1c   : > { %p9256_p0 = scmp.lt.u32.totalorder %s9249_s5, %s14908_s1 }
  0x1d   : > { %p9252_p11 = pnand %p9251_p10, %p9250_p5 }
  0x1f   : > { %p9253_p1 = pneg %p9252_p11 }
  0x21   : > { %p9258_p12 = pnand %p9256_p0, %p9253_p1 }
  0x23   : > { %9261 = shalt.err (!%p9258_p12)
}
  0x24   : > { %s9262_s16 = scalar_lea.vmem %s127_s25, 256  ;;  %p9270_p7 = scmp.lt.s32.totalorder %s127_s25, %s127_s25 }
  0x25   : > { %p9263_p9 = scmp.ne.s32.totalorder %s127_s25, %s9262_s16  ;;  %p9271_p13 = scmp.lt.s32.totalorder %s9262_s16, %s9262_s16 }
  0x27   : > { %p9265_p8 = pnand %p9263_p9, %p9251_p10  ;;  %p9272_p4 = por %p9271_p13, %p9270_p7 }
  0x29   : > { %p9266_p3 = pneg %p9265_p8 }
  0x2b   : > { %p9273_p6 = pnand %p9272_p4, %p9266_p3 }
  0x2d   : > { %9276 = shalt.err (!%p9273_p6)
}
  0x2e   : > { %8409 = dma.hbm_to_vmem [thread:$0]  (!%p9507_p2), %s14908_s1, 256, %s127_s25, [#allocation7]  }
  0x2f   : > { %p15418_p9 = scmp.ne.s32.totalorder %s15417_s29, 0  ;;  %s8349_s3 = sshll.u32 %s137_s30, 8 }
  0x30   : > { %s8359_s5 = sshll.u32 %s9389_s13, 12  ;;  %s141_s8 = scalar_lea.vmem [#allocation3], %s8349_s3 }
  0x31   : > { %s16530_s28 = smov (%p15418_p9, %s31_s28), 0  ;;  %s9543_s7 = scalar_lea.hbm %s14907_s0, %s8359_s5 }
  0x32   : > { %s35_s4 = ssub.s32 %s9389_s13, %s16530_s28  ;;  %s150_s15 = sshll.u32 %s141_s8, 4  ;;  %s9550_s15 = int_to_ptr.vmem [resolvable:$true] %s150_s15 }
  0x33   : > { %p38_p3 = scmp.eq.s32.totalorder %s35_s4, 0  ;;  %s9552_s29 = scalar_lea.sflag [#allocation4], %s137_s30 }
  0x34   : > { %s9277_s16 = scalar_lea.hbm %s9543_s7, 4096  ;;  %p15419_p8 = scmp.ne.s32.totalorder %s15415_s26, 0 }
  0x35   : > { %s9548_s25 = scalar_select %p38_p3, %s9381_s11, %s40_s17  }
  0x36   : > { %p9278_p7 = scmp.ne.s32.totalorder %s9543_s7, %s9277_s16  ;;  %p9279_p12 = pneg %p15419_p8 }
  0x37   : > { %s9282_s3 = scalar_lea.hbm %s14907_s0, 8192  ;;  %p9283_p2 = scmp.lt.u32.totalorder %s9543_s7, %s14907_s0 }
  0x38   : > { %p9280_p13 = pnand %p9279_p12, %p9278_p7  ;;  %p9284_p6 = scmp.lt.u32.totalorder %s9282_s3, %s9277_s16 }
  0x39   : > { %p9286_p10 = scmp.lt.u32.totalorder %s9277_s16, %s9543_s7 }
  0x3a   : > { %p9281_p4 = pneg %p9280_p13  ;;  %p9285_p5 = por %p9284_p6, %p9283_p2 }
  0x3c   : > { %p9287_p11 = por %p9286_p10, %p9285_p5 }
  0x3e   : > { %p9288_p1 = pnand %p9287_p11, %p9281_p4 }
  0x40   : > { %9291 = shalt.err (!%p9288_p1)
}
  0x41   : > { %s9292_s17 = scalar_lea.vmem %s9550_s15, 4096  ;;  %s9396_s30 = smov [#allocation3]  }
  0x42   : > { %p9293_p0 = scmp.ne.s32.totalorder %s9550_s15, %s9292_s17  ;;  %s9297_s27 = sshll.u32 %s9396_s30, 4  ;;  %s9298_s27 = int_to_ptr.vmem [resolvable:$false] %s9297_s27 }
  0x43   : > { %s9299_s6 = scalar_lea.vmem %s9298_s27, 8192  ;;  %p9300_p7 = scmp.lt.s32.totalorder %s9550_s15, %s9298_s27 }
  0x44   : > { %p9295_p9 = pnand %p9293_p0, %p9279_p12  ;;  %p9301_p13 = scmp.lt.s32.totalorder %s9299_s6, %s9292_s17 }
  0x46   : > { %p9296_p3 = pneg %p9295_p9  ;;  %p9302_p2 = por %p9301_p13, %p9300_p7 }
  0x48   : > { %p9303_p6 = pnand %p9302_p2, %p9296_p3 }
  0x4a   : > { %9306 = shalt.err (!%p9303_p6)
}
  0x4b   : > { %s9397_s8 = smov 128   ;;  %s9398_s16 = smov 8  }
  0x4c   : > { %8413 = dma.hbm_to_vmem [thread:$0]  (!%p15419_p8), %s9543_s7, 4096, %s9550_s15, %s9552_s29, %s9397_s8, %s9397_s8, %s9398_s16  }
  0x4d   : > { %p15420_p12 = scmp.ne.s32.totalorder %s15414_s23, 0 }
  0x4f   : > { %162 = sbr.rel (%p15420_p12) target bundleno = 1398 (0x576), region = 28 }
  0x56   : > { %s9583_s19 = sand.u32 1, %s9377_s10   ;;  %p15421_p4 = scmp.ne.s32.totalorder %s15411_s20, 0 }
  0x57   : > { %s8353_s24 = sshll.u32 %s9583_s19, 8  ;;  %s165_s3 = scalar_lea.sflag [#allocation4], %s9583_s19 }
  0x58   : > { %s9587_s4 = scalar_lea.vmem [#allocation3], %s8353_s24 }
  0x59   : > { %9360 = dma.done.wait (%p15421_p4), %s165_s3, 4096  }
  0x5a   : > { %9362 = vsyncadd (%p15421_p4), %s165_s3, 4294963200  ;;  %p15422_p8 = scmp.ne.s32.totalorder %s15409_s18, 0 }
  0x5c   : > { %9364 = dma.done.wait (%p15422_p8), [#allocation7], 256  }
  0x5d   : > { %9366 = vsyncadd (%p15422_p8), [#allocation7], 4294967040  ;;  %v232_v0 = vlaneseq  ;;  %v9399_v1 = vmov 1983009808   ;;  %v9400_v3 = vmov 1934713408  }
  0x5e   : > { %v230_v2 = vunpack.c.l.s4 %v9399_v1  ;;  %v294_v4 = vunpack.c.l.s4 %v9400_v3  ;;  %v9600_v9 = vld [vmem:[%s9587_s4] sm:$0xff]  ;;  %v9603_v10 = vld [vmem:[%s9587_s4 + $0x10] sm:$0xff]  ;;  %s9401_s18 = smov 32   ;;  %s9402_s20 = smov 16   ;;  %vm922_vm2 = vcmask 146432   ;;  %vm925_vm4 = vcmask 140288  }
  0x5f   : > { %v233_v5 = vshrl.u32 %v232_v0, 7  ;;  %v9606_v11 = vld [vmem:[%s9587_s4 + $0x20] sm:$0xff]  ;;  %v9609_v12 = vld [vmem:[%s9587_s4 + $0x30] sm:$0xff]  ;;  %s9403_s23 = smov 48   ;;  %s9404_s26 = smov 64   ;;  %vm972_vm1 = vcmp.ge.f32.partialorder %v9600_v9, 0.0 }
  0x60   : > { %v231_v6 = vunpack.c.0.s8 %v230_v2  ;;  %v295_v7 = vunpack.c.0.s8 %v294_v4  ;;  %v9612_v13 = vld [vmem:[%s9587_s4 + $0x40] sm:$0xff]  ;;  %v9615_v14 = vld [vmem:[%s9587_s4 + $0x50] sm:$0xff]  ;;  %v227_v15 = vcombine.low %v9600_v9, %v9606_v11  ;;  %v243_v18 = vcombine.low %v9603_v10, %v9609_v12  ;;  %s9405_s7 = smov 80   ;;  %s9406_s15 = smov 96  }
  0x61   : > { %v9620_v16 = vld [vmem:[%s9587_s4 + $0x60] sm:$0xff]  ;;  %v9623_v17 = vld [vmem:[%s9587_s4 + $0x70] sm:$0xff]  ;;  %v228_v21 = vcombine.high %v9600_v9, %v9606_v11  ;;  %v244_v28 = vcombine.high %v9603_v10, %v9609_v12  ;;  %s9407_s29 = smov 112   ;;  %vm974_vm5 = vcmp.ge.f32.partialorder %v9603_v10, 0.0  ;;  %s9409_s5 = smov 1   ;;  %vm976_vm7 = vcmp.ge.f32.partialorder %v9606_v11, 0.0 }
  0x62   : > { %v9597_v8 = vsub.s32 %v231_v6, %v233_v5  ;;  %v9627_v19 = vsub.s32 %v295_v7, %v233_v5  ;;  %v9630_v20 = vld [vmem:[%s9587_s4 + $0x80] sm:$0xff]  ;;  %v259_v23 = vcombine.low %v9612_v13, %v9620_v16  ;;  %v275_v24 = vcombine.low %v9615_v14, %v9623_v17  ;;  %v9640_v25 = vld [vmem:[%s9587_s4 + $0x90] sm:$0xff]  ;;  %s8396_s17 = smul.u32 48, %s9583_s19  ;;  %s9410_s27 = smov 127  }
  0x63   : > { %v9643_v26 = vld [vmem:[%s9587_s4 + $0xa0] sm:$0xff]  ;;  %v9646_v27 = vld [vmem:[%s9587_s4 + $0xb0] sm:$0xff]  ;;  %vm978_vm9 = vcmp.ge.f32.partialorder %v9609_v12, 0.0  ;;  %vm980_vm11 = vcmp.ge.f32.partialorder %v9612_v13, 0.0  ;;  %vm982_vm13 = vcmp.ge.f32.partialorder %v9615_v14, 0.0  ;;  %vm984_vm15 = vcmp.ge.f32.partialorder %v9620_v16, 0.0 }
  0x64   : > { %15423 = vst [vmem:[#allocation12_spill] sm:$0xff] %v9597_v8  ;;  %v235_v22 = vrot.slane %v227_v15, %v9597_v8  ;;  %v251_v29 = vrot.slane %v243_v18, %v9597_v8  ;;  %v9652_v30 = vld [vmem:[%s9587_s4 + $0xc0] sm:$0xff]  ;;  %v9655_v31 = vld [vmem:[%s9587_s4 + $0xd0] sm:$0xff]  ;;  %v363_v33 = vcombine.low %v9630_v20, %v9643_v26  ;;  %v379_v34 = vcombine.low %v9640_v25, %v9646_v27  ;;  %s10108_s30 = scalar_lea.vmem [#allocation8], %s8396_s17  ;;  %s9411_s6 = smov 126  }
  0x65   : > { %v9658_v32 = vld [vmem:[%s9587_s4 + $0xe0] sm:$0xff]  ;;  %v364_v35 = vcombine.high %v9630_v20, %v9643_v26  ;;  %v267_v36 = vrot.slane %v259_v23, %v9597_v8  ;;  %v283_v37 = vrot.slane %v275_v24, %v9597_v8  ;;  %v9669_v38 = vld [vmem:[%s9587_s4 + $0xf0] sm:$0xff]  ;;  %v380_v40 = vcombine.high %v9640_v25, %v9646_v27  ;;  %s8247_s8 = sshll.u32 %s10108_s30, 4  ;;  %s8397_s16 = smul.u32 768, %s9385_s12  ;;  %s14850_s8 = int_to_ptr.vmem [resolvable:$true] %s8247_s8 }
  0x66   : > { %15424 = vst [vmem:[#allocation13_spill] sm:$0xff] %v9669_v38  ;;  %v395_v39 = vcombine.low %v9652_v30, %v9658_v32  ;;  %v292_v41 = vcombine.high %v235_v22, %v251_v29  ;;  %v291_v42 = vcombine.low %v235_v22, %v251_v29  ;;  %v371_v43 = vrot.slane %v363_v33, %v9597_v8  ;;  %p16521_p10 = scmp.ne.s32.totalorder %s15412_s21, 0  ;;  %s9412_s12 = smov [#allocation8]  }
  0x67   : > { %v387_v44 = vrot.slane %v379_v34, %v9597_v8  ;;  %v324_v45 = vcombine.high %v267_v36, %v283_v37  ;;  %v323_v46 = vcombine.low %v267_v36, %v283_v37  ;;  %v411_v48 = vcombine.low %v9655_v31, %v9669_v38  ;;  %v9732_v34 = vld [vmem:[%s9587_s4 + $0xa8] sm:$0xff] }
  0x68   : > { %v403_v47 = vrot.slane %v395_v39, %v9597_v8  ;;  %v9681_v49 = vrot.slane %v292_v41, %v9627_v19  ;;  %v9684_v50 = vrot.slane %v291_v42, %v9627_v19  ;;  %v378_v56 = vrot.slane %v364_v35, %v9597_v8  ;;  %v9742_v41 = vld [vmem:[%s9587_s4 + $0xb8] sm:$0xff] }
  0x69   : > { %v428_v51 = vcombine.high %v371_v43, %v387_v44  ;;  %v427_v52 = vcombine.low %v371_v43, %v387_v44  ;;  %v9687_v53 = vrot.slane %v324_v45, %v9627_v19  ;;  %v9690_v54 = vrot.slane %v323_v46, %v9627_v19 }
  0x6a   : > { %15425 = vst [vmem:[#allocation14_spill] sm:$0xff] %v9684_v50  ;;  %v419_v55 = vrot.slane %v411_v48, %v9597_v8  ;;  %v394_v58 = vrot.slane %v380_v40, %v9597_v8  ;;  %v396_v59 = vcombine.high %v9652_v30, %v9658_v32  ;;  %v9699_v60 = vrot.slane %v228_v21, %v9597_v8  ;;  %v9739_v40 = vld [vmem:[%s9587_s4 + $0x98] sm:$0xff] }
  0x6b   : > { %15426 = vst [vmem:[#allocation15_spill] sm:$0xff] %v9690_v54  ;;  %v442_v57 = vrot.slane %v428_v51, %v9627_v19  ;;  %v357_v61 = vcombine.low %v9681_v49, %v9687_v53  ;;  %v356_v62 = vcombine.high %v9684_v50, %v9690_v54  ;;  %v9708_v1 = vrot.slane %v427_v52, %v9627_v19  ;;  %v9754_v51 = vld [vmem:[%s9587_s4 + $0xd8] sm:$0xff]  ;;  %v9757_v52 = vld [vmem:[%s9587_s4 + $0xe8] sm:$0xff] }
  0x6c   : > { %v460_v0 = vcombine.high %v403_v47, %v419_v55  ;;  %v459_v2 = vcombine.low %v403_v47, %v419_v55  ;;  %v410_v3 = vrot.slane %v396_v59, %v9597_v8  ;;  %v412_v4 = vcombine.high %v9655_v31, %v9669_v38  ;;  %v9762_v55 = vld [vmem:[%s9587_s4 + $0xf8] sm:$0xff] }
  0x6d   : > { %781 = vrot.lane.b32.xlu1 %v357_v61, %s9401_s18  ;;  %773 = vrot.lane.b32.xlu0 %v356_v62, %s9402_s20  ;;  %v443_v6 = vcombine.low %v378_v56, %v394_v58  ;;  %v258_v7 = vrot.slane %v244_v28, %v9597_v8  ;;  %v260_v21 = vcombine.high %v9612_v13, %v9620_v16  ;;  %v9729_v28 = vld [vmem:[%s9587_s4 + $0x88] sm:$0xff]  ;;  %v9777_v61 = vld [vmem:[%s9587_s4 + $0x38] sm:$0xff] }
  0x6e   : > { %v474_v5 = vrot.slane %v460_v0, %v9627_v19  ;;  %v9718_v15 = vrot.slane %v459_v2, %v9627_v19  ;;  %v426_v18 = vrot.slane %v412_v4, %v9597_v8  ;;  %v276_v22 = vcombine.high %v9615_v14, %v9623_v17  ;;  %15427 = vst [vmem:[#allocation16_spill] sm:$0xff] %v9762_v55  ;;  %v9780_v62 = vld [vmem:[%s9587_s4 + $0x48] sm:$0xff]  ;;  %v9787_v4 = vld [vmem:[%s9587_s4 + $0x58] sm:$0xff] }
  0x6f   : > { %v358_v29 = vcombine.high %v9681_v49, %v9687_v53  ;;  %v307_v33 = vcombine.low %v9699_v60, %v258_v7  ;;  %v274_v37 = vrot.slane %v260_v21, %v9597_v8  ;;  %v451_v42 = vrot.slane %v443_v6, %v9627_v19  ;;  %v9751_v49 = vld [vmem:[%s9587_s4 + $0xc8] sm:$0xff]  ;;  %v9793_v6 = vld [vmem:[%s9587_s4 + $0x78] sm:$0xff] }
  0x70   : > { %v493_v23 = vcombine.low %v442_v57, %v474_v5  ;;  %v494_v24 = vcombine.high %v442_v57, %v474_v5  ;;  %v492_v35 = vcombine.high %v9708_v1, %v9718_v15  ;;  %v475_v36 = vcombine.low %v410_v3, %v426_v18  ;;  %v9767_v57 = vld [vmem:[%s9587_s4 + $0x8] sm:$0xff] }
  0x71   : > { %v290_v39 = vrot.slane %v276_v22, %v9597_v8  ;;  %v315_v43 = vrot.slane %v307_v33, %v9627_v19  ;;  %v444_v44 = vcombine.high %v378_v56, %v394_v58  ;;  %v476_v45 = vcombine.high %v410_v3, %v426_v18  ;;  %v9770_v58 = vld [vmem:[%s9587_s4 + $0x18] sm:$0xff]  ;;  %v9790_v5 = vld [vmem:[%s9587_s4 + $0x68] sm:$0xff] }
  0x72   : > { %783 = vrot.lane.b32.xlu1 %v493_v23, %s9401_s18  ;;  %775 = vrot.lane.b32.xlu0 %v492_v35, %s9402_s20  ;;  %v483_v46 = vrot.slane %v475_v36, %v9627_v19  ;;  %v308_v48 = vcombine.high %v9699_v60, %v258_v7  ;;  %v635_v53 = vcombine.low %v9729_v28, %v9732_v34  ;;  %v9774_v60 = vld [vmem:[%s9587_s4 + $0x28] sm:$0xff]  ;;  %vm973_vm0 = vcmp.ge.f32.partialorder %v9767_v57, 0.0  ;;  %s14855_s4 = scalar_lea.hbm %s14909_s2, %s8397_s16 }
  0x73   : > { %v339_v47 = vcombine.low %v274_v37, %v290_v39  ;;  %v651_v56 = vcombine.low %v9739_v40, %v9742_v41  ;;  %v9784_v2 = vrot.slane %v444_v44, %v9627_v19  ;;  %v340_v3 = vcombine.high %v274_v37, %v290_v39 }
  0x74   : > { %v495_v0 = vcombine.low %v451_v42, %v483_v46  ;;  %v490_v18 = vrot.slane %v476_v45, %v9627_v19  ;;  %v9798_v21 = vrot.slane %v308_v48, %v9627_v19  ;;  %v643_v22 = vrot.slane %v635_v53, %v9597_v8 }
  0x75   : > { %v347_v59 = vrot.slane %v339_v47, %v9627_v19  ;;  %v659_v23 = vrot.slane %v651_v56, %v9597_v8  ;;  %v683_v33 = vcombine.low %v9754_v51, %v9762_v55  ;;  %v499_v35 = vcombine.low %v9767_v57, %v9774_v60 }
  0x76   : > { %791 = vrot.lane.b32.xlu1 %v494_v24, %s9403_s23  ;;  %789 = vrot.lane.b32.xlu0 %v358_v29, %s9403_s23  ;;  %v667_v24 = vcombine.low %v9751_v49, %v9757_v52  ;;  %v496_v29 = vcombine.high %v451_v42, %v483_v46  ;;  %v515_v36 = vcombine.low %v9770_v58, %v9777_v61  ;;  %vm975_vm3 = vcmp.ge.f32.partialorder %v9770_v58, 0.0 }
  0x77   : > { %v359_v7 = vcombine.low %v315_v43, %v347_v59  ;;  %v531_v37 = vcombine.low %v9780_v62, %v9790_v5  ;;  %v547_v39 = vcombine.low %v9787_v4, %v9793_v6  ;;  %v354_v44 = vrot.slane %v340_v3, %v9627_v19 }
  0x78   : > { %v675_v45 = vrot.slane %v667_v24, %v9597_v8  ;;  %v691_v47 = vrot.slane %v683_v33, %v9597_v8  ;;  %v507_v42 = vrot.slane %v499_v35, %v9597_v8  ;;  %v360_v46 = vcombine.high %v315_v43, %v347_v59 }
  0x79   : > { %v523_v48 = vrot.slane %v515_v36, %v9597_v8  ;;  %v539_v53 = vrot.slane %v531_v37, %v9597_v8  ;;  %v555_v56 = vrot.slane %v547_v39, %v9597_v8  ;;  %v699_v63 = vcombine.low %v643_v22, %v659_v23 }
  0x7a   : > { %799 = vrot.lane.b32.xlu1 %v495_v0, %s9404_s26  ;;  %797 = vrot.lane.b32.xlu0 %v359_v7, %s9404_s26  ;;  %v731_v54 = vcombine.low %v675_v45, %v691_v47  ;;  %v497_v0 = vcombine.low %v9784_v2, %v490_v18  ;;  %v361_v7 = vcombine.low %v9798_v21, %v354_v44  ;;  %vm977_vm6 = vcmp.ge.f32.partialorder %v9774_v60, 0.0 }
  0x7b   : > { %v563_v3 = vcombine.low %v507_v42, %v523_v48  ;;  %v595_v24 = vcombine.low %v539_v53, %v555_v56  ;;  %v498_v43 = vcombine.high %v9784_v2, %v490_v18  ;;  %v362_v59 = vcombine.high %v9798_v21, %v354_v44 }
  0x7c   : > { %v9830_v33 = vrot.slane %v699_v63, %v9627_v19  ;;  %v700_v35 = vcombine.high %v643_v22, %v659_v23  ;;  %v732_v36 = vcombine.high %v675_v45, %v691_v47  ;;  %v9835_v37 = vrot.slane %v731_v54, %v9627_v19 }
  0x7d   : > { %v564_v39 = vcombine.high %v507_v42, %v523_v48  ;;  %v596_v50 = vcombine.high %v539_v53, %v555_v56  ;;  %v9841_v2 = vrot.slane %v563_v3, %v9627_v19  ;;  %v9844_v63 = vrot.slane %v595_v24, %v9627_v19 }
  0x7e   : > { %807 = vrot.lane.b32.xlu1 %v496_v29, %s9405_s7  ;;  %805 = vrot.lane.b32.xlu0 %v360_v46, %s9405_s7  ;;  %v636_v29 = vcombine.high %v9729_v28, %v9732_v34  ;;  %v652_v46 = vcombine.high %v9739_v40, %v9742_v41  ;;  %v668_v18 = vcombine.high %v9751_v49, %v9757_v52  ;;  %vm979_vm8 = vcmp.ge.f32.partialorder %v9777_v61, 0.0 }
  0x7f   : > { %v684_v54 = vcombine.high %v9754_v51, %v9762_v55  ;;  %v500_v21 = vcombine.high %v9767_v57, %v9774_v60  ;;  %v516_v22 = vcombine.high %v9770_v58, %v9777_v61  ;;  %v532_v23 = vcombine.high %v9780_v62, %v9790_v5 }
  0x80   : > { %v548_v44 = vcombine.high %v9787_v4, %v9793_v6  ;;  %v714_v45 = vrot.slane %v700_v35, %v9627_v19  ;;  %v746_v47 = vrot.slane %v732_v36, %v9627_v19  ;;  %v578_v42 = vrot.slane %v564_v39, %v9627_v19 }
  0x81   : > { %v610_v48 = vrot.slane %v596_v50, %v9627_v19  ;;  %v650_v53 = vrot.slane %v636_v29, %v9597_v8  ;;  %v666_v56 = vrot.slane %v652_v46, %v9597_v8  ;;  %v628_v3 = vcombine.high %v9841_v2, %v9844_v63 }
  0x82   : > { %815 = vrot.lane.b32.xlu1 %v497_v0, %s9406_s15  ;;  %813 = vrot.lane.b32.xlu0 %v361_v7, %s9406_s15  ;;  %v764_v0 = vcombine.high %v9830_v33, %v9835_v37  ;;  %v682_v24 = vrot.slane %v668_v18, %v9597_v8  ;;  %v698_v7 = vrot.slane %v684_v54, %v9597_v8  ;;  %vm981_vm10 = vcmp.ge.f32.partialorder %v9780_v62, 0.0 }
  0x83   : > { %v514_v50 = vrot.slane %v500_v21, %v9597_v8  ;;  %v530_v35 = vrot.slane %v516_v22, %v9597_v8  ;;  %v546_v36 = vrot.slane %v532_v23, %v9597_v8  ;;  %v765_v29 = vcombine.low %v714_v45, %v746_v47 }
  0x84   : > { %v715_v39 = vcombine.low %v650_v53, %v666_v56  ;;  %v747_v46 = vcombine.low %v682_v24, %v698_v7  ;;  %v629_v18 = vcombine.low %v578_v42, %v610_v48  ;;  %v630_v23 = vcombine.high %v578_v42, %v610_v48 }
  0x85   : > { %v579_v38 = vcombine.low %v514_v50, %v530_v35  ;;  %v748_v55 = vcombine.high %v682_v24, %v698_v7  ;;  %vm983_vm12 = vcmp.ge.f32.partialorder %v9787_v4, 0.0  ;;  %vm985_vm14 = vcmp.ge.f32.partialorder %v9790_v5, 0.0 }
  0x86   : > { %823 = vrot.lane.b32.xlu1 %v498_v43, %s9407_s29  ;;  %821 = vrot.lane.b32.xlu0 %v362_v59, %s9407_s29  ;;  %v562_v43 = vrot.slane %v548_v44, %v9597_v8  ;;  %v766_v59 = vcombine.high %v714_v45, %v746_v47  ;;  %v723_v21 = vrot.slane %v715_v39, %v9627_v19 }
  0x87   : > { %v755_v22 = vrot.slane %v747_v46, %v9627_v19  ;;  %v587_v44 = vrot.slane %v579_v38, %v9627_v19  ;;  %v716_v8 = vcombine.high %v650_v53, %v666_v56  ;;  %v580_v45 = vcombine.high %v514_v50, %v530_v35 }
  0x88   : > { %v611_v54 = vcombine.low %v546_v36, %v562_v43  ;;  %v612_v47 = vcombine.high %v546_v36, %v562_v43  ;;  %v762_v42 = vrot.slane %v748_v55, %v9627_v19  ;;  %v1004_v50 = vmul.f32 0.2, %v9600_v9 }
  0x89   : > { %v768_v39 = vcombine.high %v723_v21, %v755_v22  ;;  %v730_v46 = vrot.slane %v716_v8, %v9627_v19  ;;  %v594_v48 = vrot.slane %v580_v45, %v9627_v19  ;;  %v1005_v8 = vmul.f32 0.2, %v9767_v57 }
  0x8a   : > { %831 = vrot.lane.b32.xlu1 %v764_v0, %s9402_s20  ;;  %829 = vrot.lane.b32.xlu0 %v628_v3, %s9402_s20  ;;  %v619_v0 = vrot.slane %v611_v54, %v9627_v19  ;;  %v767_v3 = vcombine.low %v723_v21, %v755_v22  ;;  %v626_v53 = vrot.slane %v612_v47, %v9627_v19  ;;  %v9906_v43 = vmul.f32 0.2, %v9770_v58 }
  0x8b   : > { %v769_v56 = vcombine.low %v730_v46, %v762_v42  ;;  %v770_v7 = vcombine.high %v730_v46, %v762_v42  ;;  %v491_v35 = vcombine.low %v9708_v1, %v9718_v15  ;;  %v1037_v36 = vsel %vm973_vm0, %v9767_v57, %v1005_v8 }
  0x8c   : > { %v632_v38 = vcombine.high %v587_v44, %v619_v0  ;;  %v633_v24 = vcombine.low %v594_v48, %v626_v53  ;;  %v634_v55 = vcombine.high %v594_v48, %v626_v53  ;;  %v627_v54 = vcombine.low %v9841_v2, %v9844_v63 }
  0x8d   : > { %v1006_v21 = vmul.f32 0.2, %v9603_v10  ;;  %v9408_v22 = vmov 0.0   ;;  %v1009_v57 = vmul.f32 0.2, %v9774_v60  ;;  %vm987_vm0 = vcmp.ge.f32.partialorder %v9793_v6, 0.0 }
  0x8e   : > { %839 = vrot.lane.b32.xlu1 %v765_v29, %s9401_s18  ;;  %837 = vrot.lane.b32.xlu0 %v629_v18, %s9401_s18  ;;  %v631_v29 = vcombine.low %v587_v44, %v619_v0  ;;  %v763_v18 = vcombine.low %v9830_v33, %v9835_v37  ;;  %924 = vst.msk [vmem:[#allocation2 + $0x8] sm:$0xff] %vm922_vm2, %v9408_v22  ;;  %923 = vst.msk [vmem:[#allocation2] sm:$0xff] %vm922_vm2, %v9408_v22  ;;  %v1008_v44 = vmul.f32 0.2, %v9606_v11 }
  0x8f   : > { %927 = vst.msk [vmem:[#allocation2 + $0x18] sm:$0xff] %vm922_vm2, %v9408_v22  ;;  %928 = vst.msk [vmem:[#allocation2 + $0x20] sm:$0xff] %vm922_vm2, %v9408_v22  ;;  %v1041_v0 = vsel %vm977_vm6, %v9774_v60, %v1009_v57  ;;  %v1013_v45 = vmul.f32 0.2, %v9780_v62  ;;  %v1017_v42 = vmul.f32 0.2, %v9790_v5 }
  0x90   : > { %930 = vst.msk [vmem:[#allocation2 + $0x30] sm:$0xff] %vm922_vm2, %v9408_v22  ;;  %931 = vst.msk [vmem:[#allocation2 + $0x38] sm:$0xff] %vm922_vm2, %v9408_v22  ;;  %v1019_v48 = vmul.f32 0.2, %v9793_v6  ;;  %vm993_vm6 = vcmp.ge.f32.partialorder %v9732_v34, 0.0 }
  0x91   : > { %933 = vst.msk [vmem:[#allocation2 + $0x48] sm:$0xff] %vm922_vm2, %v9408_v22  ;;  %934 = vst.msk [vmem:[#allocation2 + $0x50] sm:$0xff] %vm922_vm2, %v9408_v22  ;;  %v1045_v47 = vsel %vm981_vm10, %v9780_v62, %v1013_v45  ;;  %vm997_vm10 = vcmp.ge.f32.partialorder %v9751_v49, 0.0  ;;  %v1033_v57 = vmul.f32 0.2, %v9757_v52 }
  0x92   : > { %847 = vrot.lane.b32.xlu1 %v766_v59, %s9403_s23  ;;  %845 = vrot.lane.b32.xlu0 %v630_v23, %s9403_s23  ;;  %v1036_v59 = vsel %vm972_vm1, %v9600_v9, %v1004_v50  ;;  %936 = vst.msk [vmem:[#allocation2 + $0x60] sm:$0xff] %vm922_vm2, %v9408_v22  ;;  %937 = vst.msk [vmem:[#allocation2 + $0x68] sm:$0xff] %vm922_vm2, %v9408_v22  ;;  %v1039_v9 = vsel %vm975_vm3, %v9770_v58, %v9906_v43  ;;  %v1011_v58 = vmul.f32 0.2, %v9777_v61 }
  0x93   : > { %939 = vst.msk [vmem:[#allocation2 + $0x78] sm:$0xff] %vm922_vm2, %v9408_v22  ;;  %940 = vst.msk [vmem:[#allocation2 + $0x80] sm:$0xff] %vm922_vm2, %v9408_v22  ;;  %v1038_v23 = vsel %vm974_vm5, %v9603_v10, %v1006_v21  ;;  %v1010_v10 = vmul.f32 0.2, %v9609_v12  ;;  %vm986_vm1 = vcmp.ge.f32.partialorder %v9623_v17, 0.0  ;;  %v1051_v53 = vsel %vm987_vm0, %v9793_v6, %v1019_v48 }
  0x94   : > { %942 = vst.msk [vmem:[#allocation2 + $0x90] sm:$0xff] %vm922_vm2, %v9408_v22  ;;  %943 = vst.msk [vmem:[#allocation2 + $0x98] sm:$0xff] %vm922_vm2, %v9408_v22  ;;  %vm988_vm3 = vcmp.ge.f32.partialorder %v9630_v20, 0.0  ;;  %vm990_vm5 = vcmp.ge.f32.partialorder %v9640_v25, 0.0 }
  0x95   : > { %945 = vst.msk [vmem:[#allocation2 + $0xa8] sm:$0xff] %vm922_vm2, %v9408_v22  ;;  %946 = vst.msk [vmem:[#allocation2 + $0xb0] sm:$0xff] %vm922_vm2, %v9408_v22  ;;  %v1042_v60 = vsel %vm978_vm9, %v9609_v12, %v1010_v10  ;;  %v1014_v12 = vmul.f32 0.2, %v9615_v14  ;;  %vm994_vm9 = vcmp.ge.f32.partialorder %v9646_v27, 0.0 }
  0x96   : > { %855 = vrot.lane.b32.xlu1 %v767_v3, %s9404_s26  ;;  %853 = vrot.lane.b32.xlu0 %v631_v29, %s9404_s26  ;;  %948 = vst.msk [vmem:[#allocation2 + $0xc0] sm:$0xff] %vm922_vm2, %v9408_v22  ;;  %949 = vst.msk [vmem:[#allocation2 + $0xc8] sm:$0xff] %vm922_vm2, %v9408_v22  ;;  %v1040_v3 = vsel %vm976_vm7, %v9606_v11, %v1008_v44  ;;  %v1043_v29 = vsel %vm979_vm8, %v9777_v61, %v1011_v58  ;;  %v1012_v11 = vmul.f32 0.2, %v9612_v13  ;;  %v15428_v44 = vld [vmem:[#allocation16_spill] sm:$0xff]  ;;  %v15429_v58 = vld [vmem:[#allocation13_spill] sm:$0xff] }
  0x97   : > { %951 = vst.msk [vmem:[#allocation2 + $0xd8] sm:$0xff] %vm922_vm2, %v9408_v22  ;;  %952 = vst.msk [vmem:[#allocation2 + $0xe0] sm:$0xff] %vm922_vm2, %v9408_v22  ;;  %v1046_v62 = vsel %vm982_vm13, %v9615_v14, %v1014_v12  ;;  %v1018_v14 = vmul.f32 0.2, %v9623_v17  ;;  %vm992_vm7 = vcmp.ge.f32.partialorder %v9643_v26, 0.0  ;;  %vm995_vm8 = vcmp.ge.f32.partialorder %v9742_v41, 0.0 }
  0x98   : > { %954 = vst.msk [vmem:[#allocation2 + $0xf0] sm:$0xff] %vm922_vm2, %v9408_v22  ;;  %955 = vst.msk [vmem:[#allocation2 + $0xf8] sm:$0xff] %vm922_vm2, %v9408_v22  ;;  %v1044_v61 = vsel %vm980_vm11, %v9612_v13, %v1012_v11  ;;  %v1016_v13 = vmul.f32 0.2, %v9620_v16  ;;  %vm996_vm11 = vcmp.ge.f32.partialorder %v9652_v30, 0.0  ;;  %vm998_vm13 = vcmp.ge.f32.partialorder %v9655_v31, 0.0 }
  0x99   : > { %957 = vst.msk [vmem:[#allocation2 + $0x108] sm:$0xff] %vm922_vm2, %v9408_v22  ;;  %958 = vst.msk [vmem:[#allocation2 + $0x110] sm:$0xff] %vm922_vm2, %v9408_v22  ;;  %vm1003_vm0 = vcmp.ge.f32.partialorder %v15428_v44, 0.0 }
  0x9a   : > { %863 = vrot.lane.b32.xlu1 %v768_v39, %s9405_s7  ;;  %861 = vrot.lane.b32.xlu0 %v632_v38, %s9405_s7  ;;  %960 = vst.msk [vmem:[#allocation2 + $0x120] sm:$0xff] %vm922_vm2, %v9408_v22  ;;  %961 = vst.msk [vmem:[#allocation2 + $0x128] sm:$0xff] %vm922_vm2, %v9408_v22  ;;  %v1015_v39 = vmul.f32 0.2, %v9787_v4  ;;  %v1049_v38 = vsel %vm985_vm14, %v9790_v5, %v1017_v42  ;;  %v1050_v5 = vsel %vm986_vm1, %v9623_v17, %v1018_v14  ;;  %v15430_v42 = vld [vmem:[#allocation14_spill] sm:$0xff] }
  0x9b   : > { %963 = vst.msk [vmem:[#allocation2 + $0x138] sm:$0xff] %vm922_vm2, %v9408_v22  ;;  %964 = vst.msk [vmem:[#allocation2 + $0x140] sm:$0xff] %vm922_vm2, %v9408_v22  ;;  %v1022_v17 = vmul.f32 0.2, %v9640_v25  ;;  %vm1001_vm14 = vcmp.ge.f32.partialorder %v9757_v52, 0.0  ;;  %vm1002_vm1 = vcmp.ge.f32.partialorder %v15429_v58, 0.0 }
  0x9c   : > { %966 = vst.msk [vmem:[#allocation2 + $0x150] sm:$0xff] %vm922_vm2, %v9408_v22  ;;  %967 = vst.msk [vmem:[#allocation2 + $0x158] sm:$0xff] %vm922_vm2, %v9408_v22  ;;  %v1047_v46 = vsel %vm983_vm12, %v9787_v4, %v1015_v39  ;;  %v1048_v4 = vsel %vm984_vm15, %v9620_v16, %v1016_v13  ;;  %v1020_v16 = vmul.f32 0.2, %v9630_v20  ;;  %vm999_vm12 = vcmp.ge.f32.partialorder %v9754_v51, 0.0 }
  0x9d   : > { %969 = vst.msk [vmem:[#allocation2 + $0x168] sm:$0xff] %vm922_vm2, %v9408_v22  ;;  %970 = vst.msk [vmem:[#allocation2 + $0x170] sm:$0xff] %vm922_vm2, %v9408_v22  ;;  %vm989_vm2 = vcmp.ge.f32.partialorder %v9729_v28, 0.0  ;;  %vm1000_vm15 = vcmp.ge.f32.partialorder %v9658_v32, 0.0 }
  0x9e   : > { %871 = vrot.lane.b32.xlu1 %v769_v56, %s9406_s15  ;;  %869 = vrot.lane.b32.xlu0 %v633_v24, %s9406_s15  ;;  %926 = vst.msk [vmem:[#allocation2 + $0x10] sm:$0x3] %vm925_vm4, %v9408_v22  ;;  %929 = vst.msk [vmem:[#allocation2 + $0x28] sm:$0x3] %vm925_vm4, %v9408_v22  ;;  %v1021_v56 = vmul.f32 0.2, %v9729_v28  ;;  %v1052_v6 = vsel %vm988_vm3, %v9630_v20, %v1020_v16 }
  0x9f   : > { %932 = vst.msk [vmem:[#allocation2 + $0x40] sm:$0x3] %vm925_vm4, %v9408_v22  ;;  %935 = vst.msk [vmem:[#allocation2 + $0x58] sm:$0x3] %vm925_vm4, %v9408_v22  ;;  %v1024_v20 = vmul.f32 0.2, %v9643_v26 }
  0xa0   : > { %938 = vst.msk [vmem:[#allocation2 + $0x70] sm:$0x3] %vm925_vm4, %v9408_v22  ;;  %941 = vst.msk [vmem:[#allocation2 + $0x88] sm:$0x3] %vm925_vm4, %v9408_v22  ;;  %v1053_v24 = vsel %vm989_vm2, %v9729_v28, %v1021_v56  ;;  %v1054_v28 = vsel %vm990_vm5, %v9640_v25, %v1022_v17  ;;  %v1026_v25 = vmul.f32 0.2, %v9646_v27 }
  0xa1   : > { %944 = vst.msk [vmem:[#allocation2 + $0xa0] sm:$0x3] %vm925_vm4, %v9408_v22  ;;  %947 = vst.msk [vmem:[#allocation2 + $0xb8] sm:$0x3] %vm925_vm4, %v9408_v22  ;;  %vm883_vm2 = vcmask 130048   ;;  %vm886_vm3 = vcmask 261120  }
  0xa2   : > { %879 = vrot.lane.b32.xlu1 %v770_v7, %s9407_s29  ;;  %877 = vrot.lane.b32.xlu0 %v634_v55, %s9407_s29  ;;  %950 = vst.msk [vmem:[#allocation2 + $0xd0] sm:$0x3] %vm925_vm4, %v9408_v22  ;;  %953 = vst.msk [vmem:[#allocation2 + $0xe8] sm:$0x3] %vm925_vm4, %v9408_v22  ;;  %v1023_v7 = vmul.f32 0.2, %v9739_v40 }
  0xa3   : > { %956 = vst.msk [vmem:[#allocation2 + $0x100] sm:$0x3] %vm925_vm4, %v9408_v22  ;;  %959 = vst.msk [vmem:[#allocation2 + $0x118] sm:$0x3] %vm925_vm4, %v9408_v22  ;;  %v1025_v55 = vmul.f32 0.2, %v9732_v34 }
  0xa4   : > { %962 = vst.msk [vmem:[#allocation2 + $0x130] sm:$0x3] %vm925_vm4, %v9408_v22  ;;  %965 = vst.msk [vmem:[#allocation2 + $0x148] sm:$0x3] %vm925_vm4, %v9408_v22  ;;  %vm892_vm5 = vcmask 523264  }
  0xa5   : > { %968 = vst.msk [vmem:[#allocation2 + $0x160] sm:$0x3] %vm925_vm4, %v9408_v22  ;;  %971 = vst.msk [vmem:[#allocation2 + $0x178] sm:$0x3] %vm925_vm4, %v9408_v22  ;;  %vm991_vm4 = vcmp.ge.f32.partialorder %v9739_v40, 0.0  ;;  %v1057_v50 = vsel %vm993_vm6, %v9732_v34, %v1025_v55  ;;  %v1058_v34 = vsel %vm994_vm9, %v9646_v27, %v1026_v25  ;;  %vm895_vm6 = vcmask 654336  }
  0xa6   : > { %1102 = vrot.lane.b32.xlu1 %v1037_v36, %s9409_s5  ;;  %1100 = vrot.lane.b32.xlu0 %v1036_v59, %s9409_s5  ;;  %v1055_v8 = vsel %vm991_vm4, %v9739_v40, %v1023_v7  ;;  %v1027_v36 = vmul.f32 0.2, %v9742_v41  ;;  %v1056_v40 = vsel %vm992_vm7, %v9643_v26, %v1024_v20  ;;  %v1029_v59 = vmul.f32 0.2, %v9751_v49 }
  0xa7   : > { %v1028_v26 = vmul.f32 0.2, %v9652_v30  ;;  %v1031_v22 = vmul.f32 0.2, %v9754_v51  ;;  %v1030_v27 = vmul.f32 0.2, %v9655_v31 }
  0xa8   : > { %v1059_v43 = vsel %vm995_vm8, %v9742_v41, %v1027_v36  ;;  %v1061_v21 = vsel %vm997_vm10, %v9751_v49, %v1029_v59  ;;  %vm889_vm4 = vcmask 392192   ;;  %vm898_vm7 = vcmask 785408  }
  0xa9   : > { %v1060_v41 = vsel %vm996_vm11, %v9652_v30, %v1028_v26  ;;  %v1062_v49 = vsel %vm998_vm13, %v9655_v31, %v1030_v27  ;;  %v1032_v30 = vmul.f32 0.2, %v9658_v32  ;;  %v1034_v31 = vmul.f32 0.2, %v15429_v58 }
  0xaa   : > { %1106 = vrot.lane.b32.xlu1 %v1039_v9, %s9409_s5  ;;  %1104 = vrot.lane.b32.xlu0 %v1038_v23, %s9409_s5  ;;  %v1063_v9 = vsel %vm999_vm12, %v9754_v51, %v1031_v22  ;;  %v1065_v23 = vsel %vm1001_vm14, %v9757_v52, %v1033_v57  ;;  %vm901_vm8 = vcmask 916480   ;;  %vm1196_vm9 = vcmask 138248  }
  0xab   : > { %v1064_v51 = vsel %vm1000_vm15, %v9658_v32, %v1032_v30  ;;  %v1066_v52 = vsel %vm1002_vm1, %v15429_v58, %v1034_v31 }
  0xae   : > { %1110 = vrot.lane.b32.xlu1 %v1041_v0, %s9409_s5  ;;  %1108 = vrot.lane.b32.xlu0 %v1040_v3, %s9409_s5  ;;  %v1035_v0 = vmul.f32 0.2, %v15428_v44 }
  0xb0   : > { %v1067_v3 = vsel %vm1003_vm0, %v15428_v44, %v1035_v0 }
  0xb2   : > { %1114 = vrot.lane.b32.xlu1 %v1043_v29, %s9409_s5  ;;  %1112 = vrot.lane.b32.xlu0 %v1042_v60, %s9409_s5 }
  0xb6   : > { %1118 = vrot.lane.b32.xlu1 %v1045_v47, %s9409_s5  ;;  %1116 = vrot.lane.b32.xlu0 %v1044_v61, %s9409_s5 }
  0xba   : > { %1122 = vrot.lane.b32.xlu1 %v1047_v46, %s9409_s5  ;;  %1120 = vrot.lane.b32.xlu0 %v1046_v62, %s9409_s5  ;;  %v15431_v62 = vld [vmem:[#allocation15_spill] sm:$0xff] }
  0xbb   : > { %v15432_v13 = vcombine.low %v15430_v42, %v15431_v62 }
  0xbe   : > { %1126 = vrot.lane.b32.xlu1 %v1049_v38, %s9409_s5  ;;  %1124 = vrot.lane.b32.xlu0 %v1048_v4, %s9409_s5 }
  0xc2   : > { %1130 = vrot.lane.b32.xlu1 %v1051_v53, %s9409_s5  ;;  %1128 = vrot.lane.b32.xlu0 %v1050_v5, %s9409_s5 }
  0xc6   : > { %1134 = vrot.lane.b32.xlu1 %v1053_v24, %s9409_s5  ;;  %1132 = vrot.lane.b32.xlu0 %v1052_v6, %s9409_s5 }
  0xca   : > { %1138 = vrot.lane.b32.xlu1 %v1055_v8, %s9409_s5  ;;  %1136 = vrot.lane.b32.xlu0 %v1054_v28, %s9409_s5 }
  0xce   : > { %1142 = vrot.lane.b32.xlu1 %v1057_v50, %s9409_s5  ;;  %1140 = vrot.lane.b32.xlu0 %v1056_v40, %s9409_s5 }
  0xd2   : > { %1146 = vrot.lane.b32.xlu1 %v1059_v43, %s9409_s5  ;;  %1144 = vrot.lane.b32.xlu0 %v1058_v34, %s9409_s5 }
  0xd6   : > { %1150 = vrot.lane.b32.xlu1 %v1061_v21, %s9409_s5  ;;  %1148 = vrot.lane.b32.xlu0 %v1060_v41, %s9409_s5 }
  0xda   : > { %1154 = vrot.lane.b32.xlu1 %v1063_v9, %s9409_s5  ;;  %1152 = vrot.lane.b32.xlu0 %v1062_v49, %s9409_s5 }
  0xde   : > { %1158 = vrot.lane.b32.xlu1 %v1065_v23, %s9409_s5  ;;  %1156 = vrot.lane.b32.xlu0 %v1064_v51, %s9409_s5 }
  0xdf   : > { %v782_v10 = vpop.permute.xlu1 %781  ;;  %v774_v29 = vpop.permute.xlu0 %773 }
  0xe0   : > { %v884_v38 = vsel %vm883_vm2, %v15432_v13, %v774_v29 }
  0xe1   : > { %v887_v1 = vsel %vm886_vm3, %v884_v38, %v782_v10 }
  0xe2   : > { %1162 = vrot.lane.b32.xlu1 %v1067_v3, %s9409_s5  ;;  %1160 = vrot.lane.b32.xlu0 %v1066_v52, %s9409_s5 }
  0xe4   : > { %v784_v32 = vpop.permute.xlu1 %783  ;;  %v776_v45 = vpop.permute.xlu0 %775 }
  0xe5   : > { %v885_v12 = vsel %vm883_vm2, %v491_v35, %v776_v45 }
  0xe6   : > { %v888_v48 = vsel %vm886_vm3, %v885_v12, %v784_v32 }
  0xe8   : > { %v792_v60 = vpop.permute.xlu1 %791  ;;  %v790_v11 = vpop.permute.xlu0 %789 }
  0xe9   : > { %v891_v14 = vsel %vm889_vm4, %v888_v48, %v792_v60  ;;  %v890_v35 = vsel %vm889_vm4, %v887_v1, %v790_v11 }
  0xec   : > { %v800_v47 = vpop.permute.xlu1 %799  ;;  %v798_v39 = vpop.permute.xlu0 %797 }
  0xed   : > { %v894_v53 = vsel %vm892_vm5, %v891_v14, %v800_v47  ;;  %v893_v56 = vsel %vm892_vm5, %v890_v35, %v798_v39 }
  0xf0   : > { %v808_v61 = vpop.permute.xlu1 %807  ;;  %v806_v46 = vpop.permute.xlu0 %805 }
  0xf1   : > { %v897_v5 = vsel %vm895_vm6, %v894_v53, %v808_v61  ;;  %v896_v16 = vsel %vm895_vm6, %v893_v56, %v806_v46 }
  0xf4   : > { %v816_v4 = vpop.permute.xlu1 %815  ;;  %v814_v15 = vpop.permute.xlu0 %813 }
  0xf5   : > { %v900_v24 = vsel %vm898_vm7, %v897_v5, %v816_v4  ;;  %v899_v6 = vsel %vm898_vm7, %v896_v16, %v814_v15 }
  0xf8   : > { %v824_v7 = vpop.permute.xlu1 %823  ;;  %v822_v8 = vpop.permute.xlu0 %821 }
  0xf9   : > { %v903_v17 = vsel %vm901_vm8, %v900_v24, %v824_v7  ;;  %v902_v55 = vsel %vm901_vm8, %v899_v6, %v822_v8  ;;  %v15435_v24 = vld [vmem:[#allocation12_spill] sm:$0xff] }
  0xfa   : > { %920 = vst [vmem:[%s10108_s30 + $0x10] sm:$0xff] %v903_v17  ;;  %918 = vst [vmem:[%s10108_s30] sm:$0xff] %v902_v55 }
  0xfc   : > { %v832_v28 = vpop.permute.xlu1 %831  ;;  %v830_v20 = vpop.permute.xlu0 %829 }
  0xfd   : > { %v905_v40 = vsel %vm883_vm2, %v763_v18, %v832_v28  ;;  %v904_v33 = vsel %vm883_vm2, %v627_v54, %v830_v20 }
 0x100   : > { %v840_v50 = vpop.permute.xlu1 %839  ;;  %v838_v36 = vpop.permute.xlu0 %837 }
 0x101   : > { %v907_v59 = vsel %vm886_vm3, %v905_v40, %v840_v50  ;;  %v906_v18 = vsel %vm886_vm3, %v904_v33, %v838_v36 }
 0x104   : > { %v848_v25 = vpop.permute.xlu1 %847  ;;  %v846_v43 = vpop.permute.xlu0 %845 }
 0x105   : > { %v909_v26 = vsel %vm889_vm4, %v907_v59, %v848_v25  ;;  %v908_v49 = vsel %vm889_vm4, %v906_v18, %v846_v43 }
 0x108   : > { %v856_v34 = vpop.permute.xlu1 %855  ;;  %v854_v21 = vpop.permute.xlu0 %853 }
 0x109   : > { %v911_v22 = vsel %vm892_vm5, %v909_v26, %v856_v34  ;;  %v910_v23 = vsel %vm892_vm5, %v908_v49, %v854_v21 }
 0x10c   : > { %v864_v41 = vpop.permute.xlu1 %863  ;;  %v862_v27 = vpop.permute.xlu0 %861 }
 0x10d   : > { %v913_v9 = vsel %vm895_vm6, %v911_v22, %v864_v41  ;;  %v912_v44 = vsel %vm895_vm6, %v910_v23, %v862_v27 }
 0x110   : > { %v872_v37 = vpop.permute.xlu1 %871  ;;  %v870_v57 = vpop.permute.xlu0 %869 }
 0x111   : > { %v915_v30 = vsel %vm898_vm7, %v913_v9, %v872_v37  ;;  %v914_v51 = vsel %vm898_vm7, %v912_v44, %v870_v57 }
 0x114   : > { %v880_v0 = vpop.permute.xlu1 %879  ;;  %v878_v63 = vpop.permute.xlu0 %877 }
 0x115   : > { %v917_v2 = vsel %vm901_vm8, %v915_v30, %v880_v0  ;;  %v916_v54 = vsel %vm901_vm8, %v914_v51, %v878_v63 }
 0x116   : > { %921 = vst [vmem:[%s10108_s30 + $0x18] sm:$0xff] %v917_v2  ;;  %919 = vst [vmem:[%s10108_s30 + $0x8] sm:$0xff] %v916_v54 }
 0x118   : > { %v1103_v58 = vpop.permute.xlu1 %1102  ;;  %v1101_v31 = vpop.permute.xlu0 %1100 }
 0x119   : > { %1198 = vst.msk [vmem:[#allocation2 + $0x9] sm:$0xff] %vm1196_vm9, %v1103_v58  ;;  %1197 = vst.msk [vmem:[#allocation2 + $0x1] sm:$0xff] %vm1196_vm9, %v1101_v31 }
 0x11c   : > { %v1107_v3 = vpop.permute.xlu1 %1106  ;;  %v1105_v10 = vpop.permute.xlu0 %1104 }
 0x11d   : > { %1200 = vst.msk [vmem:[#allocation2 + $0x21] sm:$0xff] %vm1196_vm9, %v1107_v3  ;;  %1199 = vst.msk [vmem:[#allocation2 + $0x19] sm:$0xff] %vm1196_vm9, %v1105_v10 }
 0x120   : > { %v1111_v29 = vpop.permute.xlu1 %1110  ;;  %v1109_v52 = vpop.permute.xlu0 %1108  ;;  %v10140_v32 = vld [vmem:[#allocation2 + $0x8] sm:$0xff]  ;;  %v10142_v45 = vld [vmem:[#allocation2] sm:$0xff] }
 0x121   : > { %1202 = vst.msk [vmem:[#allocation2 + $0x39] sm:$0xff] %vm1196_vm9, %v1111_v29  ;;  %1201 = vst.msk [vmem:[#allocation2 + $0x31] sm:$0xff] %vm1196_vm9, %v1109_v52  ;;  %1359 = vrot.lane.b32.xlu1 %v10140_v32, %s9410_s27  ;;  %1357 = vrot.lane.b32.xlu0 %v10142_v45, %s9410_s27  ;;  %v10193_v16 = vld [vmem:[#allocation2 + $0x1] sm:$0xff] }
 0x122   : > { %15434 = vst [vmem:[#allocation13_spill] sm:$0xff] %v10193_v16  ;;  %v10283_v52 = vld [vmem:[#allocation2 + $0x2] sm:$0xff] }
 0x124   : > { %v1115_v60 = vpop.permute.xlu1 %1114  ;;  %v1113_v11 = vpop.permute.xlu0 %1112  ;;  %v10150_v47 = vld [vmem:[#allocation2 + $0x20] sm:$0xff]  ;;  %v10152_v39 = vld [vmem:[#allocation2 + $0x18] sm:$0xff] }
 0x125   : > { %1204 = vst.msk [vmem:[#allocation2 + $0x51] sm:$0xff] %vm1196_vm9, %v1115_v60  ;;  %1203 = vst.msk [vmem:[#allocation2 + $0x49] sm:$0xff] %vm1196_vm9, %v1113_v11  ;;  %1363 = vrot.lane.b32.xlu1 %v10150_v47, %s9410_s27  ;;  %1361 = vrot.lane.b32.xlu0 %v10152_v39, %s9410_s27  ;;  %v10201_v17 = vld [vmem:[#allocation2 + $0x19] sm:$0xff] }
 0x126   : > { %15438 = vst [vmem:[#allocation17_spill] sm:$0xff] %v10201_v17 }
 0x128   : > { %v1119_v61 = vpop.permute.xlu1 %1118  ;;  %v1117_v12 = vpop.permute.xlu0 %1116  ;;  %v10160_v46 = vld [vmem:[#allocation2 + $0x38] sm:$0xff]  ;;  %v10162_v42 = vld [vmem:[#allocation2 + $0x30] sm:$0xff] }
 0x129   : > { %1206 = vst.msk [vmem:[#allocation2 + $0x69] sm:$0xff] %vm1196_vm9, %v1119_v61  ;;  %1205 = vst.msk [vmem:[#allocation2 + $0x61] sm:$0xff] %vm1196_vm9, %v1117_v12  ;;  %1367 = vrot.lane.b32.xlu1 %v10160_v46, %s9410_s27  ;;  %v4445_v62 = vcombine.low %v10140_v32, %v10160_v46  ;;  %v4446_v13 = vcombine.high %v10140_v32, %v10160_v46  ;;  %1365 = vrot.lane.b32.xlu0 %v10162_v42, %s9410_s27  ;;  %v10173_v48 = vld [vmem:[#allocation2 + $0x31] sm:$0xff] }
 0x12a   : > { %15433 = vst [vmem:[#allocation16_spill] sm:$0xff] %v10173_v48  ;;  %v1997_v4 = vcombine.low %v10142_v45, %v10162_v42  ;;  %v2813_v8 = vcombine.low %v10193_v16, %v10173_v48  ;;  %v2814_v34 = vcombine.high %v10193_v16, %v10173_v48  ;;  %v10272_v31 = vld [vmem:[#allocation2 + $0x32] sm:$0xff] }
 0x12b   : > { %v10196_v7 = vrot.slane %v4445_v62, %v15435_v24  ;;  %v10199_v6 = vrot.slane %v4446_v13, %v15435_v24  ;;  %v3629_v61 = vcombine.low %v10283_v52, %v10272_v31  ;;  %v3630_v12 = vcombine.high %v10283_v52, %v10272_v31  ;;  %v1295_v52 = vld [vmem:[#allocation2 + $0x1a] sm:$0xff] }
 0x12c   : > { %v1123_v38 = vpop.permute.xlu1 %1122  ;;  %v1121_v14 = vpop.permute.xlu0 %1120  ;;  %v10178_v1 = vld [vmem:[#allocation2 + $0x50] sm:$0xff]  ;;  %v10180_v15 = vld [vmem:[#allocation2 + $0x48] sm:$0xff]  ;;  %v10216_v40 = vrot.slane %v1997_v4, %v15435_v24  ;;  %v10241_v33 = vrot.slane %v2813_v8, %v15435_v24  ;;  %v10256_v23 = vrot.slane %v2814_v34, %v15435_v24 }
 0x12d   : > { %1208 = vst.msk [vmem:[#allocation2 + $0x81] sm:$0xff] %vm1196_vm9, %v1123_v38  ;;  %v1267_v35 = vld [vmem:[#allocation2 + $0x49] sm:$0xff]  ;;  %1207 = vst.msk [vmem:[#allocation2 + $0x79] sm:$0xff] %vm1196_vm9, %v1121_v14  ;;  %1371 = vrot.lane.b32.xlu1 %v10178_v1, %s9410_s27  ;;  %v4461_v53 = vcombine.low %v10150_v47, %v10178_v1  ;;  %v4462_v56 = vcombine.high %v10150_v47, %v10178_v1  ;;  %1369 = vrot.lane.b32.xlu0 %v10180_v15, %s9410_s27 }
 0x12e   : > { %v2013_v5 = vcombine.low %v10152_v39, %v10180_v15  ;;  %15436 = vst [vmem:[#allocation14_spill] sm:$0xff] %v10196_v7  ;;  %15437 = vst [vmem:[#allocation15_spill] sm:$0xff] %v10199_v6  ;;  %v2829_v36 = vcombine.low %v10201_v17, %v1267_v35  ;;  %v2830_v37 = vcombine.high %v10201_v17, %v1267_v35  ;;  %v1299_v34 = vld [vmem:[#allocation2 + $0x4a] sm:$0xff] }
 0x12f   : > { %v10206_v55 = vrot.slane %v4461_v53, %v15435_v24  ;;  %v10209_v28 = vrot.slane %v4462_v56, %v15435_v24  ;;  %15441 = vst [vmem:[#allocation20_spill] sm:$0xff] %v10256_v23  ;;  %v3646_v2 = vcombine.high %v1295_v52, %v1299_v34 }
 0x130   : > { %v10212_v20 = vrot.slane %v2013_v5, %v15435_v24  ;;  %v1127_v50 = vpop.permute.xlu1 %1126  ;;  %v1125_v25 = vpop.permute.xlu0 %1124  ;;  %v10219_v43 = vld [vmem:[#allocation2 + $0x68] sm:$0xff]  ;;  %v10221_v59 = vld [vmem:[#allocation2 + $0x60] sm:$0xff]  ;;  %v10245_v18 = vrot.slane %v2829_v36, %v15435_v24  ;;  %v10259_v44 = vrot.slane %v2830_v37, %v15435_v24 }
 0x131   : > { %15439 = vst [vmem:[#allocation18_spill] sm:$0xff] %v10206_v55  ;;  %15440 = vst [vmem:[#allocation19_spill] sm:$0xff] %v10209_v28  ;;  %1375 = vrot.lane.b32.xlu1 %v10219_v43, %s9410_s27  ;;  %1373 = vrot.lane.b32.xlu0 %v10221_v59, %s9410_s27  ;;  %v10285_v11 = vld [vmem:[#allocation2 + $0x61] sm:$0xff] }
 0x132   : > { %1210 = vst.msk [vmem:[#allocation2 + $0x99] sm:$0xff] %vm1196_vm9, %v1127_v50  ;;  %1209 = vst.msk [vmem:[#allocation2 + $0x91] sm:$0xff] %vm1196_vm9, %v1125_v25 }
 0x133   : > { %15442 = vst [vmem:[#allocation21_spill] sm:$0xff] %v10259_v44  ;;  %15443 = vst [vmem:[#allocation22_spill] sm:$0xff] %v10285_v11 }
 0x134   : > { %v1131_v9 = vpop.permute.xlu1 %1130  ;;  %v1129_v57 = vpop.permute.xlu0 %1128  ;;  %v10248_v49 = vld [vmem:[#allocation2 + $0x80] sm:$0xff]  ;;  %v10250_v30 = vld [vmem:[#allocation2 + $0x78] sm:$0xff] }
 0x135   : > { %1212 = vst.msk [vmem:[#allocation2 + $0xb1] sm:$0xff] %vm1196_vm9, %v1131_v9  ;;  %1211 = vst.msk [vmem:[#allocation2 + $0xa9] sm:$0xff] %vm1196_vm9, %v1129_v57  ;;  %1379 = vrot.lane.b32.xlu1 %v10248_v49, %s9410_s27  ;;  %1377 = vrot.lane.b32.xlu0 %v10250_v30, %s9410_s27  ;;  %v10313_v25 = vld [vmem:[#allocation2 + $0x79] sm:$0xff] }
 0x136   : > { %15444 = vst [vmem:[#allocation23_spill] sm:$0xff] %v10313_v25 }
 0x138   : > { %v1135_v51 = vpop.permute.xlu1 %1134  ;;  %v1133_v63 = vpop.permute.xlu0 %1132 }
 0x139   : > { %1214 = vst.msk [vmem:[#allocation2 + $0xc9] sm:$0xff] %vm1196_vm9, %v1135_v51  ;;  %v10268_v54 = vld [vmem:[#allocation2 + $0x98] sm:$0xff]  ;;  %v10270_v58 = vld [vmem:[#allocation2 + $0x90] sm:$0xff]  ;;  %1213 = vst.msk [vmem:[#allocation2 + $0xc1] sm:$0xff] %vm1196_vm9, %v1133_v63 }
 0x13a   : > { %1383 = vrot.lane.b32.xlu1 %v10268_v54, %s9410_s27  ;;  %v4477_v3 = vcombine.low %v10219_v43, %v10268_v54  ;;  %v4478_v10 = vcombine.high %v10219_v43, %v10268_v54  ;;  %v1273_v29 = vld [vmem:[#allocation2 + $0x91] sm:$0xff]  ;;  %1381 = vrot.lane.b32.xlu0 %v10270_v58, %s9410_s27  ;;  %v2029_v62 = vcombine.low %v10221_v59, %v10270_v58 }
 0x13b   : > { %v2030_v13 = vcombine.high %v10221_v59, %v10270_v58  ;;  %v2845_v35 = vcombine.low %v10285_v11, %v1273_v29  ;;  %v2846_v53 = vcombine.high %v10285_v11, %v1273_v29 }
 0x13c   : > { %v1139_v60 = vpop.permute.xlu1 %1138  ;;  %v1137_v38 = vpop.permute.xlu0 %1136  ;;  %v10296_v4 = vld [vmem:[#allocation2 + $0xb0] sm:$0xff]  ;;  %v10298_v14 = vld [vmem:[#allocation2 + $0xa8] sm:$0xff]  ;;  %v10316_v9 = vrot.slane %v4477_v3, %v15435_v24  ;;  %v10319_v37 = vrot.slane %v4478_v10, %v15435_v24 }
 0x13d   : > { %1216 = vst.msk [vmem:[#allocation2 + $0xe1] sm:$0xff] %vm1196_vm9, %v1139_v60  ;;  %v1275_v56 = vld [vmem:[#allocation2 + $0xa9] sm:$0xff]  ;;  %1215 = vst.msk [vmem:[#allocation2 + $0xd9] sm:$0xff] %vm1196_vm9, %v1137_v38  ;;  %v4493_v5 = vcombine.low %v10248_v49, %v10296_v4  ;;  %v4494_v8 = vcombine.high %v10248_v49, %v10296_v4  ;;  %v2045_v50 = vcombine.low %v10250_v30, %v10298_v14 }
 0x13e   : > { %1387 = vrot.lane.b32.xlu1 %v10296_v4, %s9410_s27  ;;  %v2046_v36 = vcombine.high %v10250_v30, %v10298_v14  ;;  %15445 = vst [vmem:[#allocation24_spill] sm:$0xff] %v10316_v9  ;;  %15446 = vst [vmem:[#allocation25_spill] sm:$0xff] %v10319_v37  ;;  %1385 = vrot.lane.b32.xlu0 %v10298_v14, %s9410_s27  ;;  %v2861_v57 = vcombine.low %v10313_v25, %v1275_v56  ;;  %v1307_v37 = vld [vmem:[#allocation2 + $0xaa] sm:$0xff] }
 0x13f   : > { %v2862_v51 = vcombine.high %v10313_v25, %v1275_v56  ;;  %v10326_v63 = vrot.slane %v4493_v5, %v15435_v24  ;;  %v10329_v31 = vrot.slane %v4494_v8, %v15435_v24  ;;  %v10332_v29 = vrot.slane %v2045_v50, %v15435_v24 }
 0x140   : > { %v10335_v3 = vrot.slane %v2046_v36, %v15435_v24  ;;  %v1143_v10 = vpop.permute.xlu1 %1142  ;;  %v10338_v60 = vrot.slane %v2029_v62, %v15435_v24  ;;  %v10341_v38 = vrot.slane %v2030_v13, %v15435_v24  ;;  %v1141_v56 = vpop.permute.xlu0 %1140  ;;  %v10344_v5 = vld [vmem:[#allocation2 + $0xc8] sm:$0xff]  ;;  %v10346_v8 = vld [vmem:[#allocation2 + $0xc0] sm:$0xff]  ;;  %v3645_v50 = vcombine.low %v1295_v52, %v1299_v34 }
 0x141   : > { %15447 = vst [vmem:[#allocation26_spill] sm:$0xff] %v10326_v63  ;;  %15448 = vst [vmem:[#allocation27_spill] sm:$0xff] %v10329_v31  ;;  %v10373_v22 = vrot.slane %v2846_v53, %v15435_v24  ;;  %v10376_v41 = vrot.slane %v2861_v57, %v15435_v24  ;;  %v10379_v21 = vrot.slane %v2862_v51, %v15435_v24 }
 0x142   : > { %1218 = vst.msk [vmem:[#allocation2 + $0xf9] sm:$0xff] %vm1196_vm9, %v1143_v10  ;;  %1217 = vst.msk [vmem:[#allocation2 + $0xf1] sm:$0xff] %vm1196_vm9, %v1141_v56  ;;  %1391 = vrot.lane.b32.xlu1 %v10344_v5, %s9410_s27  ;;  %1389 = vrot.lane.b32.xlu0 %v10346_v8, %s9410_s27  ;;  %v10370_v56 = vrot.slane %v2845_v35, %v15435_v24  ;;  %v10387_v52 = vrot.slane %v3629_v61, %v15435_v24 }
 0x143   : > { %15449 = vst [vmem:[#allocation28_spill] sm:$0xff] %v10373_v22  ;;  %15450 = vst [vmem:[#allocation29_spill] sm:$0xff] %v10379_v21  ;;  %v10390_v35 = vrot.slane %v3630_v12, %v15435_v24  ;;  %v10393_v53 = vrot.slane %v3645_v50, %v15435_v24  ;;  %v10396_v57 = vrot.slane %v3646_v2, %v15435_v24  ;;  %v10427_v12 = vld [vmem:[#allocation2 + $0xc1] sm:$0xff] }
 0x144   : > { %v1147_v13 = vpop.permute.xlu1 %1146  ;;  %v1145_v36 = vpop.permute.xlu0 %1144  ;;  %v10382_v26 = vld [vmem:[#allocation2 + $0xe0] sm:$0xff]  ;;  %v10384_v62 = vld [vmem:[#allocation2 + $0xd8] sm:$0xff]  ;;  %15457 = vst [vmem:[#allocation36_spill] sm:$0xff] %v10427_v12 }
 0x145   : > { %1220 = vst.msk [vmem:[#allocation2 + $0x111] sm:$0xff] %vm1196_vm9, %v1147_v13  ;;  %15451 = vst [vmem:[#allocation30_spill] sm:$0xff] %v10384_v62 }
 0x146   : > { %15452 = vst [vmem:[#allocation31_spill] sm:$0xff] %v10390_v35  ;;  %15453 = vst [vmem:[#allocation32_spill] sm:$0xff] %v10396_v57  ;;  %1395 = vrot.lane.b32.xlu1 %v10382_v26, %s9410_s27  ;;  %1393 = vrot.lane.b32.xlu0 %v10384_v62, %s9410_s27 }
 0x147   : > { %1219 = vst.msk [vmem:[#allocation2 + $0x109] sm:$0xff] %vm1196_vm9, %v1145_v36 }
 0x148   : > { %v1151_v50 = vpop.permute.xlu1 %1150  ;;  %v1149_v36 = vpop.permute.xlu0 %1148 }
 0x149   : > { %1222 = vst.msk [vmem:[#allocation2 + $0x129] sm:$0xff] %vm1196_vm9, %v1151_v50  ;;  %v10412_v13 = vld [vmem:[#allocation2 + $0xf8] sm:$0xff]  ;;  %v10414_v0 = vld [vmem:[#allocation2 + $0xf0] sm:$0xff]  ;;  %1221 = vst.msk [vmem:[#allocation2 + $0x121] sm:$0xff] %vm1196_vm9, %v1149_v36 }
 0x14a   : > { %15454 = vst [vmem:[#allocation33_spill] sm:$0xff] %v10412_v13  ;;  %15455 = vst [vmem:[#allocation34_spill] sm:$0xff] %v10414_v0  ;;  %1399 = vrot.lane.b32.xlu1 %v10412_v13, %s9410_s27  ;;  %v4581_v61 = vcombine.low %v10344_v5, %v10412_v13  ;;  %v4582_v51 = vcombine.high %v10344_v5, %v10412_v13  ;;  %v10423_v2 = vld [vmem:[#allocation2 + $0xf1] sm:$0xff]  ;;  %1397 = vrot.lane.b32.xlu0 %v10414_v0, %s9410_s27 }
 0x14b   : > { %15456 = vst [vmem:[#allocation35_spill] sm:$0xff] %v10423_v2  ;;  %v2133_v36 = vcombine.low %v10346_v8, %v10414_v0  ;;  %v2134_v10 = vcombine.high %v10346_v8, %v10414_v0  ;;  %v2949_v11 = vcombine.low %v10427_v12, %v10423_v2  ;;  %v2950_v57 = vcombine.high %v10427_v12, %v10423_v2  ;;  %v10455_v2 = vld [vmem:[#allocation2 + $0xd9] sm:$0xff] }
 0x14c   : > { %v1155_v50 = vpop.permute.xlu1 %1154  ;;  %v1153_v27 = vpop.permute.xlu0 %1152  ;;  %15461 = vst [vmem:[#allocation40_spill] sm:$0xff] %v10455_v2  ;;  %v10458_v12 = vrot.slane %v4581_v61, %v15435_v24 }
 0x14d   : > { %1224 = vst.msk [vmem:[#allocation2 + $0x141] sm:$0xff] %vm1196_vm9, %v1155_v50  ;;  %1223 = vst.msk [vmem:[#allocation2 + $0x139] sm:$0xff] %vm1196_vm9, %v1153_v27  ;;  %v10461_v27 = vrot.slane %v4582_v51, %v15435_v24  ;;  %v10485_v31 = vrot.slane %v2134_v10, %v15435_v24 }
 0x14e   : > { %v10434_v34 = vld [vmem:[#allocation2 + $0x110] sm:$0xff]  ;;  %v10436_v25 = vld [vmem:[#allocation2 + $0x108] sm:$0xff]  ;;  %15462 = vst [vmem:[#allocation41_spill] sm:$0xff] %v10458_v12 }
 0x14f   : > { %15458 = vst [vmem:[#allocation37_spill] sm:$0xff] %v10434_v34  ;;  %15459 = vst [vmem:[#allocation38_spill] sm:$0xff] %v10436_v25  ;;  %v10442_v35 = vld [vmem:[#allocation2 + $0x109] sm:$0xff]  ;;  %1403 = vrot.lane.b32.xlu1 %v10434_v34, %s9410_s27  ;;  %v4597_v50 = vcombine.low %v10382_v26, %v10434_v34  ;;  %v4598_v48 = vcombine.high %v10382_v26, %v10434_v34  ;;  %v2149_v17 = vcombine.low %v10384_v62, %v10436_v25 }
 0x150   : > { %15460 = vst [vmem:[#allocation39_spill] sm:$0xff] %v10442_v35  ;;  %v2150_v16 = vcombine.high %v10384_v62, %v10436_v25  ;;  %15463 = vst [vmem:[#allocation42_spill] sm:$0xff] %v10461_v27  ;;  %1401 = vrot.lane.b32.xlu0 %v10436_v25, %s9410_s27  ;;  %v2965_v44 = vcombine.low %v10455_v2, %v10442_v35  ;;  %v2966_v23 = vcombine.high %v10455_v2, %v10442_v35  ;;  %v1159_v34 = vpop.permute.xlu1 %1158  ;;  %v10488_v35 = vld [vmem:[#allocation2 + $0x128] sm:$0xff] }
 0x151   : > { %v10470_v21 = vrot.slane %v4597_v50, %v15435_v24  ;;  %v10473_v22 = vrot.slane %v4598_v48, %v15435_v24  ;;  %v10476_v61 = vrot.slane %v2149_v17, %v15435_v24  ;;  %v10482_v25 = vrot.slane %v2133_v36, %v15435_v24  ;;  %1226 = vst.msk [vmem:[#allocation2 + $0x159] sm:$0xff] %vm1196_vm9, %v1159_v34  ;;  %v1157_v50 = vpop.permute.xlu0 %1156  ;;  %v10490_v48 = vld [vmem:[#allocation2 + $0x120] sm:$0xff] }
 0x152   : > { %v10479_v51 = vrot.slane %v2150_v16, %v15435_v24  ;;  %15466 = vst [vmem:[#allocation45_spill] sm:$0xff] %v10488_v35  ;;  %15467 = vst [vmem:[#allocation46_spill] sm:$0xff] %v10490_v48  ;;  %v10517_v2 = vrot.slane %v2950_v57, %v15435_v24  ;;  %v10520_v34 = vrot.slane %v2965_v44, %v15435_v24  ;;  %v1305_v16 = vld [vmem:[#allocation2 + $0x92] sm:$0xff]  ;;  %v1303_v57 = vld [vmem:[#allocation2 + $0x7a] sm:$0xff] }
 0x153   : > { %15464 = vst [vmem:[#allocation43_spill] sm:$0xff] %v10470_v21  ;;  %15465 = vst [vmem:[#allocation44_spill] sm:$0xff] %v10473_v22  ;;  %1407 = vrot.lane.b32.xlu1 %v10488_v35, %s9410_s27  ;;  %v10523_v17 = vrot.slane %v2966_v23, %v15435_v24  ;;  %v3677_v6 = vcombine.low %v1303_v57, %v1307_v37  ;;  %v3678_v13 = vcombine.high %v1303_v57, %v1307_v37 }
 0x154   : > { %1225 = vst.msk [vmem:[#allocation2 + $0x151] sm:$0xff] %vm1196_vm9, %v1157_v50  ;;  %1405 = vrot.lane.b32.xlu0 %v10490_v48, %s9410_s27  ;;  %v1163_v10 = vpop.permute.xlu1 %1162  ;;  %v10514_v50 = vrot.slane %v2949_v11, %v15435_v24  ;;  %15468 = vst [vmem:[#allocation47_spill] sm:$0xff] %v10517_v2  ;;  %v10526_v22 = vld [vmem:[#allocation2 + $0x140] sm:$0xff]  ;;  %v10528_v27 = vld [vmem:[#allocation2 + $0x138] sm:$0xff] }
 0x155   : > { %15469 = vst [vmem:[#allocation48_spill] sm:$0xff] %v10523_v17  ;;  %1228 = vst.msk [vmem:[#allocation2 + $0x171] sm:$0xff] %vm1196_vm9, %v1163_v10  ;;  %v1161_v36 = vpop.permute.xlu0 %1160  ;;  %v1301_v11 = vld [vmem:[#allocation2 + $0x62] sm:$0xff]  ;;  %v10562_v21 = vrot.slane %v3677_v6, %v15435_v24  ;;  %v10588_v9 = vld [vmem:[#allocation2 + $0x139] sm:$0xff] }
 0x156   : > { %15470 = vst [vmem:[#allocation49_spill] sm:$0xff] %v10526_v22  ;;  %15471 = vst [vmem:[#allocation50_spill] sm:$0xff] %v10528_v27  ;;  %v3661_v10 = vcombine.low %v1301_v11, %v1305_v16  ;;  %v3662_v28 = vcombine.high %v1301_v11, %v1305_v16  ;;  %v10553_v16 = vld [vmem:[#allocation2 + $0x121] sm:$0xff] }
 0x157   : > { %1227 = vst.msk [vmem:[#allocation2 + $0x169] sm:$0xff] %vm1196_vm9, %v1161_v36  ;;  %1411 = vrot.lane.b32.xlu1 %v10526_v22, %s9410_s27  ;;  %15475 = vst [vmem:[#allocation54_spill] sm:$0xff] %v10553_v16 }
 0x158   : > { %1409 = vrot.lane.b32.xlu0 %v10528_v27, %s9410_s27  ;;  %v10556_v11 = vrot.slane %v3661_v10, %v15435_v24  ;;  %v10559_v2 = vrot.slane %v3662_v28, %v15435_v24  ;;  %15480 = vst [vmem:[#allocation59_spill] sm:$0xff] %v10588_v9 }
 0x15a   : > { %15476 = vst [vmem:[#allocation55_spill] sm:$0xff] %v10559_v2 }
 0x15b   : > { %v10539_v0 = vld [vmem:[#allocation2 + $0x158] sm:$0xff]  ;;  %v10541_v36 = vld [vmem:[#allocation2 + $0x150] sm:$0xff] }
 0x15c   : > { %15472 = vst [vmem:[#allocation51_spill] sm:$0xff] %v10539_v0  ;;  %15473 = vst [vmem:[#allocation52_spill] sm:$0xff] %v10541_v36  ;;  %1415 = vrot.lane.b32.xlu1 %v10539_v0, %s9410_s27  ;;  %v4613_v44 = vcombine.low %v10488_v35, %v10539_v0  ;;  %v4614_v23 = vcombine.high %v10488_v35, %v10539_v0  ;;  %v10549_v17 = vld [vmem:[#allocation2 + $0x151] sm:$0xff]  ;;  %1413 = vrot.lane.b32.xlu0 %v10541_v36, %s9410_s27 }
 0x15d   : > { %15474 = vst [vmem:[#allocation53_spill] sm:$0xff] %v10549_v17  ;;  %v2165_v0 = vcombine.low %v10490_v48, %v10541_v36  ;;  %v2166_v35 = vcombine.high %v10490_v48, %v10541_v36  ;;  %v2981_v10 = vcombine.low %v10553_v16, %v10549_v17  ;;  %v2982_v28 = vcombine.high %v10553_v16, %v10549_v17 }
 0x15e   : > { %v10568_v12 = vld [vmem:[#allocation2 + $0x170] sm:$0xff]  ;;  %v10570_v63 = vld [vmem:[#allocation2 + $0x168] sm:$0xff]  ;;  %v10591_v17 = vrot.slane %v4613_v44, %v15435_v24  ;;  %v10594_v16 = vrot.slane %v4614_v23, %v15435_v24 }
 0x15f   : > { %15477 = vst [vmem:[#allocation56_spill] sm:$0xff] %v10568_v12  ;;  %15478 = vst [vmem:[#allocation57_spill] sm:$0xff] %v10570_v63  ;;  %v10576_v37 = vld [vmem:[#allocation2 + $0x169] sm:$0xff]  ;;  %v4629_v6 = vcombine.low %v10526_v22, %v10568_v12  ;;  %v4630_v57 = vcombine.high %v10526_v22, %v10568_v12  ;;  %v2181_v36 = vcombine.low %v10528_v27, %v10570_v63 }
 0x160   : > { %15479 = vst [vmem:[#allocation58_spill] sm:$0xff] %v10576_v37  ;;  %1419 = vrot.lane.b32.xlu1 %v10568_v12, %s9410_s27  ;;  %v2182_v48 = vcombine.high %v10528_v27, %v10570_v63  ;;  %15481 = vst [vmem:[#allocation60_spill] sm:$0xff] %v10591_v17  ;;  %1417 = vrot.lane.b32.xlu0 %v10570_v63, %s9410_s27  ;;  %v2997_v12 = vcombine.low %v10588_v9, %v10576_v37 }
 0x161   : > { %15482 = vst [vmem:[#allocation61_spill] sm:$0xff] %v10594_v16  ;;  %v2998_v22 = vcombine.high %v10588_v9, %v10576_v37  ;;  %v10603_v55 = vrot.slane %v4629_v6, %v15435_v24  ;;  %v10606_v27 = vrot.slane %v4630_v57, %v15435_v24  ;;  %v10609_v44 = vrot.slane %v2181_v36, %v15435_v24  ;;  %v1309_v36 = vld [vmem:[#allocation2 + $0xc2] sm:$0xff]  ;;  %v1315_v9 = vld [vmem:[#allocation2 + $0x10a] sm:$0xff] }
 0x162   : > { %v10612_v23 = vrot.slane %v2182_v48, %v15435_v24  ;;  %v10615_v63 = vrot.slane %v2165_v0, %v15435_v24  ;;  %v10618_v7 = vrot.slane %v2166_v35, %v15435_v24  ;;  %v10621_v37 = vrot.slane %v2981_v10, %v15435_v24  ;;  %v1313_v0 = vld [vmem:[#allocation2 + $0xf2] sm:$0xff] }
 0x163   : > { %15483 = vst [vmem:[#allocation62_spill] sm:$0xff] %v10603_v55  ;;  %15484 = vst [vmem:[#allocation63_spill] sm:$0xff] %v10606_v27  ;;  %v10624_v6 = vrot.slane %v3678_v13, %v15435_v24  ;;  %v10647_v48 = vrot.slane %v2982_v28, %v15435_v24  ;;  %v10653_v57 = vrot.slane %v2998_v22, %v15435_v24  ;;  %v1311_v13 = vld [vmem:[#allocation2 + $0xda] sm:$0xff] }
 0x164   : > { %1455 = vrot.lane.b32.xlu1 %v10140_v32, %s9411_s6  ;;  %v2229_v35 = vcombine.low %v10615_v63, %v10609_v44  ;;  %1453 = vrot.lane.b32.xlu0 %v10142_v45, %s9411_s6  ;;  %v10650_v32 = vrot.slane %v2997_v12, %v15435_v24  ;;  %v3765_v27 = vcombine.low %v1309_v36, %v1313_v0 }
 0x165   : > { %15485 = vst [vmem:[#allocation64_spill] sm:$0xff] %v10624_v6  ;;  %15486 = vst [vmem:[#allocation65_spill] sm:$0xff] %v10647_v48  ;;  %v3766_v22 = vcombine.high %v1309_v36, %v1313_v0  ;;  %v3781_v16 = vcombine.low %v1311_v13, %v1315_v9  ;;  %v3782_v55 = vcombine.high %v1311_v13, %v1315_v9  ;;  %v1321_v6 = vld [vmem:[#allocation2 + $0x152] sm:$0xff]  ;;  %v1323_v9 = vld [vmem:[#allocation2 + $0x16a] sm:$0xff] }
 0x166   : > { %15487 = vst [vmem:[#allocation66_spill] sm:$0xff] %v10653_v57  ;;  %v1998_v10 = vcombine.high %v10142_v45, %v10162_v42  ;;  %v3773_v12 = vrot.slane %v3765_v27, %v15435_v24  ;;  %v1317_v45 = vld [vmem:[#allocation2 + $0x122] sm:$0xff] }
 0x167   : > { %v10675_v36 = vrot.slane %v3766_v22, %v15435_v24  ;;  %v3789_v0 = vrot.slane %v3781_v16, %v15435_v24  ;;  %v10679_v28 = vrot.slane %v3782_v55, %v15435_v24  ;;  %v3798_v2 = vcombine.high %v1317_v45, %v1321_v6  ;;  %v1319_v22 = vld [vmem:[#allocation2 + $0x13a] sm:$0xff] }
 0x168   : > { %1459 = vrot.lane.b32.xlu1 %v10150_v47, %s9411_s6  ;;  %1457 = vrot.lane.b32.xlu0 %v10152_v39, %s9411_s6  ;;  %v2014_v47 = vcombine.high %v10152_v39, %v10180_v15  ;;  %v10686_v27 = vrot.slane %v1998_v10, %v15435_v24  ;;  %v2061_v16 = vcombine.low %v10216_v40, %v10212_v20 }
 0x169   : > { %15488 = vst [vmem:[#allocation67_spill] sm:$0xff] %v10675_v36  ;;  %15489 = vst [vmem:[#allocation68_spill] sm:$0xff] %v10679_v28  ;;  %v3830_v39 = vcombine.high %v3773_v12, %v3789_v0  ;;  %v3813_v57 = vcombine.low %v1319_v22, %v1323_v9  ;;  %v3814_v13 = vcombine.high %v1319_v22, %v1323_v9 }
 0x16a   : > { %v10691_v55 = vrot.slane %v2014_v47, %v15435_v24  ;;  %v3693_v10 = vcombine.low %v10387_v52, %v10393_v53  ;;  %v15490_v47 = vcombine.low %v10338_v60, %v10332_v29  ;;  %v10714_v22 = vrot.slane %v3798_v2, %v15435_v24 }
 0x16b   : > { %v10718_v28 = vrot.slane %v3814_v13, %v15435_v24  ;;  %v3013_v36 = vcombine.low %v10514_v50, %v10520_v34  ;;  %v10725_v48 = vrot.slane %v2061_v16, %v9627_v19  ;;  %v3829_v17 = vcombine.low %v3773_v12, %v3789_v0 }
 0x16c   : > { %1463 = vrot.lane.b32.xlu1 %v10160_v46, %s9411_s6  ;;  %1461 = vrot.lane.b32.xlu0 %v10162_v42, %s9411_s6  ;;  %v3797_v46 = vcombine.low %v1317_v45, %v1321_v6  ;;  %v2877_v42 = vcombine.low %v10241_v33, %v10245_v18  ;;  %v2909_v6 = vcombine.low %v10370_v56, %v10376_v41 }
 0x16d   : > { %v10707_v45 = vrot.slane %v15490_v47, %v9627_v19  ;;  %15493 = vst [vmem:[#allocation71_spill] sm:$0xff] %v10714_v22  ;;  %15494 = vst [vmem:[#allocation72_spill] sm:$0xff] %v10718_v28  ;;  %v3045_v47 = vcombine.low %v10621_v37, %v10650_v32  ;;  %v10762_v28 = vrot.slane %v3693_v10, %v9627_v19 }
 0x16e   : > { %v3805_v9 = vrot.slane %v3797_v46, %v15435_v24  ;;  %15495 = vst [vmem:[#allocation73_spill] sm:$0xff] %v10725_v48  ;;  %v10748_v62 = vrot.slane %v2877_v42, %v9627_v19 }
 0x16f   : > { %15491 = vst [vmem:[#allocation69_spill] sm:$0xff] %v10707_v45  ;;  %v2126_v16 = vcombine.high %v10725_v48, %v10707_v45  ;;  %15503 = vst [vmem:[#allocation80_spill] sm:$0xff] %v10762_v28  ;;  %v11049_v48 = vld [vmem:[#allocation2 + $0x21] sm:$0xff]  ;;  %v11202_v28 = vld [vmem:[#allocation2 + $0x171] sm:$0xff] }
 0x170   : > { %1467 = vrot.lane.b32.xlu1 %v10178_v1, %s9411_s6  ;;  %1465 = vrot.lane.b32.xlu0 %v10180_v15, %s9411_s6  ;;  %v10710_v1 = vrot.slane %v2229_v35, %v9627_v19  ;;  %v3821_v15 = vrot.slane %v3813_v57, %v15435_v24  ;;  %v15496_v35 = vcombine.low %v10482_v25, %v10476_v61 }
 0x171   : > { %v3725_v57 = vcombine.low %v10556_v11, %v10562_v21  ;;  %15498 = vst [vmem:[#allocation75_spill] sm:$0xff] %v10748_v62  ;;  %v10759_v24 = vrot.slane %v3045_v47, %v9627_v19  ;;  %v11225_v62 = vld [vmem:[#allocation2 + $0x12a] sm:$0xff] }
 0x172   : > { %15492 = vst [vmem:[#allocation70_spill] sm:$0xff] %v10710_v1  ;;  %v10731_v2 = vrot.slane %v15496_v35, %v9627_v19  ;;  %v3861_v13 = vcombine.low %v3805_v9, %v3821_v15  ;;  %v3862_v46 = vcombine.high %v3805_v9, %v3821_v15  ;;  %v10751_v9 = vrot.slane %v2909_v6, %v9627_v19 }
 0x173   : > { %15502 = vst [vmem:[#allocation79_spill] sm:$0xff] %v10759_v24  ;;  %v10767_v12 = vrot.slane %v3725_v57, %v9627_v19  ;;  %v15507_v6 = vcombine.high %v10338_v60, %v10332_v29  ;;  %v15509_v57 = vcombine.high %v10615_v63, %v10609_v44  ;;  %v15511_v29 = vcombine.high %v10556_v11, %v10562_v21  ;;  %v11239_v24 = vld [vmem:[#allocation2 + $0x172] sm:$0xff] }
 0x174   : > { %15497 = vst [vmem:[#allocation74_spill] sm:$0xff] %v10731_v2  ;;  %1471 = vrot.lane.b32.xlu1 %v10219_v43, %s9411_s6  ;;  %1469 = vrot.lane.b32.xlu0 %v10221_v59, %s9411_s6  ;;  %v2262_v35 = vcombine.high %v10731_v2, %v10710_v1  ;;  %v2077_v43 = vcombine.low %v10686_v27, %v10691_v55  ;;  %15499 = vst [vmem:[#allocation76_spill] sm:$0xff] %v10751_v9  ;;  %v11068_v2 = vld [vmem:[#allocation2 + $0x99] sm:$0xff] }
 0x175   : > { %v10756_v59 = vrot.slane %v3013_v36, %v9627_v19  ;;  %15504 = vst [vmem:[#allocation81_spill] sm:$0xff] %v10767_v12  ;;  %v10770_v0 = vrot.slane %v3861_v13, %v9627_v19  ;;  %v15506_v36 = vcombine.high %v10216_v40, %v10212_v20  ;;  %v2108_v10 = vrot.slane %v15507_v6, %v9627_v19  ;;  %v11227_v9 = vld [vmem:[#allocation2 + $0x15a] sm:$0xff] }
 0x176   : > { %v10753_v15 = vpack.i.bf16 %v2262_v35, %v2126_v16  ;;  %v2244_v13 = vrot.slane %v15509_v57, %v9627_v19  ;;  %v15510_v20 = vcombine.high %v10387_v52, %v10393_v53  ;;  %v10799_v60 = vrot.slane %v3829_v17, %v9627_v19  ;;  %15642 = vst [vmem:[#allocation99_spill] sm:$0xff] %v11225_v62 }
 0x177   : > { %15501 = vst [vmem:[#allocation78_spill] sm:$0xff] %v10756_v59  ;;  %15505 = vst [vmem:[#allocation82_spill] sm:$0xff] %v10770_v0  ;;  %v2076_v42 = vrot.slane %v15506_v36, %v9627_v19  ;;  %v3876_v16 = vrot.slane %v3862_v46, %v9627_v19  ;;  %v15515_v6 = vcombine.high %v10370_v56, %v10376_v41  ;;  %v15606_v46 = vld [vmem:[#allocation57_spill] sm:$0xff]  ;;  %v11237_v59 = vld [vmem:[#allocation2 + $0x142] sm:$0xff] }
 0x178   : > { %15500 = vst [vmem:[#allocation77_spill] sm:$0xff] %v10753_v15  ;;  %1475 = vrot.lane.b32.xlu1 %v10248_v49, %s9411_s6  ;;  %1473 = vrot.lane.b32.xlu0 %v10250_v30, %s9411_s6  ;;  %v15508_v49 = vcombine.high %v10482_v25, %v10476_v61  ;;  %v3708_v40 = vrot.slane %v15510_v20, %v9627_v19  ;;  %15512 = vst [vmem:[#allocation83_spill] sm:$0xff] %v10799_v60  ;;  %v11223_v15 = vld [vmem:[#allocation2 + $0x112] sm:$0xff] }
 0x179   : > { %v3740_v30 = vrot.slane %v15511_v29, %v9627_v19  ;;  %v2127_v25 = vcombine.low %v2076_v42, %v2108_v10  ;;  %v3844_v61 = vrot.slane %v3830_v39, %v9627_v19  ;;  %v15518_v29 = vcombine.high %v10621_v37, %v10650_v32  ;;  %15641 = vst [vmem:[#allocation98_spill] sm:$0xff] %v11223_v15 }
 0x17a   : > { %v2212_v47 = vrot.slane %v15508_v49, %v9627_v19  ;;  %v2924_v49 = vrot.slane %v15515_v6, %v9627_v19  ;;  %v15519_v41 = vcombine.low %v10341_v38, %v10335_v3  ;;  %v15521_v32 = vcombine.low %v10618_v7, %v10612_v23  ;;  %15643 = vst [vmem:[#allocation100_spill] sm:$0xff] %v11227_v9 }
 0x17b   : > { %v3759_v44 = vcombine.low %v3708_v40, %v3740_v30  ;;  %v3895_v21 = vcombine.low %v3844_v61, %v3876_v16  ;;  %15645 = vst [vmem:[#allocation102_spill] sm:$0xff] %v11239_v24 }
 0x17c   : > { %v2263_v63 = vcombine.low %v2212_v47, %v2244_v13  ;;  %1479 = vrot.lane.b32.xlu1 %v10268_v54, %s9411_s6  ;;  %1477 = vrot.lane.b32.xlu0 %v10270_v58, %s9411_s6  ;;  %v15514_v54 = vcombine.high %v10241_v33, %v10245_v18  ;;  %v15517_v58 = vcombine.high %v10514_v50, %v10520_v34 }
 0x17d   : > { %v10829_v57 = vpack.i.bf16 %v3895_v21, %v3759_v44  ;;  %v2085_v33 = vrot.slane %v2077_v43, %v9627_v19  ;;  %v2117_v56 = vrot.slane %v15519_v41, %v9627_v19  ;;  %v15520_v44 = vcombine.low %v10485_v31, %v10479_v51 }
 0x17e   : > { %v10817_v39 = vpack.i.bf16 %v2263_v63, %v2127_v25  ;;  %v2892_v36 = vrot.slane %v15514_v54, %v9627_v19  ;;  %v3028_v20 = vrot.slane %v15517_v58, %v9627_v19  ;;  %v3060_v25 = vrot.slane %v15518_v29, %v9627_v19 }
 0x17f   : > { %15516 = vst [vmem:[#allocation85_spill] sm:$0xff] %v10829_v57  ;;  %v2221_v34 = vrot.slane %v15520_v44, %v9627_v19  ;;  %v2253_v43 = vrot.slane %v15521_v32, %v9627_v19  ;;  %v2128_v21 = vcombine.high %v2076_v42, %v2108_v10  ;;  %v2264_v54 = vcombine.high %v2212_v47, %v2244_v13  ;;  %v11186_v57 = vld [vmem:[#allocation2 + $0xe2] sm:$0xff] }
 0x180   : > { %15513 = vst [vmem:[#allocation84_spill] sm:$0xff] %v10817_v39  ;;  %v2944_v18 = vcombine.high %v2892_v36, %v2924_v49  ;;  %v2943_v63 = vcombine.low %v2892_v36, %v2924_v49  ;;  %1483 = vrot.lane.b32.xlu1 %v10296_v4, %s9411_s6  ;;  %v3080_v50 = vcombine.high %v3028_v20, %v3060_v25  ;;  %15636 = vst [vmem:[#allocation93_spill] sm:$0xff] %v11186_v57  ;;  %v11188_v39 = vld [vmem:[#allocation2 + $0xfa] sm:$0xff] }
 0x181   : > { %v3079_v37 = vcombine.low %v3028_v20, %v3060_v25  ;;  %1481 = vrot.lane.b32.xlu0 %v10298_v14, %s9411_s6  ;;  %v2129_v49 = vcombine.low %v2085_v33, %v2117_v56  ;;  %v2265_v58 = vcombine.low %v2221_v34, %v2253_v43  ;;  %v2078_v4 = vcombine.high %v10686_v27, %v10691_v55  ;;  %v15532_v25 = vld [vmem:[#allocation18_spill] sm:$0xff] }
 0x182   : > { %v10856_v36 = vpack.i.bf16 %v3080_v50, %v2944_v18  ;;  %v10862_v20 = vpack.i.bf16 %v2264_v54, %v2128_v21  ;;  %v3760_v29 = vcombine.high %v3708_v40, %v3740_v30  ;;  %v3896_v10 = vcombine.high %v3844_v61, %v3876_v16  ;;  %v15531_v16 = vld [vmem:[#allocation14_spill] sm:$0xff]  ;;  %v15544_v50 = vld [vmem:[#allocation60_spill] sm:$0xff]  ;;  %15637 = vst [vmem:[#allocation94_spill] sm:$0xff] %v11188_v39 }
 0x183   : > { %v10858_v6 = vpack.i.bf16 %v3079_v37, %v2943_v63  ;;  %v10866_v42 = vpack.i.bf16 %v2265_v58, %v2129_v49  ;;  %v15527_v47 = vcombine.high %v10341_v38, %v10335_v3  ;;  %v2092_v27 = vrot.slane %v2078_v4, %v9627_v19  ;;  %v15530_v3 = vld [vmem:[#allocation30_spill] sm:$0xff] }
 0x184   : > { %15522 = vst [vmem:[#allocation86_spill] sm:$0xff] %v10856_v36  ;;  %15524 = vst [vmem:[#allocation88_spill] sm:$0xff] %v10862_v20  ;;  %1487 = vrot.lane.b32.xlu1 %v10344_v5, %s9411_s6  ;;  %v10870_v14 = vpack.i.bf16 %v3896_v10, %v3760_v29  ;;  %v15528_v5 = vcombine.high %v10485_v31, %v10479_v51  ;;  %v2130_v30 = vcombine.high %v2085_v33, %v2117_v56  ;;  %v15535_v31 = vld [vmem:[#allocation24_spill] sm:$0xff]  ;;  %v15536_v51 = vld [vmem:[#allocation26_spill] sm:$0xff] }
 0x185   : > { %15523 = vst [vmem:[#allocation87_spill] sm:$0xff] %v10858_v6  ;;  %15525 = vst [vmem:[#allocation89_spill] sm:$0xff] %v10866_v42  ;;  %1485 = vrot.lane.b32.xlu0 %v10346_v8, %s9411_s6  ;;  %v2124_v13 = vrot.slane %v15527_v47, %v9627_v19  ;;  %v15529_v8 = vcombine.high %v10618_v7, %v10612_v23  ;;  %v2266_v61 = vcombine.high %v2221_v34, %v2253_v43  ;;  %v15540_v33 = vld [vmem:[#allocation41_spill] sm:$0xff]  ;;  %v15541_v56 = vld [vmem:[#allocation43_spill] sm:$0xff] }
 0x186   : > { %15526 = vst [vmem:[#allocation90_spill] sm:$0xff] %v10870_v14  ;;  %v2228_v55 = vrot.slane %v15528_v5, %v9627_v19  ;;  %v15537_v63 = vcombine.low %v15535_v31, %v15536_v51  ;;  %v15542_v44 = vcombine.low %v15540_v33, %v15541_v56  ;;  %v15545_v37 = vld [vmem:[#allocation62_spill] sm:$0xff]  ;;  %v15548_v54 = vcombine.high %v15531_v16, %v15532_v25  ;;  %v15550_v29 = vld [vmem:[#allocation33_spill] sm:$0xff]  ;;  %v15619_v36 = vld [vmem:[#allocation16_spill] sm:$0xff] }
 0x187   : > { %v2260_v40 = vrot.slane %v15529_v8, %v9627_v19  ;;  %v2131_v38 = vcombine.low %v2092_v27, %v2124_v13  ;;  %v10901_v23 = vpack.i.bf16 %v2266_v61, %v2130_v30  ;;  %v15546_v32 = vcombine.low %v15544_v50, %v15545_v37  ;;  %v11109_v14 = vld [vmem:[#allocation2 + $0xf9] sm:$0xff] }
 0x188   : > { %1491 = vrot.lane.b32.xlu1 %v10382_v26, %s9411_s6  ;;  %v15533_v26 = vcombine.low %v15531_v16, %v15532_v25  ;;  %v10899_v41 = vrot.slane %v15537_v63, %v9627_v19  ;;  %v10907_v34 = vrot.slane %v15542_v44, %v9627_v19  ;;  %v4524_v49 = vrot.slane %v15548_v54, %v9627_v19 }
 0x189   : > { %1489 = vrot.lane.b32.xlu0 %v15530_v3, %s9411_s6  ;;  %v2267_v7 = vcombine.low %v2228_v55, %v2260_v40  ;;  %15539 = vst [vmem:[#allocation18_spill] sm:$0xff] %v10901_v23  ;;  %v10913_v43 = vrot.slane %v15546_v32, %v9627_v19  ;;  %v15549_v58 = vcombine.high %v15535_v31, %v15536_v51  ;;  %v15554_v3 = vld [vmem:[#allocation34_spill] sm:$0xff] }
 0x18a   : > { %v10893_v18 = vrot.slane %v15533_v26, %v9627_v19  ;;  %15538 = vst [vmem:[#allocation14_spill] sm:$0xff] %v10899_v41  ;;  %15543 = vst [vmem:[#allocation24_spill] sm:$0xff] %v10907_v34  ;;  %v15552_v5 = vcombine.high %v15540_v33, %v15541_v56  ;;  %v15553_v30 = vcombine.high %v15544_v50, %v15545_v37  ;;  %v15557_v33 = vld [vmem:[#allocation15_spill] sm:$0xff]  ;;  %v15560_v50 = vld [vmem:[#allocation25_spill] sm:$0xff] }
 0x18b   : > { %15547 = vst [vmem:[#allocation26_spill] sm:$0xff] %v10913_v43  ;;  %v4556_v4 = vrot.slane %v15549_v58, %v9627_v19  ;;  %v10927_v10 = vpack.i.bf16 %v2267_v7, %v2131_v38  ;;  %v4710_v47 = vcombine.high %v10907_v34, %v10913_v43  ;;  %v2132_v25 = vcombine.high %v2092_v27, %v2124_v13  ;;  %v15558_v56 = vld [vmem:[#allocation19_spill] sm:$0xff]  ;;  %v15563_v13 = vld [vmem:[#allocation37_spill] sm:$0xff] }
 0x18c   : > { %15534 = vst [vmem:[#allocation30_spill] sm:$0xff] %v10893_v18  ;;  %v4574_v21 = vcombine.high %v10893_v18, %v10899_v41  ;;  %1495 = vrot.lane.b32.xlu1 %v15550_v29, %s9411_s6  ;;  %v4660_v8 = vrot.slane %v15552_v5, %v9627_v19  ;;  %v4692_v61 = vrot.slane %v15553_v30, %v9627_v19  ;;  %v15561_v37 = vld [vmem:[#allocation27_spill] sm:$0xff]  ;;  %v15569_v29 = vld [vmem:[#allocation61_spill] sm:$0xff]  ;;  %v15572_v30 = vld [vmem:[#allocation38_spill] sm:$0xff] }
 0x18d   : > { %15551 = vst [vmem:[#allocation41_spill] sm:$0xff] %v10927_v10  ;;  %1493 = vrot.lane.b32.xlu0 %v15554_v3, %s9411_s6  ;;  %v4576_v16 = vcombine.high %v4524_v49, %v4556_v4  ;;  %v2268_v38 = vcombine.high %v2228_v55, %v2260_v40  ;;  %v4575_v51 = vcombine.low %v4524_v49, %v4556_v4  ;;  %v15566_v40 = vld [vmem:[#allocation42_spill] sm:$0xff]  ;;  %v11107_v10 = vld [vmem:[#allocation2 + $0xc9] sm:$0xff] }
 0x18e   : > { %v10941_v26 = vpack.i.bf16 %v4710_v47, %v4574_v21  ;;  %v4712_v31 = vcombine.high %v4660_v8, %v4692_v61  ;;  %v4711_v63 = vcombine.low %v4660_v8, %v4692_v61  ;;  %v15559_v44 = vcombine.low %v15557_v33, %v15558_v56  ;;  %v15567_v21 = vld [vmem:[#allocation44_spill] sm:$0xff]  ;;  %v15570_v47 = vld [vmem:[#allocation63_spill] sm:$0xff]  ;;  %v11103_v23 = vld [vmem:[#allocation2 + $0x9a] sm:$0xff] }
 0x18f   : > { %v10943_v7 = vpack.i.bf16 %v2268_v38, %v2132_v25  ;;  %v15562_v54 = vcombine.low %v15560_v50, %v15561_v37  ;;  %v15568_v49 = vcombine.low %v15566_v40, %v15567_v21  ;;  %v15571_v5 = vcombine.low %v15569_v29, %v15570_v47  ;;  %v11141_v41 = vld [vmem:[#allocation2 + $0x82] sm:$0xff]  ;;  %v15622_v18 = vld [vmem:[#allocation32_spill] sm:$0xff] }
 0x190   : > { %15555 = vst [vmem:[#allocation43_spill] sm:$0xff] %v10941_v26  ;;  %v4533_v32 = vrot.slane %v15559_v44, %v9627_v19  ;;  %1499 = vrot.lane.b32.xlu1 %v15563_v13, %s9411_s6  ;;  %v10955_v27 = vpack.i.bf16 %v4712_v31, %v4576_v16  ;;  %v10957_v55 = vpack.i.bf16 %v4711_v63, %v4575_v51  ;;  %v11101_v26 = vld [vmem:[#allocation2 + $0x6a] sm:$0xff] }
 0x191   : > { %15556 = vst [vmem:[#allocation60_spill] sm:$0xff] %v10943_v7  ;;  %v4565_v58 = vrot.slane %v15562_v54, %v9627_v19  ;;  %v4669_v4 = vrot.slane %v15568_v49, %v9627_v19  ;;  %v4701_v8 = vrot.slane %v15571_v5, %v9627_v19  ;;  %1497 = vrot.lane.b32.xlu0 %v15572_v30, %s9411_s6  ;;  %v15580_v5 = vld [vmem:[#allocation46_spill] sm:$0xff]  ;;  %v11097_v7 = vld [vmem:[#allocation2 + $0x52] sm:$0xff] }
 0x192   : > { %15564 = vst [vmem:[#allocation62_spill] sm:$0xff] %v10955_v27  ;;  %15565 = vst [vmem:[#allocation33_spill] sm:$0xff] %v10957_v55  ;;  %v15573_v16 = vcombine.high %v15557_v33, %v15558_v56  ;;  %v15574_v38 = vcombine.high %v15560_v50, %v15561_v37  ;;  %v15575_v44 = vcombine.high %v15566_v40, %v15567_v21  ;;  %v15577_v56 = vld [vmem:[#allocation45_spill] sm:$0xff]  ;;  %v15586_v30 = vld [vmem:[#allocation50_spill] sm:$0xff] }
 0x193   : > { %v4577_v61 = vcombine.low %v4533_v32, %v4565_v58  ;;  %v4578_v3 = vcombine.high %v4533_v32, %v4565_v58  ;;  %v4713_v51 = vcombine.low %v4669_v4, %v4701_v8  ;;  %v4714_v63 = vcombine.high %v4669_v4, %v4701_v8  ;;  %v10993_v40 = vpop.permute.xlu1 %1359  ;;  %v10995_v21 = vpop.permute.xlu0 %1357  ;;  %v15585_v8 = vld [vmem:[#allocation49_spill] sm:$0xff]  ;;  %v11095_v55 = vld [vmem:[#allocation2 + $0x22] sm:$0xff] }
 0x194   : > { %v4540_v25 = vrot.slane %v15573_v16, %v9627_v19  ;;  %v4572_v31 = vrot.slane %v15574_v38, %v9627_v19  ;;  %v4676_v54 = vrot.slane %v15575_v44, %v9627_v19  ;;  %v15576_v32 = vcombine.high %v15569_v29, %v15570_v47  ;;  %1503 = vrot.lane.b32.xlu1 %v15577_v56, %s9411_s6  ;;  %v15589_v16 = vld [vmem:[#allocation51_spill] sm:$0xff]  ;;  %v15591_v38 = vld [vmem:[#allocation28_spill] sm:$0xff]  ;;  %v15615_v27 = vld [vmem:[#allocation17_spill] sm:$0xff] }
 0x195   : > { %v10987_v49 = vpack.i.bf16 %v4713_v51, %v4577_v61  ;;  %v10989_v50 = vpack.i.bf16 %v4714_v63, %v4578_v3  ;;  %1501 = vrot.lane.b32.xlu0 %v15580_v5, %s9411_s6  ;;  %15581 = vst [vmem:[#allocation19_spill] sm:$0xff] %v10993_v40  ;;  %15582 = vst [vmem:[#allocation25_spill] sm:$0xff] %v10995_v21  ;;  %v15599_v56 = vld [vmem:[#allocation47_spill] sm:$0xff]  ;;  %v5397_v20 = vcombine.low %v11107_v10, %v11109_v14 }
 0x196   : > { %v4708_v58 = vrot.slane %v15576_v32, %v9627_v19  ;;  %v4579_v13 = vcombine.low %v4540_v25, %v4572_v31  ;;  %v4580_v33 = vcombine.high %v4540_v25, %v4572_v31  ;;  %v15590_v25 = vld [vmem:[#allocation52_spill] sm:$0xff]  ;;  %v15592_v31 = vld [vmem:[#allocation29_spill] sm:$0xff] }
 0x197   : > { %15578 = vst [vmem:[#allocation34_spill] sm:$0xff] %v10987_v49  ;;  %15579 = vst [vmem:[#allocation15_spill] sm:$0xff] %v10989_v50  ;;  %v11005_v61 = vpop.permute.xlu1 %1363  ;;  %v11007_v3 = vpop.permute.xlu0 %1361  ;;  %v15593_v51 = vcombine.high %v15591_v38, %v15592_v31  ;;  %v15596_v32 = vld [vmem:[#allocation20_spill] sm:$0xff]  ;;  %v11163_v31 = vld [vmem:[#allocation2 + $0xe1] sm:$0xff] }
 0x198   : > { %v4715_v37 = vcombine.low %v4676_v54, %v4708_v58  ;;  %v4716_v4 = vcombine.high %v4676_v54, %v4708_v58  ;;  %1507 = vrot.lane.b32.xlu1 %v15585_v8, %s9411_s6  ;;  %15587 = vst [vmem:[#allocation42_spill] sm:$0xff] %v11005_v61  ;;  %15588 = vst [vmem:[#allocation44_spill] sm:$0xff] %v11007_v3  ;;  %v15597_v58 = vld [vmem:[#allocation21_spill] sm:$0xff] }
 0x199   : > { %1505 = vrot.lane.b32.xlu0 %v15586_v30, %s9411_s6  ;;  %v2940_v63 = vrot.slane %v15593_v51, %v9627_v19  ;;  %v15602_v8 = vld [vmem:[#allocation65_spill] sm:$0xff]  ;;  %v15603_v30 = vld [vmem:[#allocation66_spill] sm:$0xff]  ;;  %v15605_v51 = vld [vmem:[#allocation56_spill] sm:$0xff]  ;;  %15616 = vst [vmem:[#allocation52_spill] sm:$0xff] %v11103_v23 }
 0x19a   : > { %v10997_v29 = vpack.i.bf16 %v4715_v37, %v4579_v13  ;;  %v10999_v47 = vpack.i.bf16 %v4716_v4, %v4580_v33  ;;  %v15598_v13 = vcombine.high %v15596_v32, %v15597_v58  ;;  %v15600_v37 = vld [vmem:[#allocation48_spill] sm:$0xff] }
 0x19b   : > { %v11017_v44 = vpop.permute.xlu1 %1367  ;;  %v11019_v54 = vpop.permute.xlu0 %1365  ;;  %v15601_v4 = vcombine.high %v15599_v56, %v15600_v37  ;;  %v15625_v56 = vld [vmem:[#allocation64_spill] sm:$0xff] }
 0x19c   : > { %15583 = vst [vmem:[#allocation27_spill] sm:$0xff] %v10997_v29  ;;  %15584 = vst [vmem:[#allocation37_spill] sm:$0xff] %v10999_v47  ;;  %1511 = vrot.lane.b32.xlu1 %v15589_v16, %s9411_s6  ;;  %v2908_v33 = vrot.slane %v15598_v13, %v9627_v19  ;;  %v15604_v16 = vcombine.high %v15602_v8, %v15603_v30  ;;  %v2269_v13 = vcombine.low %v10995_v21, %v11019_v54  ;;  %v15624_v30 = vld [vmem:[#allocation55_spill] sm:$0xff]  ;;  %v11165_v32 = vld [vmem:[#allocation2 + $0xb2] sm:$0xff] }
 0x19d   : > { %1509 = vrot.lane.b32.xlu0 %v15590_v25, %s9411_s6  ;;  %15594 = vst [vmem:[#allocation61_spill] sm:$0xff] %v11017_v44  ;;  %15595 = vst [vmem:[#allocation63_spill] sm:$0xff] %v11019_v54  ;;  %v3044_v5 = vrot.slane %v15601_v4, %v9627_v19  ;;  %v15626_v37 = vcombine.high %v15624_v30, %v15625_v56 }
 0x19e   : > { %v3076_v25 = vrot.slane %v15604_v16, %v9627_v19  ;;  %v2948_v35 = vcombine.high %v2908_v33, %v2940_v63  ;;  %v2947_v11 = vcombine.low %v2908_v33, %v2940_v63  ;;  %v11055_v63 = vld [vmem:[#allocation2 + $0x51] sm:$0xff]  ;;  %v11057_v33 = vld [vmem:[#allocation2 + $0x69] sm:$0xff]  ;;  %15630 = vst [vmem:[#allocation16_spill] sm:$0xff] %v11165_v32 }
 0x19f   : > { %v11039_v53 = vpop.permute.xlu1 %1371  ;;  %v11041_v4 = vpop.permute.xlu0 %1369  ;;  %v11153_v38 = vrot.slane %v15626_v37, %v9627_v19 }
 0x1a0   : > { %1515 = vrot.lane.b32.xlu1 %v15605_v51, %s9411_s6  ;;  %v3084_v52 = vcombine.high %v3044_v5, %v3076_v25  ;;  %15607 = vst [vmem:[#allocation38_spill] sm:$0xff] %v11039_v53  ;;  %15608 = vst [vmem:[#allocation45_spill] sm:$0xff] %v11041_v4  ;;  %v3083_v45 = vcombine.low %v3044_v5, %v3076_v25  ;;  %v2285_v16 = vcombine.low %v11007_v3, %v11041_v4  ;;  %v11047_v51 = vld [vmem:[#allocation2 + $0x9] sm:$0xff]  ;;  %v15612_v5 = vld [vmem:[#allocation13_spill] sm:$0xff] }
 0x1a1   : > { %1513 = vrot.lane.b32.xlu0 %v15606_v46, %s9411_s6  ;;  %v11053_v46 = vld [vmem:[#allocation2 + $0x39] sm:$0xff]  ;;  %v11066_v25 = vld [vmem:[#allocation2 + $0x81] sm:$0xff]  ;;  %v6093_v4 = vcombine.low %v11095_v55, %v11097_v7  ;;  %15620 = vst [vmem:[#allocation13_spill] sm:$0xff] %v11141_v41 }
 0x1a2   : > { %v11043_v17 = vpack.i.bf16 %v3084_v52, %v2948_v35  ;;  %v11059_v1 = vpack.i.bf16 %v3083_v45, %v2947_v11  ;;  %v15611_v35 = vld [vmem:[#allocation12_spill] sm:$0xff]  ;;  %v5261_v45 = vcombine.low %v11047_v51, %v11053_v46  ;;  %v5277_v11 = vcombine.low %v11049_v48, %v11055_v63 }
 0x1a3   : > { %v11062_v52 = vrot.slane %v2285_v16, %v15611_v35  ;;  %v11073_v47 = vrot.slane %v2269_v13, %v15611_v35  ;;  %v11075_v29 = vpop.permute.xlu1 %1375  ;;  %v11077_v50 = vpop.permute.xlu0 %1373  ;;  %v11083_v16 = vld [vmem:[#allocation2 + $0xa] sm:$0xff]  ;;  %v5293_v13 = vcombine.low %v11057_v33, %v11068_v2  ;;  %v11205_v12 = vrot.slane %v6093_v4, %v15611_v35 }
 0x1a4   : > { %15609 = vst [vmem:[#allocation46_spill] sm:$0xff] %v11043_v17  ;;  %1583 = vrot.lane.b32.xlu1 %v11047_v51, %s9410_s27  ;;  %15610 = vst [vmem:[#allocation49_spill] sm:$0xff] %v11059_v1  ;;  %v11070_v17 = vld [vmem:[#allocation2 + $0xb1] sm:$0xff]  ;;  %v11116_v3 = vrot.slane %v5261_v45, %v15611_v35  ;;  %v6109_v45 = vcombine.low %v11101_v26, %v11103_v23  ;;  %v6125_v4 = vcombine.low %v11141_v41, %v11165_v32 }
 0x1a5   : > { %1581 = vrot.lane.b32.xlu0 %v15612_v5, %s9410_s27  ;;  %15613 = vst [vmem:[#allocation50_spill] sm:$0xff] %v11075_v29  ;;  %15614 = vst [vmem:[#allocation51_spill] sm:$0xff] %v11077_v50  ;;  %v11085_v5 = vld [vmem:[#allocation2 + $0x3a] sm:$0xff]  ;;  %v5309_v49 = vcombine.low %v11066_v25, %v11070_v17  ;;  %v11128_v42 = vrot.slane %v5293_v13, %v15611_v35  ;;  %v15621_v13 = vld [vmem:[#allocation31_spill] sm:$0xff] }
 0x1a6   : > { %v6077_v21 = vcombine.low %v11083_v16, %v11085_v5  ;;  %v15623_v8 = vcombine.high %v15621_v13, %v15622_v18  ;;  %v15631_v13 = vld [vmem:[#allocation67_spill] sm:$0xff]  ;;  %v15632_v18 = vld [vmem:[#allocation68_spill] sm:$0xff]  ;;  %15638 = vst [vmem:[#allocation95_spill] sm:$0xff] %v11205_v12  ;;  %v11219_v0 = vrot.slane %v6109_v45, %v15611_v35 }
 0x1a7   : > { %v11105_v1 = vpop.permute.xlu1 %1379  ;;  %v11113_v54 = vpop.permute.xlu0 %1377  ;;  %v11131_v6 = vrot.slane %v5309_v49, %v15611_v35  ;;  %v15633_v30 = vcombine.high %v15631_v13, %v15632_v18  ;;  %v4733_v13 = vcombine.low %v11005_v61, %v11039_v53  ;;  %v11198_v18 = vld [vmem:[#allocation2 + $0x141] sm:$0xff]  ;;  %v11211_v53 = vld [vmem:[#allocation2 + $0x49] sm:$0xff] }
 0x1a8   : > { %1587 = vrot.lane.b32.xlu1 %v11049_v48, %s9410_s27  ;;  %15617 = vst [vmem:[#allocation56_spill] sm:$0xff] %v11105_v1  ;;  %15618 = vst [vmem:[#allocation57_spill] sm:$0xff] %v11113_v54  ;;  %v11147_v49 = vrot.slane %v15623_v8, %v9627_v19  ;;  %v11167_v8 = vld [vmem:[#allocation2 + $0xca] sm:$0xff]  ;;  %v11184_v58 = vrot.slane %v6077_v21, %v15611_v35  ;;  %v11200_v21 = vld [vmem:[#allocation2 + $0x159] sm:$0xff] }
 0x1a9   : > { %1585 = vrot.lane.b32.xlu0 %v15615_v27, %s9410_s27  ;;  %v11119_v27 = vrot.slane %v5277_v11, %v15611_v35  ;;  %v11173_v37 = vrot.slane %v15633_v30, %v9627_v19  ;;  %15640 = vst [vmem:[#allocation97_spill] sm:$0xff] %v11219_v0 }
 0x1aa   : > { %15635 = vst [vmem:[#allocation92_spill] sm:$0xff] %v11184_v58  ;;  %v3763_v30 = vcombine.low %v11147_v49, %v11153_v38 }
 0x1ac   : > { %1591 = vrot.lane.b32.xlu1 %v11053_v46, %s9410_s27  ;;  %v11161_v34 = vpop.permute.xlu1 %1383  ;;  %v11175_v56 = vpop.permute.xlu0 %1381 }
 0x1ad   : > { %1589 = vrot.lane.b32.xlu0 %v15619_v36, %s9410_s27  ;;  %v15627_v36 = vld [vmem:[#allocation72_spill] sm:$0xff]  ;;  %15629 = vst [vmem:[#allocation17_spill] sm:$0xff] %v11161_v34  ;;  %15634 = vst [vmem:[#allocation91_spill] sm:$0xff] %v11175_v56  ;;  %v4749_v61 = vcombine.low %v11075_v29, %v11161_v34  ;;  %v4717_v29 = vcombine.low %v10993_v40, %v11017_v44  ;;  %v2301_v34 = vcombine.low %v11077_v50, %v11175_v56 }
 0x1ae   : > { %v15628_v11 = vcombine.high %v10714_v22, %v15627_v36  ;;  %v11179_v22 = vld [vmem:[#allocation2 + $0x111] sm:$0xff]  ;;  %v11181_v36 = vld [vmem:[#allocation2 + $0x129] sm:$0xff]  ;;  %v5445_v44 = vcombine.low %v11198_v18, %v11202_v28  ;;  %v6213_v50 = vcombine.low %v11167_v8, %v11188_v39  ;;  %v11254_v56 = vrot.slane %v4733_v13, %v15611_v35 }
 0x1af   : > { %v5413_v45 = vcombine.low %v11163_v31, %v11179_v22  ;;  %v5429_v40 = vcombine.low %v11181_v36, %v11200_v21 }
 0x1b0   : > { %v11159_v43 = vrot.slane %v15628_v11, %v9627_v19  ;;  %1595 = vrot.lane.b32.xlu1 %v11055_v63, %s9410_s27  ;;  %v11216_v11 = vrot.slane %v5397_v20, %v15611_v35  ;;  %v11233_v20 = vpop.permute.xlu1 %1387  ;;  %v11245_v41 = vpop.permute.xlu0 %1385  ;;  %15648 = vst [vmem:[#allocation105_spill] sm:$0xff] %v11254_v56 }
 0x1b1   : > { %1593 = vrot.lane.b32.xlu0 %v11211_v53, %s9410_s27  ;;  %15644 = vst [vmem:[#allocation101_spill] sm:$0xff] %v11233_v20  ;;  %v4765_v23 = vcombine.low %v11105_v1, %v11233_v20  ;;  %15647 = vst [vmem:[#allocation104_spill] sm:$0xff] %v11245_v41  ;;  %v2333_v1 = vcombine.low %v11073_v47, %v11062_v52  ;;  %v11267_v20 = vrot.slane %v4749_v61, %v15611_v35 }
 0x1b2   : > { %v3899_v60 = vcombine.low %v11173_v37, %v11159_v43  ;;  %15639 = vst [vmem:[#allocation96_spill] sm:$0xff] %v11216_v11  ;;  %v11284_v61 = vrot.slane %v5413_v45, %v15611_v35 }
 0x1b3   : > { %15649 = vst [vmem:[#allocation106_spill] sm:$0xff] %v11267_v20  ;;  %v11270_v13 = vrot.slane %v4765_v23, %v15611_v35 }
 0x1b4   : > { %v11241_v32 = vpack.i.bf16 %v3899_v60, %v3763_v30  ;;  %v2317_v60 = vcombine.low %v11113_v54, %v11245_v41  ;;  %1599 = vrot.lane.b32.xlu1 %v11057_v33, %s9410_s27  ;;  %v6229_v30 = vcombine.low %v11186_v57, %v11223_v15  ;;  %v15651_v54 = vld [vmem:[#allocation22_spill] sm:$0xff]  ;;  %v6261_v41 = vcombine.low %v11237_v59, %v11239_v24  ;;  %v11281_v39 = vpop.permute.xlu1 %1391  ;;  %v11288_v57 = vpop.permute.xlu0 %1389 }
 0x1b5   : > { %15650 = vst [vmem:[#allocation107_spill] sm:$0xff] %v11270_v13  ;;  %1597 = vrot.lane.b32.xlu0 %v15651_v54, %s9410_s27  ;;  %v11277_v15 = vrot.slane %v4717_v29, %v15611_v35  ;;  %15653 = vst [vmem:[#allocation108_spill] sm:$0xff] %v11281_v39  ;;  %v4813_v23 = vcombine.low %v11267_v20, %v11270_v13  ;;  %v11291_v54 = vrot.slane %v5429_v40, %v15611_v35 }
 0x1b6   : > { %15646 = vst [vmem:[#allocation103_spill] sm:$0xff] %v11241_v32  ;;  %v6245_v32 = vcombine.low %v11225_v62, %v11227_v9  ;;  %v2309_v9 = vrot.slane %v2301_v34, %v15611_v35  ;;  %v2325_v62 = vrot.slane %v2317_v60, %v15611_v35  ;;  %15654 = vst [vmem:[#allocation109_spill] sm:$0xff] %v11284_v61 }
 0x1b7   : > { %15652 = vst [vmem:[#allocation22_spill] sm:$0xff] %v11277_v15  ;;  %15655 = vst [vmem:[#allocation110_spill] sm:$0xff] %v11288_v57  ;;  %v11294_v29 = vrot.slane %v5445_v44, %v15611_v35  ;;  %v11297_v34 = vrot.slane %v6125_v4, %v15611_v35  ;;  %v4781_v60 = vcombine.low %v11277_v15, %v11254_v56  ;;  %v15661_v44 = vld [vmem:[#allocation23_spill] sm:$0xff] }
 0x1b8   : > { %15656 = vst [vmem:[#allocation111_spill] sm:$0xff] %v11291_v54  ;;  %v2365_v24 = vcombine.low %v2309_v9, %v2325_v62  ;;  %v2366_v45 = vcombine.high %v2309_v9, %v2325_v62  ;;  %1603 = vrot.lane.b32.xlu1 %v11066_v25, %s9410_s27  ;;  %v11304_v20 = vrot.slane %v6213_v50, %v15611_v35  ;;  %v11337_v15 = vpop.permute.xlu0 %1393 }
 0x1b9   : > { %15657 = vst [vmem:[#allocation112_spill] sm:$0xff] %v11294_v29  ;;  %15658 = vst [vmem:[#allocation113_spill] sm:$0xff] %v11297_v34  ;;  %v11307_v40 = vrot.slane %v2333_v1, %v9627_v19  ;;  %1601 = vrot.lane.b32.xlu0 %v15661_v44, %s9410_s27  ;;  %v11312_v4 = vrot.slane %v6229_v30, %v15611_v35  ;;  %v11315_v13 = vrot.slane %v6245_v32, %v15611_v35  ;;  %v11335_v32 = vpop.permute.xlu1 %1395 }
 0x1ba   : > { %15659 = vst [vmem:[#allocation114_spill] sm:$0xff] %v11304_v20  ;;  %v11318_v62 = vrot.slane %v6261_v41, %v15611_v35  ;;  %v15665_v9 = vcombine.high %v11073_v47, %v11062_v52  ;;  %v11327_v1 = vrot.slane %v4813_v23, %v9627_v19  ;;  %v11330_v44 = vrot.slane %v2365_v24, %v9627_v19 }
 0x1bb   : > { %15660 = vst [vmem:[#allocation115_spill] sm:$0xff] %v11307_v40  ;;  %15662 = vst [vmem:[#allocation23_spill] sm:$0xff] %v11312_v4  ;;  %v11333_v30 = vrot.slane %v2366_v45, %v9627_v19  ;;  %v6141_v41 = vcombine.low %v11184_v58, %v11205_v12  ;;  %v6173_v47 = vcombine.low %v11219_v0, %v11297_v34 }
 0x1bc   : > { %15663 = vst [vmem:[#allocation116_spill] sm:$0xff] %v11315_v13  ;;  %15664 = vst [vmem:[#allocation117_spill] sm:$0xff] %v11318_v62  ;;  %v11324_v50 = vrot.slane %v15665_v9, %v9627_v19  ;;  %v11344_v52 = vrot.slane %v4781_v60, %v9627_v19  ;;  %1607 = vrot.lane.b32.xlu1 %v11068_v2, %s9410_s27  ;;  %v11354_v9 = vld [vmem:[#allocation2 + $0x91] sm:$0xff]  ;;  %v5461_v60 = vcombine.low %v11216_v11, %v11284_v61 }
 0x1bd   : > { %15666 = vst [vmem:[#allocation118_spill] sm:$0xff] %v11327_v1  ;;  %15667 = vst [vmem:[#allocation119_spill] sm:$0xff] %v11330_v44  ;;  %1605 = vrot.lane.b32.xlu0 %v11354_v9, %s9410_s27  ;;  %v5493_v24 = vcombine.low %v11291_v54, %v11294_v29  ;;  %v6277_v56 = vcombine.low %v11304_v20, %v11312_v4  ;;  %v11364_v0 = vpop.permute.xlu1 %1399  ;;  %v6309_v23 = vcombine.low %v11315_v13, %v11318_v62  ;;  %v11382_v4 = vpop.permute.xlu0 %1397  ;;  %v11392_v62 = vld [vmem:[#allocation2 + $0xa9] sm:$0xff] }
 0x1be   : > { %15668 = vst [vmem:[#allocation120_spill] sm:$0xff] %v11335_v32  ;;  %15669 = vst [vmem:[#allocation121_spill] sm:$0xff] %v11337_v15  ;;  %v15672_v45 = vcombine.low %v11116_v3, %v11119_v27  ;;  %v15674_v11 = vcombine.low %v11128_v42, %v11131_v6  ;;  %v11387_v13 = vrot.slane %v6141_v41, %v9627_v19 }
 0x1bf   : > { %15670 = vst [vmem:[#allocation122_spill] sm:$0xff] %v11344_v52  ;;  %15671 = vst [vmem:[#allocation123_spill] sm:$0xff] %v11364_v0  ;;  %v11400_v20 = vrot.slane %v5493_v24, %v9627_v19  ;;  %v3764_v52 = vcombine.high %v11147_v49, %v11153_v38  ;;  %v3900_v41 = vcombine.high %v11173_v37, %v11159_v43 }
 0x1c0   : > { %v11372_v34 = vrot.slane %v15672_v45, %v9627_v19  ;;  %v11378_v61 = vrot.slane %v15674_v11, %v9627_v19  ;;  %15676 = vst [vmem:[#allocation126_spill] sm:$0xff] %v11382_v4  ;;  %1611 = vrot.lane.b32.xlu1 %v11070_v17, %s9410_s27  ;;  %15677 = vst [vmem:[#allocation127_spill] sm:$0xff] %v11387_v13  ;;  %v11390_v45 = vrot.slane %v6173_v47, %v9627_v19 }
 0x1c1   : > { %1609 = vrot.lane.b32.xlu0 %v11392_v62, %s9410_s27  ;;  %v11397_v11 = vrot.slane %v5461_v60, %v9627_v19  ;;  %15680 = vst [vmem:[#allocation130_spill] sm:$0xff] %v11400_v20  ;;  %v2405_v47 = vcombine.low %v11288_v57, %v11382_v4  ;;  %v11408_v1 = vpop.permute.xlu1 %1403  ;;  %v11411_v54 = vrot.slane %v6277_v56, %v9627_v19  ;;  %v15689_v56 = vld [vmem:[#allocation40_spill] sm:$0xff]  ;;  %v15698_v57 = vld [vmem:[#allocation54_spill] sm:$0xff] }
 0x1c2   : > { %15673 = vst [vmem:[#allocation124_spill] sm:$0xff] %v11372_v34  ;;  %15675 = vst [vmem:[#allocation125_spill] sm:$0xff] %v11378_v61  ;;  %v11414_v60 = vrot.slane %v6309_v23, %v9627_v19  ;;  %v11418_v29 = vpop.permute.xlu0 %1401  ;;  %v11420_v38 = vpack.i.bf16 %v3900_v41, %v3764_v52  ;;  %v15686_v23 = vld [vmem:[#allocation36_spill] sm:$0xff]  ;;  %v4869_v20 = vcombine.low %v11335_v32, %v11408_v1  ;;  %v9197_v61 = vld [vmem:[#allocation2 + $0x121] sm:$0xff] }
 0x1c3   : > { %15678 = vst [vmem:[#allocation128_spill] sm:$0xff] %v11390_v45  ;;  %15679 = vst [vmem:[#allocation129_spill] sm:$0xff] %v11397_v11  ;;  %v2421_v49 = vcombine.low %v11337_v15, %v11418_v29  ;;  %v2413_v52 = vrot.slane %v2405_v47, %v15611_v35  ;;  %v15692_v47 = vld [vmem:[#allocation35_spill] sm:$0xff] }
 0x1c4   : > { %15681 = vst [vmem:[#allocation131_spill] sm:$0xff] %v11408_v1  ;;  %15682 = vst [vmem:[#allocation132_spill] sm:$0xff] %v11411_v54  ;;  %1615 = vrot.lane.b32.xlu1 %v11107_v10, %s9410_s27  ;;  %v15695_v54 = vld [vmem:[#allocation39_spill] sm:$0xff]  ;;  %v15710_v1 = vcombine.high %v11324_v50, %v11333_v30 }
 0x1c5   : > { %15683 = vst [vmem:[#allocation133_spill] sm:$0xff] %v11414_v60  ;;  %15684 = vst [vmem:[#allocation134_spill] sm:$0xff] %v11418_v29  ;;  %1613 = vrot.lane.b32.xlu0 %v15686_v23, %s9410_s27  ;;  %v2429_v41 = vrot.slane %v2421_v49, %v15611_v35  ;;  %v11436_v24 = vpop.permute.xlu1 %1407 }
 0x1c6   : > { %15685 = vst [vmem:[#allocation135_spill] sm:$0xff] %v11420_v38  ;;  %15687 = vst [vmem:[#allocation36_spill] sm:$0xff] %v11436_v24  ;;  %v11438_v43 = vpop.permute.xlu0 %1405 }
 0x1c7   : > { %15688 = vst [vmem:[#allocation136_spill] sm:$0xff] %v11438_v43  ;;  %v2470_v38 = vcombine.high %v2413_v52, %v2429_v41 }
 0x1c8   : > { %1619 = vrot.lane.b32.xlu1 %v11163_v31, %s9410_s27 }
 0x1c9   : > { %1617 = vrot.lane.b32.xlu0 %v15689_v56, %s9410_s27  ;;  %v11444_v13 = vpop.permute.xlu1 %1411 }
 0x1ca   : > { %15690 = vst [vmem:[#allocation40_spill] sm:$0xff] %v11444_v13  ;;  %v11446_v37 = vpop.permute.xlu0 %1409 }
 0x1cb   : > { %15691 = vst [vmem:[#allocation137_spill] sm:$0xff] %v11446_v37 }
 0x1cc   : > { %1623 = vrot.lane.b32.xlu1 %v11109_v14, %s9410_s27 }
 0x1cd   : > { %1621 = vrot.lane.b32.xlu0 %v15692_v47, %s9410_s27 }
 0x1ce   : > { %v11452_v49 = vpop.permute.xlu1 %1415  ;;  %v11454_v23 = vpop.permute.xlu0 %1413 }
 0x1cf   : > { %15693 = vst [vmem:[#allocation35_spill] sm:$0xff] %v11452_v49  ;;  %15694 = vst [vmem:[#allocation138_spill] sm:$0xff] %v11454_v23  ;;  %v2437_v56 = vcombine.low %v11438_v43, %v11454_v23  ;;  %v4885_v4 = vcombine.low %v11436_v24, %v11452_v49  ;;  %v4853_v23 = vcombine.low %v11281_v39, %v11364_v0 }
 0x1d0   : > { %1627 = vrot.lane.b32.xlu1 %v11179_v22, %s9410_s27  ;;  %v2484_v39 = vrot.slane %v2470_v38, %v9627_v19  ;;  %v15712_v38 = vcombine.low %v11324_v50, %v11333_v30 }
 0x1d1   : > { %1625 = vrot.lane.b32.xlu0 %v15695_v54, %s9410_s27  ;;  %v2469_v54 = vcombine.low %v2413_v52, %v2429_v41  ;;  %v2445_v43 = vrot.slane %v2437_v56, %v15611_v35  ;;  %v11499_v0 = vrot.slane %v4885_v4, %v15611_v35 }
 0x1d2   : > { %v11462_v60 = vpop.permute.xlu1 %1419  ;;  %v11464_v45 = vpop.permute.xlu0 %1417 }
 0x1d3   : > { %15696 = vst [vmem:[#allocation39_spill] sm:$0xff] %v11462_v60  ;;  %15697 = vst [vmem:[#allocation139_spill] sm:$0xff] %v11464_v45  ;;  %v4901_v47 = vcombine.low %v11444_v13, %v11462_v60  ;;  %v2453_v11 = vcombine.low %v11446_v37, %v11464_v45  ;;  %v11493_v56 = vrot.slane %v2469_v54, %v9627_v19  ;;  %v11957_v37 = vld [vmem:[#allocation2 + $0xda] sm:$0xff] }
 0x1d4   : > { %1631 = vrot.lane.b32.xlu1 %v11181_v36, %s9410_s27 }
 0x1d5   : > { %1629 = vrot.lane.b32.xlu0 %v15698_v57, %s9410_s27  ;;  %v2461_v13 = vrot.slane %v2453_v11, %v15611_v35  ;;  %v11485_v29 = vrot.slane %v4901_v47, %v15611_v35  ;;  %v11490_v57 = vrot.slane %v4869_v20, %v15611_v35  ;;  %15702 = vst [vmem:[#allocation142_spill] sm:$0xff] %v11493_v56  ;;  %v15703_v11 = vld [vmem:[#allocation59_spill] sm:$0xff] }
 0x1d6   : > { %v11480_v60 = vpop.permute.xlu1 %1455  ;;  %v1454_v15 = vpop.permute.xlu0 %1453  ;;  %15704 = vst [vmem:[#allocation59_spill] sm:$0xff] %v11499_v0  ;;  %v11508_v20 = vrot.slane %v4853_v23, %v15611_v35 }
 0x1d7   : > { %15699 = vst [vmem:[#allocation54_spill] sm:$0xff] %v11480_v60  ;;  %15700 = vst [vmem:[#allocation140_spill] sm:$0xff] %v11485_v29  ;;  %v2501_v52 = vcombine.low %v2445_v43, %v2461_v13  ;;  %v2502_v41 = vcombine.high %v2445_v43, %v2461_v13  ;;  %v4949_v32 = vcombine.low %v11499_v0, %v11485_v29 }
 0x1d8   : > { %1635 = vrot.lane.b32.xlu1 %v11198_v18, %s9410_s27  ;;  %15701 = vst [vmem:[#allocation141_spill] sm:$0xff] %v11490_v57  ;;  %15707 = vst [vmem:[#allocation145_spill] sm:$0xff] %v11508_v20 }
 0x1d9   : > { %1633 = vrot.lane.b32.xlu0 %v15703_v11, %s9410_s27  ;;  %v11502_v47 = vrot.slane %v2501_v52, %v9627_v19  ;;  %v2516_v13 = vrot.slane %v2502_v41, %v9627_v19  ;;  %v15708_v11 = vld [vmem:[#allocation53_spill] sm:$0xff]  ;;  %v4917_v41 = vcombine.low %v11508_v20, %v11490_v57 }
 0x1da   : > { %v11505_v43 = vpop.permute.xlu1 %1459  ;;  %v1458_v54 = vpop.permute.xlu0 %1457 }
 0x1db   : > { %15705 = vst [vmem:[#allocation143_spill] sm:$0xff] %v11502_v47  ;;  %15706 = vst [vmem:[#allocation144_spill] sm:$0xff] %v11505_v43  ;;  %v2536_v4 = vcombine.high %v2484_v39, %v2516_v13  ;;  %v2535_v52 = vcombine.low %v2484_v39, %v2516_v13  ;;  %v11533_v39 = vrot.slane %v4949_v32, %v9627_v19  ;;  %v15715_v13 = vld [vmem:[#allocation58_spill] sm:$0xff] }
 0x1dc   : > { %1639 = vrot.lane.b32.xlu1 %v11200_v21, %s9410_s27 }
 0x1dd   : > { %1637 = vrot.lane.b32.xlu0 %v15708_v11, %s9410_s27  ;;  %v11525_v24 = vpack.i.bf16 %v2536_v4, %v15710_v1  ;;  %v11530_v49 = vpack.i.bf16 %v2535_v52, %v15712_v38  ;;  %15714 = vst [vmem:[#allocation148_spill] sm:$0xff] %v11533_v39  ;;  %v11540_v11 = vrot.slane %v4917_v41, %v9627_v19  ;;  %v9188_v52 = vld [vmem:[#allocation2 + $0x1] sm:$0xff] }
 0x1de   : > { %v11520_v23 = vpop.permute.xlu1 %1463  ;;  %v1462_v0 = vpop.permute.xlu0 %1461 }
 0x1df   : > { %15709 = vst [vmem:[#allocation53_spill] sm:$0xff] %v11520_v23  ;;  %15711 = vst [vmem:[#allocation146_spill] sm:$0xff] %v11525_v24  ;;  %v2541_v1 = vcombine.low %v1454_v15, %v1462_v0  ;;  %v2542_v4 = vcombine.high %v1454_v15, %v1462_v0 }
 0x1e0   : > { %15713 = vst [vmem:[#allocation147_spill] sm:$0xff] %v11530_v49  ;;  %1643 = vrot.lane.b32.xlu1 %v11202_v28, %s9410_s27  ;;  %15716 = vst [vmem:[#allocation58_spill] sm:$0xff] %v11540_v11  ;;  %v12064_v49 = vld [vmem:[#allocation2 + $0x16a] sm:$0xff] }
 0x1e1   : > { %1641 = vrot.lane.b32.xlu0 %v15715_v13, %s9410_s27  ;;  %v2549_v13 = vrot.slane %v2541_v1, %v15611_v35  ;;  %v11551_v41 = vrot.slane %v2542_v4, %v15611_v35 }
 0x1e2   : > { %v11542_v20 = vpop.permute.xlu1 %1467  ;;  %v1466_v50 = vpop.permute.xlu0 %1465 }
 0x1e3   : > { %15717 = vst [vmem:[#allocation149_spill] sm:$0xff] %v11542_v20  ;;  %v2557_v30 = vcombine.low %v1458_v54, %v1466_v50  ;;  %v2558_v38 = vcombine.high %v1458_v54, %v1466_v50  ;;  %15718 = vst [vmem:[#allocation150_spill] sm:$0xff] %v11551_v41  ;;  %v5005_v39 = vcombine.low %v11505_v43, %v11542_v20 }
 0x1e4   : > { %1679 = vrot.lane.b32.xlu1 %v11047_v51, %s9411_s6 }
 0x1e5   : > { %1677 = vrot.lane.b32.xlu0 %v9188_v52, %s9411_s6  ;;  %v2565_v15 = vrot.slane %v2557_v30, %v15611_v35  ;;  %v11555_v0 = vrot.slane %v2558_v38, %v15611_v35  ;;  %v9189_v52 = vld [vmem:[#allocation2 + $0x19] sm:$0xff]  ;;  %v9190_v30 = vld [vmem:[#allocation2 + $0x31] sm:$0xff]  ;;  %v11586_v20 = vrot.slane %v5005_v39, %v15611_v35 }
 0x1e6   : > { %v11557_v54 = vpop.permute.xlu1 %1471  ;;  %v1470_v50 = vpop.permute.xlu0 %1469 }
 0x1e7   : > { %15719 = vst [vmem:[#allocation151_spill] sm:$0xff] %v11555_v0  ;;  %15720 = vst [vmem:[#allocation152_spill] sm:$0xff] %v11557_v54  ;;  %v2606_v51 = vcombine.high %v2549_v13, %v2565_v15  ;;  %v2622_v32 = vcombine.high %v11551_v41, %v11555_v0 }
 0x1e8   : > { %1683 = vrot.lane.b32.xlu1 %v11049_v48, %s9411_s6  ;;  %v4989_v48 = vcombine.low %v11480_v60, %v11520_v23  ;;  %15724 = vst [vmem:[#allocation156_spill] sm:$0xff] %v11586_v20  ;;  %v9191_v23 = vld [vmem:[#allocation2 + $0x61] sm:$0xff] }
 0x1e9   : > { %1681 = vrot.lane.b32.xlu0 %v9189_v52, %s9411_s6 }
 0x1ea   : > { %v11564_v1 = vpop.permute.xlu1 %1475  ;;  %v1474_v4 = vpop.permute.xlu0 %1473  ;;  %v11591_v60 = vrot.slane %v4989_v48, %v15611_v35 }
 0x1eb   : > { %15721 = vst [vmem:[#allocation153_spill] sm:$0xff] %v11564_v1 }
 0x1ec   : > { %1687 = vrot.lane.b32.xlu1 %v11053_v46, %s9411_s6  ;;  %15725 = vst [vmem:[#allocation157_spill] sm:$0xff] %v11591_v60  ;;  %v5053_v48 = vcombine.low %v11591_v60, %v11586_v20 }
 0x1ed   : > { %1685 = vrot.lane.b32.xlu0 %v9190_v30, %s9411_s6 }
 0x1ee   : > { %v11569_v38 = vpop.permute.xlu1 %1479  ;;  %v1478_v11 = vpop.permute.xlu0 %1477 }
 0x1ef   : > { %15722 = vst [vmem:[#allocation154_spill] sm:$0xff] %v11569_v38  ;;  %v5021_v52 = vcombine.low %v11557_v54, %v11569_v38  ;;  %v2573_v46 = vcombine.low %v1470_v50, %v1478_v11  ;;  %v2574_v30 = vcombine.high %v1470_v50, %v1478_v11 }
 0x1f0   : > { %1691 = vrot.lane.b32.xlu1 %v11055_v63, %s9411_s6 }
 0x1f1   : > { %1689 = vrot.lane.b32.xlu0 %v11211_v53, %s9411_s6  ;;  %v2605_v53 = vcombine.low %v2549_v13, %v2565_v15  ;;  %v11594_v11 = vrot.slane %v5021_v52, %v15611_v35  ;;  %v2581_v39 = vrot.slane %v2573_v46, %v15611_v35 }
 0x1f2   : > { %v11581_v57 = vpop.permute.xlu1 %1483 }
 0x1f3   : > { %15723 = vst [vmem:[#allocation155_spill] sm:$0xff] %v11581_v57  ;;  %v5037_v29 = vcombine.low %v11564_v1, %v11581_v57  ;;  %v1482_v43 = vpop.permute.xlu0 %1481  ;;  %15726 = vst [vmem:[#allocation158_spill] sm:$0xff] %v11594_v11 }
 0x1f4   : > { %v2589_v63 = vcombine.low %v1474_v4, %v1482_v43  ;;  %v2590_v34 = vcombine.high %v1474_v4, %v1482_v43  ;;  %1695 = vrot.lane.b32.xlu1 %v11057_v33, %s9411_s6  ;;  %v11602_v43 = vrot.slane %v2574_v30, %v15611_v35  ;;  %v11622_v30 = vrot.slane %v2606_v51, %v9627_v19 }
 0x1f5   : > { %v11597_v50 = vrot.slane %v5037_v29, %v15611_v35  ;;  %1693 = vrot.lane.b32.xlu0 %v9191_v23, %s9411_s6  ;;  %v11640_v51 = vrot.slane %v2622_v32, %v9627_v19 }
 0x1f6   : > { %15728 = vst [vmem:[#allocation160_spill] sm:$0xff] %v11602_v43  ;;  %v2597_v33 = vrot.slane %v2589_v63, %v15611_v35  ;;  %v11606_v4 = vrot.slane %v2590_v34, %v15611_v35  ;;  %v11608_v13 = vpop.permute.xlu1 %1487  ;;  %v11619_v34 = vrot.slane %v2605_v53, %v9627_v19  ;;  %v9192_v63 = vld [vmem:[#allocation2 + $0x79] sm:$0xff] }
 0x1f7   : > { %15727 = vst [vmem:[#allocation159_spill] sm:$0xff] %v11597_v50  ;;  %15730 = vst [vmem:[#allocation162_spill] sm:$0xff] %v11608_v13  ;;  %v5085_v15 = vcombine.low %v11594_v11, %v11597_v50  ;;  %v1486_v29 = vpop.permute.xlu0 %1485 }
 0x1f8   : > { %15729 = vst [vmem:[#allocation161_spill] sm:$0xff] %v11606_v4  ;;  %v2637_v23 = vcombine.low %v2581_v39, %v2597_v33  ;;  %v2638_v52 = vcombine.high %v2581_v39, %v2597_v33  ;;  %v2654_v46 = vcombine.high %v11602_v43, %v11606_v4  ;;  %1699 = vrot.lane.b32.xlu1 %v11066_v25, %s9411_s6  ;;  %15731 = vst [vmem:[#allocation163_spill] sm:$0xff] %v11619_v34 }
 0x1f9   : > { %1697 = vrot.lane.b32.xlu0 %v9192_v63, %s9411_s6  ;;  %v11626_v54 = vrot.slane %v5085_v15, %v9627_v19  ;;  %v11643_v63 = vrot.slane %v5053_v48, %v9627_v19 }
 0x1fa   : > { %v11629_v39 = vrot.slane %v2637_v23, %v9627_v19  ;;  %v11632_v33 = vrot.slane %v2638_v52, %v9627_v19  ;;  %v11635_v25 = vrot.slane %v2654_v46, %v9627_v19  ;;  %v11637_v53 = vpop.permute.xlu1 %1491  ;;  %v9193_v46 = vld [vmem:[#allocation2 + $0xc1] sm:$0xff] }
 0x1fb   : > { %15732 = vst [vmem:[#allocation164_spill] sm:$0xff] %v11626_v54  ;;  %15734 = vst [vmem:[#allocation166_spill] sm:$0xff] %v11637_v53  ;;  %v1490_v38 = vpop.permute.xlu0 %1489  ;;  %v9196_v54 = vld [vmem:[#allocation2 + $0x109] sm:$0xff] }
 0x1fc   : > { %15733 = vst [vmem:[#allocation165_spill] sm:$0xff] %v11629_v39  ;;  %15735 = vst [vmem:[#allocation167_spill] sm:$0xff] %v11643_v63  ;;  %1703 = vrot.lane.b32.xlu1 %v11068_v2, %s9411_s6 }
 0x1fd   : > { %1701 = vrot.lane.b32.xlu0 %v11354_v9, %s9411_s6 }
 0x1fe   : > { %v11657_v48 = vpop.permute.xlu1 %1495 }
 0x1ff   : > { %15736 = vst [vmem:[#allocation168_spill] sm:$0xff] %v11657_v48  ;;  %v1494_v15 = vpop.permute.xlu0 %1493 }
 0x200   : > { %1707 = vrot.lane.b32.xlu1 %v11070_v17, %s9411_s6  ;;  %v2677_v9 = vcombine.low %v1486_v29, %v1494_v15  ;;  %v2678_v32 = vcombine.high %v1486_v29, %v1494_v15 }
 0x201   : > { %1705 = vrot.lane.b32.xlu0 %v11392_v62, %s9411_s6 }
 0x202   : > { %v11667_v23 = vpop.permute.xlu1 %1499  ;;  %v2685_v2 = vrot.slane %v2677_v9, %v15611_v35  ;;  %v11674_v17 = vrot.slane %v2678_v32, %v15611_v35 }
 0x203   : > { %15737 = vst [vmem:[#allocation169_spill] sm:$0xff] %v11667_v23  ;;  %v1498_v52 = vpop.permute.xlu0 %1497 }
 0x204   : > { %v2693_v60 = vcombine.low %v1490_v38, %v1498_v52  ;;  %v2694_v20 = vcombine.high %v1490_v38, %v1498_v52  ;;  %1711 = vrot.lane.b32.xlu1 %v11107_v10, %s9411_s6  ;;  %15738 = vst [vmem:[#allocation170_spill] sm:$0xff] %v11674_v17  ;;  %v9194_v52 = vld [vmem:[#allocation2 + $0xd9] sm:$0xff] }
 0x205   : > { %1709 = vrot.lane.b32.xlu0 %v9193_v46, %s9411_s6 }
 0x206   : > { %v2701_v62 = vrot.slane %v2693_v60, %v15611_v35  ;;  %v11678_v29 = vrot.slane %v2694_v20, %v15611_v35  ;;  %v11680_v15 = vpop.permute.xlu1 %1503  ;;  %v9195_v60 = vld [vmem:[#allocation2 + $0xf1] sm:$0xff] }
 0x207   : > { %15740 = vst [vmem:[#allocation172_spill] sm:$0xff] %v11680_v15  ;;  %v1502_v63 = vpop.permute.xlu0 %1501 }
 0x208   : > { %15739 = vst [vmem:[#allocation171_spill] sm:$0xff] %v11678_v29  ;;  %v2742_v38 = vcombine.high %v2685_v2, %v2701_v62  ;;  %v2758_v10 = vcombine.high %v11674_v17, %v11678_v29  ;;  %1715 = vrot.lane.b32.xlu1 %v11163_v31, %s9411_s6  ;;  %v15797_v29 = vld [vmem:[#allocation99_spill] sm:$0xff] }
 0x209   : > { %1713 = vrot.lane.b32.xlu0 %v9194_v52, %s9411_s6 }
 0x20a   : > { %v11687_v32 = vpop.permute.xlu1 %1507 }
 0x20b   : > { %15741 = vst [vmem:[#allocation173_spill] sm:$0xff] %v11687_v32  ;;  %v1506_v46 = vpop.permute.xlu0 %1505 }
 0x20c   : > { %1719 = vrot.lane.b32.xlu1 %v11109_v14, %s9411_s6  ;;  %v2741_v14 = vcombine.low %v2685_v2, %v2701_v62 }
 0x20d   : > { %1717 = vrot.lane.b32.xlu0 %v9195_v60, %s9411_s6 }
 0x20e   : > { %v11692_v20 = vpop.permute.xlu1 %1511 }
 0x20f   : > { %15742 = vst [vmem:[#allocation174_spill] sm:$0xff] %v11692_v20  ;;  %v1510_v9 = vpop.permute.xlu0 %1509  ;;  %v5157_v2 = vcombine.low %v11680_v15, %v11692_v20  ;;  %v11729_v15 = vrot.slane %v2741_v14, %v9627_v19  ;;  %v15755_v14 = vcombine.low %v11622_v30, %v11632_v33 }
 0x210   : > { %1723 = vrot.lane.b32.xlu1 %v11179_v22, %s9411_s6  ;;  %v2709_v31 = vcombine.low %v1502_v63, %v1510_v9  ;;  %v2710_v52 = vcombine.high %v1502_v63, %v1510_v9 }
 0x211   : > { %1721 = vrot.lane.b32.xlu0 %v9196_v54, %s9411_s6  ;;  %15748 = vst [vmem:[#allocation180_spill] sm:$0xff] %v11729_v15 }
 0x212   : > { %v11697_v11 = vpop.permute.xlu1 %1515  ;;  %v2717_v22 = vrot.slane %v2709_v31, %v15611_v35  ;;  %v11706_v54 = vrot.slane %v2710_v52, %v15611_v35  ;;  %v9198_v52 = vld [vmem:[#allocation2 + $0x139] sm:$0xff] }
 0x213   : > { %15743 = vst [vmem:[#allocation175_spill] sm:$0xff] %v11697_v11  ;;  %v1514_v50 = vpop.permute.xlu0 %1513  ;;  %v5173_v60 = vcombine.low %v11687_v32, %v11697_v11  ;;  %v15756_v32 = vcombine.high %v11622_v30, %v11632_v33 }
 0x214   : > { %v2725_v1 = vcombine.low %v1506_v46, %v1514_v50  ;;  %v2726_v57 = vcombine.high %v1506_v46, %v1514_v50  ;;  %1727 = vrot.lane.b32.xlu1 %v11181_v36, %s9411_s6  ;;  %15744 = vst [vmem:[#allocation176_spill] sm:$0xff] %v11706_v54  ;;  %v5141_v36 = vcombine.low %v11637_v53, %v11667_v23 }
 0x215   : > { %1725 = vrot.lane.b32.xlu0 %v9197_v61, %s9411_s6  ;;  %v2772_v53 = vrot.slane %v2758_v10, %v9627_v19 }
 0x216   : > { %v2733_v63 = vrot.slane %v2725_v1, %v15611_v35  ;;  %v11710_v9 = vrot.slane %v2726_v57, %v15611_v35  ;;  %v11712_v50 = vpop.permute.xlu1 %1583  ;;  %v5125_v57 = vcombine.low %v11608_v13, %v11657_v48  ;;  %v11725_v1 = vrot.slane %v5173_v60, %v15611_v35 }
 0x217   : > { %15746 = vst [vmem:[#allocation178_spill] sm:$0xff] %v11712_v50  ;;  %v1582_v62 = vpop.permute.xlu0 %1581  ;;  %v11739_v13 = vrot.slane %v5141_v36, %v15611_v35  ;;  %v11742_v60 = vrot.slane %v5157_v2, %v15611_v35 }
 0x218   : > { %15745 = vst [vmem:[#allocation177_spill] sm:$0xff] %v11710_v9  ;;  %v2773_v61 = vcombine.low %v2717_v22, %v2733_v63  ;;  %v2774_v46 = vcombine.high %v2717_v22, %v2733_v63  ;;  %v2790_v31 = vcombine.high %v11706_v54, %v11710_v9  ;;  %1731 = vrot.lane.b32.xlu1 %v11198_v18, %s9411_s6  ;;  %15747 = vst [vmem:[#allocation179_spill] sm:$0xff] %v11725_v1 }
 0x219   : > { %1729 = vrot.lane.b32.xlu0 %v9198_v52, %s9411_s6  ;;  %v2756_v22 = vrot.slane %v2742_v38, %v9627_v19  ;;  %15751 = vst [vmem:[#allocation183_spill] sm:$0xff] %v11739_v13  ;;  %15752 = vst [vmem:[#allocation184_spill] sm:$0xff] %v11742_v60  ;;  %v5221_v36 = vcombine.low %v11742_v60, %v11725_v1  ;;  %v11931_v60 = vld [vmem:[#allocation2 + $0xaa] sm:$0xff] }
 0x21a   : > { %v11733_v63 = vrot.slane %v2773_v61, %v9627_v19  ;;  %v2788_v20 = vrot.slane %v2774_v46, %v9627_v19  ;;  %v11736_v18 = vpop.permute.xlu1 %1587  ;;  %v2804_v52 = vrot.slane %v2790_v31, %v9627_v19  ;;  %v11750_v61 = vrot.slane %v5125_v57, %v15611_v35  ;;  %v9199_v46 = vld [vmem:[#allocation2 + $0x151] sm:$0xff] }
 0x21b   : > { %15750 = vst [vmem:[#allocation182_spill] sm:$0xff] %v11736_v18  ;;  %v1586_v48 = vpop.permute.xlu0 %1585 }
 0x21c   : > { %15749 = vst [vmem:[#allocation181_spill] sm:$0xff] %v11733_v63  ;;  %1735 = vrot.lane.b32.xlu1 %v11200_v21, %s9411_s6  ;;  %v2807_v38 = vcombine.low %v2756_v22, %v2788_v20  ;;  %15753 = vst [vmem:[#allocation185_spill] sm:$0xff] %v11750_v61  ;;  %v2808_v2 = vcombine.high %v2756_v22, %v2788_v20  ;;  %v5189_v21 = vcombine.low %v11750_v61, %v11739_v13  ;;  %v15786_v13 = vld [vmem:[#allocation16_spill] sm:$0xff] }
 0x21d   : > { %1733 = vrot.lane.b32.xlu0 %v9199_v46, %s9411_s6  ;;  %v2811_v10 = vcombine.low %v2772_v53, %v2804_v52  ;;  %v11773_v20 = vrot.slane %v5221_v36, %v9627_v19  ;;  %v9200_v46 = vld [vmem:[#allocation2 + $0x169] sm:$0xff]  ;;  %v15760_v61 = vcombine.low %v11640_v51, %v11635_v25  ;;  %v2812_v36 = vcombine.high %v2772_v53, %v2804_v52 }
 0x21e   : > { %v11756_v31 = vpop.permute.xlu1 %1591  ;;  %v11761_v23 = vpack.i.bf16 %v2807_v38, %v15755_v14  ;;  %v11768_v11 = vpack.i.bf16 %v2808_v2, %v15756_v32  ;;  %v11784_v33 = vrot.slane %v5189_v21, %v9627_v19  ;;  %v15766_v53 = vcombine.high %v11640_v51, %v11635_v25  ;;  %v11821_v25 = vld [vmem:[#allocation2 + $0x32] sm:$0xff] }
 0x21f   : > { %15754 = vst [vmem:[#allocation186_spill] sm:$0xff] %v11756_v31  ;;  %v1590_v57 = vpop.permute.xlu0 %1589  ;;  %15758 = vst [vmem:[#allocation188_spill] sm:$0xff] %v11773_v20  ;;  %v11781_v30 = vpack.i.bf16 %v2811_v10, %v15760_v61  ;;  %v11835_v61 = vld [vmem:[#allocation2 + $0x4a] sm:$0xff]  ;;  %v11885_v20 = vld [vmem:[#allocation2 + $0x7a] sm:$0xff] }
 0x220   : > { %15757 = vst [vmem:[#allocation187_spill] sm:$0xff] %v11768_v11  ;;  %1739 = vrot.lane.b32.xlu1 %v11202_v28, %s9411_s6  ;;  %v3085_v22 = vcombine.low %v1582_v62, %v1590_v57  ;;  %v3086_v14 = vcombine.high %v1582_v62, %v1590_v57  ;;  %15762 = vst [vmem:[#allocation191_spill] sm:$0xff] %v11784_v33  ;;  %v11789_v62 = vld [vmem:[#allocation2 + $0x2] sm:$0xff]  ;;  %v11807_v52 = vpack.i.bf16 %v2812_v36, %v15766_v53 }
 0x221   : > { %1737 = vrot.lane.b32.xlu0 %v9200_v46, %s9411_s6  ;;  %15761 = vst [vmem:[#allocation190_spill] sm:$0xff] %v11781_v30  ;;  %v5533_v53 = vcombine.low %v11712_v50, %v11756_v31 }
 0x222   : > { %v11776_v38 = vpop.permute.xlu1 %1595  ;;  %v3093_v46 = vrot.slane %v3085_v22, %v15611_v35  ;;  %v11796_v21 = vrot.slane %v3086_v14, %v15611_v35  ;;  %15767 = vst [vmem:[#allocation195_spill] sm:$0xff] %v11807_v52  ;;  %v11813_v14 = vld [vmem:[#allocation2 + $0x1a] sm:$0xff] }
 0x223   : > { %15759 = vst [vmem:[#allocation189_spill] sm:$0xff] %v11776_v38  ;;  %v1594_v28 = vpop.permute.xlu0 %1593 }
 0x224   : > { %v3101_v32 = vcombine.low %v1586_v48, %v1594_v28  ;;  %v3102_v2 = vcombine.high %v1586_v48, %v1594_v28  ;;  %1807 = vrot.lane.b32.xlu1 %v11083_v16, %s9410_s27  ;;  %15763 = vst [vmem:[#allocation192_spill] sm:$0xff] %v11796_v21 }
 0x225   : > { %1805 = vrot.lane.b32.xlu0 %v11789_v62, %s9410_s27 }
 0x226   : > { %v3109_v57 = vrot.slane %v3101_v32, %v15611_v35  ;;  %v11800_v48 = vrot.slane %v3102_v2, %v15611_v35  ;;  %v11802_v16 = vpop.permute.xlu1 %1599 }
 0x227   : > { %15765 = vst [vmem:[#allocation194_spill] sm:$0xff] %v11802_v16  ;;  %v1598_v10 = vpop.permute.xlu0 %1597 }
 0x228   : > { %15764 = vst [vmem:[#allocation193_spill] sm:$0xff] %v11800_v48  ;;  %v3150_v22 = vcombine.high %v3093_v46, %v3109_v57  ;;  %v3166_v28 = vcombine.high %v11796_v21, %v11800_v48  ;;  %1811 = vrot.lane.b32.xlu1 %v11095_v55, %s9410_s27  ;;  %v5549_v55 = vcombine.low %v11736_v18, %v11776_v38 }
 0x229   : > { %1809 = vrot.lane.b32.xlu0 %v11813_v14, %s9410_s27 }
 0x22a   : > { %v11817_v32 = vpop.permute.xlu1 %1603 }
 0x22b   : > { %15768 = vst [vmem:[#allocation196_spill] sm:$0xff] %v11817_v32  ;;  %v1602_v2 = vpop.permute.xlu0 %1601 }
 0x22c   : > { %1815 = vrot.lane.b32.xlu1 %v11085_v5, %s9410_s27 }
 0x22d   : > { %1813 = vrot.lane.b32.xlu0 %v11821_v25, %s9410_s27 }
 0x22e   : > { %v11825_v51 = vpop.permute.xlu1 %1607 }
 0x22f   : > { %15769 = vst [vmem:[#allocation197_spill] sm:$0xff] %v11825_v51  ;;  %v1606_v36 = vpop.permute.xlu0 %1605  ;;  %v5565_v5 = vcombine.low %v11802_v16, %v11825_v51  ;;  %v11849_v16 = vrot.slane %v5533_v53, %v15611_v35  ;;  %v3149_v51 = vcombine.low %v3093_v46, %v3109_v57 }
 0x230   : > { %1819 = vrot.lane.b32.xlu1 %v11097_v7, %s9410_s27  ;;  %v3117_v52 = vcombine.low %v1598_v10, %v1606_v36  ;;  %v3118_v30 = vcombine.high %v1598_v10, %v1606_v36  ;;  %v11844_v7 = vrot.slane %v5549_v55, %v15611_v35 }
 0x231   : > { %1817 = vrot.lane.b32.xlu0 %v11835_v61, %s9410_s27  ;;  %15772 = vst [vmem:[#allocation200_spill] sm:$0xff] %v11849_v16  ;;  %v11852_v10 = vrot.slane %v5565_v5, %v15611_v35 }
 0x232   : > { %v11839_v33 = vpop.permute.xlu1 %1611  ;;  %15771 = vst [vmem:[#allocation199_spill] sm:$0xff] %v11844_v7  ;;  %v5597_v53 = vcombine.low %v11849_v16, %v11844_v7 }
 0x233   : > { %15770 = vst [vmem:[#allocation198_spill] sm:$0xff] %v11839_v33  ;;  %v5581_v18 = vcombine.low %v11817_v32, %v11839_v33  ;;  %v1610_v38 = vpop.permute.xlu0 %1609  ;;  %15773 = vst [vmem:[#allocation201_spill] sm:$0xff] %v11852_v10  ;;  %v11857_v32 = vld [vmem:[#allocation2 + $0x62] sm:$0xff] }
 0x234   : > { %v3133_v50 = vcombine.low %v1602_v2, %v1610_v38  ;;  %v3134_v31 = vcombine.high %v1602_v2, %v1610_v38  ;;  %1823 = vrot.lane.b32.xlu1 %v11101_v26, %s9410_s27  ;;  %v3125_v38 = vrot.slane %v3117_v52, %v15611_v35  ;;  %v11863_v2 = vrot.slane %v3118_v30, %v15611_v35  ;;  %v15778_v52 = vld [vmem:[#allocation13_spill] sm:$0xff] }
 0x235   : > { %v11855_v36 = vrot.slane %v5581_v18, %v15611_v35  ;;  %1821 = vrot.lane.b32.xlu0 %v11857_v32, %s9410_s27 }
 0x236   : > { %15775 = vst [vmem:[#allocation203_spill] sm:$0xff] %v11863_v2  ;;  %v3141_v26 = vrot.slane %v3133_v50, %v15611_v35  ;;  %v11867_v46 = vrot.slane %v3134_v31, %v15611_v35  ;;  %v11869_v57 = vpop.permute.xlu1 %1615  ;;  %v11880_v50 = vrot.slane %v3149_v51, %v9627_v19  ;;  %v11883_v31 = vrot.slane %v3150_v22, %v9627_v19 }
 0x237   : > { %15774 = vst [vmem:[#allocation202_spill] sm:$0xff] %v11855_v36  ;;  %15777 = vst [vmem:[#allocation205_spill] sm:$0xff] %v11869_v57  ;;  %v5629_v18 = vcombine.low %v11852_v10, %v11855_v36  ;;  %v1614_v55 = vpop.permute.xlu0 %1613  ;;  %v11904_v22 = vrot.slane %v3166_v28, %v9627_v19  ;;  %v11907_v10 = vrot.slane %v5597_v53, %v9627_v19 }
 0x238   : > { %15776 = vst [vmem:[#allocation204_spill] sm:$0xff] %v11867_v46  ;;  %v3181_v5 = vcombine.low %v3125_v38, %v3141_v26  ;;  %v3182_v33 = vcombine.high %v3125_v38, %v3141_v26  ;;  %v3198_v30 = vcombine.high %v11863_v2, %v11867_v46  ;;  %1827 = vrot.lane.b32.xlu1 %v15778_v52, %s9410_s27  ;;  %15779 = vst [vmem:[#allocation13_spill] sm:$0xff] %v11880_v50 }
 0x239   : > { %1825 = vrot.lane.b32.xlu0 %v11885_v20, %s9410_s27  ;;  %v11890_v16 = vrot.slane %v5629_v18, %v9627_v19  ;;  %15783 = vst [vmem:[#allocation209_spill] sm:$0xff] %v11907_v10 }
 0x23a   : > { %v11893_v38 = vrot.slane %v3181_v5, %v9627_v19  ;;  %v11896_v26 = vrot.slane %v3182_v33, %v9627_v19  ;;  %v11899_v51 = vrot.slane %v3198_v30, %v9627_v19  ;;  %v11901_v52 = vpop.permute.xlu1 %1619  ;;  %v15784_v5 = vld [vmem:[#allocation52_spill] sm:$0xff] }
 0x23b   : > { %15780 = vst [vmem:[#allocation206_spill] sm:$0xff] %v11890_v16  ;;  %15782 = vst [vmem:[#allocation208_spill] sm:$0xff] %v11901_v52  ;;  %v1618_v7 = vpop.permute.xlu0 %1617  ;;  %v11915_v30 = vld [vmem:[#allocation2 + $0x92] sm:$0xff] }
 0x23c   : > { %15781 = vst [vmem:[#allocation207_spill] sm:$0xff] %v11893_v38  ;;  %1831 = vrot.lane.b32.xlu1 %v15784_v5, %s9410_s27  ;;  %v11939_v5 = vld [vmem:[#allocation2 + $0xc2] sm:$0xff]  ;;  %v15791_v16 = vld [vmem:[#allocation93_spill] sm:$0xff] }
 0x23d   : > { %1829 = vrot.lane.b32.xlu0 %v11915_v30, %s9410_s27 }
 0x23e   : > { %v11923_v36 = vpop.permute.xlu1 %1623 }
 0x23f   : > { %15785 = vst [vmem:[#allocation52_spill] sm:$0xff] %v11923_v36  ;;  %v1622_v33 = vpop.permute.xlu0 %1621 }
 0x240   : > { %1835 = vrot.lane.b32.xlu1 %v15786_v13, %s9410_s27  ;;  %v3221_v28 = vcombine.low %v1614_v55, %v1622_v33  ;;  %v3222_v1 = vcombine.high %v1614_v55, %v1622_v33 }
 0x241   : > { %1833 = vrot.lane.b32.xlu0 %v11931_v60, %s9410_s27 }
 0x242   : > { %v11935_v53 = vpop.permute.xlu1 %1627  ;;  %v3229_v13 = vrot.slane %v3221_v28, %v15611_v35  ;;  %v11945_v18 = vrot.slane %v3222_v1, %v15611_v35  ;;  %v11965_v28 = vld [vmem:[#allocation2 + $0xf2] sm:$0xff] }
 0x243   : > { %15787 = vst [vmem:[#allocation16_spill] sm:$0xff] %v11935_v53  ;;  %v1626_v11 = vpop.permute.xlu0 %1625 }
 0x244   : > { %v3237_v21 = vcombine.low %v1618_v7, %v1626_v11  ;;  %v3238_v48 = vcombine.high %v1618_v7, %v1626_v11  ;;  %1839 = vrot.lane.b32.xlu1 %v11167_v8, %s9410_s27  ;;  %15788 = vst [vmem:[#allocation210_spill] sm:$0xff] %v11945_v18 }
 0x245   : > { %1837 = vrot.lane.b32.xlu0 %v11939_v5, %s9410_s27 }
 0x246   : > { %v3245_v55 = vrot.slane %v3237_v21, %v15611_v35  ;;  %v11949_v33 = vrot.slane %v3238_v48, %v15611_v35  ;;  %v11951_v10 = vpop.permute.xlu1 %1631  ;;  %v15793_v48 = vld [vmem:[#allocation94_spill] sm:$0xff] }
 0x247   : > { %15790 = vst [vmem:[#allocation212_spill] sm:$0xff] %v11951_v10  ;;  %v1630_v11 = vpop.permute.xlu0 %1629 }
 0x248   : > { %15789 = vst [vmem:[#allocation211_spill] sm:$0xff] %v11949_v33  ;;  %v3286_v7 = vcombine.high %v3229_v13, %v3245_v55  ;;  %v3302_v8 = vcombine.high %v11945_v18, %v11949_v33  ;;  %1843 = vrot.lane.b32.xlu1 %v15791_v16, %s9410_s27  ;;  %v15795_v16 = vld [vmem:[#allocation98_spill] sm:$0xff]  ;;  %v11973_v33 = vld [vmem:[#allocation2 + $0x10a] sm:$0xff]  ;;  %v3285_v43 = vcombine.low %v3229_v13, %v3245_v55 }
 0x249   : > { %1841 = vrot.lane.b32.xlu0 %v11957_v37, %s9410_s27  ;;  %v5685_v13 = vcombine.low %v11901_v52, %v11935_v53  ;;  %v12040_v53 = vld [vmem:[#allocation2 + $0x152] sm:$0xff] }
 0x24a   : > { %v11961_v1 = vpop.permute.xlu1 %1635 }
 0x24b   : > { %15792 = vst [vmem:[#allocation93_spill] sm:$0xff] %v11961_v1  ;;  %v1634_v21 = vpop.permute.xlu0 %1633 }
 0x24c   : > { %1847 = vrot.lane.b32.xlu1 %v15793_v48, %s9410_s27 }
 0x24d   : > { %1845 = vrot.lane.b32.xlu0 %v11965_v28, %s9410_s27 }
 0x24e   : > { %v11969_v45 = vpop.permute.xlu1 %1639 }
 0x24f   : > { %15794 = vst [vmem:[#allocation94_spill] sm:$0xff] %v11969_v45  ;;  %v1638_v18 = vpop.permute.xlu0 %1637  ;;  %v5701_v55 = vcombine.low %v11951_v10, %v11969_v45  ;;  %v12015_v10 = vrot.slane %v3285_v43, %v9627_v19 }
 0x250   : > { %1851 = vrot.lane.b32.xlu1 %v15795_v16, %s9410_s27  ;;  %v3253_v2 = vcombine.low %v1630_v11, %v1638_v18  ;;  %v3254_v46 = vcombine.high %v1630_v11, %v1638_v18  ;;  %v11983_v16 = vld [vmem:[#allocation2 + $0x122] sm:$0xff] }
 0x251   : > { %1849 = vrot.lane.b32.xlu0 %v11973_v33, %s9410_s27  ;;  %15802 = vst [vmem:[#allocation216_spill] sm:$0xff] %v12015_v10 }
 0x252   : > { %v11977_v41 = vpop.permute.xlu1 %1643  ;;  %v3261_v54 = vrot.slane %v3253_v2, %v15611_v35  ;;  %v11989_v18 = vrot.slane %v3254_v46, %v15611_v35  ;;  %v12010_v46 = vld [vmem:[#allocation2 + $0x13a] sm:$0xff] }
 0x253   : > { %15796 = vst [vmem:[#allocation98_spill] sm:$0xff] %v11977_v41  ;;  %v1642_v48 = vpop.permute.xlu0 %1641  ;;  %v5717_v4 = vcombine.low %v11961_v1, %v11977_v41 }
 0x254   : > { %v3269_v0 = vcombine.low %v1634_v21, %v1642_v48  ;;  %v3270_v17 = vcombine.high %v1634_v21, %v1642_v48  ;;  %1855 = vrot.lane.b32.xlu1 %v15797_v29, %s9410_s27  ;;  %15798 = vst [vmem:[#allocation99_spill] sm:$0xff] %v11989_v18 }
 0x255   : > { %1853 = vrot.lane.b32.xlu0 %v11983_v16, %s9410_s27 }
 0x256   : > { %v3277_v11 = vrot.slane %v3269_v0, %v15611_v35  ;;  %v11993_v21 = vrot.slane %v3270_v17, %v15611_v35  ;;  %v11995_v29 = vpop.permute.xlu1 %1679  ;;  %v5669_v0 = vcombine.low %v11869_v57, %v11923_v36  ;;  %v12008_v17 = vrot.slane %v5717_v4, %v15611_v35 }
 0x257   : > { %15800 = vst [vmem:[#allocation214_spill] sm:$0xff] %v11995_v29  ;;  %v1678_v48 = vpop.permute.xlu0 %1677  ;;  %v12025_v4 = vrot.slane %v5685_v13, %v15611_v35  ;;  %v12028_v57 = vrot.slane %v5701_v55, %v15611_v35 }
 0x258   : > { %15799 = vst [vmem:[#allocation213_spill] sm:$0xff] %v11993_v21  ;;  %v3317_v1 = vcombine.low %v3261_v54, %v3277_v11  ;;  %v3318_v41 = vcombine.high %v3261_v54, %v3277_v11  ;;  %v3334_v2 = vcombine.high %v11989_v18, %v11993_v21  ;;  %1859 = vrot.lane.b32.xlu1 %v11237_v59, %s9410_s27  ;;  %15801 = vst [vmem:[#allocation215_spill] sm:$0xff] %v12008_v17 }
 0x259   : > { %1857 = vrot.lane.b32.xlu0 %v12010_v46, %s9410_s27  ;;  %v3300_v54 = vrot.slane %v3286_v7, %v9627_v19  ;;  %15805 = vst [vmem:[#allocation219_spill] sm:$0xff] %v12025_v4  ;;  %15806 = vst [vmem:[#allocation220_spill] sm:$0xff] %v12028_v57  ;;  %v15807_v7 = vld [vmem:[#allocation100_spill] sm:$0xff]  ;;  %v5765_v13 = vcombine.low %v12028_v57, %v12008_v17  ;;  %v15811_v57 = vcombine.high %v11883_v31, %v11896_v26 }
 0x25a   : > { %v12019_v11 = vrot.slane %v3317_v1, %v9627_v19  ;;  %v3332_v59 = vrot.slane %v3318_v41, %v9627_v19  ;;  %v12022_v45 = vpop.permute.xlu1 %1683  ;;  %v3348_v52 = vrot.slane %v3334_v2, %v9627_v19  ;;  %v12036_v41 = vrot.slane %v5669_v0, %v15611_v35 }
 0x25b   : > { %15804 = vst [vmem:[#allocation218_spill] sm:$0xff] %v12022_v45  ;;  %v1682_v36 = vpop.permute.xlu0 %1681  ;;  %v3316_v2 = vrot.slane %v3302_v8, %v9627_v19 }
 0x25c   : > { %15803 = vst [vmem:[#allocation217_spill] sm:$0xff] %v12019_v11  ;;  %1863 = vrot.lane.b32.xlu1 %v15807_v7, %s9410_s27  ;;  %v3351_v1 = vcombine.low %v3300_v54, %v3332_v59  ;;  %15808 = vst [vmem:[#allocation100_spill] sm:$0xff] %v12036_v41  ;;  %v3352_v55 = vcombine.high %v3300_v54, %v3332_v59  ;;  %v15810_v7 = vcombine.low %v11883_v31, %v11896_v26  ;;  %v15813_v54 = vld [vmem:[#allocation102_spill] sm:$0xff] }
 0x25d   : > { %1861 = vrot.lane.b32.xlu0 %v12040_v53, %s9410_s27  ;;  %v5733_v0 = vcombine.low %v12036_v41, %v12025_v4  ;;  %v3355_v8 = vcombine.low %v3316_v2, %v3348_v52  ;;  %v12062_v59 = vrot.slane %v5765_v13, %v9627_v19  ;;  %v12078_v41 = vld [vmem:[#allocation2 + $0xa] sm:$0xff]  ;;  %v3356_v4 = vcombine.high %v3316_v2, %v3348_v52 }
 0x25e   : > { %v12045_v18 = vpop.permute.xlu1 %1687  ;;  %v12050_v43 = vpack.i.bf16 %v3351_v1, %v15810_v7  ;;  %v12057_v17 = vpack.i.bf16 %v3352_v55, %v15811_v57  ;;  %v15816_v57 = vcombine.low %v11904_v22, %v11899_v51  ;;  %v15822_v52 = vcombine.high %v11904_v22, %v11899_v51 }
 0x25f   : > { %15809 = vst [vmem:[#allocation221_spill] sm:$0xff] %v12045_v18  ;;  %v1686_v21 = vpop.permute.xlu0 %1685  ;;  %15814 = vst [vmem:[#allocation102_spill] sm:$0xff] %v12062_v59  ;;  %v12076_v26 = vrot.slane %v5733_v0, %v9627_v19 }
 0x260   : > { %15812 = vst [vmem:[#allocation222_spill] sm:$0xff] %v12057_v17  ;;  %1867 = vrot.lane.b32.xlu1 %v15813_v54, %s9410_s27  ;;  %v3357_v9 = vcombine.low %v1678_v48, %v1686_v21  ;;  %v3358_v1 = vcombine.high %v1678_v48, %v1686_v21  ;;  %v12073_v31 = vpack.i.bf16 %v3355_v8, %v15816_v57  ;;  %v12103_v48 = vld [vmem:[#allocation2 + $0x22] sm:$0xff] }
 0x261   : > { %1865 = vrot.lane.b32.xlu0 %v12064_v49, %s9410_s27  ;;  %15818 = vst [vmem:[#allocation225_spill] sm:$0xff] %v12076_v26 }
 0x262   : > { %v12068_v7 = vpop.permute.xlu1 %1691  ;;  %15817 = vst [vmem:[#allocation224_spill] sm:$0xff] %v12073_v31  ;;  %v3365_v21 = vrot.slane %v3357_v9, %v15611_v35  ;;  %v12088_v0 = vrot.slane %v3358_v1, %v15611_v35  ;;  %v12099_v9 = vpack.i.bf16 %v3356_v4, %v15822_v52  ;;  %v12121_v52 = vld [vmem:[#allocation2 + $0x52] sm:$0xff] }
 0x263   : > { %15815 = vst [vmem:[#allocation223_spill] sm:$0xff] %v12068_v7  ;;  %v1690_v55 = vpop.permute.xlu0 %1689  ;;  %v5821_v22 = vcombine.low %v12022_v45, %v12068_v7 }
 0x264   : > { %v3373_v13 = vcombine.low %v1682_v36, %v1690_v55  ;;  %v3374_v54 = vcombine.high %v1682_v36, %v1690_v55  ;;  %1903 = vrot.lane.b32.xlu1 %v12078_v41, %s9411_s6  ;;  %15819 = vst [vmem:[#allocation226_spill] sm:$0xff] %v12088_v0  ;;  %15823 = vst [vmem:[#allocation229_spill] sm:$0xff] %v12099_v9 }
 0x265   : > { %1901 = vrot.lane.b32.xlu0 %v11789_v62, %s9411_s6  ;;  %v12134_v45 = vrot.slane %v5821_v22, %v15611_v35 }
 0x266   : > { %v3381_v8 = vrot.slane %v3373_v13, %v15611_v35  ;;  %v12092_v36 = vrot.slane %v3374_v54, %v15611_v35  ;;  %v12094_v57 = vpop.permute.xlu1 %1695  ;;  %v12111_v54 = vld [vmem:[#allocation2 + $0x3a] sm:$0xff] }
 0x267   : > { %15821 = vst [vmem:[#allocation228_spill] sm:$0xff] %v12094_v57  ;;  %v1694_v2 = vpop.permute.xlu0 %1693  ;;  %15827 = vst [vmem:[#allocation233_spill] sm:$0xff] %v12134_v45 }
 0x268   : > { %15820 = vst [vmem:[#allocation227_spill] sm:$0xff] %v12092_v36  ;;  %v3422_v62 = vcombine.high %v3365_v21, %v3381_v8  ;;  %v3438_v55 = vcombine.high %v12088_v0, %v12092_v36  ;;  %1907 = vrot.lane.b32.xlu1 %v12103_v48, %s9411_s6 }
 0x269   : > { %1905 = vrot.lane.b32.xlu0 %v11813_v14, %s9411_s6  ;;  %v5805_v14 = vcombine.low %v11995_v29, %v12045_v18  ;;  %v12138_v29 = vld [vmem:[#allocation2 + $0x6a] sm:$0xff] }
 0x26a   : > { %v12109_v1 = vpop.permute.xlu1 %1699 }
 0x26b   : > { %15824 = vst [vmem:[#allocation230_spill] sm:$0xff] %v12109_v1  ;;  %v1698_v13 = vpop.permute.xlu0 %1697 }
 0x26c   : > { %1911 = vrot.lane.b32.xlu1 %v12111_v54, %s9411_s6 }
 0x26d   : > { %1909 = vrot.lane.b32.xlu0 %v11821_v25, %s9411_s6 }
 0x26e   : > { %v12117_v51 = vpop.permute.xlu1 %1703 }
 0x26f   : > { %15825 = vst [vmem:[#allocation231_spill] sm:$0xff] %v12117_v51  ;;  %v1702_v4 = vpop.permute.xlu0 %1701  ;;  %v5837_v9 = vcombine.low %v12094_v57, %v12117_v51 }
 0x270   : > { %1915 = vrot.lane.b32.xlu1 %v12121_v52, %s9411_s6  ;;  %v3389_v25 = vcombine.low %v1694_v2, %v1702_v4  ;;  %v3390_v31 = vcombine.high %v1694_v2, %v1702_v4  ;;  %v3421_v2 = vcombine.low %v3365_v21, %v3381_v8 }
 0x271   : > { %1913 = vrot.lane.b32.xlu0 %v11835_v61, %s9411_s6  ;;  %v12143_v61 = vrot.slane %v5805_v14, %v15611_v35  ;;  %v12146_v4 = vrot.slane %v5837_v9, %v15611_v35 }
 0x272   : > { %v12131_v26 = vpop.permute.xlu1 %1707 }
 0x273   : > { %15826 = vst [vmem:[#allocation232_spill] sm:$0xff] %v12131_v26  ;;  %v5853_v7 = vcombine.low %v12109_v1, %v12131_v26  ;;  %v1706_v59 = vpop.permute.xlu0 %1705  ;;  %15828 = vst [vmem:[#allocation234_spill] sm:$0xff] %v12143_v61  ;;  %v5869_v8 = vcombine.low %v12143_v61, %v12134_v45  ;;  %v12221_v1 = vld [vmem:[#allocation2 + $0xb2] sm:$0xff] }
 0x274   : > { %v3405_v0 = vcombine.low %v1698_v13, %v1706_v59  ;;  %v3406_v36 = vcombine.high %v1698_v13, %v1706_v59  ;;  %1919 = vrot.lane.b32.xlu1 %v12138_v29, %s9411_s6  ;;  %15829 = vst [vmem:[#allocation235_spill] sm:$0xff] %v12146_v4  ;;  %v3397_v59 = vrot.slane %v3389_v25, %v15611_v35  ;;  %v12169_v25 = vld [vmem:[#allocation2 + $0x82] sm:$0xff]  ;;  %15841 = vst [vmem:[#allocation247_spill] sm:$0xff] %v12221_v1 }
 0x275   : > { %v12149_v22 = vrot.slane %v5853_v7, %v15611_v35  ;;  %1917 = vrot.lane.b32.xlu0 %v11857_v32, %s9411_s6  ;;  %v12155_v13 = vrot.slane %v3390_v31, %v15611_v35  ;;  %15834 = vst [vmem:[#allocation240_spill] sm:$0xff] %v12169_v25 }
 0x276   : > { %v3413_v57 = vrot.slane %v3405_v0, %v15611_v35  ;;  %v12159_v14 = vrot.slane %v3406_v36, %v15611_v35  ;;  %v12161_v21 = vpop.permute.xlu1 %1711  ;;  %v12174_v0 = vrot.slane %v3421_v2, %v9627_v19  ;;  %v12177_v36 = vrot.slane %v3422_v62, %v9627_v19 }
 0x277   : > { %15830 = vst [vmem:[#allocation236_spill] sm:$0xff] %v12149_v22  ;;  %15831 = vst [vmem:[#allocation237_spill] sm:$0xff] %v12155_v13  ;;  %v5901_v7 = vcombine.low %v12146_v4, %v12149_v22  ;;  %v1710_v9 = vpop.permute.xlu0 %1709  ;;  %v12196_v62 = vrot.slane %v5869_v8, %v9627_v19 }
 0x278   : > { %15832 = vst [vmem:[#allocation238_spill] sm:$0xff] %v12159_v14  ;;  %15833 = vst [vmem:[#allocation239_spill] sm:$0xff] %v12161_v21  ;;  %v3453_v32 = vcombine.low %v3397_v59, %v3413_v57  ;;  %v3454_v51 = vcombine.high %v3397_v59, %v3413_v57  ;;  %v3470_v31 = vcombine.high %v12155_v13, %v12159_v14  ;;  %1923 = vrot.lane.b32.xlu1 %v12169_v25, %s9411_s6  ;;  %v12247_v14 = vld [vmem:[#allocation2 + $0xe2] sm:$0xff]  ;;  %v12271_v25 = vld [vmem:[#allocation2 + $0x12a] sm:$0xff] }
 0x279   : > { %15835 = vst [vmem:[#allocation241_spill] sm:$0xff] %v12174_v0  ;;  %1921 = vrot.lane.b32.xlu0 %v11885_v20, %s9411_s6  ;;  %v12182_v61 = vrot.slane %v5901_v7, %v9627_v19  ;;  %15839 = vst [vmem:[#allocation245_spill] sm:$0xff] %v12196_v62  ;;  %v12199_v20 = vrot.slane %v3438_v55, %v9627_v19  ;;  %v12229_v7 = vld [vmem:[#allocation2 + $0xca] sm:$0xff] }
 0x27a   : > { %v12185_v57 = vrot.slane %v3453_v32, %v9627_v19  ;;  %v12188_v59 = vrot.slane %v3454_v51, %v9627_v19  ;;  %v12191_v45 = vrot.slane %v3470_v31, %v9627_v19  ;;  %v12193_v2 = vpop.permute.xlu1 %1715  ;;  %v12203_v32 = vld [vmem:[#allocation2 + $0x9a] sm:$0xff]  ;;  %15843 = vst [vmem:[#allocation249_spill] sm:$0xff] %v12229_v7  ;;  %15847 = vst [vmem:[#allocation253_spill] sm:$0xff] %v12247_v14 }
 0x27b   : > { %15836 = vst [vmem:[#allocation242_spill] sm:$0xff] %v12182_v61  ;;  %15838 = vst [vmem:[#allocation244_spill] sm:$0xff] %v12193_v2  ;;  %v1714_v4 = vpop.permute.xlu0 %1713  ;;  %v12263_v61 = vld [vmem:[#allocation2 + $0x112] sm:$0xff] }
 0x27c   : > { %15837 = vst [vmem:[#allocation243_spill] sm:$0xff] %v12185_v57  ;;  %1927 = vrot.lane.b32.xlu1 %v12203_v32, %s9411_s6 }
 0x27d   : > { %1925 = vrot.lane.b32.xlu0 %v11915_v30, %s9411_s6 }
 0x27e   : > { %v12213_v8 = vpop.permute.xlu1 %1719 }
 0x27f   : > { %15840 = vst [vmem:[#allocation246_spill] sm:$0xff] %v12213_v8  ;;  %v1718_v18 = vpop.permute.xlu0 %1717 }
 0x280   : > { %1931 = vrot.lane.b32.xlu1 %v12221_v1, %s9411_s6  ;;  %v3493_v30 = vcombine.low %v1710_v9, %v1718_v18  ;;  %v3494_v31 = vcombine.high %v1710_v9, %v1718_v18 }
 0x281   : > { %1929 = vrot.lane.b32.xlu0 %v11931_v60, %s9411_s6  ;;  %v15975_v58 = vld [vmem:[#allocation249_spill] sm:$0xff] }
 0x282   : > { %v12227_v51 = vpop.permute.xlu1 %1723  ;;  %v3501_v22 = vrot.slane %v3493_v30, %v15611_v35  ;;  %v12237_v62 = vrot.slane %v3494_v31, %v15611_v35 }
 0x283   : > { %15842 = vst [vmem:[#allocation248_spill] sm:$0xff] %v12227_v51  ;;  %v1722_v55 = vpop.permute.xlu0 %1721 }
 0x284   : > { %v3509_v26 = vcombine.low %v1714_v4, %v1722_v55  ;;  %v3510_v13 = vcombine.high %v1714_v4, %v1722_v55  ;;  %1935 = vrot.lane.b32.xlu1 %v12229_v7, %s9411_s6  ;;  %15844 = vst [vmem:[#allocation250_spill] sm:$0xff] %v12237_v62 }
 0x285   : > { %1933 = vrot.lane.b32.xlu0 %v11939_v5, %s9411_s6 }
 0x286   : > { %v3517_v60 = vrot.slane %v3509_v26, %v15611_v35  ;;  %v12241_v18 = vrot.slane %v3510_v13, %v15611_v35  ;;  %v12243_v9 = vpop.permute.xlu1 %1727  ;;  %v12255_v13 = vld [vmem:[#allocation2 + $0xfa] sm:$0xff] }
 0x287   : > { %15846 = vst [vmem:[#allocation252_spill] sm:$0xff] %v12243_v9  ;;  %v1726_v4 = vpop.permute.xlu0 %1725  ;;  %15849 = vst [vmem:[#allocation255_spill] sm:$0xff] %v12255_v13 }
 0x288   : > { %15845 = vst [vmem:[#allocation251_spill] sm:$0xff] %v12241_v18  ;;  %v3558_v55 = vcombine.high %v3501_v22, %v3517_v60  ;;  %1939 = vrot.lane.b32.xlu1 %v12247_v14, %s9411_s6 }
 0x289   : > { %1937 = vrot.lane.b32.xlu0 %v11957_v37, %s9411_s6 }
 0x28a   : > { %v12253_v5 = vpop.permute.xlu1 %1731 }
 0x28b   : > { %15848 = vst [vmem:[#allocation254_spill] sm:$0xff] %v12253_v5  ;;  %v1730_v26 = vpop.permute.xlu0 %1729 }
 0x28c   : > { %1943 = vrot.lane.b32.xlu1 %v12255_v13, %s9411_s6 }
 0x28d   : > { %1941 = vrot.lane.b32.xlu0 %v11965_v28, %s9411_s6  ;;  %v3557_v28 = vcombine.low %v3501_v22, %v3517_v60  ;;  %v5957_v22 = vcombine.low %v12193_v2, %v12227_v51 }
 0x28e   : > { %v12261_v31 = vpop.permute.xlu1 %1735  ;;  %v15974_v12 = vld [vmem:[#allocation255_spill] sm:$0xff] }
 0x28f   : > { %15850 = vst [vmem:[#allocation256_spill] sm:$0xff] %v12261_v31  ;;  %v1734_v30 = vpop.permute.xlu0 %1733  ;;  %v5973_v60 = vcombine.low %v12243_v9, %v12261_v31  ;;  %v12307_v9 = vrot.slane %v3557_v28, %v9627_v19  ;;  %v12324_v28 = vld [vmem:[#allocation2 + $0x15a] sm:$0xff] }
 0x290   : > { %1947 = vrot.lane.b32.xlu1 %v12263_v61, %s9411_s6  ;;  %v3525_v37 = vcombine.low %v1726_v4, %v1734_v30  ;;  %v3526_v17 = vcombine.high %v1726_v4, %v1734_v30 }
 0x291   : > { %1945 = vrot.lane.b32.xlu0 %v11973_v33, %s9411_s6  ;;  %15856 = vst [vmem:[#allocation262_spill] sm:$0xff] %v12307_v9 }
 0x292   : > { %v12269_v24 = vpop.permute.xlu1 %1739  ;;  %v3533_v33 = vrot.slane %v3525_v37, %v15611_v35  ;;  %v12281_v4 = vrot.slane %v3526_v17, %v15611_v35  ;;  %v12295_v37 = vld [vmem:[#allocation2 + $0x142] sm:$0xff] }
 0x293   : > { %15851 = vst [vmem:[#allocation257_spill] sm:$0xff] %v12269_v24  ;;  %v1738_v14 = vpop.permute.xlu0 %1737  ;;  %v5989_v1 = vcombine.low %v12253_v5, %v12269_v24 }
 0x294   : > { %v3541_v7 = vcombine.low %v1730_v26, %v1738_v14  ;;  %v3542_v13 = vcombine.high %v1730_v26, %v1738_v14  ;;  %1951 = vrot.lane.b32.xlu1 %v12271_v25, %s9411_s6  ;;  %15852 = vst [vmem:[#allocation258_spill] sm:$0xff] %v12281_v4 }
 0x295   : > { %1949 = vrot.lane.b32.xlu0 %v11983_v16, %s9411_s6 }
 0x296   : > { %v3549_v30 = vrot.slane %v3541_v7, %v15611_v35  ;;  %v12285_v14 = vrot.slane %v3542_v13, %v15611_v35  ;;  %v12287_v26 = vpop.permute.xlu1 %1807  ;;  %v5941_v7 = vcombine.low %v12161_v21, %v12213_v8  ;;  %v12302_v13 = vrot.slane %v5989_v1, %v15611_v35 }
 0x297   : > { %15854 = vst [vmem:[#allocation260_spill] sm:$0xff] %v12287_v26  ;;  %v1806_v5 = vpop.permute.xlu0 %1805  ;;  %v12317_v21 = vrot.slane %v5957_v22, %v15611_v35  ;;  %v12320_v1 = vrot.slane %v5973_v60, %v15611_v35 }
 0x298   : > { %15853 = vst [vmem:[#allocation259_spill] sm:$0xff] %v12285_v14  ;;  %v3589_v16 = vcombine.low %v3533_v33, %v3549_v30  ;;  %v3590_v24 = vcombine.high %v3533_v33, %v3549_v30  ;;  %v3606_v17 = vcombine.high %v12281_v4, %v12285_v14  ;;  %1955 = vrot.lane.b32.xlu1 %v12295_v37, %s9411_s6  ;;  %15855 = vst [vmem:[#allocation261_spill] sm:$0xff] %v12302_v13 }
 0x299   : > { %1953 = vrot.lane.b32.xlu0 %v12010_v46, %s9411_s6  ;;  %v3572_v33 = vrot.slane %v3558_v55, %v9627_v19  ;;  %15859 = vst [vmem:[#allocation265_spill] sm:$0xff] %v12317_v21  ;;  %15860 = vst [vmem:[#allocation266_spill] sm:$0xff] %v12320_v1  ;;  %v6037_v22 = vcombine.low %v12320_v1, %v12302_v13  ;;  %v2534_v46 = vcombine.high %v11493_v56, %v11502_v47  ;;  %v12356_v47 = vld [vmem:[#allocation2 + $0x172] sm:$0xff] }
 0x29a   : > { %v12311_v30 = vrot.slane %v3589_v16, %v9627_v19  ;;  %v3604_v31 = vrot.slane %v3590_v24, %v9627_v19  ;;  %v12314_v2 = vpop.permute.xlu1 %1811  ;;  %v12329_v24 = vrot.slane %v5941_v7, %v15611_v35  ;;  %v3620_v60 = vrot.slane %v3606_v17, %v9627_v19 }
 0x29b   : > { %15858 = vst [vmem:[#allocation264_spill] sm:$0xff] %v12314_v2  ;;  %v1810_v8 = vpop.permute.xlu0 %1809  ;;  %v15863_v4 = vcombine.high %v12177_v36, %v12188_v59  ;;  %v15864_v7 = vcombine.low %v12177_v36, %v12188_v59  ;;  %v12363_v36 = vrot.slane %v6037_v22, %v9627_v19  ;;  %v15867_v59 = vld [vmem:[#allocation79_spill] sm:$0xff] }
 0x29c   : > { %15857 = vst [vmem:[#allocation263_spill] sm:$0xff] %v12311_v30  ;;  %1959 = vrot.lane.b32.xlu1 %v12324_v28, %s9411_s6  ;;  %v3624_v55 = vcombine.high %v3572_v33, %v3604_v31  ;;  %v3623_v16 = vcombine.low %v3572_v33, %v3604_v31  ;;  %15861 = vst [vmem:[#allocation267_spill] sm:$0xff] %v12329_v24  ;;  %v6005_v17 = vcombine.low %v12329_v24, %v12317_v21  ;;  %v15872_v22 = vld [vmem:[#allocation75_spill] sm:$0xff] }
 0x29d   : > { %1957 = vrot.lane.b32.xlu0 %v12040_v53, %s9411_s6  ;;  %v15865_v53 = vcombine.high %v12237_v62, %v12241_v18  ;;  %15866 = vst [vmem:[#allocation269_spill] sm:$0xff] %v12363_v36 }
 0x29e   : > { %v12336_v51 = vpop.permute.xlu1 %1815  ;;  %v12343_v31 = vpack.i.bf16 %v3624_v55, %v15863_v4  ;;  %v12348_v33 = vpack.i.bf16 %v3623_v16, %v15864_v7  ;;  %v2398_v4 = vcombine.high %v11307_v40, %v11330_v44  ;;  %v15868_v55 = vld [vmem:[#allocation78_spill] sm:$0xff]  ;;  %v12372_v18 = vrot.slane %v6005_v17, %v9627_v19  ;;  %v15871_v40 = vld [vmem:[#allocation76_spill] sm:$0xff] }
 0x29f   : > { %15862 = vst [vmem:[#allocation268_spill] sm:$0xff] %v12336_v51  ;;  %v3588_v1 = vrot.slane %v15865_v53, %v9627_v19  ;;  %v1814_v13 = vpop.permute.xlu0 %1813  ;;  %v3078_v16 = vcombine.high %v15868_v55, %v15867_v59  ;;  %v2942_v14 = vcombine.high %v15872_v22, %v15871_v40  ;;  %v15873_v59 = vcombine.high %v12199_v20, %v12191_v45 }
 0x2a0   : > { %1963 = vrot.lane.b32.xlu1 %v12356_v47, %s9411_s6  ;;  %v3901_v53 = vcombine.low %v1806_v5, %v1814_v13  ;;  %v3902_v56 = vcombine.high %v1806_v5, %v1814_v13  ;;  %v8492_v21 = vpack.i.bf16 %v2534_v46, %v2398_v4  ;;  %15870 = vst [vmem:[#allocation271_spill] sm:$0xff] %v12372_v18  ;;  %v9236_v18 = vld [vmem:[#allocation2 + $0x51] sm:$0xff] }
 0x2a1   : > { %1961 = vrot.lane.b32.xlu0 %v12064_v49, %s9411_s6  ;;  %v3628_v7 = vcombine.high %v3588_v1, %v3620_v60  ;;  %v3627_v62 = vcombine.low %v3588_v1, %v3620_v60  ;;  %v2806_v49 = vcombine.high %v11729_v15, %v11733_v63  ;;  %v15875_v1 = vcombine.low %v12199_v20, %v12191_v45  ;;  %v15877_v60 = vld [vmem:[#allocation77_spill] sm:$0xff] }
 0x2a2   : > { %v12369_v24 = vpop.permute.xlu1 %1819  ;;  %v8502_v17 = vpack.i.bf16 %v3078_v16, %v2942_v14  ;;  %v2670_v4 = vcombine.high %v11619_v34, %v11629_v39 }
 0x2a3   : > { %15869 = vst [vmem:[#allocation270_spill] sm:$0xff] %v12369_v24  ;;  %v1818_v44 = vpop.permute.xlu0 %1817  ;;  %v12381_v55 = vpack.i.bf16 %v3628_v7, %v15873_v59  ;;  %v12387_v46 = vpack.i.bf16 %v3627_v62, %v15875_v1  ;;  %v3622_v59 = vcombine.high %v12307_v9, %v12311_v30  ;;  %v3350_v7 = vcombine.high %v12015_v10, %v12019_v11  ;;  %v15885_v30 = vld [vmem:[#allocation80_spill] sm:$0xff] }
 0x2a4   : > { %v3917_v5 = vcombine.low %v1810_v8, %v1818_v44  ;;  %v3918_v13 = vcombine.high %v1810_v8, %v1818_v44  ;;  %8493 = vrot.lane.b32.xlu1 %v8492_v21, %s9402_s20  ;;  %v3909_v21 = vrot.slane %v3901_v53, %v15611_v35  ;;  %v12399_v8 = vrot.slane %v3902_v56, %v15611_v35  ;;  %v15882_v44 = vld [vmem:[#allocation82_spill] sm:$0xff] }
 0x2a5   : > { %15874 = vst [vmem:[#allocation272_spill] sm:$0xff] %v12381_v55  ;;  %15876 = vst [vmem:[#allocation273_spill] sm:$0xff] %v12387_v46  ;;  %8488 = vrot.lane.b32.xlu0 %v15877_v60, %s9402_s20  ;;  %v8497_v16 = vpack.i.bf16 %v2806_v49, %v2670_v4  ;;  %v3486_v56 = vcombine.high %v12174_v0, %v12185_v57  ;;  %v3214_v53 = vcombine.high %v11880_v50, %v11893_v38  ;;  %v15883_v46 = vld [vmem:[#allocation83_spill] sm:$0xff] }
 0x2a6   : > { %15878 = vst [vmem:[#allocation77_spill] sm:$0xff] %v12399_v8  ;;  %v3925_v45 = vrot.slane %v3917_v5, %v15611_v35  ;;  %v12403_v62 = vrot.slane %v3918_v13, %v15611_v35  ;;  %v12405_v20 = vpop.permute.xlu1 %1823  ;;  %v3894_v55 = vcombine.high %v15883_v46, %v15882_v44 }
 0x2a7   : > { %15880 = vst [vmem:[#allocation275_spill] sm:$0xff] %v12405_v20  ;;  %v1822_v14 = vpop.permute.xlu0 %1821  ;;  %v8512_v49 = vpack.i.bf16 %v3622_v59, %v3486_v56  ;;  %v8507_v4 = vpack.i.bf16 %v3350_v7, %v3214_v53  ;;  %v6349_v59 = vcombine.low %v12287_v26, %v12336_v51 }
 0x2a8   : > { %15879 = vst [vmem:[#allocation274_spill] sm:$0xff] %v12403_v62  ;;  %v3966_v1 = vcombine.high %v3909_v21, %v3925_v45  ;;  %v3982_v60 = vcombine.high %v12399_v8, %v12403_v62  ;;  %8503 = vrot.lane.b32.xlu1 %v8502_v17, %s9402_s20  ;;  %v15884_v17 = vld [vmem:[#allocation81_spill] sm:$0xff]  ;;  %v3965_v46 = vcombine.low %v3909_v21, %v3925_v45 }
 0x2a9   : > { %8498 = vrot.lane.b32.xlu0 %v8497_v16, %s9402_s20  ;;  %v3758_v9 = vcombine.high %v15885_v30, %v15884_v17  ;;  %v6365_v16 = vcombine.low %v12314_v2, %v12369_v24  ;;  %v12442_v44 = vrot.slane %v6349_v59, %v15611_v35  ;;  %v9233_v24 = vld [vmem:[#allocation2 + $0x9] sm:$0xff] }
 0x2aa   : > { %v12417_v5 = vpop.permute.xlu1 %1827 }
 0x2ab   : > { %15881 = vst [vmem:[#allocation276_spill] sm:$0xff] %v12417_v5  ;;  %v1826_v13 = vpop.permute.xlu0 %1825  ;;  %v8517_v38 = vpack.i.bf16 %v3894_v55, %v3758_v9  ;;  %15889 = vst [vmem:[#allocation280_spill] sm:$0xff] %v12442_v44 }
 0x2ac   : > { %8513 = vrot.lane.b32.xlu1 %v8512_v49, %s9402_s20 }
 0x2ad   : > { %8508 = vrot.lane.b32.xlu0 %v8507_v4, %s9402_s20  ;;  %v12437_v4 = vrot.slane %v6365_v16, %v15611_v35 }
 0x2ae   : > { %v12425_v57 = vpop.permute.xlu1 %1831 }
 0x2af   : > { %15886 = vst [vmem:[#allocation277_spill] sm:$0xff] %v12425_v57  ;;  %v1830_v0 = vpop.permute.xlu0 %1829  ;;  %v6381_v7 = vcombine.low %v12405_v20, %v12425_v57  ;;  %15888 = vst [vmem:[#allocation279_spill] sm:$0xff] %v12437_v4  ;;  %v6413_v21 = vcombine.low %v12442_v44, %v12437_v4 }
 0x2b0   : > { %v3933_v56 = vcombine.low %v1822_v14, %v1830_v0  ;;  %v3934_v53 = vcombine.high %v1822_v14, %v1830_v0 }
 0x2b1   : > { %8518 = vrot.lane.b32.xlu0 %v8517_v38, %s9402_s20  ;;  %v12445_v50 = vrot.slane %v6381_v7, %v15611_v35 }
 0x2b2   : > { %v12434_v49 = vpop.permute.xlu1 %1835  ;;  %v3941_v0 = vrot.slane %v3933_v56, %v15611_v35  ;;  %v12452_v14 = vrot.slane %v3934_v53, %v15611_v35  ;;  %v12467_v56 = vrot.slane %v3965_v46, %v9627_v19  ;;  %v12470_v53 = vrot.slane %v3966_v1, %v9627_v19 }
 0x2b3   : > { %15887 = vst [vmem:[#allocation278_spill] sm:$0xff] %v12434_v49  ;;  %v6397_v17 = vcombine.low %v12417_v5, %v12434_v49  ;;  %v1834_v30 = vpop.permute.xlu0 %1833  ;;  %15890 = vst [vmem:[#allocation281_spill] sm:$0xff] %v12445_v50  ;;  %v12487_v46 = vrot.slane %v6413_v21, %v9627_v19  ;;  %v12490_v1 = vrot.slane %v3982_v60, %v9627_v19 }
 0x2b4   : > { %v3949_v9 = vcombine.low %v1826_v13, %v1834_v30  ;;  %v3950_v55 = vcombine.high %v1826_v13, %v1834_v30  ;;  %15892 = vst [vmem:[#allocation283_spill] sm:$0xff] %v12452_v14  ;;  %15895 = vst [vmem:[#allocation286_spill] sm:$0xff] %v12467_v56 }
 0x2b5   : > { %v12448_v38 = vrot.slane %v6397_v17, %v15611_v35  ;;  %15899 = vst [vmem:[#allocation290_spill] sm:$0xff] %v12487_v46 }
 0x2b6   : > { %v3957_v16 = vrot.slane %v3949_v9, %v15611_v35  ;;  %v12456_v11 = vrot.slane %v3950_v55, %v15611_v35  ;;  %v12458_v30 = vpop.permute.xlu1 %1839 }
 0x2b7   : > { %15891 = vst [vmem:[#allocation282_spill] sm:$0xff] %v12448_v38  ;;  %15894 = vst [vmem:[#allocation285_spill] sm:$0xff] %v12458_v30  ;;  %v6445_v45 = vcombine.low %v12445_v50, %v12448_v38  ;;  %v1838_v13 = vpop.permute.xlu0 %1837 }
 0x2b8   : > { %15893 = vst [vmem:[#allocation284_spill] sm:$0xff] %v12456_v11  ;;  %v3997_v17 = vcombine.low %v3941_v0, %v3957_v16  ;;  %v3998_v59 = vcombine.high %v3941_v0, %v3957_v16  ;;  %v4014_v7 = vcombine.high %v12452_v14, %v12456_v11  ;;  %v9240_v14 = vld [vmem:[#allocation2 + $0xb1] sm:$0xff] }
 0x2b9   : > { %v12473_v9 = vrot.slane %v6445_v45, %v9627_v19 }
 0x2ba   : > { %v12476_v55 = vrot.slane %v3997_v17, %v9627_v19  ;;  %v12479_v10 = vrot.slane %v3998_v59, %v9627_v19  ;;  %v12482_v0 = vrot.slane %v4014_v7, %v9627_v19  ;;  %v12484_v16 = vpop.permute.xlu1 %1843 }
 0x2bb   : > { %15896 = vst [vmem:[#allocation287_spill] sm:$0xff] %v12473_v9  ;;  %15898 = vst [vmem:[#allocation289_spill] sm:$0xff] %v12484_v16  ;;  %v1842_v39 = vpop.permute.xlu0 %1841 }
 0x2bc   : > { %15897 = vst [vmem:[#allocation288_spill] sm:$0xff] %v12476_v55 }
 0x2be   : > { %v12498_v7 = vpop.permute.xlu1 %1847 }
 0x2bf   : > { %15900 = vst [vmem:[#allocation291_spill] sm:$0xff] %v12498_v7  ;;  %v1846_v63 = vpop.permute.xlu0 %1845 }
 0x2c0   : > { %v4037_v15 = vcombine.low %v1838_v13, %v1846_v63  ;;  %v4038_v45 = vcombine.high %v1838_v13, %v1846_v63 }
 0x2c2   : > { %v12506_v40 = vpop.permute.xlu1 %1851  ;;  %v4045_v59 = vrot.slane %v4037_v15, %v15611_v35  ;;  %v12510_v38 = vrot.slane %v4038_v45, %v15611_v35 }
 0x2c3   : > { %15901 = vst [vmem:[#allocation292_spill] sm:$0xff] %v12506_v40  ;;  %v1850_v17 = vpop.permute.xlu0 %1849 }
 0x2c4   : > { %v4053_v22 = vcombine.low %v1842_v39, %v1850_v17  ;;  %v4054_v50 = vcombine.high %v1842_v39, %v1850_v17  ;;  %15902 = vst [vmem:[#allocation293_spill] sm:$0xff] %v12510_v38 }
 0x2c6   : > { %v4061_v34 = vrot.slane %v4053_v22, %v15611_v35  ;;  %v12514_v21 = vrot.slane %v4054_v50, %v15611_v35  ;;  %v12516_v44 = vpop.permute.xlu1 %1855 }
 0x2c7   : > { %15904 = vst [vmem:[#allocation295_spill] sm:$0xff] %v12516_v44  ;;  %v1854_v60 = vpop.permute.xlu0 %1853 }
 0x2c8   : > { %15903 = vst [vmem:[#allocation294_spill] sm:$0xff] %v12514_v21  ;;  %v4102_v46 = vcombine.high %v4045_v59, %v4061_v34  ;;  %v4118_v63 = vcombine.high %v12510_v38, %v12514_v21  ;;  %v4101_v57 = vcombine.low %v4045_v59, %v4061_v34  ;;  %v9238_v38 = vld [vmem:[#allocation2 + $0x99] sm:$0xff] }
 0x2ca   : > { %v12520_v13 = vpop.permute.xlu1 %1859 }
 0x2cb   : > { %15905 = vst [vmem:[#allocation296_spill] sm:$0xff] %v12520_v13  ;;  %v1858_v39 = vpop.permute.xlu0 %1857 }
 0x2ce   : > { %v12522_v17 = vpop.permute.xlu1 %1863 }
 0x2cf   : > { %15906 = vst [vmem:[#allocation297_spill] sm:$0xff] %v12522_v17  ;;  %v1862_v15 = vpop.permute.xlu0 %1861  ;;  %v6517_v34 = vcombine.low %v12516_v44, %v12522_v17 }
 0x2d0   : > { %v4069_v45 = vcombine.low %v1854_v60, %v1862_v15  ;;  %v4070_v9 = vcombine.high %v1854_v60, %v1862_v15  ;;  %v6501_v15 = vcombine.low %v12484_v16, %v12506_v40 }
 0x2d2   : > { %v12524_v4 = vpop.permute.xlu1 %1867  ;;  %v4077_v51 = vrot.slane %v4069_v45, %v15611_v35  ;;  %v12530_v5 = vrot.slane %v4070_v9, %v15611_v35 }
 0x2d3   : > { %15907 = vst [vmem:[#allocation298_spill] sm:$0xff] %v12524_v4  ;;  %v1866_v22 = vpop.permute.xlu0 %1865  ;;  %v6533_v26 = vcombine.low %v12520_v13, %v12524_v4  ;;  %v4116_v13 = vrot.slane %v4102_v46, %v9627_v19 }
 0x2d4   : > { %v4085_v50 = vcombine.low %v1858_v39, %v1866_v22  ;;  %v4086_v20 = vcombine.high %v1858_v39, %v1866_v22  ;;  %15908 = vst [vmem:[#allocation299_spill] sm:$0xff] %v12530_v5  ;;  %v6485_v22 = vcombine.low %v12458_v30, %v12498_v7  ;;  %v12565_v30 = vrot.slane %v6517_v34, %v15611_v35 }
 0x2d6   : > { %v4093_v49 = vrot.slane %v4085_v50, %v15611_v35  ;;  %v12534_v2 = vrot.slane %v4086_v20, %v15611_v35  ;;  %v12536_v60 = vpop.permute.xlu1 %1903  ;;  %v12549_v20 = vrot.slane %v6533_v26, %v15611_v35  ;;  %v12552_v50 = vrot.slane %v4101_v57, %v9627_v19  ;;  %15916 = vst [vmem:[#allocation307_spill] sm:$0xff] %v12565_v30 }
 0x2d7   : > { %15910 = vst [vmem:[#allocation301_spill] sm:$0xff] %v12536_v60  ;;  %v12542_v59 = vpop.permute.xlu0 %1901  ;;  %v4030_v57 = vcombine.high %v12467_v56, %v12476_v55  ;;  %v12574_v4 = vrot.slane %v6485_v22, %v15611_v35  ;;  %v15919_v55 = vcombine.high %v12470_v53, %v12479_v10  ;;  %v4132_v22 = vrot.slane %v4118_v63, %v9627_v19 }
 0x2d8   : > { %15909 = vst [vmem:[#allocation300_spill] sm:$0xff] %v12534_v2  ;;  %v4133_v39 = vcombine.low %v4077_v51, %v4093_v49  ;;  %v4134_v45 = vcombine.high %v4077_v51, %v4093_v49  ;;  %v4150_v9 = vcombine.high %v12530_v5, %v12534_v2  ;;  %15911 = vst [vmem:[#allocation302_spill] sm:$0xff] %v12549_v20 }
 0x2d9   : > { %15912 = vst [vmem:[#allocation303_spill] sm:$0xff] %v12552_v50  ;;  %v12562_v49 = vrot.slane %v6501_v15, %v15611_v35  ;;  %15917 = vst [vmem:[#allocation308_spill] sm:$0xff] %v12574_v4  ;;  %v6581_v15 = vcombine.low %v12565_v30, %v12549_v20 }
 0x2da   : > { %v12556_v44 = vrot.slane %v4133_v39, %v9627_v19  ;;  %v4148_v17 = vrot.slane %v4134_v45, %v9627_v19  ;;  %v12559_v51 = vpop.permute.xlu1 %1907  ;;  %v4164_v34 = vrot.slane %v4150_v9, %v9627_v19 }
 0x2db   : > { %15914 = vst [vmem:[#allocation305_spill] sm:$0xff] %v12559_v51  ;;  %15915 = vst [vmem:[#allocation306_spill] sm:$0xff] %v12562_v49  ;;  %v1906_v26 = vpop.permute.xlu0 %1905  ;;  %v12596_v9 = vrot.slane %v6581_v15, %v9627_v19  ;;  %v15927_v15 = vcombine.low %v12490_v1, %v12482_v0 }
 0x2dc   : > { %15913 = vst [vmem:[#allocation304_spill] sm:$0xff] %v12556_v44  ;;  %v4166_v39 = vcombine.high %v12552_v50, %v12556_v44  ;;  %v4168_v7 = vcombine.high %v4116_v13, %v4148_v17  ;;  %v4167_v45 = vcombine.low %v4116_v13, %v4148_v17  ;;  %v15920_v44 = vcombine.low %v12470_v53, %v12479_v10 }
 0x2dd   : > { %v6549_v17 = vcombine.low %v12574_v4, %v12562_v49  ;;  %15921 = vst [vmem:[#allocation310_spill] sm:$0xff] %v12596_v9  ;;  %v15924_v53 = vcombine.high %v12490_v1, %v12482_v0 }
 0x2de   : > { %v12579_v16 = vpop.permute.xlu1 %1911  ;;  %v8522_v40 = vpack.i.bf16 %v4166_v39, %v4030_v57  ;;  %v12584_v46 = vpack.i.bf16 %v4168_v7, %v15919_v55  ;;  %v12589_v13 = vpack.i.bf16 %v4167_v45, %v15920_v44  ;;  %v4172_v57 = vcombine.high %v4132_v22, %v4164_v34 }
 0x2df   : > { %15918 = vst [vmem:[#allocation309_spill] sm:$0xff] %v12579_v16  ;;  %v1910_v50 = vpop.permute.xlu0 %1909  ;;  %v4171_v39 = vcombine.low %v4132_v22, %v4164_v34  ;;  %v12602_v10 = vrot.slane %v6549_v17, %v9627_v19 }
 0x2e0   : > { %8523 = vrot.lane.b32.xlu1 %v8522_v40, %s9402_s20  ;;  %v4174_v55 = vcombine.high %v12542_v59, %v1910_v50  ;;  %v12607_v63 = vpack.i.bf16 %v4172_v57, %v15924_v53  ;;  %v15926_v40 = vld [vmem:[#allocation84_spill] sm:$0xff] }
 0x2e1   : > { %15923 = vst [vmem:[#allocation312_spill] sm:$0xff] %v12602_v10  ;;  %v12614_v56 = vpack.i.bf16 %v4171_v39, %v15927_v15 }
 0x2e2   : > { %v12599_v7 = vpop.permute.xlu1 %1915  ;;  %15925 = vst [vmem:[#allocation313_spill] sm:$0xff] %v12607_v63  ;;  %v12619_v17 = vrot.slane %v4174_v55, %v15611_v35 }
 0x2e3   : > { %15922 = vst [vmem:[#allocation311_spill] sm:$0xff] %v12599_v7  ;;  %v1914_v44 = vpop.permute.xlu0 %1913  ;;  %15928 = vst [vmem:[#allocation84_spill] sm:$0xff] %v12614_v56  ;;  %v6637_v34 = vcombine.low %v12559_v51, %v12599_v7  ;;  %v15934_v56 = vld [vmem:[#allocation85_spill] sm:$0xff] }
 0x2e4   : > { %v4190_v45 = vcombine.high %v1906_v26, %v1914_v44  ;;  %8533 = vrot.lane.b32.xlu1 %v15926_v40, %s9401_s18  ;;  %15929 = vst [vmem:[#allocation314_spill] sm:$0xff] %v12619_v17  ;;  %v4189_v55 = vcombine.low %v1906_v26, %v1914_v44 }
 0x2e5   : > { %v12656_v51 = vrot.slane %v6637_v34, %v15611_v35 }
 0x2e6   : > { %v12622_v22 = vrot.slane %v4190_v45, %v15611_v35  ;;  %v12624_v57 = vpop.permute.xlu1 %1919  ;;  %v4173_v45 = vcombine.low %v12542_v59, %v1910_v50  ;;  %v12644_v63 = vrot.slane %v4189_v55, %v15611_v35 }
 0x2e7   : > { %15931 = vst [vmem:[#allocation316_spill] sm:$0xff] %v12624_v57  ;;  %v1918_v53 = vpop.permute.xlu0 %1917  ;;  %15936 = vst [vmem:[#allocation319_spill] sm:$0xff] %v12656_v51 }
 0x2e8   : > { %15930 = vst [vmem:[#allocation315_spill] sm:$0xff] %v12622_v22  ;;  %v4254_v40 = vcombine.high %v12619_v17, %v12622_v22  ;;  %8543 = vrot.lane.b32.xlu1 %v11761_v23, %s9401_s18  ;;  %v6621_v23 = vcombine.low %v12536_v60, %v12579_v16  ;;  %v12651_v59 = vrot.slane %v4173_v45, %v15611_v35  ;;  %v9234_v16 = vld [vmem:[#allocation2 + $0x39] sm:$0xff] }
 0x2ea   : > { %v12630_v0 = vpop.permute.xlu1 %1923  ;;  %v12659_v60 = vrot.slane %v6621_v23, %v15611_v35 }
 0x2eb   : > { %15932 = vst [vmem:[#allocation317_spill] sm:$0xff] %v12630_v0  ;;  %v1922_v1 = vpop.permute.xlu0 %1921 }
 0x2ec   : > { %8553 = vrot.lane.b32.xlu1 %v12050_v43, %s9401_s18  ;;  %15937 = vst [vmem:[#allocation320_spill] sm:$0xff] %v12659_v60 }
 0x2ee   : > { %v12634_v39 = vpop.permute.xlu1 %1927 }
 0x2ef   : > { %15933 = vst [vmem:[#allocation318_spill] sm:$0xff] %v12634_v39  ;;  %v1926_v15 = vpop.permute.xlu0 %1925  ;;  %v6653_v43 = vcombine.low %v12624_v57, %v12634_v39 }
 0x2f0   : > { %8563 = vrot.lane.b32.xlu1 %v15934_v56, %s9401_s18  ;;  %v4205_v26 = vcombine.low %v1918_v53, %v1926_v15  ;;  %v4206_v44 = vcombine.high %v1918_v53, %v1926_v15  ;;  %v4237_v53 = vcombine.low %v12651_v59, %v12644_v63 }
 0x2f1   : > { %v12664_v15 = vrot.slane %v6653_v43, %v15611_v35 }
 0x2f2   : > { %v12648_v10 = vpop.permute.xlu1 %1931  ;;  %v12670_v57 = vrot.slane %v4205_v26, %v15611_v35  ;;  %v12673_v34 = vrot.slane %v4206_v44, %v15611_v35 }
 0x2f3   : > { %15935 = vst [vmem:[#allocation85_spill] sm:$0xff] %v12648_v10  ;;  %v6669_v50 = vcombine.low %v12630_v0, %v12648_v10  ;;  %v1930_v56 = vpop.permute.xlu0 %1929  ;;  %15938 = vst [vmem:[#allocation321_spill] sm:$0xff] %v12664_v15 }
 0x2f4   : > { %v4221_v7 = vcombine.low %v1922_v1, %v1930_v56  ;;  %v4222_v55 = vcombine.high %v1922_v1, %v1930_v56 }
 0x2f5   : > { %v12667_v45 = vrot.slane %v6669_v50, %v15611_v35  ;;  %v6685_v50 = vcombine.low %v12659_v60, %v12656_v51  ;;  %v12706_v60 = vrot.slane %v4254_v40, %v9627_v19 }
 0x2f6   : > { %v12676_v1 = vrot.slane %v4221_v7, %v15611_v35  ;;  %v12679_v23 = vrot.slane %v4222_v55, %v15611_v35  ;;  %v12681_v56 = vpop.permute.xlu1 %1935  ;;  %v12692_v7 = vrot.slane %v4237_v53, %v9627_v19 }
 0x2f7   : > { %15939 = vst [vmem:[#allocation322_spill] sm:$0xff] %v12667_v45  ;;  %15940 = vst [vmem:[#allocation323_spill] sm:$0xff] %v12681_v56  ;;  %v6717_v43 = vcombine.low %v12664_v15, %v12667_v45  ;;  %v1934_v39 = vpop.permute.xlu0 %1933  ;;  %v12709_v10 = vrot.slane %v6685_v50, %v9627_v19 }
 0x2f8   : > { %v4269_v26 = vcombine.low %v12670_v57, %v12676_v1  ;;  %v4286_v44 = vcombine.high %v12673_v34, %v12679_v23  ;;  %15941 = vst [vmem:[#allocation324_spill] sm:$0xff] %v12692_v7 }
 0x2f9   : > { %v12695_v55 = vrot.slane %v6717_v43, %v9627_v19  ;;  %15945 = vst [vmem:[#allocation328_spill] sm:$0xff] %v12709_v10  ;;  %v5262_v10 = vcombine.high %v9233_v24, %v9234_v16  ;;  %v6078_v24 = vcombine.high %v12078_v41, %v12111_v54 }
 0x2fa   : > { %v12698_v0 = vrot.slane %v4269_v26, %v9627_v19  ;;  %v12701_v15 = vrot.slane %v4286_v44, %v9627_v19  ;;  %v12703_v45 = vpop.permute.xlu1 %1939 }
 0x2fb   : > { %15942 = vst [vmem:[#allocation325_spill] sm:$0xff] %v12695_v55  ;;  %15944 = vst [vmem:[#allocation327_spill] sm:$0xff] %v12703_v45  ;;  %v1938_v51 = vpop.permute.xlu0 %1937  ;;  %v9235_v55 = vld [vmem:[#allocation2 + $0x21] sm:$0xff]  ;;  %v12736_v2 = vrot.slane %v5262_v10, %v15611_v35 }
 0x2fc   : > { %15943 = vst [vmem:[#allocation326_spill] sm:$0xff] %v12698_v0  ;;  %v5278_v36 = vcombine.high %v9235_v55, %v9236_v18  ;;  %v6094_v18 = vcombine.high %v12103_v48, %v12121_v52 }
 0x2fd   : > { %15950 = vst [vmem:[#allocation333_spill] sm:$0xff] %v12736_v2 }
 0x2fe   : > { %v12717_v44 = vpop.permute.xlu1 %1943  ;;  %v12739_v49 = vrot.slane %v5278_v36, %v15611_v35 }
 0x2ff   : > { %15946 = vst [vmem:[#allocation329_spill] sm:$0xff] %v12717_v44  ;;  %v1942_v40 = vpop.permute.xlu0 %1941 }
 0x300   : > { %v4310_v9 = vcombine.high %v1934_v39, %v1942_v40  ;;  %15951 = vst [vmem:[#allocation334_spill] sm:$0xff] %v12739_v49  ;;  %v4309_v16 = vcombine.low %v1934_v39, %v1942_v40  ;;  %v15953_v39 = vld [vmem:[#allocation21_spill] sm:$0xff]  ;;  %v15954_v40 = vld [vmem:[#allocation20_spill] sm:$0xff]  ;;  %v9243_v49 = vld [vmem:[#allocation2 + $0xe1] sm:$0xff] }
 0x302   : > { %v12721_v30 = vpop.permute.xlu1 %1947  ;;  %v12724_v4 = vrot.slane %v4310_v9, %v15611_v35  ;;  %v9237_v9 = vld [vmem:[#allocation2 + $0x69] sm:$0xff] }
 0x303   : > { %15947 = vst [vmem:[#allocation330_spill] sm:$0xff] %v12721_v30  ;;  %v1946_v50 = vpop.permute.xlu0 %1945  ;;  %v5294_v21 = vcombine.high %v9237_v9, %v9238_v38  ;;  %v12763_v9 = vrot.slane %v6078_v24, %v15611_v35  ;;  %v9242_v24 = vld [vmem:[#allocation2 + $0xf9] sm:$0xff] }
 0x304   : > { %v4326_v20 = vcombine.high %v1938_v51, %v1946_v50  ;;  %v4325_v5 = vcombine.low %v1938_v51, %v1946_v50 }
 0x305   : > { %v12750_v51 = vrot.slane %v5294_v21, %v15611_v35  ;;  %15955 = vst [vmem:[#allocation21_spill] sm:$0xff] %v12763_v9  ;;  %v12766_v21 = vrot.slane %v6094_v18, %v15611_v35  ;;  %v9244_v18 = vld [vmem:[#allocation2 + $0x111] sm:$0xff] }
 0x306   : > { %v12727_v53 = vrot.slane %v4326_v20, %v15611_v35  ;;  %v12729_v43 = vpop.permute.xlu1 %1951  ;;  %v9239_v20 = vld [vmem:[#allocation2 + $0x81] sm:$0xff]  ;;  %v4333_v36 = vrot.slane %v4325_v5, %v15611_v35  ;;  %v5414_v2 = vcombine.high %v9243_v49, %v9244_v18  ;;  %v6110_v49 = vcombine.high %v12138_v29, %v12203_v32 }
 0x307   : > { %15948 = vst [vmem:[#allocation331_spill] sm:$0xff] %v12729_v43  ;;  %v1950_v26 = vpop.permute.xlu0 %1949  ;;  %v5310_v11 = vcombine.high %v9239_v20, %v9240_v14  ;;  %15956 = vst [vmem:[#allocation20_spill] sm:$0xff] %v12766_v21  ;;  %v9241_v14 = vld [vmem:[#allocation2 + $0xc9] sm:$0xff]  ;;  %v4238_v29 = vcombine.high %v12651_v59, %v12644_v63 }
 0x308   : > { %v5398_v50 = vcombine.high %v9241_v14, %v9242_v24  ;;  %v15961_v14 = vld [vmem:[#allocation28_spill] sm:$0xff] }
 0x309   : > { %v12753_v10 = vrot.slane %v5310_v11, %v15611_v35  ;;  %v4317_v11 = vrot.slane %v4309_v16, %v15611_v35 }
 0x30a   : > { %v12733_v8 = vpop.permute.xlu1 %1955  ;;  %v12798_v18 = vrot.slane %v5398_v50, %v15611_v35  ;;  %v15960_v50 = vld [vmem:[#allocation29_spill] sm:$0xff] }
 0x30b   : > { %15949 = vst [vmem:[#allocation332_spill] sm:$0xff] %v12733_v8  ;;  %v1954_v62 = vpop.permute.xlu0 %1953  ;;  %v4373_v17 = vcombine.low %v4317_v11, %v4333_v36  ;;  %v4374_v32 = vcombine.high %v4317_v11, %v4333_v36  ;;  %v15964_v36 = vld [vmem:[#allocation31_spill] sm:$0xff] }
 0x30d   : > { %v12843_v11 = vrot.slane %v4374_v32, %v9627_v19  ;;  %v4302_v32 = vcombine.high %v12692_v7, %v12698_v0 }
 0x30e   : > { %v12745_v55 = vpop.permute.xlu1 %1959 }
 0x30f   : > { %15952 = vst [vmem:[#allocation335_spill] sm:$0xff] %v12745_v55  ;;  %v1958_v38 = vpop.permute.xlu0 %1957 }
 0x310   : > { %v4341_v54 = vcombine.low %v1950_v26, %v1958_v38  ;;  %v4342_v52 = vcombine.high %v1950_v26, %v1958_v38  ;;  %v12835_v38 = vrot.slane %v6110_v49, %v15611_v35 }
 0x312   : > { %v12775_v16 = vpop.permute.xlu1 %1963  ;;  %v4349_v22 = vrot.slane %v4341_v54, %v15611_v35  ;;  %v12779_v20 = vrot.slane %v4342_v52, %v15611_v35  ;;  %v4270_v54 = vcombine.high %v12670_v57, %v12676_v1  ;;  %v6773_v57 = vcombine.low %v12703_v45, %v12721_v30  ;;  %v9248_v30 = vld [vmem:[#allocation2 + $0x171] sm:$0xff] }
 0x313   : > { %v1962_v5 = vpop.permute.xlu0 %1961  ;;  %15957 = vst [vmem:[#allocation336_spill] sm:$0xff] %v12775_v16  ;;  %v6805_v52 = vcombine.low %v12733_v8, %v12775_v16  ;;  %v12808_v1 = vrot.slane %v4373_v17, %v9627_v19  ;;  %v15963_v17 = vld [vmem:[#allocation32_spill] sm:$0xff]  ;;  %v6757_v8 = vcombine.low %v12681_v56, %v12717_v44 }
 0x314   : > { %v4357_v41 = vcombine.low %v1954_v62, %v1962_v5  ;;  %v4358_v26 = vcombine.high %v1954_v62, %v1962_v5  ;;  %v12801_v5 = vrot.slane %v5414_v2, %v15611_v35  ;;  %v12820_v63 = vrot.slane %v4270_v54, %v9627_v19  ;;  %v15966_v54 = vld [vmem:[#allocation247_spill] sm:$0xff]  ;;  %v15967_v16 = vld [vmem:[#allocation240_spill] sm:$0xff] }
 0x315   : > { %15958 = vst [vmem:[#allocation337_spill] sm:$0xff] %v12808_v1  ;;  %v15970_v56 = vld [vmem:[#allocation96_spill] sm:$0xff]  ;;  %v12850_v2 = vrot.slane %v6773_v57, %v15611_v35  ;;  %v9247_v57 = vld [vmem:[#allocation2 + $0x141] sm:$0xff] }
 0x316   : > { %v4365_v48 = vrot.slane %v4357_v41, %v15611_v35  ;;  %v12783_v62 = vrot.slane %v4358_v26, %v15611_v35  ;;  %15962 = vst [vmem:[#allocation29_spill] sm:$0xff] %v12820_v63  ;;  %v9245_v44 = vld [vmem:[#allocation2 + $0x129] sm:$0xff]  ;;  %v5446_v21 = vcombine.high %v9247_v57, %v9248_v30  ;;  %v15976_v30 = vld [vmem:[#allocation253_spill] sm:$0xff] }
 0x317   : > { %15971 = vst [vmem:[#allocation31_spill] sm:$0xff] %v12850_v2  ;;  %v15977_v57 = vld [vmem:[#allocation48_spill] sm:$0xff] }
 0x318   : > { %v4405_v24 = vcombine.low %v4349_v22, %v4365_v48  ;;  %v4406_v41 = vcombine.high %v4349_v22, %v4365_v48  ;;  %v4422_v26 = vcombine.high %v12779_v20, %v12783_v62  ;;  %v6789_v22 = vcombine.low %v12729_v43, %v12745_v55  ;;  %v15969_v55 = vld [vmem:[#allocation109_spill] sm:$0xff] }
 0x319   : > { %v6126_v43 = vcombine.high %v15967_v16, %v15966_v54 }
 0x31a   : > { %v12813_v48 = vrot.slane %v4405_v24, %v9627_v19  ;;  %v12823_v59 = vrot.slane %v4406_v41, %v9627_v19  ;;  %v12830_v24 = vrot.slane %v6805_v52, %v15611_v35  ;;  %v12840_v41 = vrot.slane %v4238_v29, %v9627_v19  ;;  %v9246_v52 = vld [vmem:[#allocation2 + $0x159] sm:$0xff] }
 0x31b   : > { %v12853_v49 = vrot.slane %v6789_v22, %v15611_v35  ;;  %v5430_v45 = vcombine.high %v9245_v44, %v9246_v52  ;;  %v12864_v22 = vrot.slane %v6757_v8, %v15611_v35  ;;  %v4436_v0 = vrot.slane %v4422_v26, %v9627_v19  ;;  %v15986_v26 = vld [vmem:[#allocation65_spill] sm:$0xff] }
 0x31c   : > { %15959 = vst [vmem:[#allocation338_spill] sm:$0xff] %v12813_v48  ;;  %15965 = vst [vmem:[#allocation28_spill] sm:$0xff] %v12830_v24  ;;  %v4303_v16 = vcombine.low %v12840_v41, %v12820_v63  ;;  %v4439_v29 = vcombine.low %v12843_v11, %v12823_v59  ;;  %v4438_v54 = vcombine.high %v12808_v1, %v12813_v48  ;;  %v15991_v1 = vld [vmem:[#allocation67_spill] sm:$0xff] }
 0x31d   : > { %15968 = vst [vmem:[#allocation32_spill] sm:$0xff] %v12840_v41  ;;  %15972 = vst [vmem:[#allocation247_spill] sm:$0xff] %v12853_v49  ;;  %v6853_v9 = vcombine.low %v12853_v49, %v12830_v24  ;;  %v6214_v41 = vcombine.high %v15975_v58, %v15974_v12  ;;  %v12874_v44 = vrot.slane %v6126_v43, %v15611_v35  ;;  %v15978_v49 = vld [vmem:[#allocation47_spill] sm:$0xff]  ;;  %v15980_v58 = vld [vmem:[#allocation97_spill] sm:$0xff] }
 0x31e   : > { %15973 = vst [vmem:[#allocation240_spill] sm:$0xff] %v12864_v22  ;;  %v8572_v7 = vpack.i.bf16 %v4439_v29, %v4303_v16  ;;  %v8527_v63 = vpack.i.bf16 %v4438_v54, %v4302_v32  ;;  %v6230_v8 = vcombine.high %v15976_v30, %v12263_v61  ;;  %v6821_v52 = vcombine.low %v12864_v22, %v12850_v2  ;;  %v15982_v32 = vld [vmem:[#allocation64_spill] sm:$0xff] }
 0x31f   : > { %v3029_v24 = vcombine.low %v15978_v49, %v15977_v57  ;;  %v15981_v16 = vcombine.high %v12724_v4, %v12727_v53  ;;  %v12891_v61 = vrot.slane %v5430_v45, %v15611_v35  ;;  %v12894_v43 = vrot.slane %v5446_v21, %v15611_v35  ;;  %v15983_v49 = vld [vmem:[#allocation55_spill] sm:$0xff]  ;;  %v15985_v57 = vld [vmem:[#allocation66_spill] sm:$0xff]  ;;  %v15990_v21 = vld [vmem:[#allocation68_spill] sm:$0xff] }
 0x320   : > { %8573 = vrot.lane.b32.xlu1 %v8572_v7, %s9401_s18  ;;  %8528 = vrot.lane.b32.xlu0 %v8527_v63, %s9402_s20  ;;  %v3741_v54 = vcombine.low %v15983_v49, %v15982_v32  ;;  %v12899_v30 = vrot.slane %v6853_v9, %v9627_v19  ;;  %v3061_v48 = vcombine.low %v15986_v26, %v15985_v57  ;;  %v15987_v7 = vld [vmem:[#allocation72_spill] sm:$0xff]  ;;  %v15988_v63 = vld [vmem:[#allocation71_spill] sm:$0xff]  ;;  %v15993_v26 = vld [vmem:[#allocation146_spill] sm:$0xff] }
 0x321   : > { %v4404_v29 = vrot.slane %v15981_v16, %v9627_v19  ;;  %v12904_v16 = vrot.slane %v6214_v41, %v15611_v35  ;;  %v3877_v22 = vcombine.low %v15988_v63, %v15987_v7  ;;  %v12909_v2 = vrot.slane %v6230_v8, %v15611_v35  ;;  %v15994_v49 = vld [vmem:[#allocation147_spill] sm:$0xff]  ;;  %v15997_v7 = vld [vmem:[#allocation112_spill] sm:$0xff]  ;;  %v16008_v63 = vld [vmem:[#allocation177_spill] sm:$0xff] }
 0x322   : > { %15984 = vst [vmem:[#allocation109_spill] sm:$0xff] %v12899_v30  ;;  %v3845_v12 = vcombine.low %v15991_v1, %v15990_v21  ;;  %v6246_v9 = vcombine.high %v12271_v25, %v12324_v28  ;;  %v12916_v32 = vrot.slane %v6821_v52, %v9627_v19  ;;  %v6262_v41 = vcombine.high %v12295_v37, %v12356_v47  ;;  %v15998_v25 = vld [vmem:[#allocation111_spill] sm:$0xff]  ;;  %v16006_v52 = vld [vmem:[#allocation116_spill] sm:$0xff] }
 0x323   : > { %v4443_v45 = vcombine.low %v4404_v29, %v4436_v0  ;;  %15989 = vst [vmem:[#allocation96_spill] sm:$0xff] %v12909_v2  ;;  %v15995_v8 = vcombine.low %v12706_v60, %v12701_v15  ;;  %v4444_v1 = vcombine.high %v4404_v29, %v4436_v0  ;;  %v3885_v0 = vrot.slane %v3877_v22, %v9627_v19  ;;  %v16003_v22 = vld [vmem:[#allocation86_spill] sm:$0xff]  ;;  %v16009_v28 = vld [vmem:[#allocation176_spill] sm:$0xff]  ;;  %v16014_v30 = vld [vmem:[#allocation171_spill] sm:$0xff] }
 0x324   : > { %15992 = vst [vmem:[#allocation255_spill] sm:$0xff] %v12916_v32  ;;  %8583 = vrot.lane.b32.xlu1 %v15993_v26, %s9403_s23  ;;  %8538 = vrot.lane.b32.xlu0 %v15994_v49, %s9401_s18  ;;  %v15999_v29 = vcombine.high %v12706_v60, %v12701_v15  ;;  %v16001_v26 = vld [vmem:[#allocation23_spill] sm:$0xff]  ;;  %v16002_v49 = vld [vmem:[#allocation114_spill] sm:$0xff]  ;;  %v12952_v37 = vrot.slane %v6246_v9, %v15611_v35  ;;  %v16005_v9 = vld [vmem:[#allocation117_spill] sm:$0xff] }
 0x325   : > { %v12927_v57 = vpack.i.bf16 %v4443_v45, %v15995_v8  ;;  %v3069_v47 = vrot.slane %v3061_v48, %v9627_v19  ;;  %v12956_v45 = vrot.slane %v6262_v41, %v15611_v35  ;;  %v16004_v60 = vld [vmem:[#allocation87_spill] sm:$0xff]  ;;  %v3749_v15 = vrot.slane %v3741_v54, %v9627_v19  ;;  %v16013_v32 = vld [vmem:[#allocation160_spill] sm:$0xff]  ;;  %v16015_v2 = vld [vmem:[#allocation170_spill] sm:$0xff] }
 0x326   : > { %v12945_v21 = vpack.i.bf16 %v4444_v1, %v15999_v29  ;;  %v3853_v1 = vrot.slane %v3845_v12, %v9627_v19  ;;  %v16007_v48 = vcombine.low %v15961_v14, %v15960_v50  ;;  %v16010_v12 = vcombine.low %v15964_v36, %v15963_v17 }
 0x327   : > { %15996 = vst [vmem:[#allocation249_spill] sm:$0xff] %v12927_v57  ;;  %v16011_v29 = vcombine.low %v15954_v40, %v15953_v39  ;;  %v16012_v57 = vld [vmem:[#allocation161_spill] sm:$0xff] }
 0x328   : > { %16000 = vst [vmem:[#allocation253_spill] sm:$0xff] %v12945_v21  ;;  %8593 = vrot.lane.b32.xlu1 %v16003_v22, %s9403_s23  ;;  %8548 = vrot.lane.b32.xlu0 %v16004_v60, %s9401_s18  ;;  %v2933_v41 = vrot.slane %v16007_v48, %v9627_v19  ;;  %v3037_v22 = vrot.slane %v3029_v24, %v9627_v19 }
 0x329   : > { %v2789_v60 = vcombine.low %v16009_v28, %v16008_v63  ;;  %v3717_v54 = vrot.slane %v16010_v12, %v9627_v19  ;;  %v3897_v21 = vcombine.low %v3853_v1, %v3885_v0  ;;  %v2901_v8 = vrot.slane %v16011_v29, %v9627_v19  ;;  %v16047_v63 = vld [vmem:[#allocation110_spill] sm:$0xff] }
 0x32a   : > { %v2653_v14 = vcombine.low %v16013_v32, %v16012_v57  ;;  %v3082_v50 = vcombine.high %v3037_v22, %v3069_v47  ;;  %v3081_v48 = vcombine.low %v3037_v22, %v3069_v47  ;;  %v3898_v24 = vcombine.high %v3853_v1, %v3885_v0  ;;  %v16016_v57 = vld [vmem:[#allocation151_spill] sm:$0xff]  ;;  %v16017_v47 = vld [vmem:[#allocation150_spill] sm:$0xff] }
 0x32b   : > { %v2757_v28 = vcombine.low %v16015_v2, %v16014_v30  ;;  %v3761_v39 = vcombine.low %v3717_v54, %v3749_v15  ;;  %v2946_v17 = vcombine.high %v2901_v8, %v2933_v41  ;;  %v2945_v36 = vcombine.low %v2901_v8, %v2933_v41  ;;  %v16018_v30 = vld [vmem:[#allocation213_spill] sm:$0xff]  ;;  %v16019_v1 = vld [vmem:[#allocation99_spill] sm:$0xff]  ;;  %v16021_v41 = vld [vmem:[#allocation204_spill] sm:$0xff] }
 0x32c   : > { %8603 = vrot.lane.b32.xlu1 %v12343_v31, %s9403_s23  ;;  %8558 = vrot.lane.b32.xlu0 %v12348_v33, %s9401_s18  ;;  %v3762_v32 = vcombine.high %v3717_v54, %v3749_v15  ;;  %v2621_v0 = vcombine.low %v16017_v47, %v16016_v57  ;;  %v12998_v2 = vrot.slane %v2789_v60, %v9627_v19  ;;  %v16022_v60 = vld [vmem:[#allocation203_spill] sm:$0xff]  ;;  %v16024_v47 = vld [vmem:[#allocation210_spill] sm:$0xff] }
 0x32d   : > { %v3333_v29 = vcombine.low %v16019_v1, %v16018_v30  ;;  %v13002_v31 = vpack.i.bf16 %v3897_v21, %v3761_v39  ;;  %v13005_v33 = vrot.slane %v2653_v14, %v9627_v19  ;;  %v13007_v22 = vpack.i.bf16 %v3082_v50, %v2946_v17  ;;  %v16023_v57 = vld [vmem:[#allocation211_spill] sm:$0xff]  ;;  %v16026_v14 = vld [vmem:[#allocation137_spill] sm:$0xff]  ;;  %v16032_v1 = vld [vmem:[#allocation192_spill] sm:$0xff] }
 0x32e   : > { %v13009_v12 = vpack.i.bf16 %v3081_v48, %v2945_v36  ;;  %v13011_v8 = vpack.i.bf16 %v3898_v24, %v3762_v32  ;;  %v13014_v15 = vrot.slane %v2757_v28, %v9627_v19  ;;  %v3197_v54 = vcombine.low %v16022_v60, %v16021_v41  ;;  %v16025_v21 = vld [vmem:[#allocation139_spill] sm:$0xff]  ;;  %v16027_v48 = vld [vmem:[#allocation125_spill] sm:$0xff]  ;;  %v16028_v24 = vld [vmem:[#allocation124_spill] sm:$0xff] }
 0x32f   : > { %v3301_v30 = vcombine.low %v16024_v47, %v16023_v57  ;;  %v2454_v50 = vcombine.high %v16026_v14, %v16025_v21  ;;  %v5390_v39 = vcombine.high %v16028_v24, %v16027_v48  ;;  %v16029_v28 = vcombine.high %v11116_v3, %v11119_v27  ;;  %v16031_v32 = vld [vmem:[#allocation193_spill] sm:$0xff]  ;;  %v16033_v27 = vld [vmem:[#allocation104_spill] sm:$0xff]  ;;  %v16035_v21 = vld [vmem:[#allocation134_spill] sm:$0xff] }
 0x330   : > { %16020 = vst [vmem:[#allocation48_spill] sm:$0xff] %v13011_v8  ;;  %8613 = vrot.lane.b32.xlu1 %v12584_v46, %s9403_s23  ;;  %8568 = vrot.lane.b32.xlu0 %v12589_v13, %s9401_s18  ;;  %v16030_v36 = vcombine.high %v11128_v42, %v11131_v6  ;;  %v13041_v13 = vrot.slane %v2621_v0, %v9627_v19  ;;  %v16034_v57 = vld [vmem:[#allocation57_spill] sm:$0xff]  ;;  %v16037_v42 = vld [vmem:[#allocation138_spill] sm:$0xff] }
 0x331   : > { %v13032_v17 = vrot.slane %v16029_v28, %v9627_v19  ;;  %v3165_v41 = vcombine.low %v16032_v1, %v16031_v32  ;;  %v13046_v60 = vrot.slane %v3333_v29, %v9627_v19  ;;  %v2809_v3 = vcombine.low %v13014_v15, %v12998_v2  ;;  %v16036_v14 = vld [vmem:[#allocation121_spill] sm:$0xff]  ;;  %v16038_v28 = vld [vmem:[#allocation136_spill] sm:$0xff] }
 0x332   : > { %v13038_v46 = vrot.slane %v16030_v36, %v9627_v19  ;;  %v2318_v47 = vcombine.high %v16034_v57, %v16033_v27  ;;  %v2422_v6 = vcombine.high %v16036_v14, %v16035_v21  ;;  %v2438_v36 = vcombine.high %v16038_v28, %v16037_v42  ;;  %v16040_v27 = vld [vmem:[#allocation89_spill] sm:$0xff]  ;;  %v16041_v57 = vld [vmem:[#allocation88_spill] sm:$0xff]  ;;  %v16045_v28 = vld [vmem:[#allocation51_spill] sm:$0xff] }
 0x333   : > { %v16039_v0 = vcombine.high %v15970_v56, %v15969_v55  ;;  %v13063_v29 = vrot.slane %v3197_v54, %v9627_v19  ;;  %v13066_v1 = vrot.slane %v3301_v30, %v9627_v19  ;;  %v2673_v21 = vcombine.low %v13041_v13, %v13005_v33  ;;  %v16042_v14 = vld [vmem:[#allocation45_spill] sm:$0xff]  ;;  %v16043_v42 = vld [vmem:[#allocation44_spill] sm:$0xff]  ;;  %v16044_v55 = vld [vmem:[#allocation91_spill] sm:$0xff] }
 0x334   : > { %8623 = vrot.lane.b32.xlu1 %v16040_v27, %s9404_s26  ;;  %8578 = vrot.lane.b32.xlu0 %v16041_v57, %s9403_s23  ;;  %v2286_v56 = vcombine.high %v16043_v42, %v16042_v14  ;;  %v16046_v54 = vld [vmem:[#allocation126_spill] sm:$0xff]  ;;  %v13081_v30 = vrot.slane %v2454_v50, %v15611_v35  ;;  %v13084_v27 = vrot.slane %v3165_v41, %v9627_v19  ;;  %v16049_v14 = vld [vmem:[#allocation63_spill] sm:$0xff]  ;;  %v16050_v42 = vld [vmem:[#allocation25_spill] sm:$0xff] }
 0x335   : > { %v13060_v32 = vrot.slane %v16039_v0, %v9627_v19  ;;  %v2302_v0 = vcombine.high %v16045_v28, %v16044_v55  ;;  %v2406_v40 = vcombine.high %v16047_v63, %v16046_v54  ;;  %v4421_v57 = vcombine.low %v12779_v20, %v12783_v62  ;;  %v16054_v62 = vld [vmem:[#allocation187_spill] sm:$0xff] }
 0x336   : > { %16048 = vst [vmem:[#allocation47_spill] sm:$0xff] %v13081_v30  ;;  %v8632_v48 = vpack.i.bf16 %v2809_v3, %v2673_v21  ;;  %v3353_v24 = vcombine.low %v13066_v1, %v13046_v60  ;;  %v2270_v8 = vcombine.high %v16050_v42, %v16049_v14  ;;  %v13093_v55 = vrot.slane %v2318_v47, %v15611_v35  ;;  %v16060_v21 = vld [vmem:[#allocation314_spill] sm:$0xff] }
 0x337   : > { %v13096_v63 = vrot.slane %v2422_v6, %v15611_v35  ;;  %v13099_v50 = vrot.slane %v2438_v36, %v15611_v35  ;;  %v4285_v41 = vcombine.low %v12673_v34, %v12679_v23  ;;  %v4389_v20 = vcombine.low %v12724_v4, %v12727_v53  ;;  %v16057_v34 = vld [vmem:[#allocation130_spill] sm:$0xff]  ;;  %v16058_v23 = vld [vmem:[#allocation129_spill] sm:$0xff] }
 0x338   : > { %16051 = vst [vmem:[#allocation97_spill] sm:$0xff] %v13093_v55  ;;  %8633 = vrot.lane.b32.xlu1 %v8632_v48, %s9404_s26  ;;  %8588 = vrot.lane.b32.xlu0 %v16054_v62, %s9403_s23  ;;  %v3217_v3 = vcombine.low %v13084_v27, %v13063_v29  ;;  %v13111_v47 = vrot.slane %v2286_v56, %v15611_v35  ;;  %v16059_v48 = vld [vmem:[#allocation315_spill] sm:$0xff]  ;;  %v16063_v62 = vld [vmem:[#allocation333_spill] sm:$0xff] }
 0x339   : > { %16052 = vst [vmem:[#allocation64_spill] sm:$0xff] %v13096_v63  ;;  %16053 = vst [vmem:[#allocation55_spill] sm:$0xff] %v13099_v50  ;;  %v13114_v6 = vrot.slane %v2302_v0, %v15611_v35  ;;  %v13117_v36 = vrot.slane %v2406_v40, %v15611_v35  ;;  %v5526_v4 = vcombine.high %v16058_v23, %v16057_v34  ;;  %v16064_v34 = vld [vmem:[#allocation334_spill] sm:$0xff] }
 0x33a   : > { %v2517_v53 = vcombine.low %v13099_v50, %v13081_v30  ;;  %v4253_v28 = vcombine.low %v16060_v21, %v16059_v48  ;;  %v13126_v54 = vrot.slane %v4421_v57, %v9627_v19  ;;  %v8642_v56 = vpack.i.bf16 %v3353_v24, %v3217_v3  ;;  %v16080_v50 = vld [vmem:[#allocation238_spill] sm:$0xff]  ;;  %v16082_v30 = vld [vmem:[#allocation251_spill] sm:$0xff] }
 0x33b   : > { %16055 = vst [vmem:[#allocation66_spill] sm:$0xff] %v13114_v6  ;;  %16056 = vst [vmem:[#allocation65_spill] sm:$0xff] %v13117_v36  ;;  %v13129_v14 = vrot.slane %v2270_v8, %v15611_v35  ;;  %v2381_v40 = vcombine.low %v13114_v6, %v13093_v55  ;;  %v16062_v0 = vcombine.high %v15998_v25, %v15997_v7  ;;  %v16068_v7 = vld [vmem:[#allocation222_spill] sm:$0xff] }
 0x33c   : > { %16061 = vst [vmem:[#allocation72_spill] sm:$0xff] %v13126_v54  ;;  %v16065_v48 = vcombine.low %v16063_v62, %v16064_v34  ;;  %v2485_v24 = vcombine.low %v13117_v36, %v13096_v63  ;;  %v13148_v8 = vrot.slane %v4285_v41, %v9627_v19  ;;  %v13151_v57 = vrot.slane %v4389_v20, %v9627_v19 }
 0x33d   : > { %v13137_v42 = vrot.slane %v16062_v0, %v9627_v19  ;;  %8643 = vrot.lane.b32.xlu1 %v8642_v56, %s9404_s26  ;;  %8598 = vrot.lane.b32.xlu0 %v16068_v7, %s9403_s23  ;;  %v2349_v25 = vcombine.low %v13129_v14, %v13111_v47  ;;  %v5391_v3 = vcombine.low %v13032_v17, %v13038_v46 }
 0x33e   : > { %v13143_v21 = vrot.slane %v16065_v48, %v9627_v19  ;;  %16066 = vst [vmem:[#allocation71_spill] sm:$0xff] %v13148_v8  ;;  %16067 = vst [vmem:[#allocation68_spill] sm:$0xff] %v13151_v57  ;;  %v16069_v0 = vcombine.low %v12750_v51, %v12753_v10  ;;  %v16070_v20 = vcombine.low %v12798_v18, %v12801_v5 }
 0x33f   : > { %v2525_v48 = vrot.slane %v2517_v53, %v9627_v19  ;;  %v13174_v7 = vrot.slane %v4253_v28, %v9627_v19  ;;  %v4441_v23 = vcombine.low %v13151_v57, %v13126_v54  ;;  %v4440_v36 = vcombine.high %v12843_v11, %v12823_v59  ;;  %v16075_v59 = vld [vmem:[#allocation90_spill] sm:$0xff] }
 0x340   : > { %v13164_v41 = vrot.slane %v16069_v0, %v9627_v19  ;;  %v13170_v56 = vrot.slane %v16070_v20, %v9627_v19  ;;  %v2389_v0 = vrot.slane %v2381_v40, %v9627_v19  ;;  %v13181_v63 = vpack.i.bf16 %v5526_v4, %v5390_v39  ;;  %v16076_v39 = vld [vmem:[#allocation29_spill] sm:$0xff]  ;;  %v16077_v4 = vld [vmem:[#allocation32_spill] sm:$0xff] }
 0x341   : > { %16071 = vst [vmem:[#allocation67_spill] sm:$0xff] %v13174_v7  ;;  %v16073_v20 = vcombine.low %v12891_v61, %v12894_v43  ;;  %v16074_v53 = vcombine.high %v16063_v62, %v16064_v34  ;;  %v2493_v57 = vrot.slane %v2485_v24, %v9627_v19  ;;  %8653 = vrot.lane.b32.xlu1 %v13002_v31, %s9404_s26  ;;  %v16079_v34 = vld [vmem:[#allocation258_spill] sm:$0xff] }
 0x342   : > { %16072 = vst [vmem:[#allocation146_spill] sm:$0xff] %v13181_v63  ;;  %8608 = vrot.lane.b32.xlu0 %v16075_v59, %s9403_s23  ;;  %v4305_v11 = vcombine.low %v13174_v7, %v13148_v8  ;;  %v4304_v40 = vcombine.high %v16077_v4, %v16076_v39  ;;  %v16078_v63 = vld [vmem:[#allocation259_spill] sm:$0xff]  ;;  %v5527_v24 = vcombine.low %v13060_v32, %v13137_v42  ;;  %v16081_v7 = vld [vmem:[#allocation237_spill] sm:$0xff]  ;;  %v16083_v39 = vld [vmem:[#allocation250_spill] sm:$0xff] }
 0x343   : > { %v13187_v6 = vrot.slane %v16073_v20, %v9627_v19  ;;  %v13193_v28 = vrot.slane %v16074_v53, %v9627_v19  ;;  %v2357_v20 = vrot.slane %v2349_v25, %v9627_v19  ;;  %v3605_v62 = vcombine.low %v16079_v34, %v16078_v63 }
 0x344   : > { %v5393_v31 = vcombine.low %v13143_v21, %v13164_v41  ;;  %v8662_v53 = vpack.i.bf16 %v4441_v23, %v4305_v11  ;;  %v8617_v54 = vpack.i.bf16 %v4440_v36, %v4304_v40  ;;  %v2538_v59 = vcombine.high %v2493_v57, %v2525_v48 }
 0x345   : > { %v2537_v55 = vcombine.low %v2493_v57, %v2525_v48  ;;  %v3469_v8 = vcombine.low %v16081_v7, %v16080_v50  ;;  %v3573_v4 = vcombine.low %v16083_v39, %v16082_v30  ;;  %v5529_v25 = vcombine.low %v13170_v56, %v13187_v6  ;;  %v16084_v48 = vld [vmem:[#allocation227_spill] sm:$0xff]  ;;  %v16085_v50 = vld [vmem:[#allocation226_spill] sm:$0xff] }
 0x346   : > { %v5394_v63 = vcombine.high %v13143_v21, %v13164_v41  ;;  %8663 = vrot.lane.b32.xlu1 %v8662_v53, %s9404_s26  ;;  %8618 = vrot.lane.b32.xlu0 %v8617_v54, %s9403_s23  ;;  %v2402_v23 = vcombine.high %v2357_v20, %v2389_v0  ;;  %v2401_v36 = vcombine.low %v2357_v20, %v2389_v0  ;;  %v16088_v41 = vld [vmem:[#allocation300_spill] sm:$0xff]  ;;  %v16089_v0 = vld [vmem:[#allocation299_spill] sm:$0xff] }
 0x347   : > { %v5530_v57 = vcombine.high %v13170_v56, %v13187_v6  ;;  %v3437_v7 = vcombine.low %v16085_v50, %v16084_v48  ;;  %v3613_v30 = vrot.slane %v3605_v62, %v9627_v19  ;;  %v16086_v11 = vcombine.high %v12750_v51, %v12753_v10  ;;  %v16092_v39 = vld [vmem:[#allocation283_spill] sm:$0xff]  ;;  %v16093_v50 = vld [vmem:[#allocation294_spill] sm:$0xff] }
 0x348   : > { %v16087_v21 = vcombine.high %v12798_v18, %v12801_v5  ;;  %v4149_v20 = vcombine.low %v16089_v0, %v16088_v41  ;;  %v8672_v34 = vpack.i.bf16 %v2538_v59, %v2402_v23  ;;  %v8627_v6 = vpack.i.bf16 %v2537_v55, %v2401_v36  ;;  %v16091_v18 = vld [vmem:[#allocation284_spill] sm:$0xff]  ;;  %v16094_v59 = vld [vmem:[#allocation293_spill] sm:$0xff] }
 0x349   : > { %v5388_v40 = vrot.slane %v16086_v11, %v9627_v19  ;;  %v16090_v56 = vcombine.high %v12891_v61, %v12894_v43  ;;  %v3477_v53 = vrot.slane %v3469_v8, %v9627_v19  ;;  %v3581_v51 = vrot.slane %v3573_v4, %v9627_v19  ;;  %v16095_v43 = vld [vmem:[#allocation38_spill] sm:$0xff]  ;;  %v16098_v23 = vld [vmem:[#allocation77_spill] sm:$0xff] }
 0x34a   : > { %v5492_v54 = vrot.slane %v16087_v21, %v9627_v19  ;;  %v13242_v10 = vpack.i.bf16 %v5527_v24, %v5391_v3  ;;  %v5392_v5 = vcombine.high %v13032_v17, %v13038_v46  ;;  %v4013_v48 = vcombine.low %v16092_v39, %v16091_v18  ;;  %8673 = vrot.lane.b32.xlu1 %v8672_v34, %s9405_s7  ;;  %v16096_v8 = vld [vmem:[#allocation42_spill] sm:$0xff]  ;;  %v16099_v0 = vld [vmem:[#allocation61_spill] sm:$0xff]  ;;  %v16100_v34 = vld [vmem:[#allocation19_spill] sm:$0xff] }
 0x34b   : > { %v5524_v62 = vrot.slane %v16090_v56, %v9627_v19  ;;  %v4117_v55 = vcombine.low %v16094_v59, %v16093_v50  ;;  %8628 = vrot.lane.b32.xlu0 %v8627_v6, %s9404_s26  ;;  %v5528_v61 = vcombine.high %v13060_v32, %v13137_v42  ;;  %v4734_v3 = vcombine.high %v16096_v8, %v16095_v43  ;;  %v16097_v46 = vld [vmem:[#allocation274_spill] sm:$0xff]  ;;  %v16101_v39 = vld [vmem:[#allocation92_spill] sm:$0xff]  ;;  %v16102_v50 = vld [vmem:[#allocation95_spill] sm:$0xff] }
 0x34c   : > { %v3445_v24 = vrot.slane %v3437_v7, %v9627_v19  ;;  %v3626_v4 = vcombine.high %v3581_v51, %v3613_v30  ;;  %v5395_v17 = vcombine.low %v13193_v28, %v5388_v40  ;;  %v3981_v36 = vcombine.low %v16098_v23, %v16097_v46 }
 0x34d   : > { %v4157_v11 = vrot.slane %v4149_v20, %v9627_v19  ;;  %v3625_v21 = vcombine.low %v3581_v51, %v3613_v30  ;;  %v5531_v41 = vcombine.low %v5492_v54, %v5524_v62  ;;  %v4718_v6 = vcombine.high %v16100_v34, %v16099_v0 }
 0x34e   : > { %v3490_v56 = vcombine.high %v3445_v24, %v3477_v53  ;;  %v5396_v32 = vcombine.high %v13193_v28, %v5388_v40  ;;  %v5532_v42 = vcombine.high %v5492_v54, %v5524_v62  ;;  %v4021_v18 = vrot.slane %v4013_v48, %v9627_v19  ;;  %8683 = vrot.lane.b32.xlu1 %v13007_v22, %s9405_s7  ;;  %v16104_v40 = vld [vmem:[#allocation113_spill] sm:$0xff] }
 0x34f   : > { %v4125_v7 = vrot.slane %v4117_v55, %v9627_v19  ;;  %8638 = vrot.lane.b32.xlu0 %v13009_v12, %s9404_s26  ;;  %v3489_v20 = vcombine.low %v3445_v24, %v3477_v53  ;;  %v4748_v30 = vrot.slane %v4734_v3, %v15611_v35  ;;  %v16103_v59 = vcombine.high %v16101_v39, %v16102_v50  ;;  %v16106_v12 = vld [vmem:[#allocation105_spill] sm:$0xff]  ;;  %v16107_v53 = vld [vmem:[#allocation22_spill] sm:$0xff] }
 0x350   : > { %v8692_v51 = vpack.i.bf16 %v3626_v4, %v3490_v56  ;;  %v16105_v54 = vcombine.high %v15980_v58, %v16104_v40  ;;  %v3989_v48 = vrot.slane %v3981_v36, %v9627_v19  ;;  %v4782_v8 = vcombine.high %v16107_v53, %v16106_v12  ;;  %v16123_v40 = vld [vmem:[#allocation128_spill] sm:$0xff]  ;;  %v16127_v12 = vld [vmem:[#allocation17_spill] sm:$0xff]  ;;  %v16128_v53 = vld [vmem:[#allocation50_spill] sm:$0xff] }
 0x351   : > { %v6156_v28 = vrot.slane %v16103_v59, %v9627_v19  ;;  %v8647_v22 = vpack.i.bf16 %v3625_v21, %v3489_v20  ;;  %v4170_v55 = vcombine.high %v4125_v7, %v4157_v11  ;;  %v4169_v43 = vcombine.low %v4125_v7, %v4157_v11  ;;  %v16118_v20 = vld [vmem:[#allocation96_spill] sm:$0xff] }
 0x352   : > { %v6188_v62 = vrot.slane %v16105_v54, %v9627_v19  ;;  %v13282_v3 = vpack.i.bf16 %v5529_v25, %v5393_v31  ;;  %v16108_v24 = vcombine.high %v16002_v49, %v16001_v26  ;;  %v16109_v58 = vcombine.high %v16006_v52, %v16005_v9  ;;  %8693 = vrot.lane.b32.xlu1 %v8692_v51, %s9405_s7  ;;  %v16124_v54 = vld [vmem:[#allocation127_spill] sm:$0xff] }
 0x353   : > { %v4732_v23 = vrot.slane %v4718_v6, %v15611_v35  ;;  %8648 = vrot.lane.b32.xlu0 %v8647_v22, %s9404_s26  ;;  %v4034_v36 = vcombine.high %v3989_v48, %v4021_v18  ;;  %v4033_v11 = vcombine.low %v3989_v48, %v4021_v18  ;;  %v13295_v31 = vpack.i.bf16 %v5530_v57, %v5394_v63  ;;  %v16125_v48 = vld [vmem:[#allocation133_spill] sm:$0xff]  ;;  %v16126_v22 = vld [vmem:[#allocation132_spill] sm:$0xff] }
 0x354   : > { %v6292_v4 = vrot.slane %v16108_v24, %v9627_v19  ;;  %v6324_v46 = vrot.slane %v16109_v58, %v9627_v19  ;;  %v13297_v25 = vpack.i.bf16 %v5531_v41, %v5395_v17  ;;  %v13299_v21 = vpack.i.bf16 %v5528_v61, %v5392_v5  ;;  %v16110_v5 = vld [vmem:[#allocation21_spill] sm:$0xff]  ;;  %v16111_v61 = vld [vmem:[#allocation20_spill] sm:$0xff] }
 0x355   : > { %v13301_v26 = vpack.i.bf16 %v5532_v42, %v5396_v32  ;;  %v4797_v49 = vcombine.low %v4732_v23, %v4748_v30  ;;  %v8702_v0 = vpack.i.bf16 %v4170_v55, %v4034_v36  ;;  %v8657_v52 = vpack.i.bf16 %v4169_v43, %v4033_v11  ;;  %v16114_v32 = vld [vmem:[#allocation101_spill] sm:$0xff]  ;;  %v16115_v42 = vld [vmem:[#allocation56_spill] sm:$0xff] }
 0x356   : > { %v6208_v9 = vcombine.high %v6156_v28, %v6188_v62  ;;  %v13304_v34 = vrot.slane %v4782_v8, %v9627_v19  ;;  %v4798_v6 = vcombine.high %v4732_v23, %v4748_v30  ;;  %v2350_v56 = vcombine.high %v13129_v14, %v13111_v47  ;;  %v16134_v23 = vld [vmem:[#allocation18_spill] sm:$0xff] }
 0x357   : > { %v6344_v18 = vcombine.high %v6292_v4, %v6324_v46  ;;  %8703 = vrot.lane.b32.xlu1 %v8702_v0, %s9405_s7  ;;  %8658 = vrot.lane.b32.xlu0 %v8657_v52, %s9404_s26  ;;  %v6207_v63 = vcombine.low %v6156_v28, %v6188_v62  ;;  %v6343_v57 = vcombine.low %v6292_v4, %v6324_v46  ;;  %v16133_v46 = vld [vmem:[#allocation41_spill] sm:$0xff]  ;;  %v16136_v52 = vld [vmem:[#allocation140_spill] sm:$0xff] }
 0x358   : > { %v16112_v17 = vcombine.high %v16110_v5, %v16111_v61  ;;  %v4766_v7 = vcombine.high %v16115_v42, %v16114_v32  ;;  %v16116_v47 = vcombine.high %v12835_v38, %v12874_v44  ;;  %v16119_v30 = vcombine.high %v12904_v16, %v16118_v20  ;;  %v16143_v42 = vld [vmem:[#allocation141_spill] sm:$0xff] }
 0x359   : > { %v16121_v39 = vcombine.high %v12952_v37, %v12956_v45  ;;  %v13337_v59 = vrot.slane %v4797_v49, %v9627_v19  ;;  %v2810_v28 = vcombine.high %v13014_v15, %v12998_v2  ;;  %v6206_v62 = vcombine.high %v16124_v54, %v16123_v40  ;;  %v16190_v40 = vld [vmem:[#allocation188_spill] sm:$0xff] }
 0x35a   : > { %v13314_v41 = vrot.slane %v16112_v17, %v9627_v19  ;;  %v13322_v14 = vrot.slane %v16116_v47, %v9627_v19  ;;  %v13328_v51 = vrot.slane %v16119_v30, %v9627_v19  ;;  %v6342_v55 = vcombine.high %v16126_v22, %v16125_v48  ;;  %v16192_v48 = vld [vmem:[#allocation53_spill] sm:$0xff] }
 0x35b   : > { %v13334_v50 = vrot.slane %v16121_v39, %v9627_v19  ;;  %v13346_v43 = vrot.slane %v4798_v6, %v9627_v19  ;;  %v4750_v8 = vcombine.high %v16128_v53, %v16127_v12  ;;  %v16129_v24 = vcombine.low %v16110_v5, %v16111_v61  ;;  %8713 = vrot.lane.b32.xlu1 %v16133_v46, %s9406_s15  ;;  %v16137_v6 = vld [vmem:[#allocation59_spill] sm:$0xff]  ;;  %v16154_v46 = vld [vmem:[#allocation58_spill] sm:$0xff] }
 0x35c   : > { %16113 = vst [vmem:[#allocation147_spill] sm:$0xff] %v13314_v41  ;;  %16117 = vst [vmem:[#allocation112_spill] sm:$0xff] %v13322_v14  ;;  %v16131_v2 = vcombine.low %v12835_v38, %v12874_v44  ;;  %v13363_v58 = vrot.slane %v2350_v56, %v9627_v19  ;;  %8668 = vrot.lane.b32.xlu0 %v16134_v23, %s9405_s7  ;;  %v2674_v36 = vcombine.high %v13041_v13, %v13005_v33  ;;  %v16155_v23 = vld [vmem:[#allocation97_spill] sm:$0xff] }
 0x35d   : > { %16120 = vst [vmem:[#allocation111_spill] sm:$0xff] %v13328_v51  ;;  %16122 = vst [vmem:[#allocation23_spill] sm:$0xff] %v13334_v50  ;;  %v13354_v4 = vrot.slane %v16129_v24, %v9627_v19  ;;  %v13371_v11 = vpack.i.bf16 %v6344_v18, %v6208_v9  ;;  %v4780_v49 = vrot.slane %v4766_v7, %v15611_v35  ;;  %v16139_v9 = vld [vmem:[#allocation107_spill] sm:$0xff]  ;;  %v16140_v18 = vld [vmem:[#allocation106_spill] sm:$0xff] }
 0x35e   : > { %v13360_v15 = vrot.slane %v16131_v2, %v9627_v19  ;;  %v13374_v0 = vpack.i.bf16 %v6343_v57, %v6207_v63  ;;  %v6212_v38 = vcombine.high %v13314_v41, %v13322_v14  ;;  %v6348_v44 = vcombine.high %v13328_v51, %v13334_v50  ;;  %v16144_v7 = vld [vmem:[#allocation145_spill] sm:$0xff]  ;;  %v16152_v24 = vld [vmem:[#allocation55_spill] sm:$0xff]  ;;  %v16153_v2 = vld [vmem:[#allocation148_spill] sm:$0xff] }
 0x35f   : > { %16130 = vst [vmem:[#allocation114_spill] sm:$0xff] %v13354_v4  ;;  %v4950_v56 = vcombine.high %v16137_v6, %v16136_v52  ;;  %v8677_v5 = vpack.i.bf16 %v2810_v28, %v2674_v36  ;;  %v3354_v61 = vcombine.high %v13066_v1, %v13046_v60  ;;  %v13384_v33 = vpack.i.bf16 %v6342_v55, %v6206_v62  ;;  %v16145_v60 = vld [vmem:[#allocation43_spill] sm:$0xff]  ;;  %v16149_v28 = vld [vmem:[#allocation40_spill] sm:$0xff]  ;;  %v16156_v36 = vld [vmem:[#allocation66_spill] sm:$0xff] }
 0x360   : > { %16132 = vst [vmem:[#allocation86_spill] sm:$0xff] %v13360_v15  ;;  %16135 = vst [vmem:[#allocation87_spill] sm:$0xff] %v13374_v0  ;;  %v4764_v13 = vrot.slane %v4750_v8, %v15611_v35  ;;  %v4814_v63 = vcombine.high %v16140_v18, %v16139_v9  ;;  %v6209_v57 = vcombine.low %v13354_v4, %v13360_v15  ;;  %8723 = vrot.lane.b32.xlu1 %v16145_v60, %s9402_s20  ;;  %v16151_v8 = vld [vmem:[#allocation47_spill] sm:$0xff]  ;;  %v16160_v9 = vld [vmem:[#allocation122_spill] sm:$0xff] }
 0x361   : > { %16138 = vst [vmem:[#allocation117_spill] sm:$0xff] %v13384_v33  ;;  %v16141_v17 = vcombine.low %v12904_v16, %v16118_v20  ;;  %v4918_v47 = vcombine.high %v16144_v7, %v16143_v42  ;;  %8678 = vrot.lane.b32.xlu0 %v8677_v5, %s9405_s7  ;;  %v3218_v1 = vcombine.high %v13084_v27, %v13063_v29  ;;  %v16148_v20 = vld [vmem:[#allocation39_spill] sm:$0xff]  ;;  %v16159_v5 = vld [vmem:[#allocation118_spill] sm:$0xff]  ;;  %v16164_v60 = vld [vmem:[#allocation65_spill] sm:$0xff] }
 0x362   : > { %v16146_v30 = vcombine.low %v12952_v37, %v12956_v45  ;;  %v4829_v16 = vcombine.low %v4764_v13, %v4780_v49  ;;  %v4902_v62 = vcombine.high %v16149_v28, %v16148_v20  ;;  %v13412_v55 = vpack.i.bf16 %v6348_v44, %v6212_v38  ;;  %v16157_v6 = vld [vmem:[#allocation35_spill] sm:$0xff]  ;;  %v16158_v38 = vld [vmem:[#allocation36_spill] sm:$0xff]  ;;  %v16282_v41 = vld [vmem:[#allocation277_spill] sm:$0xff] }
 0x363   : > { %v13395_v32 = vrot.slane %v16141_v17, %v9627_v19  ;;  %v4964_v53 = vrot.slane %v4950_v56, %v9627_v19  ;;  %v2518_v29 = vcombine.high %v16152_v24, %v16151_v8  ;;  %v8687_v27 = vpack.i.bf16 %v3354_v61, %v3218_v1  ;;  %v16161_v17 = vld [vmem:[#allocation131_spill] sm:$0xff]  ;;  %v16162_v56 = vld [vmem:[#allocation120_spill] sm:$0xff] }
 0x364   : > { %v13408_v39 = vrot.slane %v16146_v30, %v9627_v19  ;;  %16150 = vst [vmem:[#allocation176_spill] sm:$0xff] %v13412_v55  ;;  %v4982_v37 = vcombine.high %v16154_v46, %v16153_v2  ;;  %v4828_v45 = vrot.slane %v4814_v63, %v9627_v19  ;;  %v2382_v52 = vcombine.high %v16156_v36, %v16155_v23  ;;  %v16163_v61 = vld [vmem:[#allocation64_spill] sm:$0xff]  ;;  %v16165_v30 = vld [vmem:[#allocation62_spill] sm:$0xff]  ;;  %v16166_v20 = vld [vmem:[#allocation123_spill] sm:$0xff] }
 0x365   : > { %16142 = vst [vmem:[#allocation116_spill] sm:$0xff] %v13395_v32  ;;  %v4886_v44 = vcombine.high %v16158_v38, %v16157_v6  ;;  %v4846_v18 = vcombine.high %v16160_v9, %v16159_v5  ;;  %v4870_v42 = vcombine.high %v16162_v56, %v16161_v17  ;;  %v4932_v7 = vrot.slane %v4918_v47, %v9627_v19  ;;  %v16167_v28 = vld [vmem:[#allocation108_spill] sm:$0xff] }
 0x366   : > { %16147 = vst [vmem:[#allocation177_spill] sm:$0xff] %v13408_v39  ;;  %v2486_v1 = vcombine.high %v16164_v60, %v16163_v61  ;;  %8733 = vrot.lane.b32.xlu1 %v16165_v30, %s9403_s23  ;;  %8688 = vrot.lane.b32.xlu0 %v8687_v27, %s9405_s7  ;;  %v4830_v63 = vcombine.high %v4764_v13, %v4780_v49  ;;  %v16168_v38 = vld [vmem:[#allocation72_spill] sm:$0xff] }
 0x367   : > { %v4854_v8 = vcombine.high %v16167_v28, %v16166_v20  ;;  %v4916_v24 = vrot.slane %v4902_v62, %v15611_v35  ;;  %v6345_v23 = vcombine.low %v13395_v32, %v13408_v39  ;;  %v13442_v36 = vrot.slane %v2518_v29, %v9627_v19  ;;  %v16169_v17 = vld [vmem:[#allocation68_spill] sm:$0xff]  ;;  %v13469_v20 = vpop.permute.xlu1 %8493 }
 0x368   : > { %v8742_v47 = vpack.i.bf16 %v4982_v37, %v4846_v18  ;;  %v4983_v6 = vcombine.low %v4932_v7, %v4964_v53  ;;  %v4442_v56 = vcombine.high %v16169_v17, %v16168_v38  ;;  %v13447_v61 = vrot.slane %v4829_v16, %v9627_v19  ;;  %v16170_v37 = vld [vmem:[#allocation48_spill] sm:$0xff]  ;;  %v16171_v18 = vld [vmem:[#allocation71_spill] sm:$0xff] }
 0x369   : > { %v13450_v49 = vrot.slane %v2382_v52, %v9627_v19  ;;  %v4900_v13 = vrot.slane %v4886_v44, %v15611_v35  ;;  %v4847_v62 = vcombine.low %v13304_v34, %v4828_v45  ;;  %v4884_v27 = vrot.slane %v4870_v42, %v15611_v35  ;;  %v16172_v16 = vld [vmem:[#allocation67_spill] sm:$0xff]  ;;  %v16177_v42 = vld [vmem:[#allocation153_spill] sm:$0xff]  ;;  %v16257_v0 = vld [vmem:[#allocation252_spill] sm:$0xff] }
 0x36a   : > { %v13456_v29 = vrot.slane %v2486_v1, %v9627_v19  ;;  %8743 = vrot.lane.b32.xlu1 %v8742_v47, %s9402_s20  ;;  %8698 = vrot.lane.b32.xlu0 %v16170_v37, %s9405_s7  ;;  %v4306_v60 = vcombine.high %v16172_v16, %v16171_v18  ;;  %v13464_v52 = vrot.slane %v4830_v63, %v9627_v19 }
 0x36b   : > { %v4868_v44 = vrot.slane %v4854_v8, %v15611_v35  ;;  %v4965_v30 = vcombine.low %v4900_v13, %v4916_v24  ;;  %v8752_v1 = vpack.i.bf16 %v4983_v6, %v4847_v62  ;;  %v4984_v47 = vcombine.high %v4932_v7, %v4964_v53  ;;  %v16174_v62 = vld [vmem:[#allocation179_spill] sm:$0xff]  ;;  %v16189_v8 = vld [vmem:[#allocation173_spill] sm:$0xff] }
 0x36c   : > { %v8707_v28 = vpack.i.bf16 %v4442_v56, %v4306_v60  ;;  %v2539_v38 = vcombine.low %v13456_v29, %v13442_v36  ;;  %v4848_v17 = vcombine.high %v13304_v34, %v4828_v45  ;;  %v2403_v63 = vcombine.low %v13363_v58, %v13450_v49  ;;  %v16178_v53 = vld [vmem:[#allocation159_spill] sm:$0xff] }
 0x36d   : > { %v4849_v37 = vcombine.low %v13337_v59, %v13447_v61  ;;  %v4933_v18 = vcombine.low %v4868_v44, %v4884_v27  ;;  %v4934_v16 = vcombine.high %v4868_v44, %v4884_v27  ;;  %v4966_v7 = vcombine.high %v4900_v13, %v4916_v24  ;;  %v16175_v27 = vld [vmem:[#allocation184_spill] sm:$0xff]  ;;  %v16179_v24 = vld [vmem:[#allocation158_spill] sm:$0xff]  ;;  %v16180_v45 = vld [vmem:[#allocation183_spill] sm:$0xff] }
 0x36e   : > { %8753 = vrot.lane.b32.xlu1 %v8752_v1, %s9401_s18  ;;  %8708 = vrot.lane.b32.xlu0 %v8707_v28, %s9405_s7  ;;  %v13488_v6 = vpack.i.bf16 %v6345_v23, %v6209_v57  ;;  %v4973_v56 = vrot.slane %v4965_v30, %v9627_v19  ;;  %v5222_v60 = vcombine.high %v16175_v27, %v16174_v62  ;;  %v16176_v28 = vld [vmem:[#allocation155_spill] sm:$0xff]  ;;  %v16181_v62 = vld [vmem:[#allocation185_spill] sm:$0xff]  ;;  %v16184_v27 = vld [vmem:[#allocation156_spill] sm:$0xff] }
 0x36f   : > { %v8762_v44 = vpack.i.bf16 %v4984_v47, %v4848_v17  ;;  %v8717_v1 = vpack.i.bf16 %v2539_v38, %v2403_v63  ;;  %v5038_v12 = vcombine.high %v16177_v42, %v16176_v28  ;;  %v5086_v13 = vcombine.high %v16179_v24, %v16178_v53  ;;  %v13505_v38 = vpop.permute.xlu1 %8503  ;;  %v16182_v17 = vld [vmem:[#allocation149_spill] sm:$0xff]  ;;  %v16183_v63 = vld [vmem:[#allocation144_spill] sm:$0xff]  ;;  %v16188_v34 = vld [vmem:[#allocation175_spill] sm:$0xff] }
 0x370   : > { %16173 = vst [vmem:[#allocation161_spill] sm:$0xff] %v13488_v6  ;;  %v4941_v23 = vrot.slane %v4933_v18, %v9627_v19  ;;  %v4948_v30 = vrot.slane %v4934_v16, %v9627_v19  ;;  %v5190_v47 = vcombine.high %v16181_v62, %v16180_v45  ;;  %v4980_v42 = vrot.slane %v4966_v7, %v9627_v19  ;;  %v16185_v28 = vld [vmem:[#allocation157_spill] sm:$0xff]  ;;  %v16186_v18 = vld [vmem:[#allocation154_spill] sm:$0xff]  ;;  %v16187_v57 = vld [vmem:[#allocation152_spill] sm:$0xff] }
 0x371   : > { %v5006_v53 = vcombine.high %v16183_v63, %v16182_v17  ;;  %v5054_v24 = vcombine.high %v16185_v28, %v16184_v27  ;;  %v5022_v16 = vcombine.high %v16187_v57, %v16186_v18  ;;  %v5174_v45 = vcombine.high %v16189_v8, %v16188_v34  ;;  %v16193_v7 = vld [vmem:[#allocation54_spill] sm:$0xff]  ;;  %v16194_v27 = vld [vmem:[#allocation164_spill] sm:$0xff]  ;;  %v16195_v28 = vld [vmem:[#allocation167_spill] sm:$0xff] }
 0x372   : > { %8763 = vrot.lane.b32.xlu1 %v8762_v44, %s9403_s23  ;;  %8718 = vrot.lane.b32.xlu0 %v8717_v1, %s9406_s15  ;;  %v5236_v62 = vrot.slane %v5222_v60, %v9627_v19  ;;  %v16191_v44 = vld [vmem:[#allocation191_spill] sm:$0xff]  ;;  %v4985_v1 = vcombine.low %v4941_v23, %v4973_v56  ;;  %v4990_v22 = vcombine.high %v16193_v7, %v16192_v48  ;;  %v16196_v57 = vld [vmem:[#allocation169_spill] sm:$0xff]  ;;  %v16197_v18 = vld [vmem:[#allocation166_spill] sm:$0xff] }
 0x373   : > { %v5254_v54 = vcombine.high %v16191_v44, %v16190_v40  ;;  %v5052_v17 = vrot.slane %v5038_v12, %v15611_v35  ;;  %v5100_v63 = vrot.slane %v5086_v13, %v9627_v19  ;;  %v5118_v5 = vcombine.high %v16195_v28, %v16194_v27  ;;  %v16198_v34 = vld [vmem:[#allocation174_spill] sm:$0xff]  ;;  %v16199_v60 = vld [vmem:[#allocation172_spill] sm:$0xff]  ;;  %v16201_v48 = vld [vmem:[#allocation33_spill] sm:$0xff] }
 0x374   : > { %v5142_v9 = vcombine.high %v16197_v18, %v16196_v57  ;;  %v5204_v8 = vrot.slane %v5190_v47, %v9627_v19  ;;  %v5158_v2 = vcombine.high %v16199_v60, %v16198_v34  ;;  %v16200_v40 = vld [vmem:[#allocation60_spill] sm:$0xff]  ;;  %v5020_v12 = vrot.slane %v5006_v53, %v15611_v35  ;;  %v16203_v47 = vld [vmem:[#allocation162_spill] sm:$0xff]  ;;  %v13544_v60 = vpop.permute.xlu1 %8513 }
 0x375   : > { %v5068_v13 = vrot.slane %v5054_v24, %v9627_v19  ;;  %v5036_v7 = vrot.slane %v5022_v16, %v15611_v35  ;;  %v2540_v57 = vcombine.high %v13456_v29, %v13442_v36  ;;  %v16202_v18 = vld [vmem:[#allocation168_spill] sm:$0xff]  ;;  %v5188_v34 = vrot.slane %v5174_v45, %v15611_v35  ;;  %v16204_v36 = vld [vmem:[#allocation34_spill] sm:$0xff] }
 0x376   : > { %8773 = vrot.lane.b32.xlu1 %v16200_v40, %s9407_s29  ;;  %8728 = vrot.lane.b32.xlu0 %v16201_v48, %s9401_s18  ;;  %v5126_v27 = vcombine.high %v16203_v47, %v16202_v18  ;;  %v8782_v40 = vpack.i.bf16 %v5254_v54, %v5118_v5  ;;  %v5255_v28 = vcombine.low %v5204_v8, %v5236_v62 }
 0x377   : > { %v5004_v48 = vrot.slane %v4990_v22, %v15611_v35  ;;  %v5102_v44 = vcombine.high %v5036_v7, %v5052_v17  ;;  %v13547_v53 = vpack.i.bf16 %v4985_v1, %v4849_v37  ;;  %v4986_v24 = vcombine.high %v4941_v23, %v4973_v56 }
 0x378   : > { %v5156_v16 = vrot.slane %v5142_v9, %v15611_v35  ;;  %v5172_v46 = vrot.slane %v5158_v2, %v15611_v35  ;;  %v5119_v29 = vcombine.low %v5068_v13, %v5100_v63  ;;  %v5101_v18 = vcombine.low %v5036_v7, %v5052_v17  ;;  %v13555_v37 = vpop.permute.xlu1 %8523 }
 0x379   : > { %v5070_v45 = vcombine.high %v5004_v48, %v5020_v12  ;;  %v4987_v54 = vcombine.low %v4948_v30, %v4980_v42  ;;  %v4988_v5 = vcombine.high %v4948_v30, %v4980_v42  ;;  %v5140_v22 = vrot.slane %v5126_v27, %v15611_v35  ;;  %v16207_v27 = vld [vmem:[#allocation15_spill] sm:$0xff] }
 0x37a   : > { %8783 = vrot.lane.b32.xlu1 %v8782_v40, %s9402_s20  ;;  %8738 = vrot.lane.b32.xlu0 %v16204_v36, %s9404_s26  ;;  %v5238_v47 = vcombine.high %v5172_v46, %v5188_v34  ;;  %v8792_v56 = vpack.i.bf16 %v5255_v28, %v5119_v29  ;;  %v5256_v23 = vcombine.high %v5204_v8, %v5236_v62  ;;  %v16214_v29 = vld [vmem:[#allocation198_spill] sm:$0xff] }
 0x37b   : > { %v5069_v9 = vcombine.low %v5004_v48, %v5020_v12  ;;  %v13558_v2 = vrot.slane %v5102_v44, %v9627_v19  ;;  %v16205_v1 = vcombine.high %v13363_v58, %v13450_v49  ;;  %v16206_v17 = vcombine.high %v13337_v59, %v13447_v61  ;;  %v16210_v12 = vld [vmem:[#allocation189_spill] sm:$0xff]  ;;  %v16212_v48 = vld [vmem:[#allocation186_spill] sm:$0xff] }
 0x37c   : > { %v5206_v30 = vcombine.high %v5140_v22, %v5156_v16  ;;  %v5237_v42 = vcombine.low %v5172_v46, %v5188_v34  ;;  %v5120_v62 = vcombine.high %v5068_v13, %v5100_v63  ;;  %v13572_v44 = vrot.slane %v5070_v45, %v9627_v19  ;;  %v16211_v63 = vld [vmem:[#allocation182_spill] sm:$0xff]  ;;  %v16215_v45 = vld [vmem:[#allocation196_spill] sm:$0xff] }
 0x37d   : > { %v8812_v40 = vpack.i.bf16 %v2540_v57, %v16205_v1  ;;  %v13566_v7 = vpack.i.bf16 %v4986_v24, %v16206_v17  ;;  %v5109_v28 = vrot.slane %v5101_v18, %v9627_v19  ;;  %v16208_v58 = vcombine.low %v13346_v43, %v13464_v52  ;;  %v16213_v24 = vld [vmem:[#allocation178_spill] sm:$0xff] }
 0x37e   : > { %8793 = vrot.lane.b32.xlu1 %v8792_v56, %s9401_s18  ;;  %8748 = vrot.lane.b32.xlu0 %v16207_v27, %s9405_s7  ;;  %v16209_v59 = vcombine.high %v13346_v43, %v13464_v52  ;;  %v5205_v61 = vcombine.low %v5140_v22, %v5156_v16  ;;  %v5252_v8 = vrot.slane %v5238_v47, %v9627_v19  ;;  %v16217_v56 = vld [vmem:[#allocation93_spill] sm:$0xff]  ;;  %v13599_v22 = vpop.permute.xlu1 %8533  ;;  %v16220_v47 = vld [vmem:[#allocation27_spill] sm:$0xff]  ;;  %v16222_v1 = vld [vmem:[#allocation194_spill] sm:$0xff] }
 0x37f   : > { %v13578_v49 = vpack.i.bf16 %v4987_v54, %v16208_v58  ;;  %v5550_v13 = vcombine.high %v16211_v63, %v16210_v12  ;;  %v8802_v57 = vpack.i.bf16 %v5256_v23, %v5120_v62  ;;  %v5077_v34 = vrot.slane %v5069_v9, %v9627_v19  ;;  %v16216_v54 = vld [vmem:[#allocation98_spill] sm:$0xff]  ;;  %16219 = vst [vmem:[#allocation171_spill] sm:$0xff] %v13599_v22  ;;  %v16221_v9 = vld [vmem:[#allocation197_spill] sm:$0xff]  ;;  %v16223_v27 = vld [vmem:[#allocation16_spill] sm:$0xff] }
 0x380   : > { %v13583_v46 = vpack.i.bf16 %v4988_v5, %v16209_v59  ;;  %v5534_v36 = vcombine.high %v16213_v24, %v16212_v48  ;;  %v5582_v18 = vcombine.high %v16215_v45, %v16214_v29  ;;  %v5718_v43 = vcombine.high %v16217_v56, %v16216_v54  ;;  %v13597_v5 = vpop.permute.xlu0 %8488  ;;  %v16224_v62 = vld [vmem:[#allocation208_spill] sm:$0xff]  ;;  %v16225_v58 = vld [vmem:[#allocation94_spill] sm:$0xff]  ;;  %v16228_v56 = vld [vmem:[#allocation205_spill] sm:$0xff] }
 0x381   : > { %v5220_v52 = vrot.slane %v5206_v30, %v9627_v19  ;;  %v5245_v16 = vrot.slane %v5237_v42, %v9627_v19  ;;  %16218 = vst [vmem:[#allocation160_spill] sm:$0xff] %v13597_v5  ;;  %v5124_v23 = vcombine.high %v13572_v44, %v13558_v2  ;;  %v5566_v17 = vcombine.high %v16222_v1, %v16221_v9  ;;  %v16226_v42 = vld [vmem:[#allocation212_spill] sm:$0xff]  ;;  %v16229_v1 = vld [vmem:[#allocation202_spill] sm:$0xff] }
 0x382   : > { %8803 = vrot.lane.b32.xlu1 %v8802_v57, %s9403_s23  ;;  %8758 = vrot.lane.b32.xlu0 %v16220_v47, %s9406_s15  ;;  %v5686_v30 = vcombine.high %v16224_v62, %v16223_v27  ;;  %v5702_v59 = vcombine.high %v16226_v42, %v16225_v58  ;;  %v5121_v12 = vcombine.low %v5077_v34, %v5109_v28  ;;  %v16227_v54 = vld [vmem:[#allocation52_spill] sm:$0xff]  ;;  %v16230_v27 = vld [vmem:[#allocation201_spill] sm:$0xff]  ;;  %v16232_v42 = vld [vmem:[#allocation199_spill] sm:$0xff] }
 0x383   : > { %v5213_v63 = vrot.slane %v5205_v61, %v9627_v19  ;;  %v5564_v57 = vrot.slane %v5550_v13, %v15611_v35  ;;  %v5260_v48 = vcombine.high %v5220_v52, %v5252_v8  ;;  %v5122_v24 = vcombine.high %v5077_v34, %v5109_v28  ;;  %v16231_v61 = vld [vmem:[#allocation37_spill] sm:$0xff]  ;;  %v16255_v5 = vld [vmem:[#allocation244_spill] sm:$0xff] }
 0x384   : > { %v5548_v29 = vrot.slane %v5534_v36, %v15611_v35  ;;  %v5596_v45 = vrot.slane %v5582_v18, %v15611_v35  ;;  %v5670_v47 = vcombine.high %v16228_v56, %v16227_v54  ;;  %v5732_v9 = vrot.slane %v5718_v43, %v15611_v35  ;;  %v16233_v54 = vld [vmem:[#allocation200_spill] sm:$0xff]  ;;  %v13631_v55 = vpop.permute.xlu0 %8498 }
 0x385   : > { %v5630_v62 = vcombine.high %v16230_v27, %v16229_v1  ;;  %v5257_v13 = vcombine.low %v5213_v63, %v5245_v16  ;;  %v5258_v58 = vcombine.high %v5213_v63, %v5245_v16  ;;  %v5580_v28 = vrot.slane %v5566_v17, %v15611_v35  ;;  %v16234_v1 = vld [vmem:[#allocation215_spill] sm:$0xff]  ;;  %v16235_v27 = vld [vmem:[#allocation220_spill] sm:$0xff] }
 0x386   : > { %8813 = vrot.lane.b32.xlu1 %v8812_v40, %s9407_s29  ;;  %8768 = vrot.lane.b32.xlu0 %v16231_v61, %s9407_s29  ;;  %v5700_v34 = vrot.slane %v5686_v30, %v15611_v35  ;;  %v5716_v36 = vrot.slane %v5702_v59, %v15611_v35  ;;  %v5259_v18 = vcombine.low %v5220_v52, %v5252_v8  ;;  %v13633_v61 = vpop.permute.xlu1 %8543  ;;  %v16236_v8 = vld [vmem:[#allocation219_spill] sm:$0xff]  ;;  %v16237_v52 = vld [vmem:[#allocation100_spill] sm:$0xff] }
 0x387   : > { %v5598_v43 = vcombine.high %v16233_v54, %v16232_v42  ;;  %v5613_v56 = vcombine.low %v5548_v29, %v5564_v57  ;;  %v5614_v6 = vcombine.high %v5548_v29, %v5564_v57  ;;  %v5766_v40 = vcombine.high %v16235_v27, %v16234_v1  ;;  %v16238_v42 = vld [vmem:[#allocation146_spill] sm:$0xff] }
 0x388   : > { %v5645_v16 = vcombine.low %v5580_v28, %v5596_v45  ;;  %v5646_v63 = vcombine.high %v5580_v28, %v5596_v45  ;;  %v5684_v17 = vrot.slane %v5670_v47, %v15611_v35  ;;  %v5782_v30 = vcombine.high %v5716_v36, %v5732_v9 }
 0x389   : > { %v5644_v59 = vrot.slane %v5630_v62, %v9627_v19  ;;  %v5734_v22 = vcombine.high %v16237_v52, %v16236_v8  ;;  %v5123_v57 = vcombine.low %v13572_v44, %v13558_v2  ;;  %v8852_v54 = vpack.i.bf16 %v5260_v48, %v5124_v23  ;;  %v16244_v8 = vld [vmem:[#allocation225_spill] sm:$0xff] }
 0x38a   : > { %8823 = vrot.lane.b32.xlu1 %v16238_v42, %s9402_s20  ;;  %8778 = vrot.lane.b32.xlu0 %v13547_v53, %s9404_s26  ;;  %v5750_v29 = vcombine.high %v5684_v17, %v5700_v34  ;;  %v13645_v45 = vpack.i.bf16 %v5257_v13, %v5121_v12  ;;  %v13647_v47 = vpack.i.bf16 %v5258_v58, %v5122_v24  ;;  %v13669_v24 = vpop.permute.xlu0 %8508  ;;  %v13671_v13 = vpop.permute.xlu1 %8553  ;;  %v16245_v42 = vld [vmem:[#allocation223_spill] sm:$0xff] }
 0x38b   : > { %v5612_v62 = vrot.slane %v5598_v43, %v9627_v19  ;;  %v13651_v28 = vrot.slane %v5613_v56, %v9627_v19  ;;  %v5780_v1 = vrot.slane %v5766_v40, %v9627_v19  ;;  %v13654_v27 = vpack.i.bf16 %v5259_v18, %v5123_v57  ;;  %v16239_v43 = vld [vmem:[#allocation206_spill] sm:$0xff]  ;;  %v16240_v56 = vld [vmem:[#allocation209_spill] sm:$0xff] }
 0x38c   : > { %v13657_v53 = vrot.slane %v5614_v6, %v9627_v19  ;;  %v13660_v2 = vrot.slane %v5645_v16, %v9627_v19  ;;  %v13663_v44 = vrot.slane %v5646_v63, %v9627_v19  ;;  %v13666_v23 = vrot.slane %v5782_v30, %v9627_v19  ;;  %v16243_v30 = vld [vmem:[#allocation102_spill] sm:$0xff] }
 0x38d   : > { %v5748_v12 = vrot.slane %v5734_v22, %v9627_v19  ;;  %v5781_v48 = vcombine.low %v5716_v36, %v5732_v9  ;;  %v5664_v6 = vcombine.high %v5612_v62, %v5644_v59  ;;  %v5749_v58 = vcombine.low %v5684_v17, %v5700_v34  ;;  %v16241_v9 = vld [vmem:[#allocation232_spill] sm:$0xff]  ;;  %v16242_v36 = vld [vmem:[#allocation230_spill] sm:$0xff] }
 0x38e   : > { %8833 = vrot.lane.b32.xlu1 %v13242_v10, %s9401_s18  ;;  %8788 = vrot.lane.b32.xlu0 %v13566_v7, %s9405_s7  ;;  %v13678_v18 = vrot.slane %v5750_v29, %v9627_v19  ;;  %v5662_v40 = vcombine.high %v16240_v56, %v16239_v43  ;;  %v5663_v22 = vcombine.low %v5612_v62, %v5644_v59  ;;  %v16246_v57 = vld [vmem:[#allocation218_spill] sm:$0xff]  ;;  %v16247_v62 = vld [vmem:[#allocation221_spill] sm:$0xff]  ;;  %v16249_v43 = vld [vmem:[#allocation231_spill] sm:$0xff] }
 0x38f   : > { %v5854_v16 = vcombine.high %v16242_v36, %v16241_v9  ;;  %v5800_v63 = vcombine.high %v5748_v12, %v5780_v1  ;;  %v5798_v52 = vcombine.high %v16244_v8, %v16243_v30  ;;  %v5799_v10 = vcombine.low %v5748_v12, %v5780_v1  ;;  %v16248_v9 = vld [vmem:[#allocation214_spill] sm:$0xff]  ;;  %v16250_v56 = vld [vmem:[#allocation228_spill] sm:$0xff] }
 0x390   : > { %v5822_v7 = vcombine.high %v16246_v57, %v16245_v42  ;;  %v5668_v34 = vcombine.high %v13657_v53, %v13663_v44  ;;  %v5804_v17 = vcombine.high %v13678_v18, %v13666_v23  ;;  %v5665_v59 = vcombine.low %v13651_v28, %v13660_v2  ;;  %v16251_v12 = vld [vmem:[#allocation190_spill] sm:$0xff]  ;;  %v16252_v57 = vld [vmem:[#allocation257_spill] sm:$0xff] }
 0x391   : > { %v5789_v29 = vrot.slane %v5781_v48, %v9627_v19  ;;  %v5806_v36 = vcombine.high %v16248_v9, %v16247_v62  ;;  %v5838_v1 = vcombine.high %v16250_v56, %v16249_v43  ;;  %v5757_v42 = vrot.slane %v5749_v58, %v9627_v19  ;;  %v16253_v30 = vld [vmem:[#allocation254_spill] sm:$0xff]  ;;  %v13711_v43 = vpop.permute.xlu0 %8518  ;;  %v13713_v56 = vpop.permute.xlu1 %8563 }
 0x392   : > { %8843 = vrot.lane.b32.xlu1 %v16251_v12, %s9406_s15  ;;  %8798 = vrot.lane.b32.xlu0 %v13578_v49, %s9406_s15  ;;  %v5990_v8 = vcombine.high %v16253_v30, %v16252_v57  ;;  %v5666_v48 = vcombine.high %v13651_v28, %v13660_v2  ;;  %v5667_v62 = vcombine.low %v13657_v53, %v13663_v44  ;;  %v16254_v57 = vld [vmem:[#allocation248_spill] sm:$0xff] }
 0x393   : > { %v5868_v9 = vrot.slane %v5854_v16, %v15611_v35  ;;  %v13715_v12 = vpack.i.bf16 %v5800_v63, %v5664_v6  ;;  %v13717_v49 = vpack.i.bf16 %v5798_v52, %v5662_v40  ;;  %v13719_v58 = vpack.i.bf16 %v5799_v10, %v5663_v22  ;;  %v16256_v2 = vld [vmem:[#allocation256_spill] sm:$0xff]  ;;  %v16259_v22 = vld [vmem:[#allocation235_spill] sm:$0xff]  ;;  %v16260_v52 = vld [vmem:[#allocation246_spill] sm:$0xff] }
 0x394   : > { %v5836_v30 = vrot.slane %v5822_v7, %v15611_v35  ;;  %v5958_v28 = vcombine.high %v16255_v5, %v16254_v57  ;;  %v5974_v53 = vcombine.high %v16257_v0, %v16256_v2  ;;  %v13726_v44 = vpack.i.bf16 %v5804_v17, %v5668_v34  ;;  %v16258_v40 = vld [vmem:[#allocation236_spill] sm:$0xff]  ;;  %v16261_v5 = vld [vmem:[#allocation239_spill] sm:$0xff]  ;;  %v16262_v34 = vld [vmem:[#allocation233_spill] sm:$0xff] }
 0x395   : > { %v5820_v16 = vrot.slane %v5806_v36, %v15611_v35  ;;  %v5852_v50 = vrot.slane %v5838_v1, %v15611_v35  ;;  %v5801_v6 = vcombine.low %v5757_v42, %v5789_v29  ;;  %v5902_v63 = vcombine.high %v16259_v22, %v16258_v40  ;;  %v16263_v17 = vld [vmem:[#allocation234_spill] sm:$0xff]  ;;  %v16264_v1 = vld [vmem:[#allocation261_spill] sm:$0xff]  ;;  %v13742_v51 = vpop.permute.xlu1 %8573 }
 0x396   : > { %8853 = vrot.lane.b32.xlu1 %v8852_v54, %s9407_s29  ;;  %8808 = vrot.lane.b32.xlu0 %v13583_v46, %s9407_s29  ;;  %v5942_v10 = vcombine.high %v16261_v5, %v16260_v52  ;;  %v6004_v0 = vrot.slane %v5990_v8, %v15611_v35  ;;  %v5802_v7 = vcombine.high %v5757_v42, %v5789_v29  ;;  %v16265_v2 = vld [vmem:[#allocation266_spill] sm:$0xff]  ;;  %v13744_v46 = vpop.permute.xlu0 %8528  ;;  %v16266_v42 = vld [vmem:[#allocation265_spill] sm:$0xff]  ;;  %v16267_v5 = vld [vmem:[#allocation267_spill] sm:$0xff] }
 0x397   : > { %v5870_v36 = vcombine.high %v16263_v17, %v16262_v34  ;;  %v5917_v57 = vcombine.low %v5852_v50, %v5868_v9  ;;  %v6038_v54 = vcombine.high %v16265_v2, %v16264_v1  ;;  %v5803_v40 = vcombine.low %v13678_v18, %v13666_v23  ;;  %v16273_v2 = vld [vmem:[#allocation271_spill] sm:$0xff] }
 0x398   : > { %v5885_v22 = vcombine.low %v5820_v16, %v5836_v30  ;;  %v5918_v14 = vcombine.high %v5852_v50, %v5868_v9  ;;  %v5972_v52 = vrot.slane %v5958_v28, %v15611_v35  ;;  %v5988_v8 = vrot.slane %v5974_v53, %v15611_v35 }
 0x399   : > { %v5886_v29 = vcombine.high %v5820_v16, %v5836_v30  ;;  %v6006_v34 = vcombine.high %v16267_v5, %v16266_v42  ;;  %v13756_v17 = vpack.i.bf16 %v5801_v6, %v5665_v59  ;;  %v13759_v23 = vrot.slane %v5902_v63, %v9627_v19  ;;  %v13766_v16 = vpop.permute.xlu1 %8583 }
 0x39a   : > { %8863 = vrot.lane.b32.xlu1 %v13282_v3, %s9404_s26  ;;  %8818 = vrot.lane.b32.xlu0 %v13645_v45, %s9404_s26  ;;  %v5956_v50 = vrot.slane %v5942_v10, %v15611_v35  ;;  %v6053_v18 = vcombine.low %v5988_v8, %v6004_v0  ;;  %v13762_v9 = vpack.i.bf16 %v5802_v7, %v5666_v48  ;;  %v13768_v3 = vpop.permute.xlu0 %8538 }
 0x39b   : > { %v5925_v30 = vrot.slane %v5917_v57, %v9627_v19  ;;  %v6052_v28 = vrot.slane %v6038_v54, %v9627_v19  ;;  %v6054_v53 = vcombine.high %v5988_v8, %v6004_v0  ;;  %v13770_v45 = vpack.i.bf16 %v5803_v40, %v5667_v62  ;;  %v16271_v57 = vld [vmem:[#allocation245_spill] sm:$0xff]  ;;  %v16276_v8 = vld [vmem:[#allocation264_spill] sm:$0xff] }
 0x39c   : > { %v5884_v59 = vrot.slane %v5870_v36, %v9627_v19  ;;  %v5893_v6 = vrot.slane %v5885_v22, %v9627_v19  ;;  %v13775_v63 = vrot.slane %v5918_v14, %v9627_v19  ;;  %v6021_v48 = vcombine.low %v5956_v50, %v5972_v52  ;;  %v16270_v36 = vld [vmem:[#allocation242_spill] sm:$0xff]  ;;  %v16272_v14 = vld [vmem:[#allocation269_spill] sm:$0xff] }
 0x39d   : > { %v13778_v10 = vrot.slane %v5886_v29, %v9627_v19  ;;  %v6020_v7 = vrot.slane %v6006_v34, %v9627_v19  ;;  %v6022_v0 = vcombine.high %v5956_v50, %v5972_v52  ;;  %v6061_v62 = vrot.slane %v6053_v18, %v9627_v19  ;;  %v16275_v52 = vld [vmem:[#allocation270_spill] sm:$0xff]  ;;  %v16278_v18 = vld [vmem:[#allocation276_spill] sm:$0xff] }
 0x39e   : > { %16268 = vst [vmem:[#allocation170_spill] sm:$0xff] %v13775_v63  ;;  %8873 = vrot.lane.b32.xlu1 %v13295_v31, %s9405_s7  ;;  %8828 = vrot.lane.b32.xlu0 %v13647_v47, %s9405_s7  ;;  %v5934_v1 = vcombine.high %v16271_v57, %v16270_v36  ;;  %v6070_v54 = vcombine.high %v16273_v2, %v16272_v14  ;;  %v13796_v31 = vpop.permute.xlu1 %8593  ;;  %v13798_v42 = vpop.permute.xlu0 %8548  ;;  %v16277_v50 = vld [vmem:[#allocation278_spill] sm:$0xff]  ;;  %v16280_v2 = vld [vmem:[#allocation268_spill] sm:$0xff] }
 0x39f   : > { %16269 = vst [vmem:[#allocation151_spill] sm:$0xff] %v13778_v10  ;;  %v5935_v40 = vcombine.low %v5884_v59, %v13759_v23  ;;  %v13792_v22 = vrot.slane %v6054_v53, %v9627_v19  ;;  %v6366_v29 = vcombine.high %v16276_v8, %v16275_v52  ;;  %v6071_v47 = vcombine.low %v6020_v7, %v6052_v28  ;;  %v16281_v52 = vld [vmem:[#allocation260_spill] sm:$0xff] }
 0x3a0   : > { %v5937_v5 = vcombine.low %v5893_v6, %v5925_v30  ;;  %v6029_v34 = vrot.slane %v6021_v48, %v9627_v19  ;;  %v6398_v36 = vcombine.high %v16278_v18, %v16277_v50  ;;  %v5938_v57 = vcombine.high %v5893_v6, %v5925_v30  ;;  %v16283_v50 = vld [vmem:[#allocation275_spill] sm:$0xff] }
 0x3a1   : > { %16274 = vst [vmem:[#allocation150_spill] sm:$0xff] %v13792_v22  ;;  %v5939_v14 = vcombine.low %v13778_v10, %v13775_v63  ;;  %v13806_v53 = vrot.slane %v6022_v0, %v9627_v19  ;;  %v6350_v8 = vcombine.high %v16281_v52, %v16280_v2  ;;  %v5936_v48 = vcombine.high %v5884_v59, %v13759_v23  ;;  %v16285_v23 = vld [vmem:[#allocation279_spill] sm:$0xff]  ;;  %v16286_v59 = vld [vmem:[#allocation280_spill] sm:$0xff] }
 0x3a2   : > { %8883 = vrot.lane.b32.xlu1 %v13297_v25, %s9406_s15  ;;  %8838 = vrot.lane.b32.xlu0 %v13654_v27, %s9406_s15  ;;  %v6382_v30 = vcombine.high %v16283_v50, %v16282_v41  ;;  %v8912_v6 = vpack.i.bf16 %v6070_v54, %v5934_v1  ;;  %v6073_v18 = vcombine.low %v6029_v34, %v6061_v62  ;;  %v13820_v39 = vpop.permute.xlu1 %8603  ;;  %v13822_v2 = vpop.permute.xlu0 %8558  ;;  %v16288_v1 = vld [vmem:[#allocation289_spill] sm:$0xff]  ;;  %v16294_v10 = vld [vmem:[#allocation291_spill] sm:$0xff] }
 0x3a3   : > { %16279 = vst [vmem:[#allocation213_spill] sm:$0xff] %v13806_v53  ;;  %v6074_v33 = vcombine.high %v6029_v34, %v6061_v62  ;;  %v13818_v0 = vrot.slane %v6366_v29, %v15611_v35  ;;  %v13824_v52 = vpack.i.bf16 %v6071_v47, %v5935_v40  ;;  %v6075_v25 = vcombine.low %v13806_v53, %v13792_v22  ;;  %v16287_v62 = vld [vmem:[#allocation292_spill] sm:$0xff]  ;;  %v16289_v29 = vld [vmem:[#allocation298_spill] sm:$0xff]  ;;  %v16293_v47 = vld [vmem:[#allocation281_spill] sm:$0xff] }
 0x3a4   : > { %v6072_v27 = vcombine.high %v6020_v7, %v6052_v28  ;;  %v6414_v32 = vcombine.high %v16286_v59, %v16285_v23  ;;  %v13831_v41 = vrot.slane %v6398_v36, %v15611_v35  ;;  %v6502_v54 = vcombine.high %v16288_v1, %v16287_v62  ;;  %v16290_v34 = vld [vmem:[#allocation296_spill] sm:$0xff]  ;;  %v16292_v40 = vld [vmem:[#allocation282_spill] sm:$0xff]  ;;  %v16295_v28 = vld [vmem:[#allocation285_spill] sm:$0xff] }
 0x3a5   : > { %16284 = vst [vmem:[#allocation99_spill] sm:$0xff] %v13818_v0  ;;  %v6534_v50 = vcombine.high %v16290_v34, %v16289_v29  ;;  %v13838_v15 = vrot.slane %v6350_v8, %v15611_v35  ;;  %v6446_v4 = vcombine.high %v16293_v47, %v16292_v40  ;;  %v6486_v7 = vcombine.high %v16295_v28, %v16294_v10  ;;  %v16296_v23 = vld [vmem:[#allocation297_spill] sm:$0xff]  ;;  %v16297_v59 = vld [vmem:[#allocation295_spill] sm:$0xff]  ;;  %v16309_v29 = vld [vmem:[#allocation308_spill] sm:$0xff] }
 0x3a6   : > { %8893 = vrot.lane.b32.xlu1 %v13715_v12, %s9403_s23  ;;  %8848 = vrot.lane.b32.xlu0 %v13299_v21, %s9403_s23  ;;  %v13849_v36 = vrot.slane %v6382_v30, %v15611_v35  ;;  %v6518_v62 = vcombine.high %v16297_v59, %v16296_v23  ;;  %v13853_v8 = vpack.i.bf16 %v6073_v18, %v5937_v5  ;;  %v13859_v10 = vpop.permute.xlu1 %8613  ;;  %v13861_v34 = vpop.permute.xlu0 %8568  ;;  %v8496_v18 = vunpack.i.h.bf16 %v13469_v20  ;;  %v16308_v30 = vld [vmem:[#allocation306_spill] sm:$0xff]  ;;  %v16311_v22 = vld [vmem:[#allocation307_spill] sm:$0xff] }
 0x3a7   : > { %16291 = vst [vmem:[#allocation204_spill] sm:$0xff] %v13838_v15  ;;  %v13855_v1 = vpack.i.bf16 %v6074_v33, %v5938_v57  ;;  %v13863_v12 = vpack.i.bf16 %v6075_v25, %v5939_v14  ;;  %v13865_v21 = vpack.i.bf16 %v6072_v27, %v5936_v48  ;;  %v13870_v40 = vrot.slane %v6414_v32, %v9627_v19  ;;  %v16302_v25 = vld [vmem:[#allocation46_spill] sm:$0xff]  ;;  %v16303_v27 = vld [vmem:[#allocation195_spill] sm:$0xff]  ;;  %v16328_v15 = vld [vmem:[#allocation165_spill] sm:$0xff] }
 0x3a8   : > { %v13875_v57 = vrot.slane %v6502_v54, %v15611_v35  ;;  %v13878_v5 = vrot.slane %v6534_v50, %v15611_v35  ;;  %v13881_v14 = vrot.slane %v6446_v4, %v9627_v19  ;;  %v13884_v48 = vrot.slane %v6486_v7, %v15611_v35  ;;  %v16318_v53 = vld [vmem:[#allocation78_spill] sm:$0xff] }
 0x3a9   : > { %16298 = vst [vmem:[#allocation203_spill] sm:$0xff] %v13870_v40  ;;  %v8495_v32 = vunpack.i.l.bf16 %v13469_v20  ;;  %v13893_v54 = vrot.slane %v6518_v62, %v15611_v35  ;;  %v8506_v50 = vunpack.i.h.bf16 %v13505_v38  ;;  %v8505_v4 = vunpack.i.l.bf16 %v13505_v38  ;;  %v16310_v35 = vld [vmem:[#allocation302_spill] sm:$0xff]  ;;  %v16313_v40 = vld [vmem:[#allocation119_spill] sm:$0xff] }
 0x3aa   : > { %16299 = vst [vmem:[#allocation211_spill] sm:$0xff] %v13875_v57  ;;  %16300 = vst [vmem:[#allocation210_spill] sm:$0xff] %v13881_v14  ;;  %8903 = vrot.lane.b32.xlu1 %v16302_v25, %s9407_s29  ;;  %8858 = vrot.lane.b32.xlu0 %v16303_v27, %s9407_s29  ;;  %v8501_v47 = vunpack.i.h.bf16 %v13631_v55  ;;  %v8500_v28 = vunpack.i.l.bf16 %v13631_v55  ;;  %v8511_v7 = vunpack.i.h.bf16 %v13669_v24  ;;  %v8510_v20 = vunpack.i.l.bf16 %v13669_v24  ;;  %v13901_v23 = vpop.permute.xlu1 %8623  ;;  %v13903_v59 = vpop.permute.xlu0 %8578  ;;  %v16312_v24 = vld [vmem:[#allocation115_spill] sm:$0xff]  ;;  %v16315_v14 = vld [vmem:[#allocation142_spill] sm:$0xff] }
 0x3ab   : > { %16301 = vst [vmem:[#allocation139_spill] sm:$0xff] %v13884_v48  ;;  %16304 = vst [vmem:[#allocation137_spill] sm:$0xff] %v13901_v23  ;;  %v16314_v23 = vcombine.low %v16312_v24, %v16313_v40  ;;  %v16316_v62 = vld [vmem:[#allocation143_spill] sm:$0xff]  ;;  %v8546_v38 = vunpack.i.h.bf16 %v13633_v61  ;;  %v8545_v57 = vunpack.i.l.bf16 %v13633_v61  ;;  %v16325_v55 = vld [vmem:[#allocation181_spill] sm:$0xff] }
 0x3ac   : > { %16305 = vst [vmem:[#allocation193_spill] sm:$0xff] %v13903_v59  ;;  %v16317_v63 = vcombine.low %v16315_v14, %v16316_v62  ;;  %v16319_v40 = vld [vmem:[#allocation79_spill] sm:$0xff]  ;;  %v16322_v14 = vld [vmem:[#allocation76_spill] sm:$0xff] }
 0x3ad   : > { %v13919_v59 = vsel %vm883_vm2, %v16314_v23, %v8495_v32  ;;  %v16320_v24 = vcombine.low %v16318_v53, %v16319_v40  ;;  %v16321_v23 = vld [vmem:[#allocation75_spill] sm:$0xff]  ;;  %v16330_v40 = vld [vmem:[#allocation216_spill] sm:$0xff] }
 0x3ae   : > { %v13925_v33 = vsel %vm883_vm2, %v16317_v63, %v8496_v18  ;;  %8913 = vrot.lane.b32.xlu1 %v8912_v6, %s9402_s20  ;;  %8868 = vrot.lane.b32.xlu0 %v13717_v49, %s9402_s20  ;;  %v16323_v62 = vcombine.low %v16321_v23, %v16322_v14  ;;  %v16324_v18 = vld [vmem:[#allocation180_spill] sm:$0xff]  ;;  %v16327_v49 = vld [vmem:[#allocation163_spill] sm:$0xff]  ;;  %v16333_v14 = vld [vmem:[#allocation13_spill] sm:$0xff] }
 0x3af   : > { %v13936_v32 = vsel %vm883_vm2, %v16320_v24, %v8506_v50  ;;  %v16326_v61 = vcombine.low %v16324_v18, %v16325_v55  ;;  %v16329_v0 = vcombine.low %v16327_v49, %v16328_v15  ;;  %v8515_v50 = vunpack.i.l.bf16 %v13544_v60  ;;  %v16331_v24 = vld [vmem:[#allocation217_spill] sm:$0xff]  ;;  %v8589_v18 = vpop.permute.xlu0 %8588 }
 0x3b0   : > { %v13942_v63 = vsel %vm883_vm2, %v16323_v62, %v8505_v4  ;;  %v16332_v23 = vcombine.low %v16330_v40, %v16331_v24  ;;  %v16334_v62 = vld [vmem:[#allocation207_spill] sm:$0xff]  ;;  %v8591_v27 = vunpack.i.h.bf16 %v8589_v18  ;;  %v8590_v15 = vunpack.i.l.bf16 %v8589_v18  ;;  %v16336_v18 = vld [vmem:[#allocation224_spill] sm:$0xff] }
 0x3b1   : > { %v7906_v6 = vsel %vm883_vm2, %v16326_v61, %v8501_v47  ;;  %v7905_v53 = vsel %vm883_vm2, %v16329_v0, %v8500_v28  ;;  %v16335_v25 = vcombine.low %v16333_v14, %v16334_v62  ;;  %v8634_v47 = vpop.permute.xlu1 %8633  ;;  %v8556_v49 = vunpack.i.h.bf16 %v13671_v13 }
 0x3b2   : > { %v7910_v4 = vsel %vm883_vm2, %v16332_v23, %v8511_v7  ;;  %v8636_v61 = vunpack.i.h.bf16 %v8634_v47  ;;  %v8635_v48 = vunpack.i.l.bf16 %v8634_v47  ;;  %v7923_v0 = vsel %vm886_vm3, %v7905_v53, %v8545_v57  ;;  %8923 = vrot.lane.b32.xlu1 %v13824_v52, %s9401_s18  ;;  %8878 = vrot.lane.b32.xlu0 %v13719_v58, %s9401_s18 }
 0x3b3   : > { %v7909_v55 = vsel %vm883_vm2, %v16335_v25, %v8510_v20  ;;  %v7924_v28 = vsel %vm886_vm3, %v7906_v6, %v8546_v38  ;;  %v8555_v40 = vunpack.i.l.bf16 %v13671_v13  ;;  %v8521_v7 = vunpack.i.h.bf16 %v13711_v43  ;;  %v8599_v13 = vpop.permute.xlu0 %8598 }
 0x3b4   : > { %v8520_v20 = vunpack.i.l.bf16 %v13711_v43  ;;  %v7941_v25 = vsel %vm889_vm4, %v7923_v0, %v8590_v15  ;;  %v7942_v57 = vsel %vm889_vm4, %v7924_v28, %v8591_v27  ;;  %v8566_v38 = vunpack.i.h.bf16 %v13713_v56  ;;  %v16339_v15 = vld [vmem:[#allocation82_spill] sm:$0xff] }
 0x3b5   : > { %v8565_v6 = vunpack.i.l.bf16 %v13713_v56  ;;  %v8644_v53 = vpop.permute.xlu1 %8643  ;;  %v13977_v24 = vsel %vm892_vm5, %v7941_v25, %v8635_v48  ;;  %v13980_v52 = vsel %vm892_vm5, %v7942_v57, %v8636_v61  ;;  %v8601_v14 = vunpack.i.h.bf16 %v8599_v13  ;;  %v16337_v48 = vld [vmem:[#allocation49_spill] sm:$0xff]  ;;  %v16338_v61 = vld [vmem:[#allocation83_spill] sm:$0xff]  ;;  %v16341_v25 = vld [vmem:[#allocation80_spill] sm:$0xff] }
 0x3b6   : > { %v8646_v58 = vunpack.i.h.bf16 %v8644_v53  ;;  %v8645_v23 = vunpack.i.l.bf16 %v8644_v53  ;;  %v8600_v43 = vunpack.i.l.bf16 %v8599_v13  ;;  %v7927_v62 = vsel %vm886_vm3, %v7909_v55, %v8555_v40  ;;  %8933 = vrot.lane.b32.xlu1 %v16336_v18, %s9406_s15  ;;  %8888 = vrot.lane.b32.xlu0 %v16337_v48, %s9406_s15  ;;  %v16342_v57 = vld [vmem:[#allocation81_spill] sm:$0xff] }
 0x3b7   : > { %v7928_v27 = vsel %vm886_vm3, %v7910_v4, %v8556_v49  ;;  %v8531_v47 = vunpack.i.h.bf16 %v13744_v46  ;;  %v8530_v56 = vunpack.i.l.bf16 %v13744_v46  ;;  %v16340_v0 = vcombine.low %v16338_v61, %v16339_v15  ;;  %v8609_v18 = vpop.permute.xlu0 %8608 }
 0x3b8   : > { %v16343_v55 = vcombine.low %v16341_v25, %v16342_v57  ;;  %v7945_v49 = vsel %vm889_vm4, %v7927_v62, %v8600_v43  ;;  %v7946_v46 = vsel %vm889_vm4, %v7928_v27, %v8601_v14  ;;  %v8576_v43 = vunpack.i.h.bf16 %v13742_v51  ;;  %v16344_v62 = vld [vmem:[#allocation337_spill] sm:$0xff]  ;;  %v16348_v25 = vld [vmem:[#allocation326_spill] sm:$0xff] }
 0x3b9   : > { %v7914_v28 = vsel %vm883_vm2, %v16340_v0, %v8521_v7  ;;  %v8654_v13 = vpop.permute.xlu1 %8653  ;;  %v14003_v48 = vsel %vm892_vm5, %v7945_v49, %v8645_v23  ;;  %v14006_v7 = vsel %vm892_vm5, %v7946_v46, %v8646_v58  ;;  %v8611_v0 = vunpack.i.h.bf16 %v8609_v18 }
 0x3ba   : > { %v7913_v4 = vsel %vm883_vm2, %v16343_v55, %v8520_v20  ;;  %v7932_v53 = vsel %vm886_vm3, %v7914_v28, %v8566_v38  ;;  %v8656_v61 = vunpack.i.h.bf16 %v8654_v13  ;;  %v8655_v15 = vunpack.i.l.bf16 %v8654_v13  ;;  %v16347_v28 = vld [vmem:[#allocation324_spill] sm:$0xff]  ;;  %8943 = vrot.lane.b32.xlu1 %v13726_v44, %s9407_s29  ;;  %8898 = vrot.lane.b32.xlu0 %v13301_v26, %s9407_s29 }
 0x3bb   : > { %v7931_v40 = vsel %vm886_vm3, %v7913_v4, %v8565_v6  ;;  %v8610_v20 = vunpack.i.l.bf16 %v8609_v18  ;;  %v8575_v14 = vunpack.i.l.bf16 %v13742_v51  ;;  %v16345_v6 = vld [vmem:[#allocation338_spill] sm:$0xff]  ;;  %v16349_v23 = vcombine.low %v16347_v28, %v16348_v25 }
 0x3bc   : > { %v16346_v27 = vcombine.low %v16344_v62, %v16345_v6  ;;  %v8541_v58 = vunpack.i.h.bf16 %v13768_v3  ;;  %v8540_v51 = vunpack.i.l.bf16 %v13768_v3  ;;  %v7950_v4 = vsel %vm889_vm4, %v7932_v53, %v8611_v0 }
 0x3bd   : > { %v7917_v57 = vsel %vm883_vm2, %v16349_v23, %v8530_v56  ;;  %v7949_v55 = vsel %vm889_vm4, %v7931_v40, %v8610_v20  ;;  %v8550_v49 = vunpack.i.l.bf16 %v13798_v42  ;;  %v8664_v46 = vpop.permute.xlu1 %8663  ;;  %v8619_v56 = vpop.permute.xlu0 %8618  ;;  %v14032_v44 = vsel %vm892_vm5, %v7950_v4, %v8656_v61  ;;  %v16355_v4 = vld [vmem:[#allocation263_spill] sm:$0xff] }
 0x3be   : > { %v7918_v38 = vsel %vm883_vm2, %v16346_v27, %v8531_v47  ;;  %v8551_v47 = vunpack.i.h.bf16 %v13798_v42  ;;  %v14029_v13 = vsel %vm892_vm5, %v7949_v55, %v8655_v15  ;;  %v8666_v26 = vunpack.i.h.bf16 %v8664_v46  ;;  %8953 = vrot.lane.b32.xlu1 %v13853_v8, %s9404_s26  ;;  %8908 = vrot.lane.b32.xlu0 %v13756_v17, %s9404_s26 }
 0x3bf   : > { %v8665_v18 = vunpack.i.l.bf16 %v8664_v46  ;;  %v8621_v62 = vunpack.i.h.bf16 %v8619_v56  ;;  %v8620_v3 = vunpack.i.l.bf16 %v8619_v56  ;;  %v8586_v40 = vunpack.i.h.bf16 %v13766_v16 }
 0x3c0   : > { %v8585_v53 = vunpack.i.l.bf16 %v13766_v16  ;;  %v7935_v0 = vsel %vm886_vm3, %v7917_v57, %v8575_v14  ;;  %v7936_v42 = vsel %vm886_vm3, %v7918_v38, %v8576_v43  ;;  %v7922_v61 = vsel %vm886_vm3, %v13925_v33, %v8541_v58 }
 0x3c1   : > { %v7921_v15 = vsel %vm886_vm3, %v13919_v59, %v8540_v51  ;;  %v7953_v20 = vsel %vm889_vm4, %v7935_v0, %v8620_v3  ;;  %v7954_v16 = vsel %vm889_vm4, %v7936_v42, %v8621_v62  ;;  %v8596_v14 = vunpack.i.h.bf16 %v13796_v31  ;;  %v14050_v6 = vpop.permute.xlu1 %8673  ;;  %v8629_v8 = vpop.permute.xlu0 %8628 }
 0x3c2   : > { %v8595_v43 = vunpack.i.l.bf16 %v13796_v31  ;;  %v14053_v27 = vsel %vm892_vm5, %v7953_v20, %v8665_v18  ;;  %v14056_v17 = vsel %vm892_vm5, %v7954_v16, %v8666_v26  ;;  %v7926_v33 = vsel %vm886_vm3, %v13936_v32, %v8551_v47  ;;  %8963 = vrot.lane.b32.xlu1 %v13855_v1, %s9405_s7  ;;  %8918 = vrot.lane.b32.xlu0 %v13762_v9, %s9405_s7  ;;  %v16350_v32 = vld [vmem:[#allocation241_spill] sm:$0xff] }
 0x3c3   : > { %v7925_v59 = vsel %vm886_vm3, %v13942_v63, %v8550_v49  ;;  %v8631_v38 = vunpack.i.h.bf16 %v8629_v8  ;;  %v8630_v28 = vunpack.i.l.bf16 %v8629_v8  ;;  %v8561_v25 = vunpack.i.h.bf16 %v13822_v2  ;;  %v16351_v63 = vld [vmem:[#allocation243_spill] sm:$0xff] }
 0x3c4   : > { %v8560_v31 = vunpack.i.l.bf16 %v13822_v2  ;;  %v7939_v23 = vsel %vm889_vm4, %v7921_v15, %v8585_v53  ;;  %v7940_v57 = vsel %vm889_vm4, %v7922_v61, %v8586_v40  ;;  %v16352_v58 = vcombine.low %v16350_v32, %v16351_v63  ;;  %v16354_v2 = vld [vmem:[#allocation262_spill] sm:$0xff] }
 0x3c5   : > { %v16353_v55 = vunpack.i.h.bf16 %v13544_v60  ;;  %v16356_v47 = vcombine.low %v16354_v2, %v16355_v4  ;;  %v14083_v46 = vsel %vm892_vm5, %v7939_v23, %v8630_v28  ;;  %v14086_v1 = vsel %vm892_vm5, %v7940_v57, %v8631_v38  ;;  %v8684_v26 = vpop.permute.xlu1 %8683  ;;  %v8639_v18 = vpop.permute.xlu0 %8638  ;;  %v16361_v38 = vld [vmem:[#allocation304_spill] sm:$0xff] }
 0x3c6   : > { %v7911_v51 = vsel %vm883_vm2, %v16352_v58, %v8515_v50  ;;  %v8526_v9 = vunpack.i.h.bf16 %v13555_v37  ;;  %v8525_v56 = vunpack.i.l.bf16 %v13555_v37  ;;  %v7943_v50 = vsel %vm889_vm4, %v7925_v59, %v8595_v43  ;;  %8973 = vrot.lane.b32.xlu1 %v13863_v12, %s9406_s15  ;;  %8928 = vrot.lane.b32.xlu0 %v13770_v45, %s9406_s15  ;;  %v16357_v43 = vld [vmem:[#allocation286_spill] sm:$0xff]  ;;  %v16360_v59 = vld [vmem:[#allocation303_spill] sm:$0xff] }
 0x3c7   : > { %v7912_v49 = vsel %vm883_vm2, %v16356_v47, %v16353_v55  ;;  %v7944_v60 = vsel %vm889_vm4, %v7926_v33, %v8596_v14  ;;  %v8686_v62 = vunpack.i.h.bf16 %v8684_v26  ;;  %v8685_v3 = vunpack.i.l.bf16 %v8684_v26 }
 0x3c8   : > { %v8641_v40 = vunpack.i.h.bf16 %v8639_v18  ;;  %v8640_v53 = vunpack.i.l.bf16 %v8639_v18  ;;  %v8606_v0 = vunpack.i.h.bf16 %v13820_v39  ;;  %v8605_v42 = vunpack.i.l.bf16 %v13820_v39  ;;  %v16358_v39 = vld [vmem:[#allocation288_spill] sm:$0xff] }
 0x3c9   : > { %v7930_v61 = vsel %vm886_vm3, %v7912_v49, %v8561_v25  ;;  %v7929_v15 = vsel %vm886_vm3, %v7911_v51, %v8560_v31  ;;  %v8571_v37 = vunpack.i.h.bf16 %v13861_v34  ;;  %v8570_v20 = vunpack.i.l.bf16 %v13861_v34  ;;  %v8694_v25 = vpop.permute.xlu1 %8693  ;;  %v8649_v45 = vpop.permute.xlu0 %8648 }
 0x3ca   : > { %v7961_v16 = vsel %vm892_vm5, %v7943_v50, %v8640_v53  ;;  %v7962_v14 = vsel %vm892_vm5, %v7944_v60, %v8641_v40  ;;  %v16359_v8 = vcombine.low %v16357_v43, %v16358_v39  ;;  %v16362_v28 = vcombine.low %v16360_v59, %v16361_v38  ;;  %8983 = vrot.lane.b32.xlu1 %v13371_v11, %s9403_s23  ;;  %v16364_v11 = vld [vmem:[#allocation310_spill] sm:$0xff]  ;;  %v16365_v50 = vld [vmem:[#allocation312_spill] sm:$0xff] }
 0x3cb   : > { %v14113_v31 = vsel %vm895_vm6, %v7961_v16, %v8685_v3  ;;  %v14116_v34 = vsel %vm895_vm6, %v7962_v14, %v8686_v62  ;;  %v8696_v23 = vunpack.i.h.bf16 %v8694_v25  ;;  %v8695_v57 = vunpack.i.l.bf16 %v8694_v25  ;;  %8938 = vrot.lane.b32.xlu0 %v13865_v21, %s9403_s23 }
 0x3cc   : > { %v7915_v33 = vsel %vm883_vm2, %v16359_v8, %v8525_v56  ;;  %v7916_v12 = vsel %vm883_vm2, %v16362_v28, %v8526_v9  ;;  %v8651_v32 = vunpack.i.h.bf16 %v8649_v45  ;;  %v8650_v63 = vunpack.i.l.bf16 %v8649_v45  ;;  %v16371_v8 = vld [vmem:[#allocation290_spill] sm:$0xff]  ;;  %v16376_v45 = vld [vmem:[#allocation99_spill] sm:$0xff] }
 0x3cd   : > { %v8616_v58 = vunpack.i.h.bf16 %v13859_v10  ;;  %v8615_v51 = vunpack.i.l.bf16 %v13859_v10  ;;  %v7947_v55 = vsel %vm889_vm4, %v7929_v15, %v8605_v42  ;;  %v7948_v2 = vsel %vm889_vm4, %v7930_v61, %v8606_v0  ;;  %v8704_v26 = vpop.permute.xlu1 %8703  ;;  %v8659_v18 = vpop.permute.xlu0 %8658  ;;  %v16368_v15 = vld [vmem:[#allocation272_spill] sm:$0xff] }
 0x3ce   : > { %v7934_v4 = vsel %vm886_vm3, %v7916_v12, %v8571_v37  ;;  %v7933_v47 = vsel %vm886_vm3, %v7915_v33, %v8570_v20  ;;  %v7965_v49 = vsel %vm892_vm5, %v7947_v55, %v8650_v63  ;;  %v7966_v9 = vsel %vm892_vm5, %v7948_v2, %v8651_v32  ;;  %8993 = vrot.lane.b32.xlu1 %v16368_v15, %s9407_s29  ;;  %v16369_v37 = vld [vmem:[#allocation229_spill] sm:$0xff]  ;;  %v16372_v33 = vld [vmem:[#allocation287_spill] sm:$0xff]  ;;  %v16378_v63 = vld [vmem:[#allocation170_spill] sm:$0xff] }
 0x3cf   : > { %v16363_v10 = vcombine.high %v16311_v22, %v16310_v35  ;;  %v6614_v60 = vcombine.high %v16365_v50, %v16364_v11  ;;  %v14139_v21 = vsel %vm895_vm6, %v7965_v49, %v8695_v57  ;;  %v14142_v62 = vsel %vm895_vm6, %v7966_v9, %v8696_v23  ;;  %8948 = vrot.lane.b32.xlu0 %v16369_v37, %s9407_s29  ;;  %v16377_v23 = vld [vmem:[#allocation204_spill] sm:$0xff]  ;;  %v16380_v55 = vld [vmem:[#allocation114_spill] sm:$0xff]  ;;  %v16384_v49 = vld [vmem:[#allocation177_spill] sm:$0xff] }
 0x3d0   : > { %16366 = vst [vmem:[#allocation192_spill] sm:$0xff] %v14142_v62  ;;  %v8706_v3 = vunpack.i.h.bf16 %v8704_v26  ;;  %v8705_v40 = vunpack.i.l.bf16 %v8704_v26  ;;  %v8661_v53 = vunpack.i.h.bf16 %v8659_v18  ;;  %v8660_v0 = vunpack.i.l.bf16 %v8659_v18  ;;  %v16381_v2 = vld [vmem:[#allocation86_spill] sm:$0xff]  ;;  %v16439_v50 = vld [vmem:[#allocation69_spill] sm:$0xff] }
 0x3d1   : > { %v14134_v56 = vrot.slane %v16363_v10, %v9627_v19  ;;  %v16367_v35 = vcombine.high %v16309_v29, %v16308_v30  ;;  %v7951_v42 = vsel %vm889_vm4, %v7933_v47, %v8615_v51  ;;  %v7952_v61 = vsel %vm889_vm4, %v7934_v4, %v8616_v58  ;;  %v14164_v43 = vpop.permute.xlu1 %8713  ;;  %v14166_v39 = vpop.permute.xlu0 %8668  ;;  %v16379_v58 = vld [vmem:[#allocation151_spill] sm:$0xff]  ;;  %v16383_v47 = vld [vmem:[#allocation116_spill] sm:$0xff]  ;;  %v16395_v15 = vld [vmem:[#allocation150_spill] sm:$0xff] }
 0x3d2   : > { %v6462_v20 = vcombine.high %v13849_v36, %v13831_v41  ;;  %v16370_v16 = vcombine.low %v13893_v54, %v13878_v5  ;;  %v7969_v30 = vsel %vm892_vm5, %v7951_v42, %v8660_v0  ;;  %v7970_v14 = vsel %vm892_vm5, %v7952_v61, %v8661_v53  ;;  %v16391_v53 = vld [vmem:[#allocation210_spill] sm:$0xff]  ;;  %v16392_v0 = vld [vmem:[#allocation203_spill] sm:$0xff] }
 0x3d3   : > { %v14148_v22 = vrot.slane %v16367_v35, %v9627_v19  ;;  %v16373_v59 = vcombine.high %v16371_v8, %v16372_v33  ;;  %v14174_v12 = vsel %vm895_vm6, %v7969_v30, %v8705_v40  ;;  %v14177_v25 = vsel %vm895_vm6, %v7970_v14, %v8706_v3  ;;  %v16388_v3 = vld [vmem:[#allocation211_spill] sm:$0xff]  ;;  %v16390_v40 = vld [vmem:[#allocation117_spill] sm:$0xff]  ;;  %v16398_v14 = vld [vmem:[#allocation112_spill] sm:$0xff] }
 0x3d4   : > { %v6605_v29 = vrot.slane %v16370_v16, %v9627_v19  ;;  %16374 = vst [vmem:[#allocation104_spill] sm:$0xff] %v14174_v12  ;;  %16375 = vst [vmem:[#allocation57_spill] sm:$0xff] %v14177_v25  ;;  %v6430_v57 = vcombine.high %v16377_v23, %v16376_v45  ;;  %v6598_v32 = vcombine.high %v13893_v54, %v13878_v5  ;;  %8958 = vrot.lane.b32.xlu0 %v16390_v40, %s9402_s20  ;;  %v16397_v30 = vld [vmem:[#allocation147_spill] sm:$0xff]  ;;  %v16430_v33 = vld [vmem:[#allocation240_spill] sm:$0xff] }
 0x3d5   : > { %v9002_v38 = vpack.i.bf16 %v6614_v60, %v16373_v59  ;;  %v6615_v28 = vcombine.low %v14148_v22, %v14134_v56  ;;  %v5940_v51 = vcombine.high %v16379_v58, %v16378_v63  ;;  %v16382_v4 = vcombine.high %v16380_v55, %v16381_v2  ;;  %v16387_v60 = vld [vmem:[#allocation139_spill] sm:$0xff]  ;;  %v16435_v8 = vld [vmem:[#allocation74_spill] sm:$0xff] }
 0x3d6   : > { %v16385_v9 = vcombine.high %v16383_v47, %v16384_v49  ;;  %v16386_v26 = vcombine.low %v13849_v36, %v13831_v41  ;;  %v16389_v5 = vcombine.low %v16387_v60, %v16388_v3  ;;  %v6479_v35 = vcombine.low %v16392_v0, %v16391_v53  ;;  %v16394_v36 = vld [vmem:[#allocation213_spill] sm:$0xff]  ;;  %v16401_v63 = vld [vmem:[#allocation23_spill] sm:$0xff]  ;;  %v16436_v11 = vld [vmem:[#allocation70_spill] sm:$0xff] }
 0x3d7   : > { %9003 = vrot.lane.b32.xlu1 %v9002_v38, %s9402_s20  ;;  %v16393_v42 = vcombine.low %v16377_v23, %v16376_v45  ;;  %v6566_v41 = vcombine.high %v16387_v60, %v16388_v3  ;;  %v16396_v37 = vcombine.high %v16394_v36, %v16395_v15  ;;  %v16399_v59 = vcombine.low %v16397_v30, %v16398_v14  ;;  %v16400_v38 = vld [vmem:[#allocation111_spill] sm:$0xff]  ;;  %v14226_v45 = vpop.permute.xlu1 %8723  ;;  %v8679_v23 = vpop.permute.xlu0 %8678 }
 0x3d8   : > { %v14191_v10 = vpack.i.bf16 %v16385_v9, %v16382_v4  ;;  %v6469_v18 = vrot.slane %v16386_v26, %v9627_v19  ;;  %v6573_v54 = vrot.slane %v16389_v5, %v9627_v19  ;;  %v16402_v58 = vcombine.low %v16400_v38, %v16401_v63  ;;  %v16404_v26 = vld [vmem:[#allocation301_spill] sm:$0xff]  ;;  %v16409_v63 = vld [vmem:[#allocation311_spill] sm:$0xff] }
 0x3d9   : > { %v6437_v61 = vrot.slane %v16393_v42, %v9627_v19  ;;  %v8987_v16 = vpack.i.bf16 %v16396_v37, %v5940_v51  ;;  %v14224_v2 = vrot.slane %v6462_v20, %v9627_v19  ;;  %v9012_v4 = vpack.i.bf16 %v6615_v28, %v6479_v35  ;;  %v16403_v51 = vld [vmem:[#allocation309_spill] sm:$0xff]  ;;  %v16405_v20 = vld [vmem:[#allocation87_spill] sm:$0xff] }
 0x3da   : > { %v14221_v55 = vpack.i.bf16 %v16402_v58, %v16399_v59  ;;  %v6617_v47 = vcombine.low %v6573_v54, %v6605_v29  ;;  %v6618_v49 = vcombine.high %v6573_v54, %v6605_v29  ;;  %v14229_v9 = vrot.slane %v6598_v32, %v9627_v19  ;;  %8968 = vrot.lane.b32.xlu0 %v16405_v20, %s9401_s18  ;;  %v16406_v32 = vld [vmem:[#allocation85_spill] sm:$0xff]  ;;  %v16429_v12 = vld [vmem:[#allocation31_spill] sm:$0xff] }
 0x3db   : > { %v6622_v60 = vcombine.high %v16404_v26, %v16403_v51  ;;  %v8681_v3 = vunpack.i.h.bf16 %v8679_v23  ;;  %v8680_v5 = vunpack.i.l.bf16 %v8679_v23  ;;  %v14234_v40 = vrot.slane %v6430_v57, %v9627_v19  ;;  %9013 = vrot.lane.b32.xlu1 %v9012_v4, %s9401_s18  ;;  %v16407_v54 = vld [vmem:[#allocation317_spill] sm:$0xff]  ;;  %v14252_v15 = vpop.permute.xlu1 %8733  ;;  %v8689_v37 = vpop.permute.xlu0 %8688  ;;  %v16411_v4 = vld [vmem:[#allocation318_spill] sm:$0xff]  ;;  %v16414_v26 = vld [vmem:[#allocation327_spill] sm:$0xff] }
 0x3dc   : > { %v6481_v42 = vcombine.low %v6437_v61, %v6469_v18  ;;  %v6482_v28 = vcombine.high %v6437_v61, %v6469_v18  ;;  %v14240_v29 = vrot.slane %v6566_v41, %v9627_v19  ;;  %v6670_v35 = vcombine.high %v16407_v54, %v16406_v32  ;;  %v16408_v41 = vld [vmem:[#allocation12_spill] sm:$0xff]  ;;  %v16410_v58 = vld [vmem:[#allocation305_spill] sm:$0xff]  ;;  %v16413_v51 = vld [vmem:[#allocation330_spill] sm:$0xff] }
 0x3dd   : > { %v14246_v36 = vsel %vm895_vm6, %v13977_v24, %v8680_v5  ;;  %v14250_v57 = vsel %vm895_vm6, %v13980_v52, %v8681_v3  ;;  %v14261_v59 = vrot.slane %v6622_v60, %v16408_v41  ;;  %v8691_v24 = vunpack.i.h.bf16 %v8689_v37  ;;  %v16415_v5 = vld [vmem:[#allocation103_spill] sm:$0xff]  ;;  %v16416_v60 = vld [vmem:[#allocation273_spill] sm:$0xff] }
 0x3de   : > { %v9042_v30 = vpack.i.bf16 %v6617_v47, %v6481_v42  ;;  %v14254_v14 = vpack.i.bf16 %v6618_v49, %v6482_v28  ;;  %v8690_v38 = vunpack.i.l.bf16 %v8689_v37  ;;  %v6638_v23 = vcombine.high %v16410_v58, %v16409_v63  ;;  %v16412_v47 = vld [vmem:[#allocation316_spill] sm:$0xff]  ;;  %8978 = vrot.lane.b32.xlu0 %v16416_v60, %s9406_s15  ;;  %v16417_v42 = vld [vmem:[#allocation335_spill] sm:$0xff]  ;;  %v16419_v63 = vld [vmem:[#allocation322_spill] sm:$0xff] }
 0x3df   : > { %v6654_v49 = vcombine.high %v16412_v47, %v16411_v4  ;;  %v6774_v3 = vcombine.high %v16414_v26, %v16413_v51  ;;  %9023 = vrot.lane.b32.xlu1 %v16415_v5, %s9406_s15  ;;  %v14276_v20 = vrot.slane %v6670_v35, %v16408_v41  ;;  %v16418_v28 = vld [vmem:[#allocation331_spill] sm:$0xff]  ;;  %v14286_v37 = vsel %vm895_vm6, %v14006_v7, %v8691_v24  ;;  %v16420_v58 = vld [vmem:[#allocation321_spill] sm:$0xff]  ;;  %v16421_v47 = vld [vmem:[#allocation336_spill] sm:$0xff]  ;;  %v14294_v61 = vpop.permute.xlu1 %8743 }
 0x3e0   : > { %v6790_v32 = vcombine.high %v16418_v28, %v16417_v42  ;;  %v14282_v54 = vsel %vm895_vm6, %v14003_v48, %v8690_v38  ;;  %v6718_v4 = vcombine.high %v16420_v58, %v16419_v63  ;;  %v16422_v51 = vld [vmem:[#allocation332_spill] sm:$0xff]  ;;  %v8699_v42 = vpop.permute.xlu0 %8698  ;;  %v16424_v28 = vld [vmem:[#allocation171_spill] sm:$0xff]  ;;  %v16425_v24 = vld [vmem:[#allocation329_spill] sm:$0xff] }
 0x3e1   : > { %v6806_v26 = vcombine.high %v16422_v51, %v16421_v47  ;;  %v16423_v5 = vld [vmem:[#allocation160_spill] sm:$0xff]  ;;  %v8536_v48 = vunpack.i.h.bf16 %v16424_v28  ;;  %v8535_v38 = vunpack.i.l.bf16 %v16424_v28  ;;  %v8701_v52 = vunpack.i.h.bf16 %v8699_v42  ;;  %v16426_v18 = vld [vmem:[#allocation323_spill] sm:$0xff]  ;;  %v16427_v58 = vld [vmem:[#allocation193_spill] sm:$0xff] }
 0x3e2   : > { %v8491_v35 = vunpack.i.h.bf16 %v16423_v5  ;;  %v8490_v60 = vunpack.i.l.bf16 %v16423_v5  ;;  %v8700_v7 = vunpack.i.l.bf16 %v8699_v42  ;;  %v6758_v25 = vcombine.high %v16426_v18, %v16425_v24  ;;  %v16428_v5 = vld [vmem:[#allocation176_spill] sm:$0xff]  ;;  %8988 = vrot.lane.b32.xlu0 %v8987_v16, %s9407_s29 }
 0x3e3   : > { %v14301_v63 = vrot.slane %v6774_v3, %v16408_v41  ;;  %v8581_v47 = vunpack.i.h.bf16 %v16427_v58  ;;  %v8580_v51 = vunpack.i.l.bf16 %v16427_v58  ;;  %9033 = vrot.lane.b32.xlu1 %v16428_v5, %s9407_s29  ;;  %v6822_v28 = vcombine.high %v16430_v33, %v16429_v12  ;;  %v16433_v58 = vld [vmem:[#allocation28_spill] sm:$0xff]  ;;  %v16434_v5 = vld [vmem:[#allocation247_spill] sm:$0xff] }
 0x3e4   : > { %v14311_v42 = vrot.slane %v6790_v32, %v16408_v41  ;;  %v14315_v18 = vsel %vm895_vm6, %v14029_v13, %v8700_v7  ;;  %v14319_v3 = vsel %vm895_vm6, %v14032_v44, %v8701_v52  ;;  %v14322_v24 = vrot.slane %v6806_v26, %v16408_v41  ;;  %v16438_v32 = vld [vmem:[#allocation73_spill] sm:$0xff]  ;;  %v14334_v7 = vpop.permute.xlu1 %8753  ;;  %v8709_v44 = vpop.permute.xlu0 %8708 }
 0x3e5   : > { %16431 = vst [vmem:[#allocation134_spill] sm:$0xff] %v14315_v18  ;;  %16432 = vst [vmem:[#allocation121_spill] sm:$0xff] %v14319_v3  ;;  %v6854_v16 = vcombine.high %v16434_v5, %v16433_v58  ;;  %v16437_v33 = vcombine.low %v16435_v8, %v16436_v11  ;;  %v16440_v62 = vcombine.low %v16438_v32, %v16439_v50  ;;  %v8711_v3 = vunpack.i.h.bf16 %v8709_v44  ;;  %v16441_v58 = vld [vmem:[#allocation137_spill] sm:$0xff] }
 0x3e6   : > { %v8710_v18 = vunpack.i.l.bf16 %v8709_v44  ;;  %v8626_v5 = vunpack.i.h.bf16 %v16441_v58  ;;  %v8625_v11 = vunpack.i.l.bf16 %v16441_v58  ;;  %v16442_v50 = vld [vmem:[#allocation161_spill] sm:$0xff] }
 0x3e7   : > { %v7902_v12 = vsel %vm883_vm2, %v16437_v33, %v8491_v35  ;;  %v7901_v13 = vsel %vm883_vm2, %v16440_v62, %v8490_v60  ;;  %9043 = vrot.lane.b32.xlu1 %v9042_v30, %s9404_s26  ;;  %8998 = vrot.lane.b32.xlu0 %v16442_v50, %s9404_s26  ;;  %v8671_v62 = vunpack.i.h.bf16 %v14166_v39  ;;  %v8670_v60 = vunpack.i.l.bf16 %v14166_v39  ;;  %v16446_v30 = vld [vmem:[#allocation320_spill] sm:$0xff] }
 0x3e8   : > { %v7919_v52 = vsel %vm886_vm3, %v7901_v13, %v8535_v38  ;;  %v7920_v26 = vsel %vm886_vm3, %v7902_v12, %v8536_v48  ;;  %v14349_v48 = vsel %vm895_vm6, %v14053_v27, %v8710_v18  ;;  %v14353_v38 = vsel %vm895_vm6, %v14056_v17, %v8711_v3  ;;  %v14366_v39 = vpop.permute.xlu1 %8763  ;;  %v14368_v27 = vpop.permute.xlu0 %8718 }
 0x3e9   : > { %v7937_v8 = vsel %vm889_vm4, %v7919_v52, %v8580_v51  ;;  %v7938_v35 = vsel %vm889_vm4, %v7920_v26, %v8581_v47  ;;  %16443 = vst [vmem:[#allocation138_spill] sm:$0xff] %v14349_v48  ;;  %16444 = vst [vmem:[#allocation136_spill] sm:$0xff] %v14353_v38  ;;  %v14356_v51 = vrot.slane %v6638_v23, %v16408_v41  ;;  %v16445_v47 = vld [vmem:[#allocation319_spill] sm:$0xff]  ;;  %v8716_v3 = vunpack.i.h.bf16 %v14164_v43  ;;  %v16458_v38 = vld [vmem:[#allocation14_spill] sm:$0xff] }
 0x3ea   : > { %v6686_v33 = vcombine.high %v16446_v30, %v16445_v47  ;;  %v14361_v12 = vrot.slane %v6654_v49, %v16408_v41  ;;  %v14364_v32 = vrot.slane %v6854_v16, %v9627_v19  ;;  %v14371_v18 = vrot.slane %v6718_v4, %v9627_v19 }
 0x3eb   : > { %v14374_v17 = vrot.slane %v6758_v25, %v16408_v41  ;;  %v14377_v23 = vrot.slane %v6822_v28, %v9627_v19  ;;  %v6869_v49 = vcombine.low %v14311_v42, %v14322_v24  ;;  %v8715_v16 = vunpack.i.l.bf16 %v14164_v43  ;;  %9053 = vrot.lane.b32.xlu1 %v14254_v14, %s9405_s7  ;;  %9008 = vrot.lane.b32.xlu0 %v14191_v10, %s9405_s7 }
 0x3ec   : > { %v7955_v13 = vsel %vm892_vm5, %v7937_v8, %v8625_v11  ;;  %v7956_v44 = vsel %vm892_vm5, %v7938_v35, %v8626_v5  ;;  %v6733_v25 = vcombine.low %v14361_v12, %v14276_v20  ;;  %v14396_v28 = vrot.slane %v6686_v33, %v9627_v19  ;;  %v8774_v52 = vpop.permute.xlu1 %8773  ;;  %v8729_v26 = vpop.permute.xlu0 %8728 }
 0x3ed   : > { %v6837_v41 = vcombine.low %v14374_v17, %v14301_v63  ;;  %v7973_v4 = vsel %vm895_vm6, %v7955_v13, %v8670_v60  ;;  %v7974_v43 = vsel %vm895_vm6, %v7956_v44, %v8671_v62  ;;  %v16447_v14 = vcombine.low %v14234_v40, %v14224_v2 }
 0x3ee   : > { %v16448_v10 = vcombine.low %v14240_v29, %v14229_v9  ;;  %v6888_v5 = vcombine.high %v14377_v23, %v14364_v32  ;;  %v6616_v11 = vcombine.high %v14148_v22, %v14134_v56  ;;  %v6701_v8 = vcombine.low %v14261_v59, %v14356_v51 }
 0x3ef   : > { %v14411_v35 = vrot.slane %v6869_v49, %v9627_v19  ;;  %v8776_v50 = vunpack.i.h.bf16 %v8774_v52  ;;  %v8775_v62 = vunpack.i.l.bf16 %v8774_v52  ;;  %9018 = vrot.lane.b32.xlu0 %v14221_v55, %s9406_s15  ;;  %v6752_v60 = vcombine.high %v14396_v28, %v14371_v18  ;;  %v16451_v52 = vld [vmem:[#allocation255_spill] sm:$0xff] }
 0x3f0   : > { %v9062_v58 = vpack.i.bf16 %v16448_v10, %v16447_v14  ;;  %v7991_v47 = vsel %vm898_vm7, %v7973_v4, %v8715_v16  ;;  %v7992_v56 = vsel %vm898_vm7, %v7974_v43, %v8716_v3  ;;  %v14421_v22 = vrot.slane %v6733_v25, %v9627_v19  ;;  %v14432_v55 = vpop.permute.xlu1 %8783  ;;  %v8739_v13 = vpop.permute.xlu0 %8738  ;;  %v16450_v43 = vld [vmem:[#allocation109_spill] sm:$0xff] }
 0x3f1   : > { %v14424_v30 = vrot.slane %v6837_v41, %v9627_v19  ;;  %v14427_v33 = vsel %vm901_vm8, %v7991_v47, %v8775_v62  ;;  %v14430_v49 = vsel %vm901_vm8, %v7992_v56, %v8776_v50  ;;  %v9072_v44 = vpack.i.bf16 %v6888_v5, %v6752_v60 }
 0x3f2   : > { %9063 = vrot.lane.b32.xlu1 %v9062_v58, %s9406_s15  ;;  %v16449_v16 = vcombine.high %v16392_v0, %v16391_v53  ;;  %v14440_v41 = vrot.slane %v6701_v8, %v9627_v19  ;;  %v6886_v14 = vcombine.high %v16451_v52, %v16450_v43  ;;  %v8726_v10 = vunpack.i.h.bf16 %v14226_v45  ;;  %v16453_v8 = vld [vmem:[#allocation328_spill] sm:$0xff]  ;;  %v16457_v52 = vld [vmem:[#allocation30_spill] sm:$0xff] }
 0x3f3   : > { %v6890_v4 = vcombine.high %v14424_v30, %v14411_v35  ;;  %v8725_v58 = vunpack.i.l.bf16 %v14226_v45  ;;  %v8731_v53 = vunpack.i.h.bf16 %v8729_v26  ;;  %v8730_v0 = vunpack.i.l.bf16 %v8729_v26  ;;  %v16455_v26 = vld [vmem:[#allocation26_spill] sm:$0xff] }
 0x3f4   : > { %v9027_v3 = vpack.i.bf16 %v6616_v11, %v16449_v16  ;;  %v6754_v5 = vcombine.high %v14440_v41, %v14421_v22  ;;  %v16452_v11 = vld [vmem:[#allocation325_spill] sm:$0xff]  ;;  %v14454_v62 = vpop.permute.xlu1 %8793  ;;  %v8749_v60 = vpop.permute.xlu0 %8748  ;;  %v8676_v47 = vunpack.i.h.bf16 %v14050_v6  ;;  %v6887_v45 = vcombine.low %v14377_v23, %v14364_v32 }
 0x3f5   : > { %v6750_v50 = vcombine.high %v16453_v8, %v16452_v11  ;;  %v16459_v11 = vcombine.low %v16457_v52, %v16458_v38  ;;  %v8736_v48 = vunpack.i.h.bf16 %v14252_v15  ;;  %v8741_v23 = vunpack.i.h.bf16 %v8739_v13 }
 0x3f6   : > { %9073 = vrot.lane.b32.xlu1 %v9072_v44, %s9403_s23  ;;  %9028 = vrot.lane.b32.xlu0 %v9027_v3, %s9403_s23  ;;  %v9092_v56 = vpack.i.bf16 %v6890_v4, %v6754_v5  ;;  %v8675_v44 = vunpack.i.l.bf16 %v14050_v6  ;;  %v16454_v3 = vld [vmem:[#allocation24_spill] sm:$0xff]  ;;  %v16460_v4 = vld [vmem:[#allocation313_spill] sm:$0xff]  ;;  %v8740_v5 = vunpack.i.l.bf16 %v8739_v13  ;;  %v8720_v38 = vunpack.i.l.bf16 %v14368_v27  ;;  %s9307_s23 = scalar_lea.vmem %s14850_s8, 768 }
 0x3f7   : > { %v9047_v16 = vpack.i.bf16 %v6886_v14, %v6750_v50  ;;  %v16456_v25 = vcombine.low %v16454_v3, %v16455_v26  ;;  %v8027_v8 = vsel %vm883_vm2, %v16459_v11, %v8725_v58  ;;  %v16461_v14 = vld [vmem:[#allocation135_spill] sm:$0xff]  ;;  %v8751_v52 = vunpack.i.h.bf16 %v8749_v60  ;;  %p9308_p5 = scmp.ne.s32.totalorder %s14850_s8, %s9307_s23 }
 0x3f8   : > { %v8045_v32 = vsel %vm886_vm3, %v8027_v8, %v8730_v0  ;;  %v14477_v58 = vpop.permute.xlu1 %8803  ;;  %v8759_v11 = vpop.permute.xlu0 %8758  ;;  %v6734_v50 = vcombine.high %v14361_v12, %v14276_v20  ;;  %v8721_v3 = vunpack.i.h.bf16 %v14368_v27  ;;  %v7975_v8 = vsel %vm895_vm6, %v14083_v46, %v8675_v44 }
 0x3f9   : > { %v8028_v43 = vsel %vm883_vm2, %v16456_v25, %v8726_v10  ;;  %v8735_v25 = vunpack.i.l.bf16 %v14252_v15  ;;  %v8750_v10 = vunpack.i.l.bf16 %v8749_v60  ;;  %v8761_v15 = vunpack.i.h.bf16 %v8759_v11  ;;  %p9309_p11 = pnand %p9308_p5, %p16521_p10 }
 0x3fa   : > { %9083 = vrot.lane.b32.xlu1 %v16460_v4, %s9407_s29  ;;  %9038 = vrot.lane.b32.xlu0 %v16461_v14, %s9407_s29  ;;  %v8046_v6 = vsel %vm886_vm3, %v8028_v43, %v8731_v53  ;;  %v6751_v43 = vcombine.low %v14396_v28, %v14371_v18  ;;  %v8760_v0 = vunpack.i.l.bf16 %v8759_v11  ;;  %v7976_v18 = vsel %vm895_vm6, %v14086_v1, %v8676_v47 }
 0x3fb   : > { %v8063_v53 = vsel %vm889_vm4, %v8045_v32, %v8735_v25  ;;  %v8064_v13 = vsel %vm889_vm4, %v8046_v6, %v8736_v48  ;;  %v7993_v28 = vsel %vm898_vm7, %v7975_v8, %v8720_v38  ;;  %v7994_v44 = vsel %vm898_vm7, %v7976_v18, %v8721_v3  ;;  %v16462_v6 = vld [vmem:[#allocation249_spill] sm:$0xff]  ;;  %p9310_p1 = pneg %p9309_p11 }
 0x3fc   : > { %v8081_v20 = vsel %vm892_vm5, %v8063_v53, %v8740_v5  ;;  %v8082_v12 = vsel %vm892_vm5, %v8064_v13, %v8741_v23  ;;  %v9057_v27 = vpack.i.bf16 %v6887_v45, %v6751_v43  ;;  %v8814_v48 = vpop.permute.xlu1 %8813  ;;  %v8769_v60 = vpop.permute.xlu0 %8768  ;;  %v6870_v25 = vcombine.high %v14311_v42, %v14322_v24  ;;  %v16463_v13 = vld [vmem:[#allocation253_spill] sm:$0xff]  ;;  %v16464_v42 = vld [vmem:[#allocation84_spill] sm:$0xff] }
 0x3fd   : > { %v8099_v26 = vsel %vm895_vm6, %v8081_v20, %v8750_v10  ;;  %v8815_v4 = vunpack.i.l.bf16 %v8814_v48  ;;  %v8771_v14 = vunpack.i.h.bf16 %v8769_v60  ;;  %v8770_v46 = vunpack.i.l.bf16 %v8769_v60  ;;  %v16467_v60 = vld [vmem:[#allocation148_spill] sm:$0xff] }
 0x3fe   : > { %9093 = vrot.lane.b32.xlu1 %v9092_v56, %s9405_s7  ;;  %9048 = vrot.lane.b32.xlu0 %v9047_v16, %s9402_s20  ;;  %v8100_v56 = vsel %vm895_vm6, %v8082_v12, %v8751_v52  ;;  %v8816_v16 = vunpack.i.h.bf16 %v8814_v48  ;;  %v8117_v1 = vsel %vm898_vm7, %v8099_v26, %v8760_v0  ;;  %v6620_v11 = vcombine.high %v14240_v29, %v14229_v9  ;;  %v16466_v48 = vld [vmem:[#allocation58_spill] sm:$0xff] }
 0x3ff   : > { %v8118_v47 = vsel %vm898_vm7, %v8100_v56, %v8761_v15  ;;  %v8135_v45 = vsel %vm901_vm8, %v8117_v1, %v8770_v46  ;;  %v14506_v23 = vsel %vm901_vm8, %v7993_v28, %v8815_v4  ;;  %v6702_v43 = vcombine.high %v14261_v59, %v14356_v51  ;;  %v16469_v56 = vld [vmem:[#allocation122_spill] sm:$0xff] }
 0x400   : > { %v8136_v32 = vsel %vm901_vm8, %v8118_v47, %v8771_v14  ;;  %v14509_v5 = vsel %vm901_vm8, %v7994_v44, %v8816_v16  ;;  %v14513_v38 = vpop.permute.xlu1 %8823  ;;  %v8779_v52 = vpop.permute.xlu0 %8778  ;;  %v6838_v53 = vcombine.high %v14374_v17, %v14301_v63  ;;  %v6484_v24 = vcombine.high %v14234_v40, %v14224_v2  ;;  %v16470_v16 = vld [vmem:[#allocation118_spill] sm:$0xff] }
 0x401   : > { %v8360_v10 = vpack.c.bf16 %v8136_v32, %v8135_v45  ;;  %v8366_v3 = vpack.c.bf16 %v14509_v5, %v14506_v23  ;;  %v6748_v9 = vrot.slane %v6734_v50, %v9627_v19  ;;  %v6884_v29 = vrot.slane %v6870_v25, %v9627_v19  ;;  %v8154_v45 = vld [vmem:[#allocation6 + $0x8] sm:$0xff] }
 0x402   : > { %9103 = vrot.lane.b32.xlu1 %v16462_v6, %s9406_s15  ;;  %9058 = vrot.lane.b32.xlu0 %v9057_v27, %s9401_s18  ;;  %v16465_v59 = vpack.c.bf16 %v14430_v49, %v14427_v33  ;;  %v9077_v17 = vpack.i.bf16 %v6620_v11, %v6484_v24  ;;  %v6889_v15 = vcombine.low %v14424_v30, %v14411_v35  ;;  %v8746_v2 = vunpack.i.h.bf16 %v14294_v61  ;;  %s8232_s18 = scalar_lea.sflag [#allocation5], %s9583_s19 }
 0x403   : > { %8361 = vmatprep.subr.bf16.mxu0 %v8360_v10  ;;  %v6716_v0 = vrot.slane %v6702_v43, %v9627_v19  ;;  %v8745_v40 = vunpack.i.l.bf16 %v14294_v61  ;;  %v6852_v50 = vrot.slane %v6838_v53, %v9627_v19  ;;  %v8756_v8 = vunpack.i.h.bf16 %v14334_v7  ;;  %8355 = vmatprep.mubr.msk.f32.mxu0 %vm883_vm2, %v8154_v45 }
 0x404   : > { %8363 = vmatpush1.bf16.msra.mxu0 %v16465_v59  ;;  %v14534_v51 = vpop.permute.xlu1 %8833  ;;  %v8789_v63 = vpop.permute.xlu0 %8788  ;;  %v8755_v33 = vunpack.i.l.bf16 %v14334_v7  ;;  %v6753_v49 = vcombine.low %v14440_v41, %v14421_v22  ;;  %v8766_v20 = vunpack.i.h.bf16 %v14366_v39  ;;  %v8765_v35 = vunpack.i.l.bf16 %v14366_v39 }
 0x405   : > { %v6755_v30 = vcombine.low %v6716_v0, %v6748_v9  ;;  %v8781_v12 = vunpack.i.h.bf16 %v8779_v52  ;;  %v8780_v27 = vunpack.i.l.bf16 %v8779_v52  ;;  %v6891_v28 = vcombine.low %v6852_v50, %v6884_v29 }
 0x406   : > { %9113 = vrot.lane.b32.xlu1 %v16463_v13, %s9407_s29  ;;  %9068 = vrot.lane.b32.xlu0 %v16464_v42, %s9406_s15  ;;  %v9087_v19 = vpack.i.bf16 %v6889_v15, %v6753_v49  ;;  %v16468_v7 = vcombine.low %v16466_v48, %v16467_v60  ;;  %v16471_v22 = vcombine.low %v16469_v56, %v16470_v16  ;;  %v8791_v4 = vunpack.i.h.bf16 %v8789_v63  ;;  %v16475_v60 = vld [vmem:[#allocation167_spill] sm:$0xff] }
 0x407   : > { %v8790_v39 = vunpack.i.l.bf16 %v8789_v63  ;;  %v9097_v11 = vpack.i.bf16 %v6891_v28, %v6755_v30  ;;  %v6892_v43 = vcombine.high %v6852_v50, %v6884_v29  ;;  %v8785_v49 = vunpack.i.l.bf16 %v14432_v55 }
 0x408   : > { %v14549_v18 = vpop.permute.xlu1 %8843  ;;  %v8799_v61 = vpop.permute.xlu0 %8798  ;;  %v8030_v26 = vsel %vm883_vm2, %v16468_v7, %v8746_v2  ;;  %v8029_v41 = vsel %vm883_vm2, %v16471_v22, %v8745_v40 }
 0x409   : > { %v8047_v14 = vsel %vm886_vm3, %v8029_v41, %v8755_v33  ;;  %v8048_v46 = vsel %vm886_vm3, %v8030_v26, %v8756_v8  ;;  %v8801_v44 = vunpack.i.h.bf16 %v8799_v61  ;;  %v8800_v6 = vunpack.i.l.bf16 %v8799_v61  ;;  %v16472_v61 = vld [vmem:[#allocation191_spill] sm:$0xff] }
 0x40a   : > { %9078 = vrot.lane.b32.xlu0 %v9077_v17, %s9407_s29  ;;  %v8065_v1 = vsel %vm889_vm4, %v8047_v14, %v8765_v35  ;;  %v8066_v47 = vsel %vm889_vm4, %v8048_v46, %v8766_v20  ;;  %v6756_v17 = vcombine.high %v6716_v0, %v6748_v9  ;;  %v8786_v33 = vunpack.i.h.bf16 %v14432_v55 }
 0x40b   : > { %v8084_v32 = vsel %vm892_vm5, %v8066_v47, %v8781_v12  ;;  %v8083_v25 = vsel %vm892_vm5, %v8065_v1, %v8780_v27  ;;  %v8796_v20 = vunpack.i.h.bf16 %v14454_v62  ;;  %v8795_v9 = vunpack.i.l.bf16 %v14454_v62  ;;  %v16476_v62 = vld [vmem:[#allocation164_spill] sm:$0xff] }
 0x40c   : > { %v8854_v52 = vpop.permute.xlu1 %8853  ;;  %v8809_v10 = vpop.permute.xlu0 %8808  ;;  %v8101_v53 = vsel %vm895_vm6, %v8083_v25, %v8790_v39  ;;  %v8102_v13 = vsel %vm895_vm6, %v8084_v32, %v8791_v4  ;;  %v9107_v50 = vpack.i.bf16 %v6892_v43, %v6756_v17  ;;  %v8806_v0 = vunpack.i.h.bf16 %v14477_v58 }
 0x40d   : > { %v8811_v42 = vunpack.i.h.bf16 %v8809_v10  ;;  %v8810_v24 = vunpack.i.l.bf16 %v8809_v10  ;;  %v8119_v59 = vsel %vm898_vm7, %v8101_v53, %v8800_v6  ;;  %v8120_v63 = vsel %vm898_vm7, %v8102_v13, %v8801_v44 }
 0x40e   : > { %9088 = vrot.lane.b32.xlu0 %v9087_v19, %s9404_s26  ;;  %v8805_v35 = vunpack.i.l.bf16 %v14477_v58  ;;  %v16473_v19 = vld [vmem:[#allocation188_spill] sm:$0xff]  ;;  %v16477_v7 = vcombine.low %v16475_v60, %v16476_v62  ;;  %v8856_v44 = vunpack.i.h.bf16 %v8854_v52  ;;  %v8855_v6 = vunpack.i.l.bf16 %v8854_v52  ;;  %s9311_s26 = sshll.u32 %s9412_s12, 4  ;;  %s9312_s26 = int_to_ptr.vmem [resolvable:$false] %s9311_s26 }
 0x40f   : > { %v8137_v15 = vsel %vm901_vm8, %v8119_v59, %v8810_v24  ;;  %v8138_v2 = vsel %vm901_vm8, %v8120_v63, %v8811_v42  ;;  %v16474_v28 = vcombine.low %v16472_v61, %v16473_v19  ;;  %v8846_v53 = vunpack.i.h.bf16 %v14549_v18  ;;  %s9313_s7 = scalar_lea.vmem %s9312_s26, 1536  ;;  %p9314_p0 = scmp.lt.s32.totalorder %s14850_s8, %s9312_s26 }
 0x410   : > { %v14574_v29 = vpop.permute.xlu1 %8863  ;;  %v8819_v40 = vpop.permute.xlu0 %8818  ;;  %v8364_v8 = vpack.c.bf16 %v8138_v2, %v8137_v15  ;;  %v8031_v23 = vsel %vm883_vm2, %v16477_v7, %v8785_v49  ;;  %v8845_v13 = vunpack.i.l.bf16 %v14549_v18  ;;  %v8826_v2 = vunpack.i.h.bf16 %v14513_v38  ;;  %p9315_p9 = scmp.lt.s32.totalorder %s9313_s7, %s9307_s23 }
 0x411   : > { %v8821_v27 = vunpack.i.h.bf16 %v8819_v40  ;;  %v8820_v55 = vunpack.i.l.bf16 %v8819_v40  ;;  %v8032_v48 = vsel %vm883_vm2, %v16474_v28, %v8786_v33  ;;  %v8049_v26 = vsel %vm886_vm3, %v8031_v23, %v8795_v9 }
 0x412   : > { %9098 = vrot.lane.b32.xlu0 %v9097_v11, %s9406_s15  ;;  %8365 = vmatprep.subr.bf16.mxu0 %v8364_v8  ;;  %v8050_v58 = vsel %vm886_vm3, %v8032_v48, %v8796_v20  ;;  %v8067_v56 = vsel %vm889_vm4, %v8049_v26, %v8805_v35  ;;  %v7995_v17 = vsel %vm898_vm7, %v14246_v36, %v8845_v13  ;;  %v8825_v40 = vunpack.i.l.bf16 %v14513_v38  ;;  %v16479_v35 = vld [vmem:[#allocation130_spill] sm:$0xff]  ;;  %p9316_p3 = por %p9315_p9, %p9314_p0 }
 0x413   : > { %8367 = vmatpush1.bf16.msra.mxu0 %v8366_v3  ;;  %v8068_v16 = vsel %vm889_vm4, %v8050_v58, %v8806_v0  ;;  %v8085_v39 = vsel %vm892_vm5, %v8067_v56, %v8820_v55  ;;  %v7996_v15 = vsel %vm898_vm7, %v14250_v57, %v8846_v53  ;;  %v8836_v8 = vunpack.i.h.bf16 %v14534_v51  ;;  %v16478_v57 = vld [vmem:[#allocation129_spill] sm:$0xff] }
 0x414   : > { %v14586_v30 = vpop.permute.xlu1 %8873  ;;  %v8829_v12 = vpop.permute.xlu0 %8828  ;;  %v8086_v4 = vsel %vm892_vm5, %v8068_v16, %v8821_v27  ;;  %v8835_v33 = vunpack.i.l.bf16 %v14534_v51  ;;  %v16481_v27 = vld [vmem:[#allocation124_spill] sm:$0xff]  ;;  %v16482_v55 = vld [vmem:[#allocation125_spill] sm:$0xff]  ;;  %v8866_v23 = vunpack.i.h.bf16 %v14574_v29  ;;  %p9317_p7 = pnand %p9316_p3, %p9310_p1 }
 0x415   : > { %v8831_v5 = vunpack.i.h.bf16 %v8829_v12  ;;  %v8830_v3 = vunpack.i.l.bf16 %v8829_v12  ;;  %v16480_v12 = vcombine.low %v16478_v57, %v16479_v35  ;;  %v16483_v61 = vcombine.low %v16481_v27, %v16482_v55 }
 0x416   : > { %9108 = vrot.lane.b32.xlu0 %v9107_v50, %s9407_s29  ;;  %v8876_v16 = vunpack.i.h.bf16 %v14586_v30 }
 0x417   : > { %v8103_v1 = vsel %vm895_vm6, %v8085_v39, %v8830_v3  ;;  %v8104_v47 = vsel %vm895_vm6, %v8086_v4, %v8831_v5  ;;  %v8034_v38 = vsel %vm883_vm2, %v16480_v12, %v8826_v2  ;;  %v8033_v19 = vsel %vm883_vm2, %v16483_v61, %v8825_v40  ;;  %v16484_v40 = vld [vmem:[#allocation225_spill] sm:$0xff] }
 0x418   : > { %v14600_v22 = vpop.permute.xlu1 %8883  ;;  %v8839_v41 = vpop.permute.xlu0 %8838  ;;  %v8051_v28 = vsel %vm886_vm3, %v8033_v19, %v8835_v33  ;;  %v8052_v51 = vsel %vm886_vm3, %v8034_v38, %v8836_v8  ;;  %v8865_v5 = vunpack.i.l.bf16 %v14574_v29  ;;  %v16487_v33 = vld [vmem:[#allocation209_spill] sm:$0xff] }
 0x419   : > { %v8841_v14 = vunpack.i.h.bf16 %v8839_v41  ;;  %v8840_v46 = vunpack.i.l.bf16 %v8839_v41  ;;  %v8875_v41 = vunpack.i.l.bf16 %v14586_v30 }
 0x41b   : > { %v8121_v45 = vsel %vm898_vm7, %v8103_v1, %v8840_v46  ;;  %v8122_v32 = vsel %vm898_vm7, %v8104_v47, %v8841_v14  ;;  %v8886_v47 = vunpack.i.h.bf16 %v14600_v22 }
 0x41c   : > { %v14608_v25 = vpop.permute.xlu1 %8893  ;;  %v8849_v10 = vpop.permute.xlu0 %8848  ;;  %v8139_v11 = vsel %vm901_vm8, %v8121_v45, %v8855_v6  ;;  %v8140_v43 = vsel %vm901_vm8, %v8122_v32, %v8856_v44  ;;  %v8885_v45 = vunpack.i.l.bf16 %v14600_v22 }
 0x41d   : > { %v8368_v52 = vpack.c.bf16 %v8140_v43, %v8139_v11  ;;  %v8851_v36 = vunpack.i.h.bf16 %v8849_v10  ;;  %v8850_v0 = vunpack.i.l.bf16 %v8849_v10  ;;  %v8896_v55 = vunpack.i.h.bf16 %v14608_v25 }
 0x41e   : > { %v8895_v61 = vunpack.i.l.bf16 %v14608_v25 }
 0x41f   : > { %8369 = vmatprep.subr.bf16.mxu0 %v8368_v52  ;;  %v8070_v62 = vsel %vm889_vm4, %v8052_v51, %v8851_v36  ;;  %v8069_v7 = vsel %vm889_vm4, %v8051_v28, %v8850_v0 }
 0x420   : > { %v8904_v42 = vpop.permute.xlu1 %8903  ;;  %v8859_v24 = vpop.permute.xlu0 %8858  ;;  %v8088_v3 = vsel %vm892_vm5, %v8070_v62, %v8866_v23  ;;  %v8087_v26 = vsel %vm892_vm5, %v8069_v7, %v8865_v5 }
 0x421   : > { %v8861_v59 = vunpack.i.h.bf16 %v8859_v24  ;;  %v8860_v63 = vunpack.i.l.bf16 %v8859_v24  ;;  %v8906_v14 = vunpack.i.h.bf16 %v8904_v42  ;;  %v8905_v46 = vunpack.i.l.bf16 %v8904_v42 }
 0x422   : > { %v8105_v6 = vsel %vm895_vm6, %v8087_v26, %v8875_v41  ;;  %v8106_v1 = vsel %vm895_vm6, %v8088_v3, %v8876_v16 }
 0x423   : > { %v8013_v50 = vsel %vm901_vm8, %v7995_v17, %v8860_v63  ;;  %v8014_v18 = vsel %vm901_vm8, %v7996_v15, %v8861_v59 }
 0x424   : > { %v14624_v49 = vpop.permute.xlu1 %8913  ;;  %v8869_v20 = vpop.permute.xlu0 %8868  ;;  %v8370_v9 = vpack.c.bf16 %v8014_v18, %v8013_v50  ;;  %v16485_v50 = vld [vmem:[#allocation102_spill] sm:$0xff] }
 0x425   : > { %v8871_v24 = vunpack.i.h.bf16 %v8869_v20  ;;  %v8870_v59 = vunpack.i.l.bf16 %v8869_v20  ;;  %v16486_v18 = vcombine.low %v16484_v40, %v16485_v50  ;;  %v16494_v40 = vld [vmem:[#allocation242_spill] sm:$0xff] }
 0x426   : > { %8371 = vmatpush1.bf16.msra.mxu0 %v8370_v9  ;;  %v16488_v9 = vld [vmem:[#allocation206_spill] sm:$0xff] }
 0x427   : > { %v8036_v8 = vsel %vm883_vm2, %v16486_v18, %v8871_v24  ;;  %v16489_v36 = vcombine.low %v16487_v33, %v16488_v9 }
 0x428   : > { %v14636_v48 = vpop.permute.xlu1 %8923  ;;  %v8879_v60 = vpop.permute.xlu0 %8878 }
 0x429   : > { %v8881_v15 = vunpack.i.h.bf16 %v8879_v60  ;;  %v8880_v2 = vunpack.i.l.bf16 %v8879_v60  ;;  %v8035_v0 = vsel %vm883_vm2, %v16489_v36, %v8870_v59 }
 0x42b   : > { %v8053_v35 = vsel %vm886_vm3, %v8035_v0, %v8880_v2  ;;  %v8054_v12 = vsel %vm886_vm3, %v8036_v8, %v8881_v15  ;;  %v16493_v2 = vld [vmem:[#allocation245_spill] sm:$0xff] }
 0x42c   : > { %v14644_v58 = vpop.permute.xlu1 %8933  ;;  %v8889_v56 = vpop.permute.xlu0 %8888  ;;  %v8071_v51 = vsel %vm889_vm4, %v8053_v35, %v8895_v61  ;;  %v8072_v60 = vsel %vm889_vm4, %v8054_v12, %v8896_v55  ;;  %v16495_v50 = vcombine.low %v16493_v2, %v16494_v40 }
 0x42d   : > { %v8891_v4 = vunpack.i.h.bf16 %v8889_v56  ;;  %v8890_v39 = vunpack.i.l.bf16 %v8889_v56 }
 0x42f   : > { %v7997_v44 = vsel %vm898_vm7, %v14113_v31, %v8890_v39  ;;  %v7998_v29 = vsel %vm898_vm7, %v14116_v34, %v8891_v4  ;;  %v8123_v31 = vsel %vm898_vm7, %v8105_v6, %v8885_v45  ;;  %v8124_v34 = vsel %vm898_vm7, %v8106_v1, %v8886_v47 }
 0x430   : > { %v8944_v32 = vpop.permute.xlu1 %8943  ;;  %v8899_v30 = vpop.permute.xlu0 %8898  ;;  %v8015_v10 = vsel %vm901_vm8, %v7997_v44, %v8905_v46  ;;  %v8016_v11 = vsel %vm901_vm8, %v7998_v29, %v8906_v14  ;;  %v8936_v6 = vunpack.i.h.bf16 %v14644_v58  ;;  %v8935_v1 = vunpack.i.l.bf16 %v14644_v58 }
 0x431   : > { %v8901_v43 = vunpack.i.h.bf16 %v8899_v30  ;;  %v8900_v53 = vunpack.i.l.bf16 %v8899_v30  ;;  %v8374_v13 = vpack.c.bf16 %v8016_v11, %v8015_v10  ;;  %v8946_v56 = vunpack.i.h.bf16 %v8944_v32 }
 0x432   : > { %v8945_v16 = vunpack.i.l.bf16 %v8944_v32  ;;  %v7999_v11 = vsel %vm898_vm7, %v14282_v54, %v8935_v1 }
 0x433   : > { %v8141_v52 = vsel %vm901_vm8, %v8123_v31, %v8900_v53  ;;  %v8142_v42 = vsel %vm901_vm8, %v8124_v34, %v8901_v43  ;;  %v8000_v43 = vsel %vm898_vm7, %v14286_v37, %v8936_v6  ;;  %v8916_v53 = vunpack.i.h.bf16 %v14624_v49  ;;  %v16490_v37 = vld [vmem:[#allocation271_spill] sm:$0xff] }
 0x434   : > { %v14662_v22 = vpop.permute.xlu1 %8953  ;;  %v8909_v63 = vpop.permute.xlu0 %8908  ;;  %v8372_v17 = vpack.c.bf16 %v8142_v42, %v8141_v52  ;;  %v8915_v31 = vunpack.i.l.bf16 %v14624_v49  ;;  %v8925_v52 = vunpack.i.l.bf16 %v14636_v48 }
 0x435   : > { %v8911_v38 = vunpack.i.h.bf16 %v8909_v63  ;;  %v8910_v27 = vunpack.i.l.bf16 %v8909_v63  ;;  %v8955_v35 = vunpack.i.l.bf16 %v14662_v22 }
 0x436   : > { %8373 = vmatprep.subr.bf16.mxu0 %v8372_v17  ;;  %v16491_v17 = vld [vmem:[#allocation269_spill] sm:$0xff]  ;;  %v8037_v18 = vsel %vm883_vm2, %v16495_v50, %v8915_v31 }
 0x437   : > { %8375 = vmatpush1.bf16.msra.mxu0 %v8374_v13  ;;  %v8089_v23 = vsel %vm892_vm5, %v8071_v51, %v8910_v27  ;;  %v8090_v5 = vsel %vm892_vm5, %v8072_v60, %v8911_v38  ;;  %v8926_v13 = vunpack.i.h.bf16 %v14636_v48  ;;  %v16492_v15 = vcombine.low %v16490_v37, %v16491_v17 }
 0x438   : > { %v14672_v57 = vpop.permute.xlu1 %8963  ;;  %v8919_v20 = vpop.permute.xlu0 %8918  ;;  %v8055_v8 = vsel %vm886_vm3, %v8037_v18, %v8925_v52 }
 0x439   : > { %v8921_v19 = vunpack.i.h.bf16 %v8919_v20  ;;  %v8920_v28 = vunpack.i.l.bf16 %v8919_v20  ;;  %v8038_v49 = vsel %vm883_vm2, %v16492_v15, %v8916_v53  ;;  %v8956_v20 = vunpack.i.h.bf16 %v14662_v22  ;;  %v16498_v53 = vld [vmem:[#allocation133_spill] sm:$0xff] }
 0x43a   : > { %v8056_v48 = vsel %vm886_vm3, %v8038_v49, %v8926_v13  ;;  %v8966_v61 = vunpack.i.h.bf16 %v14672_v57  ;;  %v16501_v13 = vld [vmem:[#allocation128_spill] sm:$0xff] }
 0x43b   : > { %v8107_v41 = vsel %vm895_vm6, %v8089_v23, %v8920_v28  ;;  %v8108_v25 = vsel %vm895_vm6, %v8090_v5, %v8921_v19  ;;  %v8965_v19 = vunpack.i.l.bf16 %v14672_v57  ;;  %v16496_v5 = vld [vmem:[#allocation192_spill] sm:$0xff] }
 0x43c   : > { %v14680_v62 = vpop.permute.xlu1 %8973  ;;  %v8929_v7 = vpop.permute.xlu0 %8928 }
 0x43d   : > { %v8931_v3 = vunpack.i.h.bf16 %v8929_v7  ;;  %v8930_v26 = vunpack.i.l.bf16 %v8929_v7 }
 0x43f   : > { %v8125_v4 = vsel %vm898_vm7, %v8107_v41, %v8930_v26  ;;  %v8126_v39 = vsel %vm898_vm7, %v8108_v25, %v8931_v3 }
 0x440   : > { %v14688_v14 = vpop.permute.xlu1 %8983  ;;  %v8939_v46 = vpop.permute.xlu0 %8938  ;;  %v8143_v44 = vsel %vm901_vm8, %v8125_v4, %v8945_v16  ;;  %v8144_v29 = vsel %vm901_vm8, %v8126_v39, %v8946_v56  ;;  %v8976_v56 = vunpack.i.h.bf16 %v14680_v62  ;;  %v8975_v16 = vunpack.i.l.bf16 %v14680_v62 }
 0x441   : > { %v8376_v47 = vpack.c.bf16 %v8144_v29, %v8143_v44  ;;  %v8941_v54 = vunpack.i.h.bf16 %v8939_v46  ;;  %v8940_v63 = vunpack.i.l.bf16 %v8939_v46  ;;  %v8986_v49 = vunpack.i.h.bf16 %v14688_v14 }
 0x442   : > { %v8985_v2 = vunpack.i.l.bf16 %v14688_v14 }
 0x443   : > { %8377 = vmatprep.subr.bf16.mxu0 %v8376_v47  ;;  %v8074_v36 = vsel %vm889_vm4, %v8056_v48, %v8941_v54  ;;  %v8073_v0 = vsel %vm889_vm4, %v8055_v8, %v8940_v63 }
 0x444   : > { %v8994_v45 = vpop.permute.xlu1 %8993  ;;  %v8949_v32 = vpop.permute.xlu0 %8948  ;;  %v8092_v12 = vsel %vm892_vm5, %v8074_v36, %v8956_v20  ;;  %v8091_v38 = vsel %vm892_vm5, %v8073_v0, %v8955_v35 }
 0x445   : > { %v8951_v30 = vunpack.i.h.bf16 %v8949_v32  ;;  %v8950_v10 = vunpack.i.l.bf16 %v8949_v32  ;;  %v8996_v60 = vunpack.i.h.bf16 %v8994_v45  ;;  %v8995_v7 = vunpack.i.l.bf16 %v8994_v45 }
 0x446   : > { %v8109_v3 = vsel %vm895_vm6, %v8091_v38, %v8965_v19  ;;  %v8110_v26 = vsel %vm895_vm6, %v8092_v12, %v8966_v61 }
 0x447   : > { %v8017_v34 = vsel %vm901_vm8, %v7999_v11, %v8950_v10  ;;  %v8018_v58 = vsel %vm901_vm8, %v8000_v43, %v8951_v30  ;;  %v8128_v44 = vsel %vm898_vm7, %v8110_v26, %v8976_v56  ;;  %v16497_v43 = vld [vmem:[#allocation132_spill] sm:$0xff] }
 0x448   : > { %v8959_v24 = vpop.permute.xlu0 %8958  ;;  %v8378_v59 = vpack.c.bf16 %v8018_v58, %v8017_v34  ;;  %v16499_v31 = vcombine.low %v16497_v43, %v16498_v53  ;;  %v16500_v58 = vld [vmem:[#allocation127_spill] sm:$0xff]  ;;  %v16508_v43 = vld [vmem:[#allocation290_spill] sm:$0xff] }
 0x449   : > { %v14704_v42 = vpop.permute.xlu1 %9003  ;;  %v8961_v47 = vunpack.i.h.bf16 %v8959_v24  ;;  %v8960_v45 = vunpack.i.l.bf16 %v8959_v24  ;;  %v16502_v52 = vcombine.low %v16500_v58, %v16501_v13  ;;  %v16509_v53 = vld [vmem:[#allocation287_spill] sm:$0xff] }
 0x44a   : > { %8379 = vmatpush1.bf16.msra.mxu0 %v8378_v59 }
 0x44b   : > { %v8040_v34 = vsel %vm883_vm2, %v16499_v31, %v8961_v47  ;;  %v8039_v59 = vsel %vm883_vm2, %v16502_v52, %v8960_v45  ;;  %v16510_v31 = vcombine.low %v16508_v43, %v16509_v53  ;;  %v16519_v43 = vld [vmem:[#allocation325_spill] sm:$0xff] }
 0x44c   : > { %v8969_v9 = vpop.permute.xlu0 %8968 }
 0x44d   : > { %v14716_v33 = vpop.permute.xlu1 %9013  ;;  %v8971_v10 = vunpack.i.h.bf16 %v8969_v9  ;;  %v8970_v11 = vunpack.i.l.bf16 %v8969_v9 }
 0x44f   : > { %v8057_v63 = vsel %vm886_vm3, %v8039_v59, %v8970_v11  ;;  %v8058_v37 = vsel %vm886_vm3, %v8040_v34, %v8971_v10 }
 0x450   : > { %v8979_v55 = vpop.permute.xlu0 %8978  ;;  %v8075_v18 = vsel %vm889_vm4, %v8057_v63, %v8985_v2  ;;  %v8076_v8 = vsel %vm889_vm4, %v8058_v37, %v8986_v49 }
 0x451   : > { %v14724_v27 = vpop.permute.xlu1 %9023  ;;  %v8981_v28 = vunpack.i.h.bf16 %v8979_v55  ;;  %v8980_v51 = vunpack.i.l.bf16 %v8979_v55 }
 0x453   : > { %v8001_v23 = vsel %vm898_vm7, %v14139_v21, %v8980_v51  ;;  %v8002_v22 = vsel %vm898_vm7, %v16496_v5, %v8981_v28  ;;  %v8127_v21 = vsel %vm898_vm7, %v8109_v3, %v8975_v16  ;;  %v9025_v5 = vunpack.i.l.bf16 %v14724_v27 }
 0x454   : > { %v8989_v57 = vpop.permute.xlu0 %8988  ;;  %v8019_v25 = vsel %vm901_vm8, %v8001_v23, %v8995_v7  ;;  %v8020_v4 = vsel %vm901_vm8, %v8002_v22, %v8996_v60  ;;  %v9026_v23 = vunpack.i.h.bf16 %v14724_v27  ;;  %v9015_v27 = vunpack.i.l.bf16 %v14716_v33 }
 0x455   : > { %v9034_v41 = vpop.permute.xlu1 %9033  ;;  %v8991_v39 = vunpack.i.h.bf16 %v8989_v57  ;;  %v8990_v46 = vunpack.i.l.bf16 %v8989_v57  ;;  %v8382_v29 = vpack.c.bf16 %v8020_v4, %v8019_v25  ;;  %v9005_v57 = vunpack.i.l.bf16 %v14704_v42  ;;  %v16503_v25 = vld [vmem:[#allocation134_spill] sm:$0xff] }
 0x456   : > { %v9036_v12 = vunpack.i.h.bf16 %v9034_v41  ;;  %v9035_v38 = vunpack.i.l.bf16 %v9034_v41  ;;  %v9006_v41 = vunpack.i.h.bf16 %v14704_v42  ;;  %v8003_v4 = vsel %vm898_vm7, %v16503_v25, %v9025_v5 }
 0x457   : > { %v8145_v6 = vsel %vm901_vm8, %v8127_v21, %v8990_v46  ;;  %v8146_v1 = vsel %vm901_vm8, %v8128_v44, %v8991_v39  ;;  %v16504_v39 = vld [vmem:[#allocation121_spill] sm:$0xff]  ;;  %v9016_v21 = vunpack.i.h.bf16 %v14716_v33  ;;  %v8041_v33 = vsel %vm883_vm2, %v16510_v31, %v9005_v57 }
 0x458   : > { %v8380_v30 = vpack.c.bf16 %v8146_v1, %v8145_v6  ;;  %v8004_v46 = vsel %vm898_vm7, %v16504_v39, %v9026_v23  ;;  %v8059_v34 = vsel %vm886_vm3, %v8041_v33, %v9015_v27 }
 0x459   : > { %v14742_v62 = vpop.permute.xlu1 %9043  ;;  %v8999_v32 = vpop.permute.xlu0 %8998 }
 0x45a   : > { %8381 = vmatprep.subr.bf16.mxu0 %v8380_v30  ;;  %v9001_v17 = vunpack.i.h.bf16 %v8999_v32  ;;  %v9000_v15 = vunpack.i.l.bf16 %v8999_v32  ;;  %v16505_v32 = vld [vmem:[#allocation312_spill] sm:$0xff]  ;;  %v16506_v30 = vld [vmem:[#allocation310_spill] sm:$0xff]  ;;  %v9046_v63 = vunpack.i.h.bf16 %v14742_v62  ;;  %v9045_v37 = vunpack.i.l.bf16 %v14742_v62 }
 0x45b   : > { %8383 = vmatpush1.bf16.msra.mxu0 %v8382_v29  ;;  %v16507_v10 = vcombine.low %v16505_v32, %v16506_v30  ;;  %v16515_v32 = vld [vmem:[#allocation255_spill] sm:$0xff]  ;;  %v16516_v30 = vld [vmem:[#allocation109_spill] sm:$0xff] }
 0x45c   : > { %v8093_v36 = vsel %vm892_vm5, %v8075_v18, %v9000_v15  ;;  %v8094_v0 = vsel %vm892_vm5, %v8076_v8, %v9001_v17 }
 0x45d   : > { %v14752_v54 = vpop.permute.xlu1 %9053  ;;  %v9009_v24 = vpop.permute.xlu0 %9008  ;;  %v8042_v11 = vsel %vm883_vm2, %v16507_v10, %v9006_v41  ;;  %v16517_v10 = vcombine.low %v16515_v32, %v16516_v30 }
 0x45e   : > { %v9011_v40 = vunpack.i.h.bf16 %v9009_v24  ;;  %v9010_v50 = vunpack.i.l.bf16 %v9009_v24  ;;  %v8060_v58 = vsel %vm886_vm3, %v8042_v11, %v9016_v21  ;;  %v9056_v49 = vunpack.i.h.bf16 %v14752_v54  ;;  %v16518_v11 = vld [vmem:[#allocation328_spill] sm:$0xff] }
 0x45f   : > { %v9055_v2 = vunpack.i.l.bf16 %v14752_v54  ;;  %v16512_v54 = vld [vmem:[#allocation136_spill] sm:$0xff]  ;;  %v16520_v53 = vcombine.low %v16518_v11, %v16519_v43 }
 0x460   : > { %v8111_v55 = vsel %vm895_vm6, %v8093_v36, %v9010_v50  ;;  %v8112_v14 = vsel %vm895_vm6, %v8094_v0, %v9011_v40 }
 0x461   : > { %v9019_v9 = vpop.permute.xlu0 %9018 }
 0x462   : > { %v9021_v20 = vunpack.i.h.bf16 %v9019_v9  ;;  %v9020_v35 = vunpack.i.l.bf16 %v9019_v9 }
 0x464   : > { %v14760_v48 = vpop.permute.xlu1 %9063  ;;  %v8129_v61 = vsel %vm898_vm7, %v8111_v55, %v9020_v35  ;;  %v8130_v19 = vsel %vm898_vm7, %v8112_v14, %v9021_v20  ;;  %v16511_v55 = vld [vmem:[#allocation138_spill] sm:$0xff] }
 0x465   : > { %v8147_v60 = vsel %vm901_vm8, %v8129_v61, %v9035_v38  ;;  %v8148_v7 = vsel %vm901_vm8, %v8130_v19, %v9036_v12  ;;  %v9066_v18 = vunpack.i.h.bf16 %v14760_v48  ;;  %v9065_v8 = vunpack.i.l.bf16 %v14760_v48 }
 0x466   : > { %v8384_v22 = vpack.c.bf16 %v8148_v7, %v8147_v60  ;;  %v16513_v60 = vld [vmem:[#allocation104_spill] sm:$0xff]  ;;  %v16514_v7 = vld [vmem:[#allocation57_spill] sm:$0xff] }
 0x468   : > { %v14768_v28 = vpop.permute.xlu1 %9073  ;;  %v9029_v51 = vpop.permute.xlu0 %9028  ;;  %8385 = vmatprep.subr.bf16.mxu0 %v8384_v22 }
 0x469   : > { %v9031_v6 = vunpack.i.h.bf16 %v9029_v51  ;;  %v9030_v1 = vunpack.i.l.bf16 %v9029_v51 }
 0x46b   : > { %v8078_v13 = vsel %vm889_vm4, %v8060_v58, %v9031_v6  ;;  %v8077_v52 = vsel %vm889_vm4, %v8059_v34, %v9030_v1 }
 0x46c   : > { %v9084_v3 = vpop.permute.xlu1 %9083  ;;  %v9039_v26 = vpop.permute.xlu0 %9038  ;;  %v8096_v40 = vsel %vm892_vm5, %v8078_v13, %v9046_v63  ;;  %v8095_v50 = vsel %vm892_vm5, %v8077_v52, %v9045_v37  ;;  %v9076_v52 = vunpack.i.h.bf16 %v14768_v28 }
 0x46d   : > { %v9041_v56 = vunpack.i.h.bf16 %v9039_v26  ;;  %v9040_v16 = vunpack.i.l.bf16 %v9039_v26  ;;  %v9086_v9 = vunpack.i.h.bf16 %v9084_v3  ;;  %v9085_v36 = vunpack.i.l.bf16 %v9084_v3 }
 0x46e   : > { %v8113_v19 = vsel %vm895_vm6, %v8095_v50, %v9055_v2  ;;  %v8114_v51 = vsel %vm895_vm6, %v8096_v40, %v9056_v49 }
 0x46f   : > { %v8021_v44 = vsel %vm901_vm8, %v8003_v4, %v9040_v16  ;;  %v8022_v29 = vsel %vm901_vm8, %v8004_v46, %v9041_v56  ;;  %v8131_v27 = vsel %vm898_vm7, %v8113_v19, %v9065_v8 }
 0x470   : > { %v14784_v47 = vpop.permute.xlu1 %9093  ;;  %v9049_v45 = vpop.permute.xlu0 %9048  ;;  %v8386_v42 = vpack.c.bf16 %v8022_v29, %v8021_v44  ;;  %v8132_v44 = vsel %vm898_vm7, %v8114_v51, %v9066_v18 }
 0x471   : > { %v9051_v3 = vunpack.i.h.bf16 %v9049_v45  ;;  %v9050_v57 = vunpack.i.l.bf16 %v9049_v45  ;;  %v9096_v40 = vunpack.i.h.bf16 %v14784_v47  ;;  %v9095_v50 = vunpack.i.l.bf16 %v14784_v47 }
 0x472   : > { %8387 = vmatpush1.bf16.msra.mxu0 %v8386_v42 }
 0x473   : > { %v8044_v45 = vsel %vm883_vm2, %v16517_v10, %v9051_v3  ;;  %v8043_v31 = vsel %vm883_vm2, %v16520_v53, %v9050_v57 }
 0x474   : > { %v9104_v59 = vpop.permute.xlu1 %9103  ;;  %v9059_v24 = vpop.permute.xlu0 %9058 }
 0x475   : > { %v9106_v17 = vunpack.i.h.bf16 %v9104_v59  ;;  %v9105_v15 = vunpack.i.l.bf16 %v9104_v59  ;;  %v9061_v46 = vunpack.i.h.bf16 %v9059_v24  ;;  %v9060_v21 = vunpack.i.l.bf16 %v9059_v24 }
 0x476   : > { %v9075_v59 = vunpack.i.l.bf16 %v14768_v28 }
 0x477   : > { %v8007_v14 = vsel %vm898_vm7, %v16511_v55, %v9105_v15  ;;  %v8008_v61 = vsel %vm898_vm7, %v16512_v54, %v9106_v17  ;;  %v8061_v33 = vsel %vm886_vm3, %v8043_v31, %v9060_v21  ;;  %v8062_v34 = vsel %vm886_vm3, %v8044_v45, %v9061_v46 }
 0x478   : > { %v9114_v0 = vpop.permute.xlu1 %9113  ;;  %v9069_v20 = vpop.permute.xlu0 %9068  ;;  %v8079_v63 = vsel %vm889_vm4, %v8061_v33, %v9075_v59  ;;  %v8080_v37 = vsel %vm889_vm4, %v8062_v34, %v9076_v52 }
 0x479   : > { %v9116_v35 = vunpack.i.h.bf16 %v9114_v0  ;;  %v9115_v62 = vunpack.i.l.bf16 %v9114_v0  ;;  %v9071_v12 = vunpack.i.h.bf16 %v9069_v20  ;;  %v9070_v38 = vunpack.i.l.bf16 %v9069_v20 }
 0x47b   : > { %v8005_v48 = vsel %vm898_vm7, %v16513_v60, %v9070_v38  ;;  %v8006_v23 = vsel %vm898_vm7, %v16514_v7, %v9071_v12  ;;  %v8025_v5 = vsel %vm901_vm8, %v8007_v14, %v9115_v62  ;;  %v8026_v22 = vsel %vm901_vm8, %v8008_v61, %v9116_v35  ;;  %v8153_v12 = vld [vmem:[#allocation6] sm:$0xff] }
 0x47c   : > { %v9079_v26 = vpop.permute.xlu0 %9078  ;;  %v8023_v56 = vsel %vm901_vm8, %v8005_v48, %v9085_v36  ;;  %v8024_v16 = vsel %vm901_vm8, %v8006_v23, %v9086_v9  ;;  %v8394_v41 = vpack.c.bf16 %v8026_v22, %v8025_v5 }
 0x47d   : > { %v9081_v25 = vunpack.i.h.bf16 %v9079_v26  ;;  %v9080_v4 = vunpack.i.l.bf16 %v9079_v26  ;;  %v8390_v39 = vpack.c.bf16 %v8024_v16, %v8023_v56 }
 0x47f   : > { %v8149_v29 = vsel %vm901_vm8, %v8131_v27, %v9080_v4  ;;  %v8150_v6 = vsel %vm901_vm8, %v8132_v44, %v9081_v25 }
 0x480   : > { %v9089_v1 = vpop.permute.xlu0 %9088  ;;  %v8388_v42 = vpack.c.bf16 %v8150_v6, %v8149_v29 }
 0x481   : > { %v9091_v58 = vunpack.i.h.bf16 %v9089_v1  ;;  %v9090_v13 = vunpack.i.l.bf16 %v9089_v1 }
 0x482   : > { %8389 = vmatprep.subr.bf16.mxu0 %v8388_v42 }
 0x483   : > { %8391 = vmatpush1.bf16.msra.mxu0 %v8390_v39  ;;  %v8097_v17 = vsel %vm892_vm5, %v8079_v63, %v9090_v13  ;;  %v8098_v15 = vsel %vm892_vm5, %v8080_v37, %v9091_v58 }
 0x484   : > { %v9099_v24 = vpop.permute.xlu0 %9098  ;;  %v8115_v28 = vsel %vm895_vm6, %v8097_v17, %v9095_v50  ;;  %v8116_v8 = vsel %vm895_vm6, %v8098_v15, %v9096_v40 }
 0x485   : > { %v9101_v49 = vunpack.i.h.bf16 %v9099_v24  ;;  %v9100_v2 = vunpack.i.l.bf16 %v9099_v24 }
 0x487   : > { %v8133_v0 = vsel %vm898_vm7, %v8115_v28, %v9100_v2  ;;  %v8134_v20 = vsel %vm898_vm7, %v8116_v8, %v9101_v49 }
 0x488   : > { %v9109_v18 = vpop.permute.xlu0 %9108 }
 0x489   : > { %v9111_v9 = vunpack.i.h.bf16 %v9109_v18  ;;  %v9110_v36 = vunpack.i.l.bf16 %v9109_v18 }
 0x48b   : > { %v8151_v35 = vsel %vm901_vm8, %v8133_v0, %v9110_v36  ;;  %v8152_v62 = vsel %vm901_vm8, %v8134_v20, %v9111_v9 }
 0x48c   : > { %v8392_v47 = vpack.c.bf16 %v8152_v62, %v8151_v35 }
 0x48e   : > { %8393 = vmatprep.subr.bf16.mxu0 %v8392_v47 }
 0x48f   : > { %8395 = vmatpush1.bf16.msra.mxu0 %v8394_v41 }
 0x492   : > { %8223 = vmatmul.mubr.f32.vlgmr.msra.gmra.mrb[0].mxu0 %v8153_v12 }
 0x565   : > { %v8224_v38 = vpop.f32.mrb[0].mxu0 }
 0x566   : > { %8229 = vst [vmem:[%s10108_s30 + $0x20] sm:$0xff] %v8224_v38  ;;  %v8226_v55 = vpop.f32.mrb[1].mxu0 }
 0x567   : > { %8230 = vst [vmem:[%s10108_s30 + $0x28] sm:$0xff] %v8226_v55 }
 0x568   : > { %9320 = shalt.err (!%p9317_p7)
}
 0x569   : > { %s9321_s15 = scalar_lea.hbm %s14855_s4, 768  ;;  %s9325_s17 = scalar_lea.hbm %s14909_s2, 1536 }
 0x56a   : > { %p9322_p13 = scmp.ne.s32.totalorder %s14855_s4, %s9321_s15  ;;  %p9326_p12 = scmp.lt.u32.totalorder %s14855_s4, %s14909_s2 }
 0x56b   : > { %p9327_p4 = scmp.lt.u32.totalorder %s9325_s17, %s9321_s15  ;;  %p9329_p5 = scmp.lt.u32.totalorder %s9321_s15, %s14855_s4 }
 0x56c   : > { %p9323_p2 = pnand %p9322_p13, %p16521_p10 }
 0x56d   : > { %p9328_p8 = por %p9327_p4, %p9326_p12 }
 0x56e   : > { %p9324_p6 = pneg %p9323_p2 }
 0x56f   : > { %p9330_p11 = por %p9329_p5, %p9328_p8 }
 0x571   : > { %p9331_p1 = pnand %p9330_p11, %p9324_p6 }
 0x573   : > { %9334 = shalt.err (!%p9331_p1)
}
 0x574   : > { %s9413_s6 = smov 256  }
 0x575   : > { %8404 = dma.vmem_to_hbm [thread:$0]  (%p16521_p10), %s14850_s8, 768, %s14855_s4, %s8232_s18, %s9413_s6, %s9413_s6, %s9402_s20  }
 0x576 PF: > { %s8262_s16 = sand.u32 1, %s9373_s9   ;;  %p16522_p0 = scmp.ne.s32.totalorder %s15413_s22, 0 }
 0x577   : > { %p16523_p9 = scmp.ge.s32.totalorder %s9393_s14, 2  ;;  %s8263_s24 = scalar_lea.sflag [#allocation5], %s8262_s16 }
 0x579   : > { %p8415_p3 = pnand %p16523_p9, %p16522_p0 }
 0x57b   : > { %9368 = dma.done.wait (!%p8415_p3), %s8263_s24, 768  }
 0x57c   : > { %9370 = vsyncadd (!%p8415_p3), %s8263_s24, 4294966528  ;;  %s19_s14 = sadd.s32 1, %s9393_s14   ;;  %s16524_s9 = smov %s9377_s10 }
 0x57d   : > { %p16_p7 = scmp.ge.s32.totalorder %s19_s14, 4   ;;  %s16525_s10 = smov %s9381_s11 }
 0x57e   : > { %s16526_s11 = smov %s9548_s25  ;;  %s16527_s12 = smov %s9389_s13 }
 0x57f   : > { %s16528_s13 = smov %s16530_s28  ;;  %18 = sbr.rel (!%p16_p7) target bundleno = 7 (0x7), region = 77 }
 0x586   :  { %8268 = vsyncpa [#allocation4], 1 }
 0x587   :  { %8270 = vsyncpa [#allocation4 + $0x1], 1 }
 0x588   :  { %8271 = vsyncpa [#allocation7], 1 }
 0x589   :  { %8272 = vsyncpa [#allocation5], 1 }
 0x58a   :  { %8274 = vsyncpa [#allocation5 + $0x1], 1 }

</bundles_post_ra>
